<compile_context>
chip_gen: v7x
topology: tpu7x:2x2x1
jax: 0.10.0
libtpu: 0.0.40
codegen_flags: <defaults>
</compile_context>

<pallas_src>
import functools

import jax
import jax.numpy as jnp
from jax import lax
from jax.experimental import pallas as pl
from jax.experimental.pallas import tpu as pltpu


# ----------------------------- Pallas kernel ------------------------------
def _disc_kernel(x_ref, w1_ref, b1_ref, convw_ref, convb_ref, wlin_ref,
                 blin_ref, out_ref, *, n_blocks, compute_dtype):
    BB, L, C = x_ref.shape
    H = w1_ref.shape[1]
    M = BB * L
    f32 = jnp.float32
    cdt = compute_dtype

    # Halo masks for the 4 shifted taps.  Hoisted: built once and reused by all
    # 10 convs (JAX does not CSE broadcast_in_dim).
    t_idx = lax.broadcasted_iota(jnp.int32, (BB, L, H), 1)
    halo_mask = {}
    for k in range(5):
        d = k - 2
        if d == 0:
            continue
        lo, hi = max(0, -d), L - max(0, d)
        halo_mask[k] = (t_idx >= lo) & (t_idx < hi)

    def conv5(r, w_k, b_k):
        """Conv1d(H, H, 5, padding=2) as one im2col matmul, operand in registers.

        r:   (M, H)  f32 activation (already ReLU'd by the caller)
        w_k: (5H, H) compute-dtype weight, row index = k*H + cin
        b_k: (1, H)  f32 bias
        """
        r3 = r.reshape(BB, L, H)
        taps = []
        for k in range(5):
            d = k - 2                                   # tap offset along L
            if d == 0:
                taps.append(r3)
            else:
                # rolled[b, t, :] = r3[b, (t + d) % L, :]; the mask zeroes the
                # wrapped (out-of-sequence) positions -> exact zero padding.
                rolled = pltpu.roll(r3, (-d) % L, 1)     # XLU sublane rotate
                taps.append(jnp.where(halo_mask[k], rolled, 0.0))
        cols = jnp.concatenate(taps, axis=-1).astype(cdt)        # (BB, L, 5H)
        y = jnp.dot(cols.reshape(M, 5 * H), w_k,
                    preferred_element_type=f32)
        return y + b_k                                           # (M, H) f32

    # ---- Conv1d(n_chars, hidden, 1): one (M, C) @ (C, H) matmul -------------
    x2 = x_ref[...].reshape(M, C).astype(cdt)
    h = jnp.dot(x2, w1_ref[...], preferred_element_type=f32) + b1_ref[...]

    # ---- 5 residual blocks, statically unrolled, all weights resident -------
    for blk in range(n_blocks):
        c1 = conv5(jnp.maximum(h, 0.0), convw_ref[blk, 0], convb_ref[blk, 0])
        c2 = conv5(jnp.maximum(c1, 0.0), convw_ref[blk, 1], convb_ref[blk, 1])
        h = h + 0.3 * c2                                 # residual path in f32

    # ---- Linear(seq_len*hidden, 1) -------------------------------------------
    # wlin is pre-rearranged to (L, H) so it matches PyTorch's channel-major
    # flatten (flat index = c*seq_len + t).
    h3 = h.reshape(BB, L, H)
    prod = h3 * wlin_ref[...][None, :, :]                # (BB, L, H)
    s = jnp.sum(prod, axis=2)                            # (BB, L)  lane reduce
    # NOTE: at much larger block_b one would emit a lane-dense (nb, block_b)
    # output slab instead of this 1-lane column; negligible at these sizes.
    out_ref[...] = jnp.sum(s, axis=1, keepdims=True) + blin_ref[0, 0]


# ------------------------------- wrapper ----------------------------------
def _choose_block_b(B, L, C, H):
    """Footprint-driven batch-tile size (largest divisor of B under budget)."""
    # Rough per-example f32 value residency: x + h + im2col taps/cols temporaries.
    per_example = 4 * L * (C + H + 15 * H)
    budget = 4 << 20                  # conservative slice of scoped VMEM (v5e/v7x)
    target = max(1, min(B, budget // max(per_example, 1)))
    if B >= 16:
        # Keep >=2 batch tiles so the "parallel" grid axis can shard across the
        # two TensorCores of a v7x chip (cheap on single-TC v5e/v6e).
        target = min(target, max(8, B // 2))
    best = 1
    for d in range(1, B + 1):
        if B % d == 0 and d <= target:
            best = d
    return best


def discriminator_lang_pallas(x, params, *, block_b=None,
                              compute_dtype=jnp.bfloat16):
    """x: (B, seq_len, n_chars) float32 -> (B, 1) float32."""
    B, L, C = x.shape
    H = params['w1_k'].shape[1]
    n_blocks = params['convw_k'].shape[0]                # 5 residual blocks
    if block_b is None:
        block_b = _choose_block_b(B, L, C, H)
    assert B % block_b == 0, "batch must be divisible by block_b"
    nb = B // block_b

    cdt = jnp.dtype(compute_dtype)
    # Matmul operands in compute dtype; biases / wlin / residual path stay f32.
    w1 = params['w1_k'].astype(cdt)                      # (C, H)
    convw = params['convw_k'].astype(cdt)                # (5, 2, 5H, H) resident
    b1 = params['b1_k'].astype(jnp.float32)              # (1, H)
    convb = params['convb_k'].astype(jnp.float32)        # (5, 2, 1, H)
    wlin = params['wlin_k'].astype(jnp.float32)          # (L, H)
    blin = params['blin_k'].astype(jnp.float32)          # (1, 1) -> SMEM

    def nbytes(a):
        return int(a.size) * a.dtype.itemsize

    resident = (nbytes(w1) + nbytes(b1) + nbytes(convw) + nbytes(convb)
                + nbytes(wlin)
                + 2 * block_b * L * C * 4                # x tile, double-buffered
                + 2 * block_b * 4                        # out tile
                + 8 * block_b * L * 5 * H * 4)           # value-temporary headroom
    vmem_limit = int(min(64 << 20, max(32 << 20, 2 * resident)))

    flops = B * (2 * L * C * H + n_blocks * 2 * (2 * L * 5 * H * H) + 2 * L * H)
    bytes_accessed = (x.size * 4 + nbytes(w1) + nbytes(b1) + nbytes(convw)
                      + nbytes(convb) + nbytes(wlin) + B * 4)
    cost = pl.CostEstimate(flops=flops, transcendentals=0,
                           bytes_accessed=bytes_accessed)

    grid_spec = pltpu.PrefetchScalarGridSpec(
        num_scalar_prefetch=0,
        grid=(nb,),
        in_specs=[
            pl.BlockSpec((block_b, L, C), lambda i: (i, 0, 0)),           # x tile
            pl.BlockSpec((C, H), lambda i: (0, 0)),                       # w1 resident
            pl.BlockSpec((1, H), lambda i: (0, 0)),                       # b1 resident
            pl.BlockSpec((n_blocks, 2, 5 * H, H), lambda i: (0, 0, 0, 0)),  # all conv W resident
            pl.BlockSpec((n_blocks, 2, 1, H), lambda i: (0, 0, 0, 0)),      # all conv b resident
            pl.BlockSpec((L, H), lambda i: (0, 0)),                       # wlin resident
            pl.BlockSpec(memory_space=pltpu.MemorySpace.SMEM),            # blin scalar
        ],
        out_specs=pl.BlockSpec((block_b, 1), lambda i: (i, 0)),
    )

    return pl.pallas_call(
        functools.partial(_disc_kernel, n_blocks=n_blocks, compute_dtype=cdt),
        out_shape=jax.ShapeDtypeStruct((B, 1), jnp.float32),
        grid_spec=grid_spec,
        compiler_params=pltpu.CompilerParams(
            dimension_semantics=("parallel",),
            vmem_limit_bytes=vmem_limit),
        cost_estimate=cost,
    )(x.astype(jnp.float32), w1, b1, convw, convb, wlin, blin)


# ------------------------- parameter construction -------------------------
def make_params(key, n_chars, seq_len, hidden):
    keys = jax.random.split(key, 4 + 5 * 4)
    ki = iter(keys)

    # PyTorch-native shapes.
    W1 = jax.random.normal(next(ki), (hidden, n_chars), jnp.float32) * 0.1
    b1 = jax.random.normal(next(ki), (hidden,), jnp.float32) * 0.1

    conv_w, conv_b = [], []
    for _ in range(5):
        for _ in range(2):
            conv_w.append(
                jax.random.normal(next(ki), (hidden, hidden, 5), jnp.float32) * 0.05)
            conv_b.append(
                jax.random.normal(next(ki), (hidden,), jnp.float32) * 0.1)

    Wlin = jax.random.normal(next(ki), (1, seq_len * hidden), jnp.float32) * 0.05
    blin = jax.random.normal(next(ki), (), jnp.float32) * 0.1

    # Kernel layouts: im2col weight (5H, H) with row index k*H + cin.
    convw_k = jnp.stack([
        jnp.stack([jnp.transpose(conv_w[blk * 2 + ci], (2, 1, 0))
                   .reshape(5 * hidden, hidden) for ci in range(2)], axis=0)
        for blk in range(5)], axis=0)                    # (5, 2, 5H, H)
    convb_k = jnp.stack([
        jnp.stack([conv_b[blk * 2 + ci][None, :] for ci in range(2)], axis=0)
        for blk in range(5)], axis=0)                    # (5, 2, 1, H)

    return dict(
        # torch-native (for the reference model)
        W1=W1, b1=b1, conv_w=conv_w, conv_b=conv_b, Wlin=Wlin, blin=blin,
        # kernel layouts
        w1_k=W1.T,                                   # (n_chars, hidden)
        b1_k=b1[None, :],                            # (1, hidden)
        convw_k=convw_k,                             # (5, 2, 5H, H)
        convb_k=convb_k,                             # (5, 2, 1, H)
        wlin_k=Wlin.reshape(hidden, seq_len).T,      # (seq_len, hidden)
        blin_k=blin.reshape(1, 1),                   # (1, 1)
    )


# ----------------------------- JAX reference -------------------------------
def _torch_conv1d(x_ncl, w_oik, b, pad):
    y = lax.conv_general_dilated(
        x_ncl, w_oik, window_strides=(1,), padding=[(pad, pad)],
        dimension_numbers=('NCH', 'OIH', 'NCH'))
    return y + b[None, :, None]


def discriminator_lang_ref(x, params, seq_len, hidden):
    xt = jnp.transpose(x, (0, 2, 1))                     # (B, n_chars, L)
    h = _torch_conv1d(xt, params['W1'][:, :, None], params['b1'], 0)
    for blk in range(5):
        r1 = jnp.maximum(h, 0.0)
        c1 = _torch_conv1d(r1, params['conv_w'][blk * 2 + 0],
                           params['conv_b'][blk * 2 + 0], 2)
        r2 = jnp.maximum(c1, 0.0)
        c2 = _torch_conv1d(r2, params['conv_w'][blk * 2 + 1],
                           params['conv_b'][blk * 2 + 1], 2)
        h = h + 0.3 * c2
    flat = h.reshape(-1, seq_len * hidden)               # channel-major flatten
    return flat @ params['Wlin'].T + params['blin']


# ---------------------------------- main -----------------------------------
if __name__ == "__main__":
    B, SEQ_LEN, N_CHARS, HIDDEN = 16, 16, 8, 32          # grid = (2 batch tiles,)

    key = jax.random.PRNGKey(0)
    kx, kp = jax.random.split(key)
    x = jax.random.normal(kx, (B, SEQ_LEN, N_CHARS), jnp.float32)
    params = make_params(kp, N_CHARS, SEQ_LEN, HIDDEN)

    ref = jax.block_until_ready(discriminator_lang_ref(x, params, SEQ_LEN, HIDDEN))

    # Full-precision matmul path: tight check against the PyTorch-equivalent reference.
    out_f32 = jax.block_until_ready(
        discriminator_lang_pallas(x, params, compute_dtype=jnp.float32))
    assert out_f32.shape == (B, 1), out_f32.shape
    assert jnp.allclose(out_f32, ref, atol=1e-4, rtol=1e-4), (out_f32, ref)

    # bf16-fed MXU path (f32 accumulation; ReLU/residual/reduction in f32).
    out_bf16 = jax.block_until_ready(
        discriminator_lang_pallas(x, params, compute_dtype=jnp.bfloat16))
    assert out_bf16.shape == (B, 1), out_bf16.shape
    assert jnp.allclose(out_bf16, ref, atol=7e-2, rtol=7e-2), (out_bf16, ref)

    print("KERNEL_OK")
</pallas_src>

<mosaic_0001>
module attributes {stable_mosaic.version = 11 : i64} {
  func.func @_disc_kernel(%arg0: i32, %arg1: memref<8x16x8xf32, #tpu.memory_space<vmem>>, %arg2: memref<8x32xf32, #tpu.memory_space<vmem>>, %arg3: memref<1x32xf32, #tpu.memory_space<vmem>>, %arg4: memref<5x2x160x32xf32, #tpu.memory_space<vmem>>, %arg5: memref<5x2x1x32xf32, #tpu.memory_space<vmem>>, %arg6: memref<16x32xf32, #tpu.memory_space<vmem>>, %arg7: memref<1x1xf32, #tpu.memory_space<smem>>, %arg8: memref<8x1xf32, #tpu.memory_space<vmem>>) attributes {dimension_semantics = [#tpu.dimension_semantics<parallel>], iteration_bounds = array<i64: 2>, scalar_prefetch = 0 : i64, scratch_operands = 0 : i64, tpu.core_type = #tpu.core_type<tc>, window_params = [{transform_indices = @transform_0, window_bounds = array<i64: 8, 16, 8>}, {pipeline_mode = #tpu.pipeline_mode<synchronous>, transform_indices = @transform_1, window_bounds = array<i64: 8, 32>}, {pipeline_mode = #tpu.pipeline_mode<synchronous>, transform_indices = @transform_2, window_bounds = array<i64: 1, 32>}, {pipeline_mode = #tpu.pipeline_mode<synchronous>, transform_indices = @transform_3, window_bounds = array<i64: 5, 2, 160, 32>}, {pipeline_mode = #tpu.pipeline_mode<synchronous>, transform_indices = @transform_4, window_bounds = array<i64: 5, 2, 1, 32>}, {pipeline_mode = #tpu.pipeline_mode<synchronous>, transform_indices = @transform_5, window_bounds = array<i64: 16, 32>}, {transform_indices = @transform_6, window_bounds = array<i64: 1, 1>}, {transform_indices = @transform_7, window_bounds = array<i64: 8, 1>}]} {
    %0 = tpu.iota {dimensions = array<i32: 1>} : vector<8x16x32xi32>
    %c2_i32 = arith.constant 2 : i32
    %1 = vector.broadcast %c2_i32 : i32 to vector<8x16x32xi32>
    %2 = arith.cmpi sge, %0, %1 : vector<8x16x32xi32>
    %c16_i32 = arith.constant 16 : i32
    %3 = vector.broadcast %c16_i32 : i32 to vector<8x16x32xi32>
    %4 = arith.cmpi slt, %0, %3 : vector<8x16x32xi32>
    %5 = arith.andi %2, %4 : vector<8x16x32xi1>
    %c1_i32 = arith.constant 1 : i32
    %6 = vector.broadcast %c1_i32 : i32 to vector<8x16x32xi32>
    %7 = arith.cmpi sge, %0, %6 : vector<8x16x32xi32>
    %c16_i32_0 = arith.constant 16 : i32
    %8 = vector.broadcast %c16_i32_0 : i32 to vector<8x16x32xi32>
    %9 = arith.cmpi slt, %0, %8 : vector<8x16x32xi32>
    %10 = arith.andi %7, %9 : vector<8x16x32xi1>
    %c0_i32 = arith.constant 0 : i32
    %11 = vector.broadcast %c0_i32 : i32 to vector<8x16x32xi32>
    %12 = arith.cmpi sge, %0, %11 : vector<8x16x32xi32>
    %c15_i32 = arith.constant 15 : i32
    %13 = vector.broadcast %c15_i32 : i32 to vector<8x16x32xi32>
    %14 = arith.cmpi slt, %0, %13 : vector<8x16x32xi32>
    %15 = arith.andi %12, %14 : vector<8x16x32xi1>
    %c0_i32_1 = arith.constant 0 : i32
    %16 = vector.broadcast %c0_i32_1 : i32 to vector<8x16x32xi32>
    %17 = arith.cmpi sge, %0, %16 : vector<8x16x32xi32>
    %c14_i32 = arith.constant 14 : i32
    %18 = vector.broadcast %c14_i32 : i32 to vector<8x16x32xi32>
    %19 = arith.cmpi slt, %0, %18 : vector<8x16x32xi32>
    %20 = arith.andi %17, %19 : vector<8x16x32xi1>
    %c0 = arith.constant 0 : index
    %c0_2 = arith.constant 0 : index
    %c0_3 = arith.constant 0 : index
    %21 = vector.load %arg1[%c0, %c0_2, %c0_3] : memref<8x16x8xf32, #tpu.memory_space<vmem>>, vector<8x16x8xf32>
    %22 = vector.shape_cast %21 : vector<8x16x8xf32> to vector<128x8xf32>
    %c0_4 = arith.constant 0 : index
    %c0_5 = arith.constant 0 : index
    %23 = vector.load %arg2[%c0_4, %c0_5] : memref<8x32xf32, #tpu.memory_space<vmem>>, vector<8x32xf32>
    %cst = arith.constant dense<0.000000e+00> : vector<128x32xf32>
    %24 = tpu.matmul %22, %23, %cst {dimension_numbers = #tpu.dot_dimension_numbers<[1], [0], [0], [1], [0, 0, 1, 1], [], []>} : vector<128x8xf32>, vector<8x32xf32>, vector<128x32xf32> -> vector<128x32xf32>
    %c0_6 = arith.constant 0 : index
    %c0_7 = arith.constant 0 : index
    %25 = vector.load %arg3[%c0_6, %c0_7] : memref<1x32xf32, #tpu.memory_space<vmem>>, vector<1x32xf32>
    %26 = vector.broadcast %25 : vector<1x32xf32> to vector<128x32xf32>
    %27 = arith.addf %24, %26 : vector<128x32xf32>
    %cst_8 = arith.constant 0.000000e+00 : f32
    %28 = vector.broadcast %cst_8 : f32 to vector<128x32xf32>
    %29 = arith.maximumf %27, %28 : vector<128x32xf32>
    %c0_9 = arith.constant 0 : index
    %c0_10 = arith.constant 0 : index
    %c0_11 = arith.constant 0 : index
    %c0_12 = arith.constant 0 : index
    %30 = vector.load %arg4[%c0_9, %c0_10, %c0_11, %c0_12] : memref<5x2x160x32xf32, #tpu.memory_space<vmem>>, vector<1x1x160x32xf32>
    %31 = vector.shape_cast %30 : vector<1x1x160x32xf32> to vector<160x32xf32>
    %c0_13 = arith.constant 0 : index
    %c0_14 = arith.constant 0 : index
    %c0_15 = arith.constant 0 : index
    %c0_16 = arith.constant 0 : index
    %32 = vector.load %arg5[%c0_13, %c0_14, %c0_15, %c0_16] : memref<5x2x1x32xf32, #tpu.memory_space<vmem>>, vector<1x1x1x32xf32>
    %33 = vector.shape_cast %32 : vector<1x1x1x32xf32> to vector<1x32xf32>
    %34 = vector.shape_cast %29 : vector<128x32xf32> to vector<8x16x32xf32>
    %c2_i32_17 = arith.constant 2 : i32
    %35 = tpu.dynamic_rotate %34 by %c2_i32_17 dim 1 : vector<8x16x32xf32>, i32 -> vector<8x16x32xf32>
    %cst_18 = arith.constant 0.000000e+00 : f32
    %36 = vector.broadcast %cst_18 : f32 to vector<8x16x32xf32>
    %37 = arith.select %5, %35, %36 : vector<8x16x32xi1>, vector<8x16x32xf32>
    %c1_i32_19 = arith.constant 1 : i32
    %38 = tpu.dynamic_rotate %34 by %c1_i32_19 dim 1 : vector<8x16x32xf32>, i32 -> vector<8x16x32xf32>
    %cst_20 = arith.constant 0.000000e+00 : f32
    %39 = vector.broadcast %cst_20 : f32 to vector<8x16x32xf32>
    %40 = arith.select %10, %38, %39 : vector<8x16x32xi1>, vector<8x16x32xf32>
    %c15_i32_21 = arith.constant 15 : i32
    %41 = tpu.dynamic_rotate %34 by %c15_i32_21 dim 1 : vector<8x16x32xf32>, i32 -> vector<8x16x32xf32>
    %cst_22 = arith.constant 0.000000e+00 : f32
    %42 = vector.broadcast %cst_22 : f32 to vector<8x16x32xf32>
    %43 = arith.select %15, %41, %42 : vector<8x16x32xi1>, vector<8x16x32xf32>
    %c14_i32_23 = arith.constant 14 : i32
    %44 = tpu.dynamic_rotate %34 by %c14_i32_23 dim 1 : vector<8x16x32xf32>, i32 -> vector<8x16x32xf32>
    %cst_24 = arith.constant 0.000000e+00 : f32
    %45 = vector.broadcast %cst_24 : f32 to vector<8x16x32xf32>
    %46 = arith.select %20, %44, %45 : vector<8x16x32xi1>, vector<8x16x32xf32>
    %47 = tpu.concatenate %37, %40, %34, %43, %46 in 2 : vector<8x16x32xf32>, vector<8x16x32xf32>, vector<8x16x32xf32>, vector<8x16x32xf32>, vector<8x16x32xf32> -> vector<8x16x160xf32>
    %48 = vector.shape_cast %47 : vector<8x16x160xf32> to vector<128x160xf32>
    %cst_25 = arith.constant dense<0.000000e+00> : vector<128x32xf32>
    %49 = tpu.matmul %48, %31, %cst_25 {dimension_numbers = #tpu.dot_dimension_numbers<[1], [0], [0], [1], [0, 0, 1, 1], [], []>} : vector<128x160xf32>, vector<160x32xf32>, vector<128x32xf32> -> vector<128x32xf32>
    %50 = vector.broadcast %33 : vector<1x32xf32> to vector<128x32xf32>
    %51 = arith.addf %49, %50 : vector<128x32xf32>
    %cst_26 = arith.constant 0.000000e+00 : f32
    %52 = vector.broadcast %cst_26 : f32 to vector<128x32xf32>
    %53 = arith.maximumf %51, %52 : vector<128x32xf32>
    %c0_27 = arith.constant 0 : index
    %c1 = arith.constant 1 : index
    %c0_28 = arith.constant 0 : index
    %c0_29 = arith.constant 0 : index
    %54 = vector.load %arg4[%c0_27, %c1, %c0_28, %c0_29] : memref<5x2x160x32xf32, #tpu.memory_space<vmem>>, vector<1x1x160x32xf32>
    %55 = vector.shape_cast %54 : vector<1x1x160x32xf32> to vector<160x32xf32>
    %c0_30 = arith.constant 0 : index
    %c1_31 = arith.constant 1 : index
    %c0_32 = arith.constant 0 : index
    %c0_33 = arith.constant 0 : index
    %56 = vector.load %arg5[%c0_30, %c1_31, %c0_32, %c0_33] : memref<5x2x1x32xf32, #tpu.memory_space<vmem>>, vector<1x1x1x32xf32>
    %57 = vector.shape_cast %56 : vector<1x1x1x32xf32> to vector<1x32xf32>
    %58 = vector.shape_cast %53 : vector<128x32xf32> to vector<8x16x32xf32>
    %c2_i32_34 = arith.constant 2 : i32
    %59 = tpu.dynamic_rotate %58 by %c2_i32_34 dim 1 : vector<8x16x32xf32>, i32 -> vector<8x16x32xf32>
    %cst_35 = arith.constant 0.000000e+00 : f32
    %60 = vector.broadcast %cst_35 : f32 to vector<8x16x32xf32>
    %61 = arith.select %5, %59, %60 : vector<8x16x32xi1>, vector<8x16x32xf32>
    %c1_i32_36 = arith.constant 1 : i32
    %62 = tpu.dynamic_rotate %58 by %c1_i32_36 dim 1 : vector<8x16x32xf32>, i32 -> vector<8x16x32xf32>
    %cst_37 = arith.constant 0.000000e+00 : f32
    %63 = vector.broadcast %cst_37 : f32 to vector<8x16x32xf32>
    %64 = arith.select %10, %62, %63 : vector<8x16x32xi1>, vector<8x16x32xf32>
    %c15_i32_38 = arith.constant 15 : i32
    %65 = tpu.dynamic_rotate %58 by %c15_i32_38 dim 1 : vector<8x16x32xf32>, i32 -> vector<8x16x32xf32>
    %cst_39 = arith.constant 0.000000e+00 : f32
    %66 = vector.broadcast %cst_39 : f32 to vector<8x16x32xf32>
    %67 = arith.select %15, %65, %66 : vector<8x16x32xi1>, vector<8x16x32xf32>
    %c14_i32_40 = arith.constant 14 : i32
    %68 = tpu.dynamic_rotate %58 by %c14_i32_40 dim 1 : vector<8x16x32xf32>, i32 -> vector<8x16x32xf32>
    %cst_41 = arith.constant 0.000000e+00 : f32
    %69 = vector.broadcast %cst_41 : f32 to vector<8x16x32xf32>
    %70 = arith.select %20, %68, %69 : vector<8x16x32xi1>, vector<8x16x32xf32>
    %71 = tpu.concatenate %61, %64, %58, %67, %70 in 2 : vector<8x16x32xf32>, vector<8x16x32xf32>, vector<8x16x32xf32>, vector<8x16x32xf32>, vector<8x16x32xf32> -> vector<8x16x160xf32>
    %72 = vector.shape_cast %71 : vector<8x16x160xf32> to vector<128x160xf32>
    %cst_42 = arith.constant dense<0.000000e+00> : vector<128x32xf32>
    %73 = tpu.matmul %72, %55, %cst_42 {dimension_numbers = #tpu.dot_dimension_numbers<[1], [0], [0], [1], [0, 0, 1, 1], [], []>} : vector<128x160xf32>, vector<160x32xf32>, vector<128x32xf32> -> vector<128x32xf32>
    %74 = vector.broadcast %57 : vector<1x32xf32> to vector<128x32xf32>
    %75 = arith.addf %73, %74 : vector<128x32xf32>
    %cst_43 = arith.constant 3.000000e-01 : f32
    %76 = vector.broadcast %cst_43 : f32 to vector<128x32xf32>
    %77 = arith.mulf %76, %75 : vector<128x32xf32>
    %78 = arith.addf %27, %77 : vector<128x32xf32>
    %cst_44 = arith.constant 0.000000e+00 : f32
    %79 = vector.broadcast %cst_44 : f32 to vector<128x32xf32>
    %80 = arith.maximumf %78, %79 : vector<128x32xf32>
    %c1_45 = arith.constant 1 : index
    %c0_46 = arith.constant 0 : index
    %c0_47 = arith.constant 0 : index
    %c0_48 = arith.constant 0 : index
    %81 = vector.load %arg4[%c1_45, %c0_46, %c0_47, %c0_48] : memref<5x2x160x32xf32, #tpu.memory_space<vmem>>, vector<1x1x160x32xf32>
    %82 = vector.shape_cast %81 : vector<1x1x160x32xf32> to vector<160x32xf32>
    %c1_49 = arith.constant 1 : index
    %c0_50 = arith.constant 0 : index
    %c0_51 = arith.constant 0 : index
    %c0_52 = arith.constant 0 : index
    %83 = vector.load %arg5[%c1_49, %c0_50, %c0_51, %c0_52] : memref<5x2x1x32xf32, #tpu.memory_space<vmem>>, vector<1x1x1x32xf32>
    %84 = vector.shape_cast %83 : vector<1x1x1x32xf32> to vector<1x32xf32>
    %85 = vector.shape_cast %80 : vector<128x32xf32> to vector<8x16x32xf32>
    %c2_i32_53 = arith.constant 2 : i32
    %86 = tpu.dynamic_rotate %85 by %c2_i32_53 dim 1 : vector<8x16x32xf32>, i32 -> vector<8x16x32xf32>
    %cst_54 = arith.constant 0.000000e+00 : f32
    %87 = vector.broadcast %cst_54 : f32 to vector<8x16x32xf32>
    %88 = arith.select %5, %86, %87 : vector<8x16x32xi1>, vector<8x16x32xf32>
    %c1_i32_55 = arith.constant 1 : i32
    %89 = tpu.dynamic_rotate %85 by %c1_i32_55 dim 1 : vector<8x16x32xf32>, i32 -> vector<8x16x32xf32>
    %cst_56 = arith.constant 0.000000e+00 : f32
    %90 = vector.broadcast %cst_56 : f32 to vector<8x16x32xf32>
    %91 = arith.select %10, %89, %90 : vector<8x16x32xi1>, vector<8x16x32xf32>
    %c15_i32_57 = arith.constant 15 : i32
    %92 = tpu.dynamic_rotate %85 by %c15_i32_57 dim 1 : vector<8x16x32xf32>, i32 -> vector<8x16x32xf32>
    %cst_58 = arith.constant 0.000000e+00 : f32
    %93 = vector.broadcast %cst_58 : f32 to vector<8x16x32xf32>
    %94 = arith.select %15, %92, %93 : vector<8x16x32xi1>, vector<8x16x32xf32>
    %c14_i32_59 = arith.constant 14 : i32
    %95 = tpu.dynamic_rotate %85 by %c14_i32_59 dim 1 : vector<8x16x32xf32>, i32 -> vector<8x16x32xf32>
    %cst_60 = arith.constant 0.000000e+00 : f32
    %96 = vector.broadcast %cst_60 : f32 to vector<8x16x32xf32>
    %97 = arith.select %20, %95, %96 : vector<8x16x32xi1>, vector<8x16x32xf32>
    %98 = tpu.concatenate %88, %91, %85, %94, %97 in 2 : vector<8x16x32xf32>, vector<8x16x32xf32>, vector<8x16x32xf32>, vector<8x16x32xf32>, vector<8x16x32xf32> -> vector<8x16x160xf32>
    %99 = vector.shape_cast %98 : vector<8x16x160xf32> to vector<128x160xf32>
    %cst_61 = arith.constant dense<0.000000e+00> : vector<128x32xf32>
    %100 = tpu.matmul %99, %82, %cst_61 {dimension_numbers = #tpu.dot_dimension_numbers<[1], [0], [0], [1], [0, 0, 1, 1], [], []>} : vector<128x160xf32>, vector<160x32xf32>, vector<128x32xf32> -> vector<128x32xf32>
    %101 = vector.broadcast %84 : vector<1x32xf32> to vector<128x32xf32>
    %102 = arith.addf %100, %101 : vector<128x32xf32>
    %cst_62 = arith.constant 0.000000e+00 : f32
    %103 = vector.broadcast %cst_62 : f32 to vector<128x32xf32>
    %104 = arith.maximumf %102, %103 : vector<128x32xf32>
    %c1_63 = arith.constant 1 : index
    %c1_64 = arith.constant 1 : index
    %c0_65 = arith.constant 0 : index
    %c0_66 = arith.constant 0 : index
    %105 = vector.load %arg4[%c1_63, %c1_64, %c0_65, %c0_66] : memref<5x2x160x32xf32, #tpu.memory_space<vmem>>, vector<1x1x160x32xf32>
    %106 = vector.shape_cast %105 : vector<1x1x160x32xf32> to vector<160x32xf32>
    %c1_67 = arith.constant 1 : index
    %c1_68 = arith.constant 1 : index
    %c0_69 = arith.constant 0 : index
    %c0_70 = arith.constant 0 : index
    %107 = vector.load %arg5[%c1_67, %c1_68, %c0_69, %c0_70] : memref<5x2x1x32xf32, #tpu.memory_space<vmem>>, vector<1x1x1x32xf32>
    %108 = vector.shape_cast %107 : vector<1x1x1x32xf32> to vector<1x32xf32>
    %109 = vector.shape_cast %104 : vector<128x32xf32> to vector<8x16x32xf32>
    %c2_i32_71 = arith.constant 2 : i32
    %110 = tpu.dynamic_rotate %109 by %c2_i32_71 dim 1 : vector<8x16x32xf32>, i32 -> vector<8x16x32xf32>
    %cst_72 = arith.constant 0.000000e+00 : f32
    %111 = vector.broadcast %cst_72 : f32 to vector<8x16x32xf32>
    %112 = arith.select %5, %110, %111 : vector<8x16x32xi1>, vector<8x16x32xf32>
    %c1_i32_73 = arith.constant 1 : i32
    %113 = tpu.dynamic_rotate %109 by %c1_i32_73 dim 1 : vector<8x16x32xf32>, i32 -> vector<8x16x32xf32>
    %cst_74 = arith.constant 0.000000e+00 : f32
    %114 = vector.broadcast %cst_74 : f32 to vector<8x16x32xf32>
    %115 = arith.select %10, %113, %114 : vector<8x16x32xi1>, vector<8x16x32xf32>
    %c15_i32_75 = arith.constant 15 : i32
    %116 = tpu.dynamic_rotate %109 by %c15_i32_75 dim 1 : vector<8x16x32xf32>, i32 -> vector<8x16x32xf32>
    %cst_76 = arith.constant 0.000000e+00 : f32
    %117 = vector.broadcast %cst_76 : f32 to vector<8x16x32xf32>
    %118 = arith.select %15, %116, %117 : vector<8x16x32xi1>, vector<8x16x32xf32>
    %c14_i32_77 = arith.constant 14 : i32
    %119 = tpu.dynamic_rotate %109 by %c14_i32_77 dim 1 : vector<8x16x32xf32>, i32 -> vector<8x16x32xf32>
    %cst_78 = arith.constant 0.000000e+00 : f32
    %120 = vector.broadcast %cst_78 : f32 to vector<8x16x32xf32>
    %121 = arith.select %20, %119, %120 : vector<8x16x32xi1>, vector<8x16x32xf32>
    %122 = tpu.concatenate %112, %115, %109, %118, %121 in 2 : vector<8x16x32xf32>, vector<8x16x32xf32>, vector<8x16x32xf32>, vector<8x16x32xf32>, vector<8x16x32xf32> -> vector<8x16x160xf32>
    %123 = vector.shape_cast %122 : vector<8x16x160xf32> to vector<128x160xf32>
    %cst_79 = arith.constant dense<0.000000e+00> : vector<128x32xf32>
    %124 = tpu.matmul %123, %106, %cst_79 {dimension_numbers = #tpu.dot_dimension_numbers<[1], [0], [0], [1], [0, 0, 1, 1], [], []>} : vector<128x160xf32>, vector<160x32xf32>, vector<128x32xf32> -> vector<128x32xf32>
    %125 = vector.broadcast %108 : vector<1x32xf32> to vector<128x32xf32>
    %126 = arith.addf %124, %125 : vector<128x32xf32>
    %cst_80 = arith.constant 3.000000e-01 : f32
    %127 = vector.broadcast %cst_80 : f32 to vector<128x32xf32>
    %128 = arith.mulf %127, %126 : vector<128x32xf32>
    %129 = arith.addf %78, %128 : vector<128x32xf32>
    %cst_81 = arith.constant 0.000000e+00 : f32
    %130 = vector.broadcast %cst_81 : f32 to vector<128x32xf32>
    %131 = arith.maximumf %129, %130 : vector<128x32xf32>
    %c2 = arith.constant 2 : index
    %c0_82 = arith.constant 0 : index
    %c0_83 = arith.constant 0 : index
    %c0_84 = arith.constant 0 : index
    %132 = vector.load %arg4[%c2, %c0_82, %c0_83, %c0_84] : memref<5x2x160x32xf32, #tpu.memory_space<vmem>>, vector<1x1x160x32xf32>
    %133 = vector.shape_cast %132 : vector<1x1x160x32xf32> to vector<160x32xf32>
    %c2_85 = arith.constant 2 : index
    %c0_86 = arith.constant 0 : index
    %c0_87 = arith.constant 0 : index
    %c0_88 = arith.constant 0 : index
    %134 = vector.load %arg5[%c2_85, %c0_86, %c0_87, %c0_88] : memref<5x2x1x32xf32, #tpu.memory_space<vmem>>, vector<1x1x1x32xf32>
    %135 = vector.shape_cast %134 : vector<1x1x1x32xf32> to vector<1x32xf32>
    %136 = vector.shape_cast %131 : vector<128x32xf32> to vector<8x16x32xf32>
    %c2_i32_89 = arith.constant 2 : i32
    %137 = tpu.dynamic_rotate %136 by %c2_i32_89 dim 1 : vector<8x16x32xf32>, i32 -> vector<8x16x32xf32>
    %cst_90 = arith.constant 0.000000e+00 : f32
    %138 = vector.broadcast %cst_90 : f32 to vector<8x16x32xf32>
    %139 = arith.select %5, %137, %138 : vector<8x16x32xi1>, vector<8x16x32xf32>
    %c1_i32_91 = arith.constant 1 : i32
    %140 = tpu.dynamic_rotate %136 by %c1_i32_91 dim 1 : vector<8x16x32xf32>, i32 -> vector<8x16x32xf32>
    %cst_92 = arith.constant 0.000000e+00 : f32
    %141 = vector.broadcast %cst_92 : f32 to vector<8x16x32xf32>
    %142 = arith.select %10, %140, %141 : vector<8x16x32xi1>, vector<8x16x32xf32>
    %c15_i32_93 = arith.constant 15 : i32
    %143 = tpu.dynamic_rotate %136 by %c15_i32_93 dim 1 : vector<8x16x32xf32>, i32 -> vector<8x16x32xf32>
    %cst_94 = arith.constant 0.000000e+00 : f32
    %144 = vector.broadcast %cst_94 : f32 to vector<8x16x32xf32>
    %145 = arith.select %15, %143, %144 : vector<8x16x32xi1>, vector<8x16x32xf32>
    %c14_i32_95 = arith.constant 14 : i32
    %146 = tpu.dynamic_rotate %136 by %c14_i32_95 dim 1 : vector<8x16x32xf32>, i32 -> vector<8x16x32xf32>
    %cst_96 = arith.constant 0.000000e+00 : f32
    %147 = vector.broadcast %cst_96 : f32 to vector<8x16x32xf32>
    %148 = arith.select %20, %146, %147 : vector<8x16x32xi1>, vector<8x16x32xf32>
    %149 = tpu.concatenate %139, %142, %136, %145, %148 in 2 : vector<8x16x32xf32>, vector<8x16x32xf32>, vector<8x16x32xf32>, vector<8x16x32xf32>, vector<8x16x32xf32> -> vector<8x16x160xf32>
    %150 = vector.shape_cast %149 : vector<8x16x160xf32> to vector<128x160xf32>
    %cst_97 = arith.constant dense<0.000000e+00> : vector<128x32xf32>
    %151 = tpu.matmul %150, %133, %cst_97 {dimension_numbers = #tpu.dot_dimension_numbers<[1], [0], [0], [1], [0, 0, 1, 1], [], []>} : vector<128x160xf32>, vector<160x32xf32>, vector<128x32xf32> -> vector<128x32xf32>
    %152 = vector.broadcast %135 : vector<1x32xf32> to vector<128x32xf32>
    %153 = arith.addf %151, %152 : vector<128x32xf32>
    %cst_98 = arith.constant 0.000000e+00 : f32
    %154 = vector.broadcast %cst_98 : f32 to vector<128x32xf32>
    %155 = arith.maximumf %153, %154 : vector<128x32xf32>
    %c2_99 = arith.constant 2 : index
    %c1_100 = arith.constant 1 : index
    %c0_101 = arith.constant 0 : index
    %c0_102 = arith.constant 0 : index
    %156 = vector.load %arg4[%c2_99, %c1_100, %c0_101, %c0_102] : memref<5x2x160x32xf32, #tpu.memory_space<vmem>>, vector<1x1x160x32xf32>
    %157 = vector.shape_cast %156 : vector<1x1x160x32xf32> to vector<160x32xf32>
    %c2_103 = arith.constant 2 : index
    %c1_104 = arith.constant 1 : index
    %c0_105 = arith.constant 0 : index
    %c0_106 = arith.constant 0 : index
    %158 = vector.load %arg5[%c2_103, %c1_104, %c0_105, %c0_106] : memref<5x2x1x32xf32, #tpu.memory_space<vmem>>, vector<1x1x1x32xf32>
    %159 = vector.shape_cast %158 : vector<1x1x1x32xf32> to vector<1x32xf32>
    %160 = vector.shape_cast %155 : vector<128x32xf32> to vector<8x16x32xf32>
    %c2_i32_107 = arith.constant 2 : i32
    %161 = tpu.dynamic_rotate %160 by %c2_i32_107 dim 1 : vector<8x16x32xf32>, i32 -> vector<8x16x32xf32>
    %cst_108 = arith.constant 0.000000e+00 : f32
    %162 = vector.broadcast %cst_108 : f32 to vector<8x16x32xf32>
    %163 = arith.select %5, %161, %162 : vector<8x16x32xi1>, vector<8x16x32xf32>
    %c1_i32_109 = arith.constant 1 : i32
    %164 = tpu.dynamic_rotate %160 by %c1_i32_109 dim 1 : vector<8x16x32xf32>, i32 -> vector<8x16x32xf32>
    %cst_110 = arith.constant 0.000000e+00 : f32
    %165 = vector.broadcast %cst_110 : f32 to vector<8x16x32xf32>
    %166 = arith.select %10, %164, %165 : vector<8x16x32xi1>, vector<8x16x32xf32>
    %c15_i32_111 = arith.constant 15 : i32
    %167 = tpu.dynamic_rotate %160 by %c15_i32_111 dim 1 : vector<8x16x32xf32>, i32 -> vector<8x16x32xf32>
    %cst_112 = arith.constant 0.000000e+00 : f32
    %168 = vector.broadcast %cst_112 : f32 to vector<8x16x32xf32>
    %169 = arith.select %15, %167, %168 : vector<8x16x32xi1>, vector<8x16x32xf32>
    %c14_i32_113 = arith.constant 14 : i32
    %170 = tpu.dynamic_rotate %160 by %c14_i32_113 dim 1 : vector<8x16x32xf32>, i32 -> vector<8x16x32xf32>
    %cst_114 = arith.constant 0.000000e+00 : f32
    %171 = vector.broadcast %cst_114 : f32 to vector<8x16x32xf32>
    %172 = arith.select %20, %170, %171 : vector<8x16x32xi1>, vector<8x16x32xf32>
    %173 = tpu.concatenate %163, %166, %160, %169, %172 in 2 : vector<8x16x32xf32>, vector<8x16x32xf32>, vector<8x16x32xf32>, vector<8x16x32xf32>, vector<8x16x32xf32> -> vector<8x16x160xf32>
    %174 = vector.shape_cast %173 : vector<8x16x160xf32> to vector<128x160xf32>
    %cst_115 = arith.constant dense<0.000000e+00> : vector<128x32xf32>
    %175 = tpu.matmul %174, %157, %cst_115 {dimension_numbers = #tpu.dot_dimension_numbers<[1], [0], [0], [1], [0, 0, 1, 1], [], []>} : vector<128x160xf32>, vector<160x32xf32>, vector<128x32xf32> -> vector<128x32xf32>
    %176 = vector.broadcast %159 : vector<1x32xf32> to vector<128x32xf32>
    %177 = arith.addf %175, %176 : vector<128x32xf32>
    %cst_116 = arith.constant 3.000000e-01 : f32
    %178 = vector.broadcast %cst_116 : f32 to vector<128x32xf32>
    %179 = arith.mulf %178, %177 : vector<128x32xf32>
    %180 = arith.addf %129, %179 : vector<128x32xf32>
    %cst_117 = arith.constant 0.000000e+00 : f32
    %181 = vector.broadcast %cst_117 : f32 to vector<128x32xf32>
    %182 = arith.maximumf %180, %181 : vector<128x32xf32>
    %c3 = arith.constant 3 : index
    %c0_118 = arith.constant 0 : index
    %c0_119 = arith.constant 0 : index
    %c0_120 = arith.constant 0 : index
    %183 = vector.load %arg4[%c3, %c0_118, %c0_119, %c0_120] : memref<5x2x160x32xf32, #tpu.memory_space<vmem>>, vector<1x1x160x32xf32>
    %184 = vector.shape_cast %183 : vector<1x1x160x32xf32> to vector<160x32xf32>
    %c3_121 = arith.constant 3 : index
    %c0_122 = arith.constant 0 : index
    %c0_123 = arith.constant 0 : index
    %c0_124 = arith.constant 0 : index
    %185 = vector.load %arg5[%c3_121, %c0_122, %c0_123, %c0_124] : memref<5x2x1x32xf32, #tpu.memory_space<vmem>>, vector<1x1x1x32xf32>
    %186 = vector.shape_cast %185 : vector<1x1x1x32xf32> to vector<1x32xf32>
    %187 = vector.shape_cast %182 : vector<128x32xf32> to vector<8x16x32xf32>
    %c2_i32_125 = arith.constant 2 : i32
    %188 = tpu.dynamic_rotate %187 by %c2_i32_125 dim 1 : vector<8x16x32xf32>, i32 -> vector<8x16x32xf32>
    %cst_126 = arith.constant 0.000000e+00 : f32
    %189 = vector.broadcast %cst_126 : f32 to vector<8x16x32xf32>
    %190 = arith.select %5, %188, %189 : vector<8x16x32xi1>, vector<8x16x32xf32>
    %c1_i32_127 = arith.constant 1 : i32
    %191 = tpu.dynamic_rotate %187 by %c1_i32_127 dim 1 : vector<8x16x32xf32>, i32 -> vector<8x16x32xf32>
    %cst_128 = arith.constant 0.000000e+00 : f32
    %192 = vector.broadcast %cst_128 : f32 to vector<8x16x32xf32>
    %193 = arith.select %10, %191, %192 : vector<8x16x32xi1>, vector<8x16x32xf32>
    %c15_i32_129 = arith.constant 15 : i32
    %194 = tpu.dynamic_rotate %187 by %c15_i32_129 dim 1 : vector<8x16x32xf32>, i32 -> vector<8x16x32xf32>
    %cst_130 = arith.constant 0.000000e+00 : f32
    %195 = vector.broadcast %cst_130 : f32 to vector<8x16x32xf32>
    %196 = arith.select %15, %194, %195 : vector<8x16x32xi1>, vector<8x16x32xf32>
    %c14_i32_131 = arith.constant 14 : i32
    %197 = tpu.dynamic_rotate %187 by %c14_i32_131 dim 1 : vector<8x16x32xf32>, i32 -> vector<8x16x32xf32>
    %cst_132 = arith.constant 0.000000e+00 : f32
    %198 = vector.broadcast %cst_132 : f32 to vector<8x16x32xf32>
    %199 = arith.select %20, %197, %198 : vector<8x16x32xi1>, vector<8x16x32xf32>
    %200 = tpu.concatenate %190, %193, %187, %196, %199 in 2 : vector<8x16x32xf32>, vector<8x16x32xf32>, vector<8x16x32xf32>, vector<8x16x32xf32>, vector<8x16x32xf32> -> vector<8x16x160xf32>
    %201 = vector.shape_cast %200 : vector<8x16x160xf32> to vector<128x160xf32>
    %cst_133 = arith.constant dense<0.000000e+00> : vector<128x32xf32>
    %202 = tpu.matmul %201, %184, %cst_133 {dimension_numbers = #tpu.dot_dimension_numbers<[1], [0], [0], [1], [0, 0, 1, 1], [], []>} : vector<128x160xf32>, vector<160x32xf32>, vector<128x32xf32> -> vector<128x32xf32>
    %203 = vector.broadcast %186 : vector<1x32xf32> to vector<128x32xf32>
    %204 = arith.addf %202, %203 : vector<128x32xf32>
    %cst_134 = arith.constant 0.000000e+00 : f32
    %205 = vector.broadcast %cst_134 : f32 to vector<128x32xf32>
    %206 = arith.maximumf %204, %205 : vector<128x32xf32>
    %c3_135 = arith.constant 3 : index
    %c1_136 = arith.constant 1 : index
    %c0_137 = arith.constant 0 : index
    %c0_138 = arith.constant 0 : index
    %207 = vector.load %arg4[%c3_135, %c1_136, %c0_137, %c0_138] : memref<5x2x160x32xf32, #tpu.memory_space<vmem>>, vector<1x1x160x32xf32>
    %208 = vector.shape_cast %207 : vector<1x1x160x32xf32> to vector<160x32xf32>
    %c3_139 = arith.constant 3 : index
    %c1_140 = arith.constant 1 : index
    %c0_141 = arith.constant 0 : index
    %c0_142 = arith.constant 0 : index
    %209 = vector.load %arg5[%c3_139, %c1_140, %c0_141, %c0_142] : memref<5x2x1x32xf32, #tpu.memory_space<vmem>>, vector<1x1x1x32xf32>
    %210 = vector.shape_cast %209 : vector<1x1x1x32xf32> to vector<1x32xf32>
    %211 = vector.shape_cast %206 : vector<128x32xf32> to vector<8x16x32xf32>
    %c2_i32_143 = arith.constant 2 : i32
    %212 = tpu.dynamic_rotate %211 by %c2_i32_143 dim 1 : vector<8x16x32xf32>, i32 -> vector<8x16x32xf32>
    %cst_144 = arith.constant 0.000000e+00 : f32
    %213 = vector.broadcast %cst_144 : f32 to vector<8x16x32xf32>
    %214 = arith.select %5, %212, %213 : vector<8x16x32xi1>, vector<8x16x32xf32>
    %c1_i32_145 = arith.constant 1 : i32
    %215 = tpu.dynamic_rotate %211 by %c1_i32_145 dim 1 : vector<8x16x32xf32>, i32 -> vector<8x16x32xf32>
    %cst_146 = arith.constant 0.000000e+00 : f32
    %216 = vector.broadcast %cst_146 : f32 to vector<8x16x32xf32>
    %217 = arith.select %10, %215, %216 : vector<8x16x32xi1>, vector<8x16x32xf32>
    %c15_i32_147 = arith.constant 15 : i32
    %218 = tpu.dynamic_rotate %211 by %c15_i32_147 dim 1 : vector<8x16x32xf32>, i32 -> vector<8x16x32xf32>
    %cst_148 = arith.constant 0.000000e+00 : f32
    %219 = vector.broadcast %cst_148 : f32 to vector<8x16x32xf32>
    %220 = arith.select %15, %218, %219 : vector<8x16x32xi1>, vector<8x16x32xf32>
    %c14_i32_149 = arith.constant 14 : i32
    %221 = tpu.dynamic_rotate %211 by %c14_i32_149 dim 1 : vector<8x16x32xf32>, i32 -> vector<8x16x32xf32>
    %cst_150 = arith.constant 0.000000e+00 : f32
    %222 = vector.broadcast %cst_150 : f32 to vector<8x16x32xf32>
    %223 = arith.select %20, %221, %222 : vector<8x16x32xi1>, vector<8x16x32xf32>
    %224 = tpu.concatenate %214, %217, %211, %220, %223 in 2 : vector<8x16x32xf32>, vector<8x16x32xf32>, vector<8x16x32xf32>, vector<8x16x32xf32>, vector<8x16x32xf32> -> vector<8x16x160xf32>
    %225 = vector.shape_cast %224 : vector<8x16x160xf32> to vector<128x160xf32>
    %cst_151 = arith.constant dense<0.000000e+00> : vector<128x32xf32>
    %226 = tpu.matmul %225, %208, %cst_151 {dimension_numbers = #tpu.dot_dimension_numbers<[1], [0], [0], [1], [0, 0, 1, 1], [], []>} : vector<128x160xf32>, vector<160x32xf32>, vector<128x32xf32> -> vector<128x32xf32>
    %227 = vector.broadcast %210 : vector<1x32xf32> to vector<128x32xf32>
    %228 = arith.addf %226, %227 : vector<128x32xf32>
    %cst_152 = arith.constant 3.000000e-01 : f32
    %229 = vector.broadcast %cst_152 : f32 to vector<128x32xf32>
    %230 = arith.mulf %229, %228 : vector<128x32xf32>
    %231 = arith.addf %180, %230 : vector<128x32xf32>
    %cst_153 = arith.constant 0.000000e+00 : f32
    %232 = vector.broadcast %cst_153 : f32 to vector<128x32xf32>
    %233 = arith.maximumf %231, %232 : vector<128x32xf32>
    %c4 = arith.constant 4 : index
    %c0_154 = arith.constant 0 : index
    %c0_155 = arith.constant 0 : index
    %c0_156 = arith.constant 0 : index
    %234 = vector.load %arg4[%c4, %c0_154, %c0_155, %c0_156] : memref<5x2x160x32xf32, #tpu.memory_space<vmem>>, vector<1x1x160x32xf32>
    %235 = vector.shape_cast %234 : vector<1x1x160x32xf32> to vector<160x32xf32>
    %c4_157 = arith.constant 4 : index
    %c0_158 = arith.constant 0 : index
    %c0_159 = arith.constant 0 : index
    %c0_160 = arith.constant 0 : index
    %236 = vector.load %arg5[%c4_157, %c0_158, %c0_159, %c0_160] : memref<5x2x1x32xf32, #tpu.memory_space<vmem>>, vector<1x1x1x32xf32>
    %237 = vector.shape_cast %236 : vector<1x1x1x32xf32> to vector<1x32xf32>
    %238 = vector.shape_cast %233 : vector<128x32xf32> to vector<8x16x32xf32>
    %c2_i32_161 = arith.constant 2 : i32
    %239 = tpu.dynamic_rotate %238 by %c2_i32_161 dim 1 : vector<8x16x32xf32>, i32 -> vector<8x16x32xf32>
    %cst_162 = arith.constant 0.000000e+00 : f32
    %240 = vector.broadcast %cst_162 : f32 to vector<8x16x32xf32>
    %241 = arith.select %5, %239, %240 : vector<8x16x32xi1>, vector<8x16x32xf32>
    %c1_i32_163 = arith.constant 1 : i32
    %242 = tpu.dynamic_rotate %238 by %c1_i32_163 dim 1 : vector<8x16x32xf32>, i32 -> vector<8x16x32xf32>
    %cst_164 = arith.constant 0.000000e+00 : f32
    %243 = vector.broadcast %cst_164 : f32 to vector<8x16x32xf32>
    %244 = arith.select %10, %242, %243 : vector<8x16x32xi1>, vector<8x16x32xf32>
    %c15_i32_165 = arith.constant 15 : i32
    %245 = tpu.dynamic_rotate %238 by %c15_i32_165 dim 1 : vector<8x16x32xf32>, i32 -> vector<8x16x32xf32>
    %cst_166 = arith.constant 0.000000e+00 : f32
    %246 = vector.broadcast %cst_166 : f32 to vector<8x16x32xf32>
    %247 = arith.select %15, %245, %246 : vector<8x16x32xi1>, vector<8x16x32xf32>
    %c14_i32_167 = arith.constant 14 : i32
    %248 = tpu.dynamic_rotate %238 by %c14_i32_167 dim 1 : vector<8x16x32xf32>, i32 -> vector<8x16x32xf32>
    %cst_168 = arith.constant 0.000000e+00 : f32
    %249 = vector.broadcast %cst_168 : f32 to vector<8x16x32xf32>
    %250 = arith.select %20, %248, %249 : vector<8x16x32xi1>, vector<8x16x32xf32>
    %251 = tpu.concatenate %241, %244, %238, %247, %250 in 2 : vector<8x16x32xf32>, vector<8x16x32xf32>, vector<8x16x32xf32>, vector<8x16x32xf32>, vector<8x16x32xf32> -> vector<8x16x160xf32>
    %252 = vector.shape_cast %251 : vector<8x16x160xf32> to vector<128x160xf32>
    %cst_169 = arith.constant dense<0.000000e+00> : vector<128x32xf32>
    %253 = tpu.matmul %252, %235, %cst_169 {dimension_numbers = #tpu.dot_dimension_numbers<[1], [0], [0], [1], [0, 0, 1, 1], [], []>} : vector<128x160xf32>, vector<160x32xf32>, vector<128x32xf32> -> vector<128x32xf32>
    %254 = vector.broadcast %237 : vector<1x32xf32> to vector<128x32xf32>
    %255 = arith.addf %253, %254 : vector<128x32xf32>
    %cst_170 = arith.constant 0.000000e+00 : f32
    %256 = vector.broadcast %cst_170 : f32 to vector<128x32xf32>
    %257 = arith.maximumf %255, %256 : vector<128x32xf32>
    %c4_171 = arith.constant 4 : index
    %c1_172 = arith.constant 1 : index
    %c0_173 = arith.constant 0 : index
    %c0_174 = arith.constant 0 : index
    %258 = vector.load %arg4[%c4_171, %c1_172, %c0_173, %c0_174] : memref<5x2x160x32xf32, #tpu.memory_space<vmem>>, vector<1x1x160x32xf32>
    %259 = vector.shape_cast %258 : vector<1x1x160x32xf32> to vector<160x32xf32>
    %c4_175 = arith.constant 4 : index
    %c1_176 = arith.constant 1 : index
    %c0_177 = arith.constant 0 : index
    %c0_178 = arith.constant 0 : index
    %260 = vector.load %arg5[%c4_175, %c1_176, %c0_177, %c0_178] : memref<5x2x1x32xf32, #tpu.memory_space<vmem>>, vector<1x1x1x32xf32>
    %261 = vector.shape_cast %260 : vector<1x1x1x32xf32> to vector<1x32xf32>
    %262 = vector.shape_cast %257 : vector<128x32xf32> to vector<8x16x32xf32>
    %c2_i32_179 = arith.constant 2 : i32
    %263 = tpu.dynamic_rotate %262 by %c2_i32_179 dim 1 : vector<8x16x32xf32>, i32 -> vector<8x16x32xf32>
    %cst_180 = arith.constant 0.000000e+00 : f32
    %264 = vector.broadcast %cst_180 : f32 to vector<8x16x32xf32>
    %265 = arith.select %5, %263, %264 : vector<8x16x32xi1>, vector<8x16x32xf32>
    %c1_i32_181 = arith.constant 1 : i32
    %266 = tpu.dynamic_rotate %262 by %c1_i32_181 dim 1 : vector<8x16x32xf32>, i32 -> vector<8x16x32xf32>
    %cst_182 = arith.constant 0.000000e+00 : f32
    %267 = vector.broadcast %cst_182 : f32 to vector<8x16x32xf32>
    %268 = arith.select %10, %266, %267 : vector<8x16x32xi1>, vector<8x16x32xf32>
    %c15_i32_183 = arith.constant 15 : i32
    %269 = tpu.dynamic_rotate %262 by %c15_i32_183 dim 1 : vector<8x16x32xf32>, i32 -> vector<8x16x32xf32>
    %cst_184 = arith.constant 0.000000e+00 : f32
    %270 = vector.broadcast %cst_184 : f32 to vector<8x16x32xf32>
    %271 = arith.select %15, %269, %270 : vector<8x16x32xi1>, vector<8x16x32xf32>
    %c14_i32_185 = arith.constant 14 : i32
    %272 = tpu.dynamic_rotate %262 by %c14_i32_185 dim 1 : vector<8x16x32xf32>, i32 -> vector<8x16x32xf32>
    %cst_186 = arith.constant 0.000000e+00 : f32
    %273 = vector.broadcast %cst_186 : f32 to vector<8x16x32xf32>
    %274 = arith.select %20, %272, %273 : vector<8x16x32xi1>, vector<8x16x32xf32>
    %275 = tpu.concatenate %265, %268, %262, %271, %274 in 2 : vector<8x16x32xf32>, vector<8x16x32xf32>, vector<8x16x32xf32>, vector<8x16x32xf32>, vector<8x16x32xf32> -> vector<8x16x160xf32>
    %276 = vector.shape_cast %275 : vector<8x16x160xf32> to vector<128x160xf32>
    %cst_187 = arith.constant dense<0.000000e+00> : vector<128x32xf32>
    %277 = tpu.matmul %276, %259, %cst_187 {dimension_numbers = #tpu.dot_dimension_numbers<[1], [0], [0], [1], [0, 0, 1, 1], [], []>} : vector<128x160xf32>, vector<160x32xf32>, vector<128x32xf32> -> vector<128x32xf32>
    %278 = vector.broadcast %261 : vector<1x32xf32> to vector<128x32xf32>
    %279 = arith.addf %277, %278 : vector<128x32xf32>
    %cst_188 = arith.constant 3.000000e-01 : f32
    %280 = vector.broadcast %cst_188 : f32 to vector<128x32xf32>
    %281 = arith.mulf %280, %279 : vector<128x32xf32>
    %282 = arith.addf %231, %281 : vector<128x32xf32>
    %283 = vector.shape_cast %282 : vector<128x32xf32> to vector<8x16x32xf32>
    %c0_189 = arith.constant 0 : index
    %c0_190 = arith.constant 0 : index
    %284 = vector.load %arg6[%c0_189, %c0_190] : memref<16x32xf32, #tpu.memory_space<vmem>>, vector<16x32xf32>
    %285 = vector.shape_cast %284 : vector<16x32xf32> to vector<1x16x32xf32>
    %286 = vector.broadcast %285 : vector<1x16x32xf32> to vector<8x16x32xf32>
    %287 = arith.mulf %283, %286 : vector<8x16x32xf32>
    %cst_191 = arith.constant dense<0.000000e+00> : vector<8x16xf32>
    %288 = vector.multi_reduction <add>, %287, %cst_191 [2] : vector<8x16x32xf32> to vector<8x16xf32>
    %cst_192 = arith.constant dense<0.000000e+00> : vector<8xf32>
    %289 = vector.multi_reduction <add>, %288, %cst_192 [1] : vector<8x16xf32> to vector<8xf32>
    %290 = vector.shape_cast %289 : vector<8xf32> to vector<8x1xf32>
    %c0_193 = arith.constant 0 : index
    %c0_194 = arith.constant 0 : index
    %291 = memref.load %arg7[%c0_193, %c0_194] : memref<1x1xf32, #tpu.memory_space<smem>>
    %292 = vector.broadcast %291 : f32 to vector<8x1xf32>
    %293 = arith.addf %290, %292 : vector<8x1xf32>
    %c0_195 = arith.constant 0 : index
    %c0_196 = arith.constant 0 : index
    %294 = vector.load %arg8[%c0_195, %c0_196] : memref<8x1xf32, #tpu.memory_space<vmem>>, vector<8x1xf32>
    tpu.vector_store %arg8[%c0_195, %c0_196], %293 {strides = array<i32>} : memref<8x1xf32, #tpu.memory_space<vmem>>, vector<8x1xf32>,
    return
  }
  func.func @transform_0(%arg0: i32) -> (i32, i32, i32) {
    %c0_i32 = arith.constant 0 : i32
    %c0_i32_0 = arith.constant 0 : i32
    %c0_i32_1 = arith.constant 0 : i32
    return %arg0, %c0_i32, %c0_i32_0 : i32, i32, i32
  }
  func.func @transform_1(%arg0: i32) -> (i32, i32) {
    %c0_i32 = arith.constant 0 : i32
    %c0_i32_0 = arith.constant 0 : i32
    %c0_i32_1 = arith.constant 0 : i32
    return %c0_i32, %c0_i32_0 : i32, i32
  }
  func.func @transform_2(%arg0: i32) -> (i32, i32) {
    %c0_i32 = arith.constant 0 : i32
    %c0_i32_0 = arith.constant 0 : i32
    %c0_i32_1 = arith.constant 0 : i32
    return %c0_i32, %c0_i32_0 : i32, i32
  }
  func.func @transform_3(%arg0: i32) -> (i32, i32, i32, i32) {
    %c0_i32 = arith.constant 0 : i32
    %c0_i32_0 = arith.constant 0 : i32
    %c0_i32_1 = arith.constant 0 : i32
    %c0_i32_2 = arith.constant 0 : i32
    %c0_i32_3 = arith.constant 0 : i32
    return %c0_i32, %c0_i32_0, %c0_i32_1, %c0_i32_2 : i32, i32, i32, i32
  }
  func.func @transform_4(%arg0: i32) -> (i32, i32, i32, i32) {
    %c0_i32 = arith.constant 0 : i32
    %c0_i32_0 = arith.constant 0 : i32
    %c0_i32_1 = arith.constant 0 : i32
    %c0_i32_2 = arith.constant 0 : i32
    %c0_i32_3 = arith.constant 0 : i32
    return %c0_i32, %c0_i32_0, %c0_i32_1, %c0_i32_2 : i32, i32, i32, i32
  }
  func.func @transform_5(%arg0: i32) -> (i32, i32) {
    %c0_i32 = arith.constant 0 : i32
    %c0_i32_0 = arith.constant 0 : i32
    %c0_i32_1 = arith.constant 0 : i32
    return %c0_i32, %c0_i32_0 : i32, i32
  }
  func.func @transform_6(%arg0: i32) -> (i32, i32) {
    %c0_i32 = arith.constant 0 : i32
    %c0_i32_0 = arith.constant 0 : i32
    %c0_i32_1 = arith.constant 0 : i32
    return %c0_i32, %c0_i32_0 : i32, i32
  }
  func.func @transform_7(%arg0: i32) -> (i32, i32) {
    %c0_i32 = arith.constant 0 : i32
    %c0_i32_0 = arith.constant 0 : i32
    return %arg0, %c0_i32 : i32, i32
  }
}

</mosaic_0001>

<bundles_post_ra>
// kernel: tpu_custom_call.1
= control target key start
LH: loop header
LB: loop body
LE: loop exit
PB: predicated region body
PF: predicated region fallthrough
CT: control target
= control target key end

     0   :  { %s9472_s26 = smov 0   ;;  %s14862_s0 = inlined_call_operand.vmem [shape: f32[16,16,8], index: 0, kind: input, shape index: {}]   ;;  %s14863_s1 = inlined_call_operand.vmem [shape: f32[8,32], index: 1, kind: input, shape index: {}]   ;;  %s14864_s2 = inlined_call_operand.vmem [shape: f32[1,32], index: 2, kind: input, shape index: {}]   ;;  %s14865_s3 = inlined_call_operand.vmem [shape: f32[5,2,160,32], index: 3, kind: input, shape index: {}]   ;;  %s14866_s4 = inlined_call_operand.vmem [shape: f32[5,2,1,32], index: 4, kind: input, shape index: {}]   ;;  %s14867_s5 = inlined_call_operand.vmem [shape: f32[16,32], index: 5, kind: input, shape index: {}]   ;;  %s14868_s6 = inlined_call_operand.<no memory space> [shape: f32[1,1], index: 6, kind: input, shape index: {}]   ;;  %s14869_s7 = inlined_call_operand.vmem [shape: f32[16,1], index: 7, kind: output, shape index: {}]  }
   0x1   :  { %12 = sst [smem:[#allocation2]] %s14868_s6 }
   0x2 LB: > { %s9478_s27 = sadd.s32 4294967295, %s9423_s26   ;;  %p7628_p0 = scmp.ge.s32.totalorder %s9423_s26, 1  ;;  %s9423_s26 = sphi %s9472_s26, %s18_s26  }
   0x3   : > { %p240_p1 = scmp.lt.s32.totalorder %s9423_s26, 3 }
   0x5   : > { %p241_p2 = pnand %p7628_p0, %p240_p1 }
   0x7   : > { %244 = sbr.rel (%p241_p2) target bundleno = 4099 (0x1003), region = 48 }
   0xe   : > { %v322_v0 = vld [vmem:[%s14863_s1] sm:$0xff]  ;;  %s7629_s6 = sshll.u32 %s9478_s27, 3  ;;  %vm330_vm0 = vcmask 64512   ;;  %v541_v18 = vld [vmem:[%s14865_s3 + $0x8] sm:$0xff]  ;;  %v542_v19 = vld [vmem:[%s14865_s3 + $0x10] sm:$0xff]  ;;  %v14871_v20 = vmov 0.0|0.0   ;;  %v14870_v42 = vlaneseq }
   0xf   : > { %8029 = vmatprep.subr.mxu0 %v322_v0  ;;  %p273_p3 = scmp.lt.s32.totalorder %s7629_s6, 15  ;;  %v540_v17 = vld [vmem:[%s14865_s3] sm:$0xff]  ;;  %8055 = vmatprep.subr.bf16.mxu1 %v14871_v20  ;;  %v543_v22 = vld [vmem:[%s14865_s3 + $0x18] sm:$0xff]  ;;  %v545_v25 = vld [vmem:[%s14865_s3 + $0x28] sm:$0xff]  ;;  %vm949_vm4 = vcmask 261120   ;;  %s9426_s9 = smov 96  }
  0x10   : > { %8030 = vmatpush3.msra.mxu0 %v322_v0  ;;  %v8056_v21 = vpack.c.bf16 %v541_v18, %v540_v17  ;;  %v8059_v23 = vpack.c.bf16 %v543_v22, %v542_v19  ;;  %v544_v24 = vld [vmem:[%s14865_s3 + $0x20] sm:$0xff]  ;;  %v546_v27 = vld [vmem:[%s14865_s3 + $0x30] sm:$0xff]  ;;  %v547_v28 = vld [vmem:[%s14865_s3 + $0x38] sm:$0xff]  ;;  %v9582_v43 = vshrl.u32 %v14870_v42, 7  ;;  %s9428_s11 = smov 64   ;;  %vm966_vm9 = vcmask 523264  }
  0x11   : > { %s14921_s6 = smov (!%p273_p3, %s7629_s6), 15  ;;  %8085 = vmatprep.subr.bf16.mxu0 %v14871_v20  ;;  %v8062_v26 = vpack.c.bf16 %v545_v25, %v544_v24  ;;  %v8065_v29 = vpack.c.bf16 %v547_v28, %v546_v27  ;;  %v548_v30 = vld [vmem:[%s14865_s3 + $0x40] sm:$0xff]  ;;  %v549_v31 = vld [vmem:[%s14865_s3 + $0x48] sm:$0xff]  ;;  %v550_v33 = vld [vmem:[%s14865_s3 + $0x50] sm:$0xff]  ;;  %vm983_vm10 = vcmask 785408   ;;  %vm7482_vm12 = vcmask 130112  }
  0x12   : > { %s8011_s30 = sshll.u32 %s14921_s6, 4  ;;  %8057 = vmatpush1.bf16.msra.mxu1 %v8056_v21  ;;  %v8068_v32 = vpack.c.bf16 %v549_v31, %v548_v30  ;;  %v551_v34 = vld [vmem:[%s14865_s3 + $0x58] sm:$0xff]  ;;  %v552_v36 = vld [vmem:[%s14865_s3 + $0x60] sm:$0xff]  ;;  %v553_v37 = vld [vmem:[%s14865_s3 + $0x68] sm:$0xff]  ;;  %v9596_v49 = vadd.s32 8, %v9582_v43  ;;  %vm724_vm1 = vcmp.lt.s32.totalorder %v9582_v43, 6 }
  0x13   : > { %s9489_s10 = scalar_lea.vmem %s14862_s0, %s8011_s30  ;;  %8058 = vmatprep.subr.bf16.mxu1 %v14871_v20  ;;  %v8071_v35 = vpack.c.bf16 %v551_v34, %v550_v33  ;;  %v8074_v38 = vpack.c.bf16 %v553_v37, %v552_v36  ;;  %v554_v39 = vld [vmem:[%s14865_s3 + $0x70] sm:$0xff]  ;;  %v555_v40 = vld [vmem:[%s14865_s3 + $0x78] sm:$0xff]  ;;  %v9587_v44 = vld [vmem:[%s14864_s2] ss:$0 sm:$0xff]  ;;  %vm675_vm2 = vcmp.lt.s32.totalorder %v9582_v43, 7  ;;  %vm626_vm3 = vcmp.lt.s32.totalorder %v9582_v43, 1 }
  0x14   : > { %v306_v1 = vld [vmem:[%s9489_s10] sm:$0xff]  ;;  %v307_v2 = vld [vmem:[%s9489_s10 + $0x8] sm:$0xff]  ;;  %v308_v3 = vld [vmem:[%s9489_s10 + $0x10] sm:$0xff]  ;;  %v8077_v41 = vpack.c.bf16 %v555_v40, %v554_v39  ;;  %vm299_vm5 = vcmp.lt.s32.totalorder %v9596_v49, 15  ;;  %vm292_vm6 = vcmp.ge.s32.totalorder %v9582_v43, 1  ;;  %vm577_vm7 = vcmp.lt.s32.totalorder %v9582_v43, 2 }
  0x15   : > { %8031 = vmatprep.mubr.msk.f32.mxu0 %vm330_vm0, %v306_v1  ;;  %v309_v4 = vld [vmem:[%s9489_s10 + $0x18] sm:$0xff]  ;;  %v310_v5 = vld [vmem:[%s9489_s10 + $0x20] sm:$0xff]  ;;  %v311_v6 = vld [vmem:[%s9489_s10 + $0x28] sm:$0xff]  ;;  %vm286_vm8 = vcmp.ge.s32.totalorder %v9582_v43, 2  ;;  %vm303_vm11 = vcmp.lt.s32.totalorder %v9596_v49, 14  ;;  %vm7547_vm13 = vcmask 1041409  }
  0x16   : > { %8032 = vmatmul.mubr.msk.f32.vlgmr.msra.gmra.mrb[0].mxu0 %vm330_vm0, %v307_v2  ;;  %v312_v7 = vld [vmem:[%s9489_s10 + $0x30] sm:$0xff]  ;;  %v313_v8 = vld [vmem:[%s9489_s10 + $0x38] sm:$0xff]  ;;  %v314_v9 = vld [vmem:[%s9489_s10 + $0x40] sm:$0xff]  ;;  %8060 = vmatpush1.bf16.msra.mxu1 %v8059_v23  ;;  %vm7549_vm14 = vcmask 1042434   ;;  %vm7551_vm15 = vcmask 1043459   ;;  %p279_p4 = scmp.lt.s32.totalorder %s9478_s27, 1 }
  0x17   : > { %8034 = vmatprep.mubr.msk.f32.mxu0 %vm330_vm0, %v308_v3  ;;  %v315_v10 = vld [vmem:[%s9489_s10 + $0x48] sm:$0xff]  ;;  %v316_v11 = vld [vmem:[%s9489_s10 + $0x50] sm:$0xff]  ;;  %v317_v12 = vld [vmem:[%s9489_s10 + $0x58] sm:$0xff]  ;;  %8061 = vmatprep.subr.bf16.mxu1 %v14871_v20  ;;  %s7566_s13 = sld [smem:[#allocation2]] }
  0x18   : > { %v318_v13 = vld [vmem:[%s9489_s10 + $0x60] sm:$0xff]  ;;  %v319_v14 = vld [vmem:[%s9489_s10 + $0x68] sm:$0xff]  ;;  %v320_v15 = vld [vmem:[%s9489_s10 + $0x70] sm:$0xff]  ;;  %s14923_s27 = smov (!%p279_p4, %s9478_s27), 1 }
  0x19   : > { %v321_v16 = vld [vmem:[%s9489_s10 + $0x78] sm:$0xff]  ;;  %v556_v45 = vld [vmem:[%s14865_s3 + $0x80] sm:$0xff]  ;;  %v557_v46 = vld [vmem:[%s14865_s3 + $0x88] sm:$0xff]  ;;  %s9427_s10 = smov 32   ;;  %s7632_s14 = sshll.u32 %s14923_s27, 3 }
  0x1a   : > { %8035 = vmatmul.mubr.msk.f32.gmra.mrb[2].mxu0 %vm330_vm0, %v309_v4  ;;  %8063 = vmatpush1.bf16.msra.mxu1 %v8062_v26  ;;  %v8080_v47 = vpack.c.bf16 %v557_v46, %v556_v45  ;;  %v558_v53 = vld [vmem:[%s14865_s3 + $0x90] sm:$0xff]  ;;  %v559_v54 = vld [vmem:[%s14865_s3 + $0x98] sm:$0xff]  ;;  %v14772_v49 = vld [vmem:[%s14867_s5] sm:$0xff]  ;;  %s282_s17 = scalar_lea.vmem %s14869_s7, %s7632_s14 }
  0x1b   : > { %8037 = vmatprep.mubr.msk.f32.mxu0 %vm330_vm0, %v310_v5  ;;  %8064 = vmatprep.subr.bf16.mxu1 %v14871_v20  ;;  %v8083_v56 = vpack.c.bf16 %v559_v54, %v558_v53 }
  0x1e   : > { %8038 = vmatmul.mubr.msk.f32.gmra.mrb[4].mxu0 %vm330_vm0, %v311_v6  ;;  %8066 = vmatpush1.bf16.msra.mxu1 %v8065_v29 }
  0x1f   : > { %8040 = vmatprep.mubr.msk.f32.mxu0 %vm330_vm0, %v312_v7  ;;  %8067 = vmatprep.subr.bf16.mxu1 %v14871_v20 }
  0x22   : > { %8041 = vmatmul.mubr.msk.f32.gmra.mrb[6].mxu0 %vm330_vm0, %v313_v8  ;;  %8069 = vmatpush1.bf16.msra.mxu1 %v8068_v32 }
  0x23   : > { %8043 = vmatprep.mubr.msk.f32.mxu0 %vm330_vm0, %v314_v9  ;;  %8070 = vmatprep.subr.bf16.mxu1 %v14871_v20 }
  0x26   : > { %8044 = vmatmul.mubr.msk.f32.gmra.mrb[8].mxu0 %vm330_vm0, %v315_v10  ;;  %8072 = vmatpush1.bf16.msra.mxu1 %v8071_v35 }
  0x27   : > { %8046 = vmatprep.mubr.msk.f32.mxu0 %vm330_vm0, %v316_v11  ;;  %8073 = vmatprep.subr.bf16.mxu1 %v14871_v20 }
  0x2a   : > { %8047 = vmatmul.mubr.msk.f32.gmra.mrb[10].mxu0 %vm330_vm0, %v317_v12  ;;  %8075 = vmatpush1.bf16.msra.mxu1 %v8074_v38 }
  0x2b   : > { %8049 = vmatprep.mubr.msk.f32.mxu0 %vm330_vm0, %v318_v13  ;;  %8076 = vmatprep.subr.bf16.mxu1 %v14871_v20 }
  0x2e   : > { %8050 = vmatmul.mubr.msk.f32.gmra.mrb[12].mxu0 %vm330_vm0, %v319_v14  ;;  %8078 = vmatpush1.bf16.msra.mxu1 %v8077_v41 }
  0x2f   : > { %8052 = vmatprep.mubr.msk.f32.mxu0 %vm330_vm0, %v320_v15  ;;  %8079 = vmatprep.subr.bf16.mxu1 %v14871_v20 }
  0x32   : > { %8053 = vmatmul.mubr.msk.f32.gmra.mrb[14].mxu0 %vm330_vm0, %v321_v16  ;;  %8081 = vmatpush1.bf16.msra.mxu1 %v8080_v47  ;;  %vm7553_vm0 = vcmask 1044484  }
  0x33   : > { %8082 = vmatprep.subr.bf16.mxu1 %v14871_v20 }
  0x36   : > { %8084 = vmatpush1.bf16.msra.mxu1 %v8083_v56 }
  0x37   : > { %8115 = vmatprep.subr.bf16.mxu1 %v14871_v20 }
  0xe9   : > { %v8033_v48 = vpop.f32.mrb[0].mxu0 }
  0xea   : > { %v9599_v50 = vadd.f32 %v8033_v48, %v9587_v44  ;;  %v445_v51 = vpop.f32.mrb[1].mxu0 }
  0xeb   : > { %v9602_v52 = vadd.f32 %v9587_v44, %v445_v51 }
  0xec   : > { %v9613_v55 = vmax.f32 %v9599_v50, 0.0 }
  0xed   : > { %v9618_v57 = vmax.f32 %v9602_v52, 0.0  ;;  %v8036_v58 = vpop.f32.mrb[2].mxu0 }
  0xee   : > { %v9623_v59 = vadd.f32 %v8036_v58, %v9587_v44  ;;  %v455_v60 = vpop.f32.mrb[3].mxu0  ;;  %v716_v61 = vrot.slane %v9613_v55, 2  ;;  %v667_v62 = vrot.slane %v9613_v55, 1  ;;  %v618_v63 = vrot.slane %v9613_v55, 7 }
  0xef   : > { %v9629_v0 = vadd.f32 %v9587_v44, %v455_v60  ;;  %v708_v1 = vrot.slane %v9618_v57, 2  ;;  %v659_v2 = vrot.slane %v9618_v57, 1  ;;  %v610_v3 = vrot.slane %v9618_v57, 7 }
  0xf0   : > { %v9636_v4 = vmax.f32 %v9623_v59, 0.0  ;;  %v561_v5 = vrot.slane %v9618_v57, 6  ;;  %v569_v6 = vrot.slane %v9613_v55, 6  ;;  %v8372_v41 = vpack.i.bf16 %v9613_v55, %v9618_v57 }
  0xf1   : > { %v9642_v7 = vmax.f32 %v9629_v0, 0.0  ;;  %v725_v8 = vsel %vm724_vm1, %v708_v1, %v716_v61  ;;  %v8039_v9 = vpop.f32.mrb[4].mxu0  ;;  %v676_v10 = vsel %vm675_vm2, %v659_v2, %v667_v62  ;;  %v684_v11 = vsel %vm675_vm2, %v667_v62, %v659_v2 }
  0xf2   : > { %7651 = vmatprep.mubr.msk.f32.mxu1 %vm949_vm4, %v725_v8  ;;  %v9656_v12 = vadd.f32 %v8039_v9, %v9587_v44  ;;  %v693_v13 = vsel %vm299_vm5, %v684_v11, 0.0  ;;  %v627_v14 = vsel %vm626_vm3, %v610_v3, %v618_v63  ;;  %v635_v15 = vsel %vm626_vm3, %v618_v63, %v610_v3  ;;  %v465_v16 = vpop.f32.mrb[5].mxu0 }
  0xf3   : > { %v8377_v17 = vpack.i.bf16 %v693_v13, %v676_v10  ;;  %v643_v18 = vsel %vm292_vm6, %v635_v15, 0.0  ;;  %v9667_v19 = vadd.f32 %v9587_v44, %v465_v16  ;;  %v611_v21 = vrot.slane %v9642_v7, 7 }
  0xf4   : > { %v9671_v22 = vmax.f32 %v9656_v12, 0.0  ;;  %v8367_v23 = vpack.i.bf16 %v627_v14, %v643_v18  ;;  %v619_v24 = vrot.slane %v9636_v4, 7  ;;  %v660_v25 = vrot.slane %v9642_v7, 1 }
  0xf5   : > { %8378 = vrot.lane.b32.xlu1 %v8377_v17, %s9426_s9  ;;  %v9677_v26 = vmax.f32 %v9667_v19, 0.0  ;;  %v8042_v27 = vpop.f32.mrb[6].mxu0  ;;  %v668_v28 = vrot.slane %v9636_v4, 1  ;;  %v9686_v29 = vsel %vm577_vm7, %v569_v6, %v561_v5  ;;  %v8382_v47 = vpack.i.bf16 %v9636_v4, %v9642_v7 }
  0xf6   : > { %8368 = vrot.lane.b32.xlu0 %v8367_v23, %s9427_s10  ;;  %v9690_v30 = vadd.f32 %v8042_v27, %v9587_v44  ;;  %v628_v31 = vsel %vm626_vm3, %v611_v21, %v619_v24  ;;  %v636_v32 = vsel %vm626_vm3, %v619_v24, %v611_v21  ;;  %v475_v33 = vpop.f32.mrb[7].mxu0  ;;  %v620_v34 = vrot.slane %v9671_v22, 7 }
  0xf7   : > { %v645_v35 = vsel %vm292_vm6, %v636_v32, 0.0  ;;  %v9700_v36 = vadd.f32 %v9587_v44, %v475_v33  ;;  %v677_v37 = vsel %vm675_vm2, %v660_v25, %v668_v28  ;;  %v685_v38 = vsel %vm675_vm2, %v668_v28, %v660_v25 }
  0xf8   : > { %v9707_v39 = vmax.f32 %v9690_v30, 0.0  ;;  %v8387_v40 = vpack.i.bf16 %v628_v31, %v645_v35  ;;  %v695_v45 = vsel %vm299_vm5, %v685_v38, 0.0  ;;  %v612_v51 = vrot.slane %v9677_v26, 7 }
  0xf9   : > { %v9714_v46 = vmax.f32 %v9700_v36, 0.0  ;;  %v8045_v48 = vpop.f32.mrb[8].mxu0  ;;  %v661_v53 = vrot.slane %v9677_v26, 1  ;;  %v8392_v54 = vpack.i.bf16 %v695_v45, %v677_v37  ;;  %v669_v62 = vrot.slane %v9671_v22, 1 }
  0xfa   : > { %8388 = vrot.lane.b32.xlu1 %v8387_v40, %s9427_s10  ;;  %8373 = vrot.lane.b32.xlu0 %v8372_v41, %s9428_s11  ;;  %v9723_v56 = vadd.f32 %v8045_v48, %v9587_v44  ;;  %v485_v58 = vpop.f32.mrb[9].mxu0  ;;  %v621_v60 = vrot.slane %v9707_v39, 7  ;;  %v629_v63 = vsel %vm626_vm3, %v612_v51, %v620_v34  ;;  %v637_v2 = vsel %vm626_vm3, %v620_v34, %v612_v51 }
  0xfb   : > { %v9732_v3 = vadd.f32 %v9587_v44, %v485_v58  ;;  %v613_v8 = vrot.slane %v9714_v46, 7  ;;  %v8397_v9 = vpack.i.bf16 %v9671_v22, %v9677_v26  ;;  %v647_v10 = vsel %vm292_vm6, %v637_v2, 0.0 }
  0xfc   : > { %v686_v11 = vsel %vm675_vm2, %v669_v62, %v661_v53  ;;  %v670_v13 = vrot.slane %v9707_v39, 1  ;;  %v9743_v14 = vmax.f32 %v9723_v56, 0.0  ;;  %v8402_v15 = vpack.i.bf16 %v629_v63, %v647_v10 }
  0xfd   : > { %v9746_v16 = vmax.f32 %v9732_v3, 0.0  ;;  %v8048_v17 = vpop.f32.mrb[10].mxu0  ;;  %v638_v18 = vsel %vm626_vm3, %v621_v60, %v613_v8  ;;  %v630_v23 = vsel %vm626_vm3, %v613_v8, %v621_v60  ;;  %v662_v27 = vrot.slane %v9714_v46, 1 }
  0xfe   : > { %8393 = vrot.lane.b32.xlu1 %v8392_v54, %s9426_s9  ;;  %8383 = vrot.lane.b32.xlu0 %v8382_v47, %s9428_s11  ;;  %v9753_v21 = vadd.f32 %v8048_v17, %v9587_v44  ;;  %v649_v24 = vsel %vm292_vm6, %v638_v18, 0.0  ;;  %v495_v25 = vpop.f32.mrb[11].mxu0  ;;  %v678_v28 = vsel %vm675_vm2, %v661_v53, %v669_v62  ;;  %v697_v31 = vsel %vm299_vm5, %v686_v11, 0.0 }
  0xff   : > { %v9765_v32 = vadd.f32 %v9587_v44, %v495_v25  ;;  %v687_v34 = vsel %vm675_vm2, %v670_v13, %v662_v27  ;;  %v8417_v35 = vpack.i.bf16 %v630_v23, %v649_v24  ;;  %v614_v40 = vrot.slane %v9746_v16, 7 }
 0x100   : > { %v9768_v33 = vmax.f32 %v9753_v21, 0.0  ;;  %v622_v41 = vrot.slane %v9743_v14, 7  ;;  %v8407_v45 = vpack.i.bf16 %v697_v31, %v678_v28  ;;  %v679_v47 = vsel %vm675_vm2, %v662_v27, %v670_v13 }
 0x101   : > { %v9773_v37 = vmax.f32 %v9765_v32, 0.0  ;;  %v8051_v38 = vpop.f32.mrb[12].mxu0  ;;  %v699_v53 = vsel %vm299_vm5, %v687_v34, 0.0  ;;  %v663_v63 = vrot.slane %v9746_v16, 1  ;;  %v671_v2 = vrot.slane %v9743_v14, 1 }
 0x102   : > { %8398 = vrot.lane.b32.xlu1 %v8397_v9, %s9428_s11  ;;  %8403 = vrot.lane.b32.xlu0 %v8402_v15, %s9427_s10  ;;  %v9782_v48 = vadd.f32 %v8051_v38, %v9587_v44  ;;  %v505_v51 = vpop.f32.mrb[13].mxu0  ;;  %v623_v60 = vrot.slane %v9768_v33, 7  ;;  %v639_v62 = vsel %vm626_vm3, %v622_v41, %v614_v40  ;;  %v8412_v8 = vpack.i.bf16 %v9707_v39, %v9714_v46 }
 0x103   : > { %v9787_v54 = vadd.f32 %v9587_v44, %v505_v51  ;;  %v615_v58 = vrot.slane %v9773_v37, 7  ;;  %v664_v11 = vrot.slane %v9773_v37, 1  ;;  %v8422_v13 = vpack.i.bf16 %v699_v53, %v679_v47 }
 0x104   : > { %14888 = vst [vmem:[#allocation3_spill] sm:$0xff] %v9782_v48  ;;  %v9804_v15 = vmax.f32 %v9782_v48, 0.0  ;;  %v631_v17 = vsel %vm626_vm3, %v614_v40, %v622_v41  ;;  %v651_v24 = vsel %vm292_vm6, %v639_v62, 0.0  ;;  %v672_v28 = vrot.slane %v9768_v33, 1 }
 0x105   : > { %v9798_v9 = vmax.f32 %v9787_v54, 0.0  ;;  %v8054_v10 = vpop.f32.mrb[14].mxu0  ;;  %v640_v25 = vsel %vm626_vm3, %v623_v60, %v615_v58  ;;  %v8427_v31 = vpack.i.bf16 %v9743_v14, %v9746_v16  ;;  %v688_v34 = vsel %vm675_vm2, %v671_v2, %v663_v63 }
 0x106   : > { %8418 = vrot.lane.b32.xlu1 %v8417_v35, %s9427_s10  ;;  %8408 = vrot.lane.b32.xlu0 %v8407_v45, %s9426_s9  ;;  %v9809_v18 = vadd.f32 %v8054_v10, %v9587_v44  ;;  %v515_v23 = vpop.f32.mrb[15].mxu0  ;;  %v689_v40 = vsel %vm675_vm2, %v672_v28, %v664_v11  ;;  %v8432_v41 = vpack.i.bf16 %v631_v17, %v651_v24  ;;  %v653_v47 = vsel %vm292_vm6, %v640_v25, 0.0 }
 0x107   : > { %v9816_v27 = vadd.f32 %v9587_v44, %v515_v23  ;;  %v616_v44 = vrot.slane %v9798_v9, 7  ;;  %v632_v45 = vsel %vm626_vm3, %v615_v58, %v623_v60  ;;  %v624_v51 = vrot.slane %v9804_v15, 7 }
 0x108   : > { %14889 = vst [vmem:[#allocation4_spill] sm:$0xff] %v9809_v18  ;;  %v9824_v35 = vmax.f32 %v9809_v18, 0.0  ;;  %v680_v53 = vsel %vm675_vm2, %v663_v63, %v671_v2  ;;  %v701_v62 = vsel %vm299_vm5, %v688_v34, 0.0  ;;  %v681_v10 = vsel %vm675_vm2, %v664_v11, %v672_v28 }
 0x109   : > { %14890 = vst [vmem:[#allocation5_spill] sm:$0xff] %v9816_v27  ;;  %v9827_v38 = vmax.f32 %v9816_v27, 0.0  ;;  %v641_v58 = vsel %vm626_vm3, %v624_v51, %v616_v44  ;;  %v8437_v63 = vpack.i.bf16 %v701_v62, %v680_v53  ;;  %v8442_v2 = vpack.i.bf16 %v9768_v33, %v9773_v37 }
 0x10a   : > { %8423 = vrot.lane.b32.xlu1 %v8422_v13, %s9426_s9  ;;  %8413 = vrot.lane.b32.xlu0 %v8412_v8, %s9428_s11  ;;  %v703_v8 = vsel %vm299_vm5, %v689_v40, 0.0  ;;  %v8447_v13 = vpack.i.bf16 %v632_v45, %v653_v47  ;;  %v625_v17 = vrot.slane %v9824_v35, 7  ;;  %v8457_v11 = vpack.i.bf16 %v9804_v15, %v9798_v9 }
 0x10b   : > { %v617_v60 = vrot.slane %v9827_v38, 7  ;;  %v8452_v23 = vpack.i.bf16 %v703_v8, %v681_v10  ;;  %v665_v24 = vrot.slane %v9798_v9, 1  ;;  %v673_v25 = vrot.slane %v9804_v15, 1 }
 0x10c   : > { %v666_v28 = vrot.slane %v9827_v38, 1  ;;  %v633_v34 = vsel %vm626_vm3, %v616_v44, %v624_v51  ;;  %v9870_v40 = vsel %vm724_vm1, %v716_v61, %v708_v1  ;;  %v709_v45 = vrot.slane %v9642_v7, 2 }
 0x10d   : > { %v642_v44 = vsel %vm626_vm3, %v625_v17, %v617_v60  ;;  %v717_v61 = vrot.slane %v9636_v4, 2  ;;  %v562_v1 = vrot.slane %v9642_v7, 6  ;;  %v570_v55 = vrot.slane %v9636_v4, 6 }
 0x10e   : > { %8428 = vrot.lane.b32.xlu1 %v8427_v31, %s9428_s11  ;;  %8433 = vrot.lane.b32.xlu0 %v8432_v41, %s9427_s10  ;;  %v655_v31 = vsel %vm292_vm6, %v641_v58, 0.0  ;;  %v9878_v41 = vsel %vm577_vm7, %v561_v5, %v569_v6  ;;  %v710_v57 = vrot.slane %v9677_v26, 2  ;;  %v718_v5 = vrot.slane %v9671_v22, 2 }
 0x10f   : > { %v563_v6 = vrot.slane %v9677_v26, 6  ;;  %v690_v47 = vsel %vm675_vm2, %v673_v25, %v665_v24  ;;  %v9899_v51 = vsel %vm724_vm1, %v709_v45, %v717_v61  ;;  %v9903_v7 = vsel %vm724_vm1, %v717_v61, %v709_v45 }
 0x110   : > { %v571_v53 = vrot.slane %v9671_v22, 6  ;;  %v9908_v4 = vsel %vm577_vm7, %v570_v55, %v562_v1  ;;  %v9912_v26 = vsel %vm577_vm7, %v562_v1, %v570_v55  ;;  %v9916_v62 = vsel %vm724_vm1, %v710_v57, %v718_v5 }
 0x111   : > { %v711_v10 = vrot.slane %v9714_v46, 2  ;;  %v682_v8 = vsel %vm675_vm2, %v665_v24, %v673_v25  ;;  %v705_v24 = vsel %vm299_vm5, %v690_v47, 0.0  ;;  %v719_v25 = vrot.slane %v9707_v39, 2 }
 0x112   : > { %8448 = vrot.lane.b32.xlu1 %v8447_v13, %s9427_s10  ;;  %8438 = vrot.lane.b32.xlu0 %v8437_v63, %s9426_s9  ;;  %v9923_v22 = vsel %vm577_vm7, %v571_v53, %v563_v6  ;;  %v9927_v13 = vsel %vm724_vm1, %v718_v5, %v710_v57  ;;  %v9931_v58 = vsel %vm577_vm7, %v563_v6, %v571_v53  ;;  %v564_v45 = vrot.slane %v9714_v46, 6 }
 0x113   : > { %v8462_v63 = vpack.i.bf16 %v633_v34, %v655_v31  ;;  %v572_v61 = vrot.slane %v9707_v39, 6  ;;  %v712_v1 = vrot.slane %v9746_v16, 2  ;;  %v720_v55 = vrot.slane %v9743_v14, 2 }
 0x114   : > { %v568_v57 = vrot.slane %v9827_v38, 6  ;;  %v576_v34 = vrot.slane %v9824_v35, 6  ;;  %v565_v46 = vrot.slane %v9746_v16, 6  ;;  %v674_v39 = vrot.slane %v9824_v35, 1 }
 0x115   : > { %v9956_v31 = vsel %vm577_vm7, %v572_v61, %v564_v45  ;;  %v9960_v5 = vsel %vm577_vm7, %v564_v45, %v572_v61  ;;  %v9964_v6 = vsel %vm724_vm1, %v712_v1, %v720_v55  ;;  %v8467_v47 = vpack.i.bf16 %v705_v24, %v682_v8 }
 0x116   : > { %8453 = vrot.lane.b32.xlu1 %v8452_v23, %s9426_s9  ;;  %8443 = vrot.lane.b32.xlu0 %v8442_v2, %s9428_s11  ;;  %v9945_v23 = vsel %vm724_vm1, %v711_v10, %v719_v25  ;;  %v9949_v2 = vsel %vm724_vm1, %v719_v25, %v711_v10  ;;  %v9970_v16 = vsel %vm577_vm7, %v576_v34, %v568_v57  ;;  %v573_v53 = vrot.slane %v9743_v14, 6 }
 0x117   : > { %v9975_v10 = vsel %vm724_vm1, %v720_v55, %v712_v1  ;;  %v657_v25 = vsel %vm292_vm6, %v642_v44, 0.0  ;;  %v713_v45 = vrot.slane %v9773_v37, 2  ;;  %v9991_v14 = vsel %vm577_vm7, %v568_v57, %v576_v34 }
 0x118   : > { %v9983_v8 = vsel %vm577_vm7, %v573_v53, %v565_v46  ;;  %v566_v24 = vrot.slane %v9773_v37, 6  ;;  %v574_v61 = vrot.slane %v9768_v33, 6  ;;  %v683_v55 = vsel %vm675_vm2, %v666_v28, %v674_v39 }
 0x119   : > { %v714_v37 = vrot.slane %v9798_v9, 2  ;;  %v722_v57 = vrot.slane %v9804_v15, 2  ;;  %v567_v34 = vrot.slane %v9798_v9, 6  ;;  %v723_v9 = vrot.slane %v9824_v35, 2 }
 0x11a   : > { %8458 = vrot.lane.b32.xlu1 %v8457_v11, %s9428_s11  ;;  %8463 = vrot.lane.b32.xlu0 %v8462_v63, %s9427_s10  ;;  %v721_v11 = vrot.slane %v9768_v33, 2  ;;  %v9987_v63 = vsel %vm577_vm7, %v565_v46, %v573_v53  ;;  %v10014_v33 = vsel %vm577_vm7, %v574_v61, %v566_v24  ;;  %v10018_v46 = vsel %vm577_vm7, %v566_v24, %v574_v61 }
 0x11b   : > { %v715_v53 = vrot.slane %v9827_v38, 2 }
 0x11c   : > { %v9996_v44 = vsel %vm724_vm1, %v713_v45, %v721_v11  ;;  %v10001_v1 = vsel %vm724_vm1, %v721_v11, %v713_v45  ;;  %v10028_v45 = vsel %vm724_vm1, %v722_v57, %v714_v37 }
 0x11d   : > { %v10048_v61 = vsel %vm724_vm1, %v723_v9, %v715_v53 }
 0x11e   : > { %801 = vrot.lane.b32.xlu1 %v657_v25, %s9427_s10  ;;  %8468 = vrot.lane.b32.xlu0 %v8467_v47, %s9426_s9  ;;  %v575_v47 = vrot.slane %v9804_v15, 6  ;;  %v10024_v25 = vsel %vm724_vm1, %v714_v37, %v722_v57  ;;  %v10044_v15 = vsel %vm724_vm1, %v715_v53, %v723_v9  ;;  %v634_v37 = vsel %vm626_vm3, %v617_v60, %v625_v17 }
 0x120   : > { %v10033_v11 = vsel %vm577_vm7, %v575_v47, %v567_v34  ;;  %v10037_v24 = vsel %vm577_vm7, %v567_v34, %v575_v47 }
 0x122   : > { %865 = vrot.lane.b32.xlu0 %v9827_v38, %s9428_s11  ;;  %929 = vrot.lane.b32.xlu1 %v683_v55, %s9426_s9  ;;  %v691_v55 = vsel %vm675_vm2, %v674_v39, %v666_v28 }
 0x123   : > { %v707_v57 = vsel %vm299_vm5, %v691_v55, 0.0 }
 0x126   : > { %803 = vrot.lane.b32.xlu0 %v634_v37, %s9427_s10  ;;  %867 = vrot.lane.b32.xlu1 %v9824_v35, %s9428_s11  ;;  %v594_v35 = vsel %vm286_vm8, %v9686_v29, 0.0  ;;  %v742_v29 = vsel %vm303_vm11, %v9870_v40, 0.0 }
 0x12a   : > { %931 = vrot.lane.b32.xlu0 %v707_v57, %s9426_s9 }
 0x167   : > { %v8379_v34 = vpop.permute.xlu1 %8378 }
 0x168   : > { %v8369_v47 = vpop.permute.xlu0 %8368  ;;  %v8380_v9 = vunpack.i.l.bf16 %v8379_v34 }
 0x169   : > { %v8370_v53 = vunpack.i.l.bf16 %v8369_v47  ;;  %v8371_v60 = vunpack.i.h.bf16 %v8369_v47 }
 0x16b   : > { %v950_v37 = vsel %vm949_vm4, %v594_v35, %v8370_v53  ;;  %v8381_v35 = vunpack.i.h.bf16 %v8379_v34 }
 0x16c   : > { %v8389_v38 = vpop.permute.xlu1 %8388  ;;  %v8374_v17 = vpop.permute.xlu0 %8373 }
 0x16d   : > { %v8376_v28 = vunpack.i.h.bf16 %v8374_v17  ;;  %v8375_v39 = vunpack.i.l.bf16 %v8374_v17  ;;  %v8390_v57 = vunpack.i.l.bf16 %v8389_v38  ;;  %v951_v17 = vsel %vm949_vm4, %v9878_v41, %v8371_v60 }
 0x16f   : > { %v967_v55 = vsel %vm966_vm9, %v950_v37, %v8375_v39  ;;  %v968_v53 = vsel %vm966_vm9, %v951_v17, %v8376_v28  ;;  %v596_v39 = vsel %vm286_vm8, %v9908_v4, 0.0  ;;  %v8391_v37 = vunpack.i.h.bf16 %v8389_v38 }
 0x170   : > { %v8394_v42 = vpop.permute.xlu1 %8393  ;;  %v8384_v47 = vpop.permute.xlu0 %8383  ;;  %v984_v20 = vsel %vm983_vm10, %v967_v55, %v8380_v9  ;;  %v985_v41 = vsel %vm983_vm10, %v968_v53, %v8381_v35 }
 0x171   : > { %v8385_v18 = vunpack.i.l.bf16 %v8384_v47  ;;  %1119 = vmatmul.mubr.f32.vlgmr.msra.gmra.mrb[0].mxu1 %v984_v20  ;;  %v8395_v9 = vunpack.i.l.bf16 %v8394_v42  ;;  %v952_v20 = vsel %vm949_vm4, %v596_v39, %v8390_v57  ;;  %v8386_v60 = vunpack.i.h.bf16 %v8384_v47 }
 0x172   : > { %7652 = vmatprep.mubr.msk.f32.mxu1 %vm949_vm4, %v742_v29  ;;  %v8396_v34 = vunpack.i.h.bf16 %v8394_v42  ;;  %v953_v38 = vsel %vm949_vm4, %v9912_v26, %v8391_v37  ;;  %v744_v57 = vsel %vm303_vm11, %v9903_v7, 0.0  ;;  %v598_v42 = vsel %vm286_vm8, %v9923_v22, 0.0 }
 0x173   : > { %v969_v40 = vsel %vm966_vm9, %v952_v20, %v8385_v18  ;;  %v970_v47 = vsel %vm966_vm9, %v953_v38, %v8386_v60 }
 0x174   : > { %v8399_v55 = vpop.permute.xlu1 %8398  ;;  %v8404_v27 = vpop.permute.xlu0 %8403  ;;  %v986_v4 = vsel %vm983_vm10, %v969_v40, %v8395_v9  ;;  %v987_v39 = vsel %vm983_vm10, %v970_v47, %v8396_v34  ;;  %v746_v34 = vsel %vm303_vm11, %v9927_v13, 0.0 }
 0x175   : > { %1124 = vmatmul.mubr.f32.gmra.mrb[2].mxu1 %v985_v41  ;;  %v8405_v28 = vunpack.i.l.bf16 %v8404_v27  ;;  %v8400_v18 = vunpack.i.l.bf16 %v8399_v55  ;;  %v8401_v7 = vunpack.i.h.bf16 %v8399_v55  ;;  %v600_v55 = vsel %vm286_vm8, %v9956_v31, 0.0 }
 0x176   : > { %7653 = vmatprep.mubr.msk.f32.mxu1 %vm949_vm4, %v9899_v51  ;;  %v8406_v51 = vunpack.i.h.bf16 %v8404_v27 }
 0x177   : > { %v954_v26 = vsel %vm949_vm4, %v598_v42, %v8405_v28 }
 0x178   : > { %v8419_v17 = vpop.permute.xlu1 %8418  ;;  %v8409_v29 = vpop.permute.xlu0 %8408  ;;  %v971_v9 = vsel %vm966_vm9, %v954_v26, %v8400_v18  ;;  %v955_v27 = vsel %vm949_vm4, %v9931_v58, %v8406_v51 }
 0x179   : > { %1129 = vmatmul.mubr.f32.gmra.mrb[4].mxu1 %v986_v4  ;;  %v8410_v53 = vunpack.i.l.bf16 %v8409_v29  ;;  %v8420_v41 = vunpack.i.l.bf16 %v8419_v17  ;;  %v8411_v20 = vunpack.i.h.bf16 %v8409_v29  ;;  %v8421_v28 = vunpack.i.h.bf16 %v8419_v17 }
 0x17a   : > { %7654 = vmatprep.mubr.msk.f32.mxu1 %vm949_vm4, %v744_v57  ;;  %v748_v17 = vsel %vm303_vm11, %v9949_v2, 0.0 }
 0x17b   : > { %v988_v22 = vsel %vm983_vm10, %v971_v9, %v8410_v53  ;;  %v956_v58 = vsel %vm949_vm4, %v600_v55, %v8420_v41  ;;  %v957_v31 = vsel %vm949_vm4, %v9960_v5, %v8421_v28  ;;  %v604_v55 = vsel %vm286_vm8, %v10014_v33, 0.0 }
 0x17c   : > { %v8414_v35 = vpop.permute.xlu0 %8413  ;;  %v8424_v37 = vpop.permute.xlu1 %8423 }
 0x17d   : > { %1134 = vmatmul.mubr.f32.gmra.mrb[6].mxu1 %v987_v39  ;;  %v8415_v40 = vunpack.i.l.bf16 %v8414_v35  ;;  %v8425_v29 = vunpack.i.l.bf16 %v8424_v37  ;;  %v8416_v57 = vunpack.i.h.bf16 %v8414_v35  ;;  %v8426_v18 = vunpack.i.h.bf16 %v8424_v37 }
 0x17e   : > { %7655 = vmatprep.mubr.msk.f32.mxu1 %vm949_vm4, %v9916_v62  ;;  %v972_v62 = vsel %vm966_vm9, %v955_v27, %v8401_v7 }
 0x17f   : > { %v989_v38 = vsel %vm983_vm10, %v972_v62, %v8411_v20  ;;  %v973_v13 = vsel %vm966_vm9, %v956_v58, %v8415_v40  ;;  %v974_v53 = vsel %vm966_vm9, %v957_v31, %v8416_v57  ;;  %v750_v62 = vsel %vm303_vm11, %v9975_v10, 0.0 }
 0x180   : > { %v8434_v60 = vpop.permute.xlu0 %8433  ;;  %v8429_v4 = vpop.permute.xlu1 %8428  ;;  %v990_v51 = vsel %vm983_vm10, %v973_v13, %v8425_v29  ;;  %v991_v5 = vsel %vm983_vm10, %v974_v53, %v8426_v18 }
 0x181   : > { %1139 = vmatmul.mubr.f32.gmra.mrb[8].mxu1 %v988_v22  ;;  %v8435_v42 = vunpack.i.l.bf16 %v8434_v60  ;;  %v8430_v39 = vunpack.i.l.bf16 %v8429_v4  ;;  %v8436_v37 = vunpack.i.h.bf16 %v8434_v60  ;;  %v8431_v2 = vunpack.i.h.bf16 %v8429_v4 }
 0x182   : > { %7656 = vmatprep.mubr.msk.f32.mxu1 %vm949_vm4, %v746_v34 }
 0x184   : > { %v8439_v47 = vpop.permute.xlu0 %8438  ;;  %v8449_v35 = vpop.permute.xlu1 %8448 }
 0x185   : > { %1144 = vmatmul.mubr.f32.gmra.mrb[10].mxu1 %v989_v38  ;;  %v8440_v7 = vunpack.i.l.bf16 %v8439_v47  ;;  %v8450_v20 = vunpack.i.l.bf16 %v8449_v35  ;;  %v8441_v22 = vunpack.i.h.bf16 %v8439_v47  ;;  %v8451_v28 = vunpack.i.h.bf16 %v8449_v35 }
 0x186   : > { %7657 = vmatprep.mubr.msk.f32.mxu1 %vm949_vm4, %v9945_v23  ;;  %v602_v23 = vsel %vm286_vm8, %v9983_v8, 0.0  ;;  %v959_v8 = vsel %vm949_vm4, %v9987_v63, %v8436_v37 }
 0x187   : > { %v958_v9 = vsel %vm949_vm4, %v602_v23, %v8435_v42  ;;  %v960_v63 = vsel %vm949_vm4, %v604_v55, %v8450_v20  ;;  %v961_v33 = vsel %vm949_vm4, %v10018_v46, %v8451_v28  ;;  %v752_v42 = vsel %vm303_vm11, %v10001_v1, 0.0 }
 0x188   : > { %v8444_v26 = vpop.permute.xlu0 %8443  ;;  %v975_v41 = vsel %vm966_vm9, %v958_v9, %v8430_v39  ;;  %v8454_v27 = vpop.permute.xlu1 %8453  ;;  %v14891_v28 = vmov 0.0|0.0  }
 0x189   : > { %1149 = vmatmul.mubr.f32.gmra.mrb[12].mxu1 %v990_v51  ;;  %v992_v40 = vsel %vm983_vm10, %v975_v41, %v8440_v7  ;;  %v8445_v60 = vunpack.i.l.bf16 %v8444_v26  ;;  %v8455_v29 = vunpack.i.l.bf16 %v8454_v27  ;;  %v8446_v38 = vunpack.i.h.bf16 %v8444_v26 }
 0x18a   : > { %7658 = vmatprep.mubr.msk.f32.mxu1 %vm949_vm4, %v748_v17  ;;  %v8456_v47 = vunpack.i.h.bf16 %v8454_v27 }
 0x18b   : > { %v977_v58 = vsel %vm966_vm9, %v960_v63, %v8445_v60  ;;  %v978_v51 = vsel %vm966_vm9, %v961_v33, %v8446_v38  ;;  %v7673_v38 = vld [vmem:[%s14865_s3 + $0xd0] sm:$0xff]  ;;  %v7678_v33 = vld [vmem:[%s14865_s3 + $0xf8] sm:$0xff] }
 0x18c   : > { %v8464_v34 = vpop.permute.xlu0 %8463  ;;  %v8459_v57 = vpop.permute.xlu1 %8458  ;;  %v994_v18 = vsel %vm983_vm10, %v977_v58, %v8455_v29  ;;  %v995_v39 = vsel %vm983_vm10, %v978_v51, %v8456_v47  ;;  %v7671_v29 = vld [vmem:[%s14865_s3 + $0xc0] sm:$0xff]  ;;  %v7674_v58 = vld [vmem:[%s14865_s3 + $0xd8] sm:$0xff]  ;;  %v7676_v47 = vld [vmem:[%s14865_s3 + $0xe8] sm:$0xff] }
 0x18d   : > { %1154 = vmatmul.mubr.f32.gmra.mrb[14].mxu1 %v991_v5  ;;  %v8465_v13 = vunpack.i.l.bf16 %v8464_v34  ;;  %v8460_v31 = vunpack.i.l.bf16 %v8459_v57  ;;  %v8466_v17 = vunpack.i.h.bf16 %v8464_v34  ;;  %v8461_v1 = vunpack.i.h.bf16 %v8459_v57  ;;  %v7679_v51 = vld [vmem:[%s14865_s3 + $0x100] sm:$0xff] }
 0x18e   : > { %7659 = vmatprep.mubr.msk.f32.mxu1 %vm949_vm4, %v9964_v6  ;;  %v976_v6 = vsel %vm966_vm9, %v959_v8, %v8431_v2  ;;  %v754_v5 = vsel %vm303_vm11, %v10028_v45, 0.0  ;;  %v756_v8 = vsel %vm303_vm11, %v10048_v61, 0.0  ;;  %v8095_v57 = vpack.c.bf16 %v7674_v58, %v7673_v38 }
 0x18f   : > { %v993_v4 = vsel %vm983_vm10, %v976_v6, %v8441_v22  ;;  %v7670_v6 = vld [vmem:[%s14865_s3 + $0xb8] sm:$0xff] }
 0x190   : > { %v8469_v10 = vpop.permute.xlu0 %8468  ;;  %v802_v53 = vpop.permute.xlu1 %801 }
 0x191   : > { %1159 = vmatmul.mubr.f32.gmra.mrb[16].mxu1 %v992_v40  ;;  %v8470_v35 = vunpack.i.l.bf16 %v8469_v10  ;;  %v8471_v37 = vunpack.i.h.bf16 %v8469_v10  ;;  %v7675_v10 = vld [vmem:[%s14865_s3 + $0xe0] sm:$0xff] }
 0x192   : > { %7660 = vmatprep.mubr.msk.f32.mxu1 %vm949_vm4, %v750_v62  ;;  %v7669_v62 = vld [vmem:[%s14865_s3 + $0xb0] sm:$0xff] }
 0x193   : > { %v8089_v55 = vpack.c.bf16 %v7670_v6, %v7669_v62 }
 0x194   : > { %v866_v26 = vpop.permute.xlu0 %865  ;;  %v930_v9 = vpop.permute.xlu1 %929 }
 0x195   : > { %1164 = vmatmul.mubr.f32.gmra.mrb[18].mxu1 %v993_v4  ;;  %v7672_v4 = vld [vmem:[%s14865_s3 + $0xc8] sm:$0xff] }
 0x196   : > { %7661 = vmatprep.mubr.msk.f32.mxu1 %vm949_vm4, %v9996_v44  ;;  %v606_v44 = vsel %vm286_vm8, %v10033_v11, 0.0  ;;  %v963_v11 = vsel %vm949_vm4, %v10037_v24, %v8466_v17  ;;  %v8092_v63 = vpack.c.bf16 %v7672_v4, %v7671_v29  ;;  %v10246_v17 = vld [vmem:[%s14866_s4] ss:$0 sm:$0xff] }
 0x197   : > { %v962_v46 = vsel %vm949_vm4, %v606_v44, %v8465_v13  ;;  %v980_v41 = vsel %vm966_vm9, %v963_v11, %v8461_v1  ;;  %v8098_v13 = vpack.c.bf16 %v7676_v47, %v7675_v10 }
 0x198   : > { %v979_v23 = vsel %vm966_vm9, %v962_v46, %v8460_v31  ;;  %v804_v2 = vpop.permute.xlu0 %803  ;;  %v997_v22 = vsel %vm983_vm10, %v980_v41, %v8471_v37  ;;  %v868_v27 = vpop.permute.xlu1 %867  ;;  %v7680_v31 = vld [vmem:[%s14865_s3 + $0x108] sm:$0xff]  ;;  %v7685_v41 = vld [vmem:[%s14865_s3 + $0x130] sm:$0xff] }
 0x199   : > { %1169 = vmatmul.mubr.f32.gmra.mrb[20].mxu1 %v994_v18  ;;  %v996_v7 = vsel %vm983_vm10, %v979_v23, %v8470_v35  ;;  %v965_v45 = vsel %vm949_vm4, %v9991_v14, %v804_v2  ;;  %v7667_v14 = vld [vmem:[%s14865_s3 + $0xa0] sm:$0xff]  ;;  %v7677_v18 = vld [vmem:[%s14865_s3 + $0xf0] sm:$0xff]  ;;  %v8104_v44 = vpack.c.bf16 %v7680_v31, %v7679_v51  ;;  %v7682_v35 = vld [vmem:[%s14865_s3 + $0x118] sm:$0xff] }
 0x19a   : > { %7662 = vmatprep.mubr.msk.f32.mxu1 %vm949_vm4, %v752_v42  ;;  %v982_v60 = vsel %vm966_vm9, %v965_v45, %v868_v27  ;;  %v8101_v42 = vpack.c.bf16 %v7678_v33, %v7677_v18 }
 0x19d   : > { %1174 = vmatmul.mubr.f32.gmra.mrb[22].mxu1 %v995_v39 }
 0x19e   : > { %7663 = vmatprep.mubr.msk.f32.mxu1 %vm949_vm4, %v10024_v25  ;;  %v608_v25 = vsel %vm286_vm8, %v9970_v16, 0.0  ;;  %v932_v16 = vpop.permute.xlu0 %931 }
 0x19f   : > { %v964_v20 = vsel %vm949_vm4, %v608_v25, %v802_v53  ;;  %v999_v34 = vsel %vm983_vm10, %v982_v60, %v932_v16  ;;  %v7681_v53 = vld [vmem:[%s14865_s3 + $0x110] sm:$0xff] }
 0x1a0   : > { %v981_v24 = vsel %vm966_vm9, %v964_v20, %v866_v26  ;;  %v8107_v39 = vpack.c.bf16 %v7682_v35, %v7681_v53  ;;  %v7686_v20 = vld [vmem:[%s14865_s3 + $0x138] sm:$0xff] }
 0x1a1   : > { %1179 = vmatmul.mubr.f32.gmra.mrb[24].mxu1 %v996_v7  ;;  %v998_v40 = vsel %vm983_vm10, %v981_v24, %v930_v9  ;;  %v7684_v9 = vld [vmem:[%s14865_s3 + $0x128] sm:$0xff]  ;;  %v8113_v27 = vpack.c.bf16 %v7686_v20, %v7685_v41 }
 0x1a2   : > { %7664 = vmatprep.mubr.msk.f32.mxu1 %vm949_vm4, %v754_v5  ;;  %v7683_v5 = vld [vmem:[%s14865_s3 + $0x120] sm:$0xff] }
 0x1a3   : > { %v8110_v25 = vpack.c.bf16 %v7684_v9, %v7683_v5 }
 0x1a5   : > { %1184 = vmatmul.mubr.f32.gmra.mrb[26].mxu1 %v997_v22 }
 0x1a6   : > { %7665 = vmatprep.mubr.msk.f32.mxu1 %vm949_vm4, %v10044_v15  ;;  %v7668_v15 = vld [vmem:[%s14865_s3 + $0xa8] sm:$0xff] }
 0x1a7   : > { %v8086_v61 = vpack.c.bf16 %v7668_v15, %v7667_v14 }
 0x1a9   : > { %1189 = vmatmul.mubr.f32.gmra.mrb[28].mxu1 %v998_v40  ;;  %8087 = vmatpush1.bf16.msra.mxu0 %v8086_v61 }
 0x1aa   : > { %7666 = vmatprep.mubr.msk.f32.mxu1 %vm949_vm4, %v756_v8  ;;  %8088 = vmatprep.subr.bf16.mxu0 %v14891_v28 }
 0x1ad   : > { %1194 = vmatmul.mubr.f32.gmra.mrb[30].mxu1 %v999_v34  ;;  %8090 = vmatpush1.bf16.msra.mxu0 %v8089_v55 }
 0x1ae   : > { %8091 = vmatprep.subr.bf16.mxu0 %v14891_v28 }
 0x1b1   : > { %8093 = vmatpush1.bf16.msra.mxu0 %v8092_v63 }
 0x1b2   : > { %8094 = vmatprep.subr.bf16.mxu0 %v14891_v28 }
 0x1b5   : > { %8096 = vmatpush1.bf16.msra.mxu0 %v8095_v57 }
 0x1b6   : > { %8097 = vmatprep.subr.bf16.mxu0 %v14891_v28 }
 0x1b9   : > { %8099 = vmatpush1.bf16.msra.mxu0 %v8098_v13 }
 0x1ba   : > { %8100 = vmatprep.subr.bf16.mxu0 %v14891_v28 }
 0x1bd   : > { %8102 = vmatpush1.bf16.msra.mxu0 %v8101_v42 }
 0x1be   : > { %8103 = vmatprep.subr.bf16.mxu0 %v14891_v28 }
 0x1c1   : > { %8105 = vmatpush1.bf16.msra.mxu0 %v8104_v44 }
 0x1c2   : > { %8106 = vmatprep.subr.bf16.mxu0 %v14891_v28 }
 0x1c5   : > { %8108 = vmatpush1.bf16.msra.mxu0 %v8107_v39 }
 0x1c6   : > { %8109 = vmatprep.subr.bf16.mxu0 %v14891_v28 }
 0x1c9   : > { %8111 = vmatpush1.bf16.msra.mxu0 %v8110_v25 }
 0x1ca   : > { %8112 = vmatprep.subr.bf16.mxu0 %v14891_v28 }
 0x1cd   : > { %8114 = vmatpush1.bf16.msra.mxu0 %v8113_v27 }
 0x1ce   : > { %8145 = vmatprep.subr.bf16.mxu0 %v14891_v28 }
 0x244   : > { %v1120_v46 = vpop.f32.mrb[0].mxu1 }
 0x245   : > { %v1121_v26 = vadd.f32 %v10246_v17, %v1120_v46  ;;  %v1122_v1 = vpop.f32.mrb[1].mxu1 }
 0x247   : > { %v1199_v23 = vmax.f32 %v1121_v26, 0.0 }
 0x248   : > { %v1125_v37 = vpop.f32.mrb[2].mxu1 }
 0x249   : > { %v1126_v7 = vadd.f32 %v10246_v17, %v1125_v37  ;;  %v1127_v11 = vpop.f32.mrb[3].mxu1  ;;  %v1238_v22 = vrot.slane %v1199_v23, 6  ;;  %v1382_v45 = vrot.slane %v1199_v23, 2  ;;  %v1286_v14 = vrot.slane %v1199_v23, 7 }
 0x24a   : > { %v1334_v62 = vrot.slane %v1199_v23, 1 }
 0x24b   : > { %v1200_v2 = vmax.f32 %v1126_v7, 0.0 }
 0x24c   : > { %v1130_v24 = vpop.f32.mrb[4].mxu1 }
 0x24d   : > { %v1246_v40 = vrot.slane %v1200_v2, 6  ;;  %v1131_v16 = vadd.f32 %v10246_v17, %v1130_v24  ;;  %v1132_v8 = vpop.f32.mrb[5].mxu1  ;;  %v8472_v60 = vpack.i.bf16 %v1200_v2, %v1199_v23  ;;  %v1390_v34 = vrot.slane %v1200_v2, 2 }
 0x24e   : > { %v1294_v15 = vrot.slane %v1200_v2, 7  ;;  %v1342_v61 = vrot.slane %v1200_v2, 1 }
 0x24f   : > { %v1201_v6 = vmax.f32 %v1131_v16, 0.0  ;;  %8473 = vrot.lane.b32.xlu0 %v8472_v60, %s9428_s11  ;;  %v1398_v55 = vsel %vm724_vm1, %v1382_v45, %v1390_v34  ;;  %v10276_v29 = vsel %vm577_vm7, %v1246_v40, %v1238_v22  ;;  %v10280_v4 = vsel %vm724_vm1, %v1390_v34, %v1382_v45 }
 0x250   : > { %v1135_v63 = vpop.f32.mrb[6].mxu1  ;;  %7689 = vmatprep.mubr.msk.f32.mxu0 %vm949_vm4, %v1398_v55  ;;  %v1302_v38 = vsel %vm626_vm3, %v1286_v14, %v1294_v15  ;;  %v1310_v58 = vsel %vm626_vm3, %v1294_v15, %v1286_v14  ;;  %v1350_v57 = vsel %vm675_vm2, %v1334_v62, %v1342_v61  ;;  %v1358_v10 = vsel %vm675_vm2, %v1342_v61, %v1334_v62 }
 0x251   : > { %v1136_v47 = vadd.f32 %v10246_v17, %v1135_v63  ;;  %v1137_v13 = vpop.f32.mrb[7].mxu1  ;;  %v1318_v18 = vsel %vm292_vm6, %v1310_v58, 0.0  ;;  %v1367_v33 = vsel %vm299_vm5, %v1358_v10, 0.0  ;;  %v10299_v44 = vsel %vm577_vm7, %v1238_v22, %v1246_v40 }
 0x252   : > { %v8477_v42 = vpack.i.bf16 %v1302_v38, %v1318_v18  ;;  %v8482_v51 = vpack.i.bf16 %v1367_v33, %v1350_v57  ;;  %v1239_v53 = vrot.slane %v1201_v6, 6  ;;  %v1287_v39 = vrot.slane %v1201_v6, 7 }
 0x253   : > { %v1202_v31 = vmax.f32 %v1136_v47, 0.0  ;;  %v1335_v7 = vrot.slane %v1201_v6, 1  ;;  %v1383_v5 = vrot.slane %v1201_v6, 2 }
 0x254   : > { %8478 = vrot.lane.b32.xlu1 %v8477_v42, %s9427_s10  ;;  %v1140_v35 = vpop.f32.mrb[8].mxu1 }
 0x255   : > { %v1247_v46 = vrot.slane %v1202_v31, 6  ;;  %v1141_v26 = vadd.f32 %v10246_v17, %v1140_v35  ;;  %v1142_v1 = vpop.f32.mrb[9].mxu1  ;;  %v1295_v23 = vrot.slane %v1202_v31, 7  ;;  %v8487_v37 = vpack.i.bf16 %v1202_v31, %v1201_v6 }
 0x256   : > { %v1343_v11 = vrot.slane %v1202_v31, 1  ;;  %v1391_v9 = vrot.slane %v1202_v31, 2 }
 0x257   : > { %v1203_v25 = vmax.f32 %v1141_v26, 0.0  ;;  %v1303_v2 = vsel %vm626_vm3, %v1287_v39, %v1295_v23  ;;  %v1311_v41 = vsel %vm626_vm3, %v1295_v23, %v1287_v39  ;;  %v10309_v20 = vsel %vm577_vm7, %v1247_v46, %v1239_v53 }
 0x258   : > { %8483 = vrot.lane.b32.xlu1 %v8482_v51, %s9426_s9  ;;  %v1145_v22 = vpop.f32.mrb[10].mxu1  ;;  %v1320_v24 = vsel %vm292_vm6, %v1311_v41, 0.0  ;;  %v1351_v45 = vsel %vm675_vm2, %v1335_v7, %v1343_v11  ;;  %v1359_v27 = vsel %vm675_vm2, %v1343_v11, %v1335_v7  ;;  %v10320_v40 = vsel %vm724_vm1, %v1383_v5, %v1391_v9 }
 0x259   : > { %v1146_v16 = vadd.f32 %v10246_v17, %v1145_v22  ;;  %v1147_v8 = vpop.f32.mrb[11].mxu1  ;;  %v8492_v60 = vpack.i.bf16 %v1303_v2, %v1320_v24  ;;  %v1369_v34 = vsel %vm299_vm5, %v1359_v27, 0.0  ;;  %v10328_v62 = vsel %vm724_vm1, %v1391_v9, %v1383_v5 }
 0x25a   : > { %v8497_v14 = vpack.i.bf16 %v1369_v34, %v1351_v45  ;;  %v10332_v61 = vsel %vm577_vm7, %v1239_v53, %v1247_v46  ;;  %v1240_v6 = vrot.slane %v1203_v25, 6  ;;  %v1288_v63 = vrot.slane %v1203_v25, 7 }
 0x25b   : > { %v1204_v15 = vmax.f32 %v1146_v16, 0.0  ;;  %8493 = vrot.lane.b32.xlu0 %v8492_v60, %s9427_s10  ;;  %v1336_v13 = vrot.slane %v1203_v25, 1  ;;  %v1384_v33 = vrot.slane %v1203_v25, 2 }
 0x25c   : > { %8488 = vrot.lane.b32.xlu1 %v8487_v37, %s9428_s11  ;;  %v1150_v55 = vpop.f32.mrb[12].mxu1 }
 0x25d   : > { %v1248_v38 = vrot.slane %v1204_v15, 6  ;;  %v1151_v58 = vadd.f32 %v10246_v17, %v1150_v55  ;;  %v1152_v57 = vpop.f32.mrb[13].mxu1  ;;  %v8502_v10 = vpack.i.bf16 %v1204_v15, %v1203_v25  ;;  %v1296_v47 = vrot.slane %v1204_v15, 7 }
 0x25e   : > { %v1344_v18 = vrot.slane %v1204_v15, 1  ;;  %v1392_v42 = vrot.slane %v1204_v15, 2 }
 0x25f   : > { %v1205_v51 = vmax.f32 %v1151_v58, 0.0  ;;  %8498 = vrot.lane.b32.xlu0 %v8497_v14, %s9426_s9  ;;  %v1304_v31 = vsel %vm626_vm3, %v1288_v63, %v1296_v47  ;;  %v1312_v53 = vsel %vm626_vm3, %v1296_v47, %v1288_v63  ;;  %v10343_v35 = vsel %vm577_vm7, %v1248_v38, %v1240_v6 }
 0x260   : > { %v1155_v39 = vpop.f32.mrb[14].mxu1  ;;  %v1322_v46 = vsel %vm292_vm6, %v1312_v53, 0.0  ;;  %v1352_v26 = vsel %vm675_vm2, %v1336_v13, %v1344_v18  ;;  %v1360_v1 = vsel %vm675_vm2, %v1344_v18, %v1336_v13  ;;  %v10353_v23 = vsel %vm724_vm1, %v1384_v33, %v1392_v42 }
 0x261   : > { %v1156_v37 = vadd.f32 %v10246_v17, %v1155_v39  ;;  %v1157_v7 = vpop.f32.mrb[15].mxu1  ;;  %v8507_v11 = vpack.i.bf16 %v1304_v31, %v1322_v46  ;;  %v1371_v5 = vsel %vm299_vm5, %v1360_v1, 0.0  ;;  %v10362_v2 = vsel %vm724_vm1, %v1392_v42, %v1384_v33 }
 0x262   : > { %v8512_v9 = vpack.i.bf16 %v1371_v5, %v1352_v26  ;;  %v10366_v41 = vsel %vm577_vm7, %v1240_v6, %v1248_v38  ;;  %v1241_v22 = vrot.slane %v1205_v51, 6  ;;  %v1289_v45 = vrot.slane %v1205_v51, 7 }
 0x263   : > { %v1206_v25 = vmax.f32 %v1156_v37, 0.0  ;;  %8503 = vrot.lane.b32.xlu0 %v8502_v10, %s9428_s11  ;;  %8508 = vrot.lane.b32.xlu1 %v8507_v11, %s9427_s10  ;;  %v1337_v14 = vrot.slane %v1205_v51, 1  ;;  %v1385_v55 = vrot.slane %v1205_v51, 2 }
 0x264   : > { %v1160_v24 = vpop.f32.mrb[16].mxu1 }
 0x265   : > { %v1249_v27 = vrot.slane %v1206_v25, 6  ;;  %v1161_v16 = vadd.f32 %v10246_v17, %v1160_v24  ;;  %v1162_v8 = vpop.f32.mrb[17].mxu1  ;;  %v1297_v60 = vrot.slane %v1206_v25, 7  ;;  %v8517_v34 = vpack.i.bf16 %v1206_v25, %v1205_v51 }
 0x266   : > { %v1345_v15 = vrot.slane %v1206_v25, 1  ;;  %v1393_v63 = vrot.slane %v1206_v25, 2 }
 0x267   : > { %v1207_v58 = vmax.f32 %v1161_v16, 0.0  ;;  %8513 = vrot.lane.b32.xlu1 %v8512_v9, %s9426_s9  ;;  %v1305_v6 = vsel %vm626_vm3, %v1289_v45, %v1297_v60  ;;  %v1313_v38 = vsel %vm626_vm3, %v1297_v60, %v1289_v45  ;;  %v10376_v57 = vsel %vm577_vm7, %v1249_v27, %v1241_v22 }
 0x268   : > { %v1165_v10 = vpop.f32.mrb[18].mxu1  ;;  %v1324_v47 = vsel %vm292_vm6, %v1313_v38, 0.0  ;;  %v1353_v13 = vsel %vm675_vm2, %v1337_v14, %v1345_v15  ;;  %v1361_v18 = vsel %vm675_vm2, %v1345_v15, %v1337_v14  ;;  %v10386_v33 = vsel %vm724_vm1, %v1385_v55, %v1393_v63 }
 0x269   : > { %v1166_v42 = vadd.f32 %v10246_v17, %v1165_v10  ;;  %v1167_v51 = vpop.f32.mrb[19].mxu1  ;;  %v8522_v31 = vpack.i.bf16 %v1305_v6, %v1324_v47  ;;  %v1373_v53 = vsel %vm299_vm5, %v1361_v18, 0.0  ;;  %v10395_v26 = vsel %vm724_vm1, %v1393_v63, %v1385_v55 }
 0x26a   : > { %v8527_v39 = vpack.i.bf16 %v1373_v53, %v1353_v13  ;;  %v10399_v1 = vsel %vm577_vm7, %v1241_v22, %v1249_v27  ;;  %v1242_v37 = vrot.slane %v1207_v58, 6  ;;  %v1290_v11 = vrot.slane %v1207_v58, 7 }
 0x26b   : > { %v1208_v46 = vmax.f32 %v1166_v42, 0.0  ;;  %8523 = vrot.lane.b32.xlu0 %v8522_v31, %s9427_s10  ;;  %8518 = vrot.lane.b32.xlu1 %v8517_v34, %s9428_s11  ;;  %v1338_v16 = vrot.slane %v1207_v58, 1  ;;  %v1386_v60 = vrot.slane %v1207_v58, 2 }
 0x26c   : > { %v1170_v7 = vpop.f32.mrb[20].mxu1 }
 0x26d   : > { %v1250_v5 = vrot.slane %v1208_v46, 6  ;;  %v1171_v9 = vadd.f32 %v10246_v17, %v1170_v7  ;;  %v1172_v25 = vpop.f32.mrb[21].mxu1  ;;  %v8532_v24 = vpack.i.bf16 %v1208_v46, %v1207_v58  ;;  %v1298_v45 = vrot.slane %v1208_v46, 7 }
 0x26e   : > { %v1346_v8 = vrot.slane %v1208_v46, 1  ;;  %v1394_v34 = vrot.slane %v1208_v46, 2 }
 0x26f   : > { %v1209_v14 = vmax.f32 %v1171_v9, 0.0  ;;  %8528 = vrot.lane.b32.xlu0 %v8527_v39, %s9426_s9  ;;  %v1306_v22 = vsel %vm626_vm3, %v1290_v11, %v1298_v45  ;;  %v1314_v27 = vsel %vm626_vm3, %v1298_v45, %v1290_v11  ;;  %v10409_v15 = vsel %vm577_vm7, %v1250_v5, %v1242_v37 }
 0x270   : > { %v1175_v55 = vpop.f32.mrb[22].mxu1  ;;  %v1326_v63 = vsel %vm292_vm6, %v1314_v27, 0.0  ;;  %v1354_v58 = vsel %vm675_vm2, %v1338_v16, %v1346_v8  ;;  %v1362_v6 = vsel %vm675_vm2, %v1346_v8, %v1338_v16  ;;  %v10419_v38 = vsel %vm724_vm1, %v1386_v60, %v1394_v34 }
 0x271   : > { %v1176_v10 = vadd.f32 %v10246_v17, %v1175_v55  ;;  %v1177_v47 = vpop.f32.mrb[23].mxu1  ;;  %v8537_v13 = vpack.i.bf16 %v1306_v22, %v1326_v63  ;;  %v1375_v18 = vsel %vm299_vm5, %v1362_v6, 0.0  ;;  %v10428_v31 = vsel %vm724_vm1, %v1394_v34, %v1386_v60 }
 0x272   : > { %v8542_v42 = vpack.i.bf16 %v1375_v18, %v1354_v58  ;;  %v10432_v53 = vsel %vm577_vm7, %v1242_v37, %v1250_v5  ;;  %v1243_v39 = vrot.slane %v1209_v14, 6  ;;  %v1291_v7 = vrot.slane %v1209_v14, 7 }
 0x273   : > { %v1210_v51 = vmax.f32 %v1176_v10, 0.0  ;;  %8533 = vrot.lane.b32.xlu0 %v8532_v24, %s9428_s11  ;;  %8538 = vrot.lane.b32.xlu1 %v8537_v13, %s9427_s10  ;;  %v1339_v24 = vrot.slane %v1209_v14, 1  ;;  %v1387_v22 = vrot.slane %v1209_v14, 2 }
 0x274   : > { %v1180_v46 = vpop.f32.mrb[24].mxu1 }
 0x275   : > { %v1251_v11 = vrot.slane %v1210_v51, 6  ;;  %v1181_v9 = vadd.f32 %v10246_v17, %v1180_v46  ;;  %v1182_v25 = vpop.f32.mrb[25].mxu1  ;;  %v1299_v45 = vrot.slane %v1210_v51, 7  ;;  %v8547_v16 = vpack.i.bf16 %v1210_v51, %v1209_v14 }
 0x276   : > { %v1347_v8 = vrot.slane %v1210_v51, 1  ;;  %v1395_v27 = vrot.slane %v1210_v51, 2 }
 0x277   : > { %v1211_v55 = vmax.f32 %v1181_v9, 0.0  ;;  %8543 = vrot.lane.b32.xlu1 %v8542_v42, %s9426_s9  ;;  %v1307_v37 = vsel %vm626_vm3, %v1291_v7, %v1299_v45  ;;  %v1315_v5 = vsel %vm626_vm3, %v1299_v45, %v1291_v7  ;;  %v10442_v60 = vsel %vm577_vm7, %v1251_v11, %v1243_v39 }
 0x278   : > { %v1185_v34 = vpop.f32.mrb[26].mxu1  ;;  %v1328_v63 = vsel %vm292_vm6, %v1315_v5, 0.0  ;;  %v1355_v14 = vsel %vm675_vm2, %v1339_v24, %v1347_v8  ;;  %v1363_v58 = vsel %vm675_vm2, %v1347_v8, %v1339_v24  ;;  %v10452_v6 = vsel %vm724_vm1, %v1387_v22, %v1395_v27 }
 0x279   : > { %v1186_v10 = vadd.f32 %v10246_v17, %v1185_v34  ;;  %v1187_v47 = vpop.f32.mrb[27].mxu1  ;;  %v8552_v13 = vpack.i.bf16 %v1307_v37, %v1328_v63  ;;  %v1377_v18 = vsel %vm299_vm5, %v1363_v58, 0.0  ;;  %v10461_v46 = vsel %vm724_vm1, %v1395_v27, %v1387_v22 }
 0x27a   : > { %v8557_v42 = vpack.i.bf16 %v1377_v18, %v1355_v14  ;;  %v10465_v7 = vsel %vm577_vm7, %v1243_v39, %v1251_v11  ;;  %v1244_v9 = vrot.slane %v1211_v55, 6  ;;  %v1292_v45 = vrot.slane %v1211_v55, 7 }
 0x27b   : > { %v1212_v51 = vmax.f32 %v1186_v10, 0.0  ;;  %8553 = vrot.lane.b32.xlu0 %v8552_v13, %s9427_s10  ;;  %8548 = vrot.lane.b32.xlu1 %v8547_v16, %s9428_s11  ;;  %v1340_v63 = vrot.slane %v1211_v55, 1  ;;  %v1388_v16 = vrot.slane %v1211_v55, 2 }
 0x27c   : > { %v1190_v25 = vpop.f32.mrb[28].mxu1 }
 0x27d   : > { %v1252_v24 = vrot.slane %v1212_v51, 6  ;;  %v1191_v8 = vadd.f32 %v10246_v17, %v1190_v25  ;;  %v1192_v37 = vpop.f32.mrb[29].mxu1  ;;  %v8562_v5 = vpack.i.bf16 %v1212_v51, %v1211_v55  ;;  %v1300_v34 = vrot.slane %v1212_v51, 7 }
 0x27e   : > { %v1348_v14 = vrot.slane %v1212_v51, 1  ;;  %v1396_v58 = vrot.slane %v1212_v51, 2 }
 0x27f   : > { %v1213_v10 = vmax.f32 %v1191_v8, 0.0  ;;  %8558 = vrot.lane.b32.xlu0 %v8557_v42, %s9426_s9  ;;  %v1308_v39 = vsel %vm626_vm3, %v1292_v45, %v1300_v34  ;;  %v1316_v11 = vsel %vm626_vm3, %v1300_v34, %v1292_v45  ;;  %v10475_v22 = vsel %vm577_vm7, %v1252_v24, %v1244_v9 }
 0x280   : > { %v1195_v27 = vpop.f32.mrb[30].mxu1  ;;  %v1330_v47 = vsel %vm292_vm6, %v1316_v11, 0.0  ;;  %v1356_v55 = vsel %vm675_vm2, %v1340_v63, %v1348_v14  ;;  %v1364_v13 = vsel %vm675_vm2, %v1348_v14, %v1340_v63  ;;  %v10485_v18 = vsel %vm724_vm1, %v1388_v16, %v1396_v58 }
 0x281   : > { %v1196_v42 = vadd.f32 %v10246_v17, %v1195_v27  ;;  %v1197_v51 = vpop.f32.mrb[31].mxu1  ;;  %v8567_v25 = vpack.i.bf16 %v1308_v39, %v1330_v47  ;;  %v1379_v45 = vsel %vm299_vm5, %v1364_v13, 0.0  ;;  %v10494_v34 = vsel %vm724_vm1, %v1396_v58, %v1388_v16 }
 0x282   : > { %v8572_v8 = vpack.i.bf16 %v1379_v45, %v1356_v55  ;;  %v10498_v63 = vsel %vm577_vm7, %v1244_v9, %v1252_v24  ;;  %v1293_v17 = vrot.slane %v1213_v10, 7  ;;  %v1341_v14 = vrot.slane %v1213_v10, 1 }
 0x283   : > { %v1214_v37 = vmax.f32 %v1196_v42, 0.0  ;;  %8563 = vrot.lane.b32.xlu0 %v8562_v5, %s9428_s11  ;;  %8568 = vrot.lane.b32.xlu1 %v8567_v25, %s9427_s10  ;;  %v1245_v55 = vrot.slane %v1213_v10, 6  ;;  %v1389_v13 = vrot.slane %v1213_v10, 2 }
 0x285   : > { %v1301_v39 = vrot.slane %v1214_v37, 7  ;;  %v1349_v11 = vrot.slane %v1214_v37, 1  ;;  %v1253_v27 = vrot.slane %v1214_v37, 6  ;;  %v1397_v47 = vrot.slane %v1214_v37, 2 }
 0x287   : > { %8573 = vrot.lane.b32.xlu1 %v8572_v8, %s9426_s9  ;;  %v1317_v5 = vsel %vm626_vm3, %v1301_v39, %v1293_v17  ;;  %v1357_v16 = vsel %vm675_vm2, %v1341_v14, %v1349_v11  ;;  %v1309_v9 = vsel %vm626_vm3, %v1293_v17, %v1301_v39  ;;  %v1365_v24 = vsel %vm675_vm2, %v1349_v11, %v1341_v14 }
 0x288   : > { %v1332_v58 = vsel %vm292_vm6, %v1317_v5, 0.0  ;;  %v10513_v42 = vsel %vm577_vm7, %v1253_v27, %v1245_v55  ;;  %v10517_v51 = vsel %vm577_vm7, %v1245_v55, %v1253_v27  ;;  %v10522_v25 = vsel %vm724_vm1, %v1389_v13, %v1397_v47 }
 0x289   : > { %1474 = vrot.lane.b32.xlu0 %v1332_v58, %s9427_s10  ;;  %v10526_v45 = vsel %vm724_vm1, %v1397_v47, %v1389_v13  ;;  %v1381_v8 = vsel %vm299_vm5, %v1365_v24, 0.0  ;;  %v1270_v11 = vsel %vm286_vm8, %v10276_v29, 0.0  ;;  %v1415_v29 = vsel %vm303_vm11, %v10280_v4, 0.0 }
 0x28b   : > { %1538 = vrot.lane.b32.xlu1 %v1213_v10, %s9428_s11 }
 0x28d   : > { %1602 = vrot.lane.b32.xlu0 %v1357_v16, %s9426_s9 }
 0x28f   : > { %1476 = vrot.lane.b32.xlu1 %v1309_v9, %s9427_s10 }
 0x291   : > { %1540 = vrot.lane.b32.xlu0 %v1214_v37, %s9428_s11 }
 0x293   : > { %1604 = vrot.lane.b32.xlu1 %v1381_v8, %s9426_s9 }
 0x2c1   : > { %v8474_v14 = vpop.permute.xlu0 %8473 }
 0x2c2   : > { %v8475_v47 = vunpack.i.l.bf16 %v8474_v14  ;;  %v8476_v58 = vunpack.i.h.bf16 %v8474_v14 }
 0x2c6   : > { %v8479_v17 = vpop.permute.xlu1 %8478 }
 0x2c7   : > { %v8480_v39 = vunpack.i.l.bf16 %v8479_v17  ;;  %v8481_v27 = vunpack.i.h.bf16 %v8479_v17 }
 0x2c9   : > { %v1622_v10 = vsel %vm949_vm4, %v1270_v11, %v8480_v39  ;;  %v1623_v24 = vsel %vm949_vm4, %v10299_v44, %v8481_v27  ;;  %v1272_v39 = vsel %vm286_vm8, %v10309_v20, 0.0 }
 0x2ca   : > { %v8484_v55 = vpop.permute.xlu1 %8483  ;;  %v1638_v37 = vsel %vm966_vm9, %v1622_v10, %v8475_v47  ;;  %v1639_v11 = vsel %vm966_vm9, %v1623_v24, %v8476_v58 }
 0x2cb   : > { %v8485_v13 = vunpack.i.l.bf16 %v8484_v55  ;;  %v8486_v5 = vunpack.i.h.bf16 %v8484_v55 }
 0x2cd   : > { %v8494_v16 = vpop.permute.xlu0 %8493  ;;  %v1654_v9 = vsel %vm983_vm10, %v1638_v37, %v8485_v13  ;;  %v1655_v27 = vsel %vm983_vm10, %v1639_v11, %v8486_v5  ;;  %v1417_v5 = vsel %vm303_vm11, %v10328_v62, 0.0 }
 0x2ce   : > { %v8495_v8 = vunpack.i.l.bf16 %v8494_v16  ;;  %v8489_v48 = vpop.permute.xlu1 %8488  ;;  %1789 = vmatmul.mubr.f32.vlgmr.msra.gmra.mrb[16].mxu0 %v1654_v9  ;;  %v8496_v44 = vunpack.i.h.bf16 %v8494_v16 }
 0x2cf   : > { %v8490_v17 = vunpack.i.l.bf16 %v8489_v48  ;;  %7690 = vmatprep.mubr.msk.f32.mxu0 %vm949_vm4, %v1415_v29  ;;  %v8491_v55 = vunpack.i.h.bf16 %v8489_v48  ;;  %v1274_v48 = vsel %vm286_vm8, %v10343_v35, 0.0 }
 0x2d0   : > { %v1624_v10 = vsel %vm949_vm4, %v1272_v39, %v8495_v8  ;;  %v1625_v24 = vsel %vm949_vm4, %v10332_v61, %v8496_v44 }
 0x2d1   : > { %v8499_v14 = vpop.permute.xlu0 %8498  ;;  %v1640_v4 = vsel %vm966_vm9, %v1624_v10, %v8490_v17 }
 0x2d2   : > { %v8500_v47 = vunpack.i.l.bf16 %v8499_v14  ;;  %1794 = vmatmul.mubr.f32.gmra.mrb[18].mxu0 %v1655_v27  ;;  %v8501_v37 = vunpack.i.h.bf16 %v8499_v14 }
 0x2d3   : > { %7691 = vmatprep.mubr.msk.f32.mxu0 %vm949_vm4, %v10320_v40  ;;  %v1641_v40 = vsel %vm966_vm9, %v1625_v24, %v8491_v55 }
 0x2d4   : > { %v1656_v13 = vsel %vm983_vm10, %v1640_v4, %v8500_v47  ;;  %v1657_v61 = vsel %vm983_vm10, %v1641_v40, %v8501_v37  ;;  %v1419_v4 = vsel %vm303_vm11, %v10362_v2, 0.0 }
 0x2d5   : > { %v8504_v20 = vpop.permute.xlu0 %8503  ;;  %v8509_v9 = vpop.permute.xlu1 %8508 }
 0x2d6   : > { %v8510_v16 = vunpack.i.l.bf16 %v8509_v9  ;;  %1799 = vmatmul.mubr.f32.gmra.mrb[20].mxu0 %v1656_v13  ;;  %v8505_v58 = vunpack.i.l.bf16 %v8504_v20  ;;  %v8511_v29 = vunpack.i.h.bf16 %v8509_v9  ;;  %v8506_v11 = vunpack.i.h.bf16 %v8504_v20 }
 0x2d7   : > { %7692 = vmatprep.mubr.msk.f32.mxu0 %vm949_vm4, %v1417_v5 }
 0x2d8   : > { %v1626_v8 = vsel %vm949_vm4, %v1274_v48, %v8510_v16  ;;  %v1627_v27 = vsel %vm949_vm4, %v10366_v41, %v8511_v29  ;;  %v1421_v29 = vsel %vm303_vm11, %v10395_v26, 0.0 }
 0x2d9   : > { %v8514_v17 = vpop.permute.xlu1 %8513  ;;  %v1642_v62 = vsel %vm966_vm9, %v1626_v8, %v8505_v58  ;;  %v1643_v13 = vsel %vm966_vm9, %v1627_v27, %v8506_v11 }
 0x2da   : > { %v8515_v39 = vunpack.i.l.bf16 %v8514_v17  ;;  %1804 = vmatmul.mubr.f32.gmra.mrb[22].mxu0 %v1657_v61  ;;  %v8516_v44 = vunpack.i.h.bf16 %v8514_v17 }
 0x2db   : > { %7693 = vmatprep.mubr.msk.f32.mxu0 %vm949_vm4, %v10353_v23  ;;  %v1276_v23 = vsel %vm286_vm8, %v10376_v57, 0.0 }
 0x2dc   : > { %v1658_v10 = vsel %vm983_vm10, %v1642_v62, %v8515_v39  ;;  %v1659_v41 = vsel %vm983_vm10, %v1643_v13, %v8516_v44 }
 0x2dd   : > { %v8524_v35 = vpop.permute.xlu0 %8523  ;;  %v8519_v14 = vpop.permute.xlu1 %8518 }
 0x2de   : > { %v8525_v47 = vunpack.i.l.bf16 %v8524_v35  ;;  %1809 = vmatmul.mubr.f32.gmra.mrb[24].mxu0 %v1658_v10  ;;  %v8520_v55 = vunpack.i.l.bf16 %v8519_v14  ;;  %v8526_v20 = vunpack.i.h.bf16 %v8524_v35  ;;  %v8521_v16 = vunpack.i.h.bf16 %v8519_v14 }
 0x2df   : > { %7694 = vmatprep.mubr.msk.f32.mxu0 %vm949_vm4, %v1419_v4 }
 0x2e0   : > { %v1628_v37 = vsel %vm949_vm4, %v1276_v23, %v8525_v47  ;;  %v1629_v40 = vsel %vm949_vm4, %v10399_v1, %v8526_v20 }
 0x2e1   : > { %v8529_v9 = vpop.permute.xlu0 %8528  ;;  %v1644_v2 = vsel %vm966_vm9, %v1628_v37, %v8520_v55  ;;  %v1645_v61 = vsel %vm966_vm9, %v1629_v40, %v8521_v16  ;;  %v1423_v55 = vsel %vm303_vm11, %v10428_v31, 0.0 }
 0x2e2   : > { %v8530_v24 = vunpack.i.l.bf16 %v8529_v9  ;;  %1814 = vmatmul.mubr.f32.gmra.mrb[26].mxu0 %v1659_v41  ;;  %v8531_v58 = vunpack.i.h.bf16 %v8529_v9 }
 0x2e3   : > { %7695 = vmatprep.mubr.msk.f32.mxu0 %vm949_vm4, %v10386_v33  ;;  %v1278_v33 = vsel %vm286_vm8, %v10409_v15, 0.0 }
 0x2e4   : > { %v1660_v5 = vsel %vm983_vm10, %v1644_v2, %v8530_v24  ;;  %v1661_v1 = vsel %vm983_vm10, %v1645_v61, %v8531_v58 }
 0x2e5   : > { %v8534_v57 = vpop.permute.xlu0 %8533  ;;  %v8539_v48 = vpop.permute.xlu1 %8538 }
 0x2e6   : > { %v8540_v8 = vunpack.i.l.bf16 %v8539_v48  ;;  %1819 = vmatmul.mubr.f32.gmra.mrb[28].mxu0 %v1660_v5  ;;  %v8535_v17 = vunpack.i.l.bf16 %v8534_v57  ;;  %v8541_v62 = vunpack.i.h.bf16 %v8539_v48  ;;  %v8536_v44 = vunpack.i.h.bf16 %v8534_v57 }
 0x2e7   : > { %7696 = vmatprep.mubr.msk.f32.mxu0 %vm949_vm4, %v1421_v29  ;;  %v1425_v48 = vsel %vm303_vm11, %v10461_v46, 0.0 }
 0x2e8   : > { %v1630_v39 = vsel %vm949_vm4, %v1278_v33, %v8540_v8  ;;  %v1631_v47 = vsel %vm949_vm4, %v10432_v53, %v8541_v62 }
 0x2e9   : > { %v8544_v11 = vpop.permute.xlu1 %8543  ;;  %v1646_v26 = vsel %vm966_vm9, %v1630_v39, %v8535_v17  ;;  %v1647_v13 = vsel %vm966_vm9, %v1631_v47, %v8536_v44 }
 0x2ea   : > { %v8545_v10 = vunpack.i.l.bf16 %v8544_v11  ;;  %1824 = vmatmul.mubr.f32.gmra.mrb[30].mxu0 %v1661_v1  ;;  %v8546_v14 = vunpack.i.h.bf16 %v8544_v11 }
 0x2eb   : > { %7697 = vmatprep.mubr.msk.f32.mxu0 %vm949_vm4, %v10419_v38  ;;  %v1280_v38 = vsel %vm286_vm8, %v10442_v60, 0.0 }
 0x2ec   : > { %v1662_v35 = vsel %vm983_vm10, %v1646_v26, %v8545_v10  ;;  %v1663_v53 = vsel %vm983_vm10, %v1647_v13, %v8546_v14  ;;  %v1284_v26 = vsel %vm286_vm8, %v10513_v42, 0.0 }
 0x2ed   : > { %v8554_v15 = vpop.permute.xlu0 %8553  ;;  %v8549_v27 = vpop.permute.xlu1 %8548 }
 0x2ee   : > { %v8555_v4 = vunpack.i.l.bf16 %v8554_v15  ;;  %1829 = vmatmul.mubr.f32.gmra.mrb[32].mxu0 %v1662_v35  ;;  %v8550_v23 = vunpack.i.l.bf16 %v8549_v27  ;;  %v8556_v20 = vunpack.i.h.bf16 %v8554_v15  ;;  %v8551_v24 = vunpack.i.h.bf16 %v8549_v27 }
 0x2ef   : > { %7698 = vmatprep.mubr.msk.f32.mxu0 %vm949_vm4, %v1423_v55 }
 0x2f0   : > { %v1632_v37 = vsel %vm949_vm4, %v1280_v38, %v8555_v4  ;;  %v1633_v58 = vsel %vm949_vm4, %v10465_v7, %v8556_v20  ;;  %v7709_v20 = vld [vmem:[%s14865_s3 + $0x160] sm:$0xff] }
 0x2f1   : > { %v8559_v9 = vpop.permute.xlu0 %8558  ;;  %v1648_v31 = vsel %vm966_vm9, %v1632_v37, %v8550_v23  ;;  %v1649_v8 = vsel %vm966_vm9, %v1633_v58, %v8551_v24  ;;  %v1429_v23 = vsel %vm303_vm11, %v10526_v45, 0.0  ;;  %v7707_v45 = vld [vmem:[%s14865_s3 + $0x150] sm:$0xff]  ;;  %v7708_v37 = vld [vmem:[%s14865_s3 + $0x158] sm:$0xff] }
 0x2f2   : > { %v8560_v41 = vunpack.i.l.bf16 %v8559_v9  ;;  %1834 = vmatmul.mubr.f32.gmra.mrb[34].mxu0 %v1663_v53  ;;  %v8561_v16 = vunpack.i.h.bf16 %v8559_v9  ;;  %v8119_v9 = vpack.c.bf16 %v7708_v37, %v7707_v45  ;;  %v7710_v53 = vld [vmem:[%s14865_s3 + $0x168] sm:$0xff]  ;;  %v7712_v24 = vld [vmem:[%s14865_s3 + $0x178] sm:$0xff]  ;;  %v7715_v58 = vld [vmem:[%s14865_s3 + $0x190] sm:$0xff] }
 0x2f3   : > { %7699 = vmatprep.mubr.msk.f32.mxu0 %vm949_vm4, %v10452_v6  ;;  %v1282_v6 = vsel %vm286_vm8, %v10475_v22, 0.0 }
 0x2f4   : > { %v1664_v2 = vsel %vm983_vm10, %v1648_v31, %v8560_v41  ;;  %v1665_v7 = vsel %vm983_vm10, %v1649_v8, %v8561_v16  ;;  %v8122_v41 = vpack.c.bf16 %v7710_v53, %v7709_v20  ;;  %v7711_v31 = vld [vmem:[%s14865_s3 + $0x170] sm:$0xff]  ;;  %v7713_v16 = vld [vmem:[%s14865_s3 + $0x180] sm:$0xff] }
 0x2f5   : > { %v8564_v60 = vpop.permute.xlu0 %8563  ;;  %v8569_v5 = vpop.permute.xlu1 %8568 }
 0x2f6   : > { %v8570_v57 = vunpack.i.l.bf16 %v8569_v5  ;;  %1839 = vmatmul.mubr.f32.gmra.mrb[36].mxu0 %v1664_v2  ;;  %v8565_v40 = vunpack.i.l.bf16 %v8564_v60  ;;  %v8571_v17 = vunpack.i.h.bf16 %v8569_v5  ;;  %v8566_v62 = vunpack.i.h.bf16 %v8564_v60  ;;  %v7714_v60 = vld [vmem:[%s14865_s3 + $0x188] sm:$0xff] }
 0x2f7   : > { %7700 = vmatprep.mubr.msk.f32.mxu0 %vm949_vm4, %v1425_v48  ;;  %v8125_v2 = vpack.c.bf16 %v7712_v24, %v7711_v31  ;;  %v8128_v5 = vpack.c.bf16 %v7714_v60, %v7713_v16 }
 0x2f8   : > { %v1634_v29 = vsel %vm949_vm4, %v1282_v6, %v8570_v57  ;;  %v1635_v10 = vsel %vm949_vm4, %v10498_v63, %v8571_v17  ;;  %v7716_v57 = vld [vmem:[%s14865_s3 + $0x198] sm:$0xff]  ;;  %v7718_v6 = vld [vmem:[%s14865_s3 + $0x1a8] sm:$0xff] }
 0x2f9   : > { %v8574_v33 = vpop.permute.xlu1 %8573  ;;  %v1650_v39 = vsel %vm966_vm9, %v1634_v29, %v8565_v40  ;;  %v1651_v14 = vsel %vm966_vm9, %v1635_v10, %v8566_v62  ;;  %v8131_v48 = vpack.c.bf16 %v7716_v57, %v7715_v58  ;;  %v7717_v40 = vld [vmem:[%s14865_s3 + $0x1a0] sm:$0xff]  ;;  %v7719_v29 = vld [vmem:[%s14865_s3 + $0x1b0] sm:$0xff]  ;;  %v7720_v17 = vld [vmem:[%s14865_s3 + $0x1b8] sm:$0xff] }
 0x2fa   : > { %v8575_v61 = vunpack.i.l.bf16 %v8574_v33  ;;  %1844 = vmatmul.mubr.f32.gmra.mrb[38].mxu0 %v1665_v7  ;;  %v8576_v22 = vunpack.i.h.bf16 %v8574_v33  ;;  %v8134_v8 = vpack.c.bf16 %v7718_v6, %v7717_v40  ;;  %v8137_v33 = vpack.c.bf16 %v7720_v17, %v7719_v29  ;;  %v7721_v7 = vld [vmem:[%s14865_s3 + $0x1c0] sm:$0xff] }
 0x2fb   : > { %7701 = vmatprep.mubr.msk.f32.mxu0 %vm949_vm4, %v10485_v18  ;;  %v1475_v46 = vpop.permute.xlu0 %1474  ;;  %v1427_v18 = vsel %vm303_vm11, %v10494_v34, 0.0 }
 0x2fc   : > { %v1666_v11 = vsel %vm983_vm10, %v1650_v39, %v8575_v61  ;;  %v1636_v44 = vsel %vm949_vm4, %v1284_v26, %v1475_v46  ;;  %v1667_v27 = vsel %vm983_vm10, %v1651_v14, %v8576_v22  ;;  %v7722_v61 = vld [vmem:[%s14865_s3 + $0x1c8] sm:$0xff]  ;;  %v10727_v39 = vld [vmem:[%s14866_s4 + $0x1] ss:$0 sm:$0xff] }
 0x2fd   : > { %v1539_v1 = vpop.permute.xlu1 %1538  ;;  %v8140_v46 = vpack.c.bf16 %v7722_v61, %v7721_v7 }
 0x2fe   : > { %1849 = vmatmul.mubr.f32.gmra.mrb[40].mxu0 %v1666_v11  ;;  %v1652_v63 = vsel %vm966_vm9, %v1636_v44, %v1539_v1 }
 0x2ff   : > { %7702 = vmatprep.mubr.msk.f32.mxu0 %vm949_vm4, %v1427_v18  ;;  %v1603_v35 = vpop.permute.xlu0 %1602 }
 0x300   : > { %v1668_v47 = vsel %vm983_vm10, %v1652_v63, %v1603_v35 }
 0x301   : > { %v1477_v15 = vpop.permute.xlu1 %1476 }
 0x302   : > { %1854 = vmatmul.mubr.f32.gmra.mrb[42].mxu0 %v1667_v27  ;;  %v1637_v42 = vsel %vm949_vm4, %v10517_v51, %v1477_v15  ;;  %v7705_v51 = vld [vmem:[%s14865_s3 + $0x140] sm:$0xff] }
 0x303   : > { %7703 = vmatprep.mubr.msk.f32.mxu0 %vm949_vm4, %v10522_v25  ;;  %v1541_v34 = vpop.permute.xlu0 %1540  ;;  %v7706_v25 = vld [vmem:[%s14865_s3 + $0x148] sm:$0xff] }
 0x304   : > { %v1653_v4 = vsel %vm966_vm9, %v1637_v42, %v1541_v34  ;;  %v8116_v13 = vpack.c.bf16 %v7706_v25, %v7705_v51  ;;  %v7723_v34 = vld [vmem:[%s14865_s3 + $0x1d0] sm:$0xff] }
 0x305   : > { %v1605_v55 = vpop.permute.xlu1 %1604 }
 0x306   : > { %1859 = vmatmul.mubr.f32.gmra.mrb[44].mxu0 %v1668_v47  ;;  %v1669_v38 = vsel %vm983_vm10, %v1653_v4, %v1605_v55  ;;  %8117 = vmatpush1.bf16.msra.mxu1 %v8116_v13 }
 0x307   : > { %7704 = vmatprep.mubr.msk.f32.mxu0 %vm949_vm4, %v1429_v23  ;;  %8118 = vmatprep.subr.bf16.mxu1 %v14891_v28 }
 0x30a   : > { %1864 = vmatmul.mubr.f32.gmra.mrb[46].mxu0 %v1669_v38  ;;  %8120 = vmatpush1.bf16.msra.mxu1 %v8119_v9 }
 0x30b   : > { %8121 = vmatprep.subr.bf16.mxu1 %v14891_v28 }
 0x30e   : > { %8123 = vmatpush1.bf16.msra.mxu1 %v8122_v41 }
 0x30f   : > { %8124 = vmatprep.subr.bf16.mxu1 %v14891_v28 }
 0x312   : > { %8126 = vmatpush1.bf16.msra.mxu1 %v8125_v2 }
 0x313   : > { %8127 = vmatprep.subr.bf16.mxu1 %v14891_v28 }
 0x316   : > { %8129 = vmatpush1.bf16.msra.mxu1 %v8128_v5 }
 0x317   : > { %8130 = vmatprep.subr.bf16.mxu1 %v14891_v28 }
 0x31a   : > { %8132 = vmatpush1.bf16.msra.mxu1 %v8131_v48 }
 0x31b   : > { %8133 = vmatprep.subr.bf16.mxu1 %v14891_v28 }
 0x31e   : > { %8135 = vmatpush1.bf16.msra.mxu1 %v8134_v8 }
 0x31f   : > { %8136 = vmatprep.subr.bf16.mxu1 %v14891_v28 }
 0x322   : > { %8138 = vmatpush1.bf16.msra.mxu1 %v8137_v33 }
 0x323   : > { %8139 = vmatprep.subr.bf16.mxu1 %v14891_v28 }
 0x326   : > { %8141 = vmatpush1.bf16.msra.mxu1 %v8140_v46 }
 0x327   : > { %8142 = vmatprep.subr.bf16.mxu1 %v14891_v28 }
 0x3a1   : > { %v1790_v62 = vpop.f32.mrb[16].mxu0 }
 0x3a2   : > { %v1791_v11 = vadd.f32 %v10727_v39, %v1790_v62  ;;  %v1792_v22 = vpop.f32.mrb[17].mxu0 }
 0x3a4   : > { %v1869_v1 = vmul.f32 0.3, %v1791_v11 }
 0x3a5   : > { %v1795_v10 = vpop.f32.mrb[18].mxu0 }
 0x3a6   : > { %v10731_v26 = vadd.f32 %v1869_v1, %v9602_v52  ;;  %v1796_v18 = vadd.f32 %v10727_v39, %v1795_v10  ;;  %v1797_v44 = vpop.f32.mrb[19].mxu0  ;;  %v7724_v52 = vld [vmem:[%s14865_s3 + $0x1d8] sm:$0xff] }
 0x3a7   : > { %v8143_v47 = vpack.c.bf16 %v7724_v52, %v7723_v34 }
 0x3a8   : > { %v1870_v35 = vmul.f32 0.3, %v1796_v18  ;;  %v1901_v14 = vmax.f32 %v10731_v26, 0.0 }
 0x3a9   : > { %v1800_v15 = vpop.f32.mrb[20].mxu0  ;;  %8144 = vmatpush1.bf16.msra.mxu1 %v8143_v47 }
 0x3aa   : > { %v10736_v27 = vadd.f32 %v1870_v35, %v9599_v50  ;;  %v1801_v63 = vadd.f32 %v10727_v39, %v1800_v15  ;;  %v1802_v42 = vpop.f32.mrb[21].mxu0  ;;  %v2084_v38 = vrot.slane %v1901_v14, 2  ;;  %v1988_v51 = vrot.slane %v1901_v14, 7  ;;  %8175 = vmatprep.subr.bf16.mxu1 %v14891_v28 }
 0x3ab   : > { %v2036_v50 = vrot.slane %v1901_v14, 1  ;;  %v1940_v41 = vrot.slane %v1901_v14, 6 }
 0x3ac   : > { %v1902_v4 = vmax.f32 %v10736_v27, 0.0  ;;  %v1871_v55 = vmul.f32 0.3, %v1801_v63 }
 0x3ad   : > { %v1805_v23 = vpop.f32.mrb[22].mxu0 }
 0x3ae   : > { %v10747_v25 = vadd.f32 %v1871_v55, %v9629_v0  ;;  %v1806_v13 = vadd.f32 %v10727_v39, %v1805_v23  ;;  %v1807_v45 = vpop.f32.mrb[23].mxu0  ;;  %v8577_v37 = vpack.i.bf16 %v1902_v4, %v1901_v14  ;;  %v2092_v20 = vrot.slane %v1902_v4, 2 }
 0x3af   : > { %v1996_v9 = vrot.slane %v1902_v4, 7  ;;  %v2044_v53 = vrot.slane %v1902_v4, 1  ;;  %v1948_v31 = vrot.slane %v1902_v4, 6 }
 0x3b0   : > { %v10752_v24 = vmax.f32 %v10747_v25, 0.0  ;;  %v1872_v2 = vmul.f32 0.3, %v1806_v13  ;;  %8578 = vrot.lane.b32.xlu1 %v8577_v37, %s9428_s11  ;;  %v2100_v0 = vsel %vm724_vm1, %v2084_v38, %v2092_v20  ;;  %v10759_v16 = vsel %vm724_vm1, %v2092_v20, %v2084_v38 }
 0x3b1   : > { %v1810_v60 = vpop.f32.mrb[24].mxu0  ;;  %7727 = vmatprep.mubr.msk.f32.mxu1 %vm949_vm4, %v2100_v0  ;;  %v2004_v5 = vsel %vm626_vm3, %v1988_v51, %v1996_v9  ;;  %v2012_v58 = vsel %vm626_vm3, %v1996_v9, %v1988_v51  ;;  %v2052_v57 = vsel %vm675_vm2, %v2036_v50, %v2044_v53  ;;  %v2060_v48 = vsel %vm675_vm2, %v2044_v53, %v2036_v50 }
 0x3b2   : > { %v10771_v40 = vadd.f32 %v1872_v2, %v9623_v59  ;;  %v1811_v6 = vadd.f32 %v10727_v39, %v1810_v60  ;;  %v1812_v8 = vpop.f32.mrb[25].mxu0  ;;  %v2020_v29 = vsel %vm292_vm6, %v2012_v58, 0.0  ;;  %v2069_v17 = vsel %vm299_vm5, %v2060_v48, 0.0 }
 0x3b3   : > { %v8582_v33 = vpack.i.bf16 %v2004_v5, %v2020_v29  ;;  %v10781_v46 = vsel %vm577_vm7, %v1948_v31, %v1940_v41  ;;  %v8587_v62 = vpack.i.bf16 %v2069_v17, %v2052_v57  ;;  %v1989_v11 = vrot.slane %v10752_v24, 7 }
 0x3b4   : > { %v1904_v7 = vmax.f32 %v10771_v40, 0.0  ;;  %v1873_v61 = vmul.f32 0.3, %v1811_v6  ;;  %v2037_v22 = vrot.slane %v10752_v24, 1  ;;  %v10788_v1 = vsel %vm577_vm7, %v1940_v41, %v1948_v31 }
 0x3b5   : > { %8583 = vrot.lane.b32.xlu0 %v8582_v33, %s9427_s10  ;;  %v1815_v59 = vpop.f32.mrb[26].mxu0  ;;  %v2085_v14 = vrot.slane %v10752_v24, 2  ;;  %v1941_v42 = vrot.slane %v10752_v24, 6 }
 0x3b6   : > { %v10791_v10 = vadd.f32 %v1873_v61, %v9667_v19  ;;  %v1816_v18 = vadd.f32 %v10727_v39, %v1815_v59  ;;  %v1817_v44 = vpop.f32.mrb[27].mxu0  ;;  %v1997_v35 = vrot.slane %v1904_v7, 7  ;;  %v2045_v15 = vrot.slane %v1904_v7, 1 }
 0x3b7   : > { %v2093_v63 = vrot.slane %v1904_v7, 2  ;;  %v1949_v34 = vrot.slane %v1904_v7, 6  ;;  %v8592_v53 = vpack.i.bf16 %v1904_v7, %v10752_v24 }
 0x3b8   : > { %v10797_v52 = vmax.f32 %v10791_v10, 0.0  ;;  %v1874_v47 = vmul.f32 0.3, %v1816_v18  ;;  %v2005_v4 = vsel %vm626_vm3, %v1989_v11, %v1997_v35  ;;  %v2013_v19 = vsel %vm626_vm3, %v1997_v35, %v1989_v11 }
 0x3b9   : > { %8588 = vrot.lane.b32.xlu0 %v8587_v62, %s9426_s9  ;;  %v1820_v55 = vpop.f32.mrb[28].mxu0  ;;  %v2022_v23 = vsel %vm292_vm6, %v2013_v19, 0.0  ;;  %v2053_v38 = vsel %vm675_vm2, %v2037_v22, %v2045_v15  ;;  %v2061_v51 = vsel %vm675_vm2, %v2045_v15, %v2037_v22  ;;  %v10812_v50 = vsel %vm724_vm1, %v2085_v14, %v2093_v63 }
 0x3ba   : > { %v10815_v13 = vadd.f32 %v1874_v47, %v9656_v12  ;;  %v1821_v45 = vadd.f32 %v10727_v39, %v1820_v55  ;;  %v1822_v37 = vpop.f32.mrb[29].mxu0  ;;  %v8597_v20 = vpack.i.bf16 %v2005_v4, %v2022_v23  ;;  %v2071_v9 = vsel %vm299_vm5, %v2061_v51, 0.0 }
 0x3bb   : > { %v10823_v41 = vsel %vm577_vm7, %v1949_v34, %v1941_v42  ;;  %v8602_v12 = vpack.i.bf16 %v2071_v9, %v2053_v38  ;;  %v10829_v0 = vsel %vm724_vm1, %v2093_v63, %v2085_v14  ;;  %v1990_v5 = vrot.slane %v10797_v52, 7 }
 0x3bc   : > { %v1906_v31 = vmax.f32 %v10815_v13, 0.0  ;;  %v1875_v2 = vmul.f32 0.3, %v1821_v45  ;;  %8598 = vrot.lane.b32.xlu1 %v8597_v20, %s9427_s10  ;;  %v2038_v24 = vrot.slane %v10797_v52, 1  ;;  %v10836_v58 = vsel %vm577_vm7, %v1941_v42, %v1949_v34 }
 0x3bd   : > { %8593 = vrot.lane.b32.xlu0 %v8592_v53, %s9428_s11  ;;  %v1825_v60 = vpop.f32.mrb[30].mxu0  ;;  %v2086_v57 = vrot.slane %v10797_v52, 2  ;;  %v1942_v17 = vrot.slane %v10797_v52, 6 }
 0x3be   : > { %v10840_v48 = vadd.f32 %v1875_v2, %v9700_v36  ;;  %v1826_v6 = vadd.f32 %v10727_v39, %v1825_v60  ;;  %v1827_v8 = vpop.f32.mrb[31].mxu0  ;;  %v1998_v29 = vrot.slane %v1906_v31, 7  ;;  %v8607_v33 = vpack.i.bf16 %v1906_v31, %v10797_v52 }
 0x3bf   : > { %v2046_v7 = vrot.slane %v1906_v31, 1  ;;  %v2094_v61 = vrot.slane %v1906_v31, 2  ;;  %v1950_v59 = vrot.slane %v1906_v31, 6 }
 0x3c0   : > { %v10846_v62 = vmax.f32 %v10840_v48, 0.0  ;;  %v1876_v11 = vmul.f32 0.3, %v1826_v6  ;;  %8603 = vrot.lane.b32.xlu1 %v8602_v12, %s9426_s9  ;;  %v2006_v36 = vsel %vm626_vm3, %v1990_v5, %v1998_v29  ;;  %v2014_v22 = vsel %vm626_vm3, %v1998_v29, %v1990_v5 }
 0x3c1   : > { %v1830_v18 = vpop.f32.mrb[32].mxu0  ;;  %v2024_v44 = vsel %vm292_vm6, %v2014_v22, 0.0  ;;  %v2054_v35 = vsel %vm675_vm2, %v2038_v24, %v2046_v7  ;;  %v2062_v14 = vsel %vm675_vm2, %v2046_v7, %v2038_v24  ;;  %v10861_v15 = vsel %vm724_vm1, %v2086_v57, %v2094_v61 }
 0x3c2   : > { %v10864_v63 = vadd.f32 %v1876_v11, %v9690_v30  ;;  %v1831_v42 = vadd.f32 %v10727_v39, %v1830_v18  ;;  %v1832_v34 = vpop.f32.mrb[33].mxu0  ;;  %v8612_v52 = vpack.i.bf16 %v2006_v36, %v2024_v44  ;;  %v2073_v47 = vsel %vm299_vm5, %v2062_v14, 0.0 }
 0x3c3   : > { %v10871_v4 = vsel %vm577_vm7, %v1950_v59, %v1942_v17  ;;  %v8617_v30 = vpack.i.bf16 %v2073_v47, %v2054_v35  ;;  %v10878_v23 = vsel %vm724_vm1, %v2094_v61, %v2086_v57  ;;  %v1991_v51 = vrot.slane %v10846_v62, 7 }
 0x3c4   : > { %v1908_v19 = vmax.f32 %v10864_v63, 0.0  ;;  %v1877_v55 = vmul.f32 0.3, %v1831_v42  ;;  %8608 = vrot.lane.b32.xlu1 %v8607_v33, %s9428_s11  ;;  %8613 = vrot.lane.b32.xlu0 %v8612_v52, %s9427_s10  ;;  %v2039_v45 = vrot.slane %v10846_v62, 1  ;;  %v10884_v37 = vsel %vm577_vm7, %v1942_v17, %v1950_v59 }
 0x3c5   : > { %v1835_v38 = vpop.f32.mrb[34].mxu0  ;;  %v2087_v20 = vrot.slane %v10846_v62, 2  ;;  %v1943_v12 = vrot.slane %v10846_v62, 6 }
 0x3c6   : > { %v10888_v9 = vadd.f32 %v1877_v55, %v9732_v3  ;;  %v1836_v53 = vadd.f32 %v10727_v39, %v1835_v38  ;;  %v1837_v31 = vpop.f32.mrb[35].mxu0  ;;  %v1999_v2 = vrot.slane %v1908_v19, 7  ;;  %v8622_v60 = vpack.i.bf16 %v1908_v19, %v10846_v62 }
 0x3c7   : > { %v2047_v5 = vrot.slane %v1908_v19, 1  ;;  %v2095_v24 = vrot.slane %v1908_v19, 2  ;;  %v1951_v57 = vrot.slane %v1908_v19, 6 }
 0x3c8   : > { %v10894_v6 = vmax.f32 %v10888_v9, 0.0  ;;  %v1878_v8 = vmul.f32 0.3, %v1836_v53  ;;  %8618 = vrot.lane.b32.xlu0 %v8617_v30, %s9426_s9  ;;  %v2007_v3 = vsel %vm626_vm3, %v1991_v51, %v1999_v2  ;;  %v2015_v29 = vsel %vm626_vm3, %v1999_v2, %v1991_v51 }
 0x3c9   : > { %v1840_v17 = vpop.f32.mrb[36].mxu0  ;;  %v2026_v33 = vsel %vm292_vm6, %v2015_v29, 0.0  ;;  %v2055_v7 = vsel %vm675_vm2, %v2039_v45, %v2047_v5  ;;  %v2063_v61 = vsel %vm675_vm2, %v2047_v5, %v2039_v45  ;;  %v10909_v59 = vsel %vm724_vm1, %v2087_v20, %v2095_v24 }
 0x3ca   : > { %v10912_v62 = vadd.f32 %v1878_v8, %v9723_v56  ;;  %v1841_v11 = vadd.f32 %v10727_v39, %v1840_v17  ;;  %v1842_v36 = vpop.f32.mrb[37].mxu0  ;;  %v8627_v22 = vpack.i.bf16 %v2007_v3, %v2026_v33  ;;  %v2075_v18 = vsel %vm299_vm5, %v2063_v61, 0.0 }
 0x3cb   : > { %v10919_v44 = vsel %vm577_vm7, %v1951_v57, %v1943_v12  ;;  %v8632_v56 = vpack.i.bf16 %v2075_v18, %v2055_v7  ;;  %v10926_v42 = vsel %vm724_vm1, %v2095_v24, %v2087_v20  ;;  %v1992_v52 = vrot.slane %v10894_v6, 7 }
 0x3cc   : > { %v1910_v35 = vmax.f32 %v10912_v62, 0.0  ;;  %v1879_v14 = vmul.f32 0.3, %v1841_v11  ;;  %8628 = vrot.lane.b32.xlu1 %v8627_v22, %s9427_s10  ;;  %8623 = vrot.lane.b32.xlu0 %v8622_v60, %s9428_s11  ;;  %v2040_v47 = vrot.slane %v10894_v6, 1  ;;  %v10932_v19 = vsel %vm577_vm7, %v1943_v12, %v1951_v57 }
 0x3cd   : > { %v1845_v34 = vpop.f32.mrb[38].mxu0  ;;  %v2088_v55 = vrot.slane %v10894_v6, 2  ;;  %v1944_v20 = vrot.slane %v10894_v6, 6 }
 0x3ce   : > { %v10936_v30 = vadd.f32 %v1879_v14, %v9765_v32  ;;  %v1846_v38 = vadd.f32 %v10727_v39, %v1845_v34  ;;  %v1847_v51 = vpop.f32.mrb[39].mxu0  ;;  %v2000_v45 = vrot.slane %v1910_v35, 7  ;;  %v8637_v53 = vpack.i.bf16 %v1910_v35, %v10894_v6 }
 0x3cf   : > { %v2048_v31 = vrot.slane %v1910_v35, 1  ;;  %v2096_v2 = vrot.slane %v1910_v35, 2  ;;  %v1952_v60 = vrot.slane %v1910_v35, 6 }
 0x3d0   : > { %v1911_v5 = vmax.f32 %v10936_v30, 0.0  ;;  %v1880_v12 = vmul.f32 0.3, %v1846_v38  ;;  %8633 = vrot.lane.b32.xlu1 %v8632_v56, %s9426_s9  ;;  %v2008_v32 = vsel %vm626_vm3, %v1992_v52, %v2000_v45  ;;  %v2016_v24 = vsel %vm626_vm3, %v2000_v45, %v1992_v52 }
 0x3d1   : > { %v1850_v57 = vpop.f32.mrb[40].mxu0  ;;  %v2028_v8 = vsel %vm292_vm6, %v2016_v24, 0.0  ;;  %v2056_v6 = vsel %vm675_vm2, %v2040_v47, %v2048_v31  ;;  %v2064_v3 = vsel %vm675_vm2, %v2048_v31, %v2040_v47  ;;  %v10955_v29 = vsel %vm724_vm1, %v2088_v55, %v2096_v2 }
 0x3d2   : > { %v10958_v17 = vadd.f32 %v1880_v12, %v9753_v21  ;;  %v1851_v33 = vadd.f32 %v10727_v39, %v1850_v57  ;;  %v1852_v7 = vpop.f32.mrb[41].mxu0  ;;  %v8642_v61 = vpack.i.bf16 %v2008_v32, %v2028_v8  ;;  %v2077_v11 = vsel %vm299_vm5, %v2064_v3, 0.0 }
 0x3d3   : > { %v10965_v36 = vsel %vm577_vm7, %v1952_v60, %v1944_v20  ;;  %v8647_v21 = vpack.i.bf16 %v2077_v11, %v2056_v6  ;;  %v10972_v35 = vsel %vm724_vm1, %v2096_v2, %v2088_v55  ;;  %v1993_v56 = vrot.slane %v1911_v5, 7 }
 0x3d4   : > { %v1912_v22 = vmax.f32 %v10958_v17, 0.0  ;;  %v1881_v18 = vmul.f32 0.3, %v1851_v33  ;;  %8638 = vrot.lane.b32.xlu1 %v8637_v53, %s9428_s11  ;;  %8643 = vrot.lane.b32.xlu0 %v8642_v61, %s9427_s10  ;;  %v2041_v34 = vrot.slane %v1911_v5, 1  ;;  %v10976_v52 = vsel %vm577_vm7, %v1944_v20, %v1952_v60  ;;  %v14892_v33 = vld [vmem:[#allocation3_spill] sm:$0xff] }
 0x3d5   : > { %v1855_v14 = vpop.f32.mrb[42].mxu0  ;;  %v2089_v47 = vrot.slane %v1911_v5, 2  ;;  %v1945_v31 = vrot.slane %v1911_v5, 6 }
 0x3d6   : > { %v10979_v38 = vadd.f32 %v1881_v18, %v9787_v54  ;;  %v1856_v51 = vadd.f32 %v10727_v39, %v1855_v14  ;;  %v1857_v45 = vpop.f32.mrb[43].mxu0  ;;  %v2001_v53 = vrot.slane %v1912_v22, 7  ;;  %v8652_v12 = vpack.i.bf16 %v1912_v22, %v1911_v5 }
 0x3d7   : > { %v2049_v32 = vrot.slane %v1912_v22, 1  ;;  %v2097_v55 = vrot.slane %v1912_v22, 2  ;;  %v1953_v2 = vrot.slane %v1912_v22, 6 }
 0x3d8   : > { %v1913_v24 = vmax.f32 %v10979_v38, 0.0  ;;  %v1882_v57 = vmul.f32 0.3, %v1856_v51  ;;  %8648 = vrot.lane.b32.xlu0 %v8647_v21, %s9426_s9  ;;  %v2009_v20 = vsel %vm626_vm3, %v1993_v56, %v2001_v53  ;;  %v2017_v54 = vsel %vm626_vm3, %v2001_v53, %v1993_v56 }
 0x3d9   : > { %v1860_v60 = vpop.f32.mrb[44].mxu0  ;;  %v2030_v8 = vsel %vm292_vm6, %v2017_v54, 0.0  ;;  %v2057_v5 = vsel %vm675_vm2, %v2041_v34, %v2049_v32  ;;  %v2065_v6 = vsel %vm675_vm2, %v2049_v32, %v2041_v34  ;;  %v10996_v3 = vsel %vm724_vm1, %v2089_v47, %v2097_v55 }
 0x3da   : > { %v10999_v7 = vadd.f32 %v1882_v57, %v14892_v33  ;;  %v1861_v61 = vadd.f32 %v10727_v39, %v1860_v60  ;;  %v1862_v11 = vpop.f32.mrb[45].mxu0  ;;  %v8657_v22 = vpack.i.bf16 %v2009_v20, %v2030_v8  ;;  %v2079_v18 = vsel %vm299_vm5, %v2065_v6, 0.0  ;;  %v14894_v57 = vld [vmem:[#allocation5_spill] sm:$0xff] }
 0x3db   : > { %v11006_v21 = vsel %vm577_vm7, %v1953_v2, %v1945_v31  ;;  %v11013_v34 = vsel %vm724_vm1, %v2097_v55, %v2089_v47  ;;  %v8662_v45 = vpack.i.bf16 %v2079_v18, %v2057_v5  ;;  %v1994_v53 = vrot.slane %v1913_v24, 7 }
 0x3dc   : > { %14893 = vst [vmem:[#allocation3_spill] sm:$0xff] %v10999_v7  ;;  %v1914_v14 = vmax.f32 %v10999_v7, 0.0  ;;  %v1883_v56 = vmul.f32 0.3, %v1861_v61  ;;  %8658 = vrot.lane.b32.xlu1 %v8657_v22, %s9427_s10  ;;  %8653 = vrot.lane.b32.xlu0 %v8652_v12, %s9428_s11  ;;  %v11017_v32 = vsel %vm577_vm7, %v1945_v31, %v1953_v2  ;;  %v2042_v6 = vrot.slane %v1913_v24, 1 }
 0x3dd   : > { %v1865_v51 = vpop.f32.mrb[46].mxu0  ;;  %v2090_v33 = vrot.slane %v1913_v24, 2  ;;  %v1946_v2 = vrot.slane %v1913_v24, 6 }
 0x3de   : > { %v11020_v20 = vadd.f32 %v1883_v56, %v14894_v57  ;;  %v1866_v54 = vadd.f32 %v10727_v39, %v1865_v51  ;;  %v1867_v60 = vpop.f32.mrb[47].mxu0  ;;  %v2002_v8 = vrot.slane %v1914_v14, 7  ;;  %v2050_v12 = vrot.slane %v1914_v14, 1  ;;  %v14896_v56 = vld [vmem:[#allocation4_spill] sm:$0xff] }
 0x3df   : > { %v2098_v61 = vrot.slane %v1914_v14, 2  ;;  %v1954_v47 = vrot.slane %v1914_v14, 6 }
 0x3e0   : > { %14895 = vst [vmem:[#allocation5_spill] sm:$0xff] %v11020_v20  ;;  %v1884_v55 = vmul.f32 0.3, %v1866_v54  ;;  %8663 = vrot.lane.b32.xlu1 %v8662_v45, %s9426_s9  ;;  %v2010_v5 = vsel %vm626_vm3, %v1994_v53, %v2002_v8  ;;  %v2018_v31 = vsel %vm626_vm3, %v2002_v8, %v1994_v53  ;;  %v1915_v11 = vmax.f32 %v11020_v20, 0.0 }
 0x3e1   : > { %v2032_v39 = vsel %vm292_vm6, %v2018_v31, 0.0  ;;  %v2066_v22 = vsel %vm675_vm2, %v2050_v12, %v2042_v6  ;;  %v11035_v18 = vsel %vm724_vm1, %v2090_v33, %v2098_v61  ;;  %v8667_v45 = vpack.i.bf16 %v1914_v14, %v1913_v24 }
 0x3e2   : > { %v11038_v51 = vadd.f32 %v1884_v55, %v14896_v56  ;;  %v8672_v57 = vpack.i.bf16 %v2010_v5, %v2032_v39  ;;  %v2058_v53 = vsel %vm675_vm2, %v2042_v6, %v2050_v12  ;;  %v2081_v54 = vsel %vm299_vm5, %v2066_v22, 0.0 }
 0x3e3   : > { %v11046_v60 = vsel %vm577_vm7, %v1954_v47, %v1946_v2  ;;  %v11053_v24 = vsel %vm724_vm1, %v2098_v61, %v2090_v33  ;;  %v11057_v14 = vsel %vm577_vm7, %v1946_v2, %v1954_v47  ;;  %v1995_v6 = vrot.slane %v1915_v11, 7 }
 0x3e4   : > { %14897 = vst [vmem:[#allocation4_spill] sm:$0xff] %v11038_v51  ;;  %v1916_v8 = vmax.f32 %v11038_v51, 0.0  ;;  %8668 = vrot.lane.b32.xlu1 %v8667_v45, %s9428_s11  ;;  %8673 = vrot.lane.b32.xlu0 %v8672_v57, %s9427_s10  ;;  %v8677_v12 = vpack.i.bf16 %v2081_v54, %v2058_v53  ;;  %v1947_v39 = vrot.slane %v1915_v11, 6  ;;  %v2091_v56 = vrot.slane %v1915_v11, 2 }
 0x3e5   : > { %v2043_v53 = vrot.slane %v1915_v11, 1 }
 0x3e6   : > { %v2003_v55 = vrot.slane %v1916_v8, 7  ;;  %v1955_v5 = vrot.slane %v1916_v8, 6  ;;  %v2099_v31 = vrot.slane %v1916_v8, 2  ;;  %v2051_v61 = vrot.slane %v1916_v8, 1 }
 0x3e8   : > { %8678 = vrot.lane.b32.xlu0 %v8677_v12, %s9426_s9  ;;  %v2019_v22 = vsel %vm626_vm3, %v2003_v55, %v1995_v6  ;;  %v11066_v47 = vsel %vm577_vm7, %v1955_v5, %v1947_v39  ;;  %v11070_v2 = vsel %vm577_vm7, %v1947_v39, %v1955_v5  ;;  %v11075_v45 = vsel %vm724_vm1, %v2091_v56, %v2099_v31 }
 0x3e9   : > { %v2034_v33 = vsel %vm292_vm6, %v2019_v22, 0.0  ;;  %v11079_v57 = vsel %vm724_vm1, %v2099_v31, %v2091_v56  ;;  %v2059_v54 = vsel %vm675_vm2, %v2043_v53, %v2051_v61  ;;  %v2011_v12 = vsel %vm626_vm3, %v1995_v6, %v2003_v55 }
 0x3ea   : > { %2176 = vrot.lane.b32.xlu1 %v2034_v33, %s9427_s10  ;;  %v2067_v5 = vsel %vm675_vm2, %v2051_v61, %v2043_v53  ;;  %v1972_v56 = vsel %vm286_vm8, %v10781_v46, 0.0  ;;  %v2117_v46 = vsel %vm303_vm11, %v10759_v16, 0.0 }
 0x3eb   : > { %v2083_v31 = vsel %vm299_vm5, %v2067_v5, 0.0 }
 0x3ec   : > { %2240 = vrot.lane.b32.xlu0 %v1915_v11, %s9428_s11 }
 0x3ee   : > { %2304 = vrot.lane.b32.xlu1 %v2059_v54, %s9426_s9 }
 0x3f0   : > { %2178 = vrot.lane.b32.xlu0 %v2011_v12, %s9427_s10 }
 0x3f2   : > { %2242 = vrot.lane.b32.xlu1 %v1916_v8, %s9428_s11 }
 0x3f4   : > { %2306 = vrot.lane.b32.xlu0 %v2083_v31, %s9426_s9 }
 0x422   : > { %v8579_v39 = vpop.permute.xlu1 %8578 }
 0x423   : > { %v8580_v33 = vunpack.i.l.bf16 %v8579_v39  ;;  %v8581_v51 = vunpack.i.h.bf16 %v8579_v39 }
 0x427   : > { %v8584_v11 = vpop.permute.xlu0 %8583 }
 0x428   : > { %v8585_v22 = vunpack.i.l.bf16 %v8584_v11  ;;  %v8586_v6 = vunpack.i.h.bf16 %v8584_v11 }
 0x42a   : > { %v2324_v55 = vsel %vm949_vm4, %v1972_v56, %v8585_v22  ;;  %v2325_v31 = vsel %vm949_vm4, %v10788_v1, %v8586_v6  ;;  %v1974_v22 = vsel %vm286_vm8, %v10823_v41, 0.0 }
 0x42b   : > { %v8589_v54 = vpop.permute.xlu0 %8588  ;;  %v2340_v8 = vsel %vm966_vm9, %v2324_v55, %v8580_v33  ;;  %v2341_v56 = vsel %vm966_vm9, %v2325_v31, %v8581_v51 }
 0x42c   : > { %v8590_v61 = vunpack.i.l.bf16 %v8589_v54  ;;  %v8591_v53 = vunpack.i.h.bf16 %v8589_v54 }
 0x42e   : > { %v8599_v12 = vpop.permute.xlu1 %8598  ;;  %v2356_v5 = vsel %vm983_vm10, %v2340_v8, %v8590_v61  ;;  %v2357_v6 = vsel %vm983_vm10, %v2341_v56, %v8591_v53  ;;  %v2119_v53 = vsel %vm303_vm11, %v10829_v0, 0.0 }
 0x42f   : > { %v8600_v20 = vunpack.i.l.bf16 %v8599_v12  ;;  %v8594_v7 = vpop.permute.xlu0 %8593  ;;  %2491 = vmatmul.mubr.f32.vlgmr.msra.gmra.mrb[32].mxu1 %v2356_v5  ;;  %v8601_v1 = vunpack.i.h.bf16 %v8599_v12 }
 0x430   : > { %v8595_v11 = vunpack.i.l.bf16 %v8594_v7  ;;  %7728 = vmatprep.mubr.msk.f32.mxu1 %vm949_vm4, %v2117_v46  ;;  %v8596_v54 = vunpack.i.h.bf16 %v8594_v7 }
 0x431   : > { %v2326_v55 = vsel %vm949_vm4, %v1974_v22, %v8600_v20  ;;  %v2327_v20 = vsel %vm949_vm4, %v10836_v58, %v8601_v1 }
 0x432   : > { %v8604_v39 = vpop.permute.xlu1 %8603  ;;  %v2342_v16 = vsel %vm966_vm9, %v2326_v55, %v8595_v11  ;;  %v2343_v7 = vsel %vm966_vm9, %v2327_v20, %v8596_v54 }
 0x433   : > { %v8605_v33 = vunpack.i.l.bf16 %v8604_v39  ;;  %2496 = vmatmul.mubr.f32.gmra.mrb[34].mxu1 %v2357_v6  ;;  %v8606_v8 = vunpack.i.h.bf16 %v8604_v39 }
 0x434   : > { %7729 = vmatprep.mubr.msk.f32.mxu1 %vm949_vm4, %v10812_v50  ;;  %v1976_v50 = vsel %vm286_vm8, %v10871_v4, 0.0 }
 0x435   : > { %v2358_v61 = vsel %vm983_vm10, %v2342_v16, %v8605_v33  ;;  %v2359_v58 = vsel %vm983_vm10, %v2343_v7, %v8606_v8  ;;  %v2121_v16 = vsel %vm303_vm11, %v10878_v23, 0.0 }
 0x436   : > { %v8609_v41 = vpop.permute.xlu1 %8608  ;;  %v8614_v5 = vpop.permute.xlu0 %8613 }
 0x437   : > { %v8615_v51 = vunpack.i.l.bf16 %v8614_v5  ;;  %2501 = vmatmul.mubr.f32.gmra.mrb[36].mxu1 %v2358_v61  ;;  %v8610_v12 = vunpack.i.l.bf16 %v8609_v41  ;;  %v8616_v46 = vunpack.i.h.bf16 %v8614_v5  ;;  %v8611_v56 = vunpack.i.h.bf16 %v8609_v41 }
 0x438   : > { %7730 = vmatprep.mubr.msk.f32.mxu1 %vm949_vm4, %v2119_v53 }
 0x439   : > { %v2328_v31 = vsel %vm949_vm4, %v1976_v50, %v8615_v51  ;;  %v2329_v6 = vsel %vm949_vm4, %v10884_v37, %v8616_v46  ;;  %v2123_v46 = vsel %vm303_vm11, %v10926_v42, 0.0 }
 0x43a   : > { %v8619_v11 = vpop.permute.xlu0 %8618  ;;  %v2344_v0 = vsel %vm966_vm9, %v2328_v31, %v8610_v12  ;;  %v2345_v61 = vsel %vm966_vm9, %v2329_v6, %v8611_v56 }
 0x43b   : > { %v8620_v22 = vunpack.i.l.bf16 %v8619_v11  ;;  %2506 = vmatmul.mubr.f32.gmra.mrb[38].mxu1 %v2359_v58  ;;  %v8621_v1 = vunpack.i.h.bf16 %v8619_v11 }
 0x43c   : > { %7731 = vmatprep.mubr.msk.f32.mxu1 %vm949_vm4, %v10861_v15  ;;  %v1978_v15 = vsel %vm286_vm8, %v10919_v44, 0.0 }
 0x43d   : > { %v2360_v55 = vsel %vm983_vm10, %v2344_v0, %v8620_v22  ;;  %v2361_v37 = vsel %vm983_vm10, %v2345_v61, %v8621_v1 }
 0x43e   : > { %v8629_v4 = vpop.permute.xlu1 %8628  ;;  %v8624_v39 = vpop.permute.xlu0 %8623 }
 0x43f   : > { %v8630_v33 = vunpack.i.l.bf16 %v8629_v4  ;;  %2511 = vmatmul.mubr.f32.gmra.mrb[40].mxu1 %v2360_v55  ;;  %v8625_v54 = vunpack.i.l.bf16 %v8624_v39  ;;  %v8631_v41 = vunpack.i.h.bf16 %v8629_v4  ;;  %v8626_v51 = vunpack.i.h.bf16 %v8624_v39 }
 0x440   : > { %7732 = vmatprep.mubr.msk.f32.mxu1 %vm949_vm4, %v2121_v16 }
 0x441   : > { %v2330_v8 = vsel %vm949_vm4, %v1978_v15, %v8630_v33  ;;  %v2331_v7 = vsel %vm949_vm4, %v10932_v19, %v8631_v41 }
 0x442   : > { %v8634_v5 = vpop.permute.xlu1 %8633  ;;  %v2346_v23 = vsel %vm966_vm9, %v2330_v8, %v8625_v54  ;;  %v2347_v58 = vsel %vm966_vm9, %v2331_v7, %v8626_v51  ;;  %v2125_v54 = vsel %vm303_vm11, %v10972_v35, 0.0 }
 0x443   : > { %v8635_v20 = vunpack.i.l.bf16 %v8634_v5  ;;  %2516 = vmatmul.mubr.f32.gmra.mrb[42].mxu1 %v2361_v37  ;;  %v8636_v12 = vunpack.i.h.bf16 %v8634_v5 }
 0x444   : > { %7733 = vmatprep.mubr.msk.f32.mxu1 %vm949_vm4, %v10909_v59  ;;  %v1980_v59 = vsel %vm286_vm8, %v10965_v36, 0.0 }
 0x445   : > { %v2362_v53 = vsel %vm983_vm10, %v2346_v23, %v8635_v20  ;;  %v2363_v19 = vsel %vm983_vm10, %v2347_v58, %v8636_v12 }
 0x446   : > { %v8639_v44 = vpop.permute.xlu1 %8638  ;;  %v8644_v50 = vpop.permute.xlu0 %8643 }
 0x447   : > { %v8645_v31 = vunpack.i.l.bf16 %v8644_v50  ;;  %2521 = vmatmul.mubr.f32.gmra.mrb[44].mxu1 %v2362_v53  ;;  %v8640_v11 = vunpack.i.l.bf16 %v8639_v44  ;;  %v8646_v0 = vunpack.i.h.bf16 %v8644_v50  ;;  %v8641_v1 = vunpack.i.h.bf16 %v8639_v44 }
 0x448   : > { %7734 = vmatprep.mubr.msk.f32.mxu1 %vm949_vm4, %v2123_v46  ;;  %v2127_v50 = vsel %vm303_vm11, %v11013_v34, 0.0 }
 0x449   : > { %v2332_v22 = vsel %vm949_vm4, %v1980_v59, %v8645_v31  ;;  %v2333_v33 = vsel %vm949_vm4, %v10976_v52, %v8646_v0 }
 0x44a   : > { %v8649_v56 = vpop.permute.xlu0 %8648  ;;  %v2348_v42 = vsel %vm966_vm9, %v2332_v22, %v8640_v11  ;;  %v2349_v61 = vsel %vm966_vm9, %v2333_v33, %v8641_v1 }
 0x44b   : > { %v8650_v55 = vunpack.i.l.bf16 %v8649_v56  ;;  %2526 = vmatmul.mubr.f32.gmra.mrb[46].mxu1 %v2363_v19  ;;  %v8651_v39 = vunpack.i.h.bf16 %v8649_v56 }
 0x44c   : > { %7735 = vmatprep.mubr.msk.f32.mxu1 %vm949_vm4, %v10955_v29  ;;  %v1982_v29 = vsel %vm286_vm8, %v11006_v21, 0.0 }
 0x44d   : > { %v2364_v4 = vsel %vm983_vm10, %v2348_v42, %v8650_v55  ;;  %v2365_v52 = vsel %vm983_vm10, %v2349_v61, %v8651_v39  ;;  %v1986_v42 = vsel %vm286_vm8, %v11066_v47, 0.0 }
 0x44e   : > { %v8659_v36 = vpop.permute.xlu1 %8658  ;;  %v8654_v6 = vpop.permute.xlu0 %8653 }
 0x44f   : > { %v8660_v16 = vunpack.i.l.bf16 %v8659_v36  ;;  %2531 = vmatmul.mubr.f32.gmra.mrb[48].mxu1 %v2364_v4  ;;  %v8655_v15 = vunpack.i.l.bf16 %v8654_v6  ;;  %v8661_v41 = vunpack.i.h.bf16 %v8659_v36  ;;  %v8656_v20 = vunpack.i.h.bf16 %v8654_v6 }
 0x450   : > { %7736 = vmatprep.mubr.msk.f32.mxu1 %vm949_vm4, %v2125_v54 }
 0x451   : > { %v2334_v8 = vsel %vm949_vm4, %v1982_v29, %v8660_v16  ;;  %v2335_v12 = vsel %vm949_vm4, %v11017_v32, %v8661_v41  ;;  %v7747_v41 = vld [vmem:[%s14865_s3 + $0x200] sm:$0xff] }
 0x452   : > { %v8664_v5 = vpop.permute.xlu1 %8663  ;;  %v2350_v35 = vsel %vm966_vm9, %v2334_v8, %v8655_v15  ;;  %v2351_v31 = vsel %vm966_vm9, %v2335_v12, %v8656_v20  ;;  %v2131_v15 = vsel %vm303_vm11, %v11079_v57, 0.0  ;;  %v7745_v57 = vld [vmem:[%s14865_s3 + $0x1f0] sm:$0xff]  ;;  %v7746_v8 = vld [vmem:[%s14865_s3 + $0x1f8] sm:$0xff] }
 0x453   : > { %v8665_v37 = vunpack.i.l.bf16 %v8664_v5  ;;  %2536 = vmatmul.mubr.f32.gmra.mrb[50].mxu1 %v2365_v52  ;;  %v8666_v51 = vunpack.i.h.bf16 %v8664_v5  ;;  %v8149_v5 = vpack.c.bf16 %v7746_v8, %v7745_v57  ;;  %v7748_v52 = vld [vmem:[%s14865_s3 + $0x208] sm:$0xff]  ;;  %v7750_v20 = vld [vmem:[%s14865_s3 + $0x218] sm:$0xff]  ;;  %v7753_v12 = vld [vmem:[%s14865_s3 + $0x230] sm:$0xff] }
 0x454   : > { %7737 = vmatprep.mubr.msk.f32.mxu1 %vm949_vm4, %v10996_v3  ;;  %v1984_v3 = vsel %vm286_vm8, %v11046_v60, 0.0 }
 0x455   : > { %v2366_v23 = vsel %vm983_vm10, %v2350_v35, %v8665_v37  ;;  %v2367_v32 = vsel %vm983_vm10, %v2351_v31, %v8666_v51  ;;  %v8152_v37 = vpack.c.bf16 %v7748_v52, %v7747_v41  ;;  %v7749_v35 = vld [vmem:[%s14865_s3 + $0x210] sm:$0xff]  ;;  %v7751_v51 = vld [vmem:[%s14865_s3 + $0x220] sm:$0xff] }
 0x456   : > { %v8669_v21 = vpop.permute.xlu1 %8668  ;;  %v8674_v53 = vpop.permute.xlu0 %8673 }
 0x457   : > { %v8675_v44 = vunpack.i.l.bf16 %v8674_v53  ;;  %2541 = vmatmul.mubr.f32.gmra.mrb[52].mxu1 %v2366_v23  ;;  %v8670_v7 = vunpack.i.l.bf16 %v8669_v21  ;;  %v8676_v11 = vunpack.i.h.bf16 %v8674_v53  ;;  %v8671_v0 = vunpack.i.h.bf16 %v8669_v21  ;;  %v7752_v21 = vld [vmem:[%s14865_s3 + $0x228] sm:$0xff] }
 0x458   : > { %7738 = vmatprep.mubr.msk.f32.mxu1 %vm949_vm4, %v2127_v50  ;;  %v8155_v23 = vpack.c.bf16 %v7750_v20, %v7749_v35  ;;  %v8158_v53 = vpack.c.bf16 %v7752_v21, %v7751_v51 }
 0x459   : > { %v2336_v46 = vsel %vm949_vm4, %v1984_v3, %v8675_v44  ;;  %v2337_v55 = vsel %vm949_vm4, %v11057_v14, %v8676_v11  ;;  %v7754_v44 = vld [vmem:[%s14865_s3 + $0x238] sm:$0xff]  ;;  %v7756_v3 = vld [vmem:[%s14865_s3 + $0x248] sm:$0xff] }
 0x45a   : > { %v8679_v59 = vpop.permute.xlu0 %8678  ;;  %v2352_v22 = vsel %vm966_vm9, %v2336_v46, %v8670_v7  ;;  %v2353_v39 = vsel %vm966_vm9, %v2337_v55, %v8671_v0  ;;  %v8161_v50 = vpack.c.bf16 %v7754_v44, %v7753_v12  ;;  %v7755_v7 = vld [vmem:[%s14865_s3 + $0x240] sm:$0xff]  ;;  %v7757_v46 = vld [vmem:[%s14865_s3 + $0x250] sm:$0xff]  ;;  %v7758_v11 = vld [vmem:[%s14865_s3 + $0x258] sm:$0xff] }
 0x45b   : > { %v8680_v58 = vunpack.i.l.bf16 %v8679_v59  ;;  %2546 = vmatmul.mubr.f32.gmra.mrb[54].mxu1 %v2367_v32  ;;  %v8681_v60 = vunpack.i.h.bf16 %v8679_v59  ;;  %v8164_v31 = vpack.c.bf16 %v7756_v3, %v7755_v7  ;;  %v8167_v59 = vpack.c.bf16 %v7758_v11, %v7757_v46  ;;  %v7759_v32 = vld [vmem:[%s14865_s3 + $0x260] sm:$0xff] }
 0x45c   : > { %7739 = vmatprep.mubr.msk.f32.mxu1 %vm949_vm4, %v11035_v18  ;;  %v2177_v34 = vpop.permute.xlu1 %2176  ;;  %v2129_v18 = vsel %vm303_vm11, %v11053_v24, 0.0 }
 0x45d   : > { %v2368_v56 = vsel %vm983_vm10, %v2352_v22, %v8680_v58  ;;  %v2338_v1 = vsel %vm949_vm4, %v1986_v42, %v2177_v34  ;;  %v2369_v6 = vsel %vm983_vm10, %v2353_v39, %v8681_v60  ;;  %v7760_v58 = vld [vmem:[%s14865_s3 + $0x268] sm:$0xff]  ;;  %v11286_v22 = vld [vmem:[%s14866_s4 + $0x2] ss:$0 sm:$0xff] }
 0x45e   : > { %v2241_v19 = vpop.permute.xlu0 %2240  ;;  %v8170_v34 = vpack.c.bf16 %v7760_v58, %v7759_v32 }
 0x45f   : > { %2551 = vmatmul.mubr.f32.gmra.mrb[56].mxu1 %v2368_v56  ;;  %v2354_v14 = vsel %vm966_vm9, %v2338_v1, %v2241_v19  ;;  %v7761_v1 = vld [vmem:[%s14865_s3 + $0x270] sm:$0xff] }
 0x460   : > { %7740 = vmatprep.mubr.msk.f32.mxu1 %vm949_vm4, %v2129_v18  ;;  %v2305_v4 = vpop.permute.xlu1 %2304 }
 0x461   : > { %v2370_v33 = vsel %vm983_vm10, %v2354_v14, %v2305_v4  ;;  %v7762_v4 = vld [vmem:[%s14865_s3 + $0x278] sm:$0xff] }
 0x462   : > { %v2179_v36 = vpop.permute.xlu0 %2178  ;;  %v8173_v39 = vpack.c.bf16 %v7762_v4, %v7761_v1 }
 0x463   : > { %2556 = vmatmul.mubr.f32.gmra.mrb[58].mxu1 %v2369_v6  ;;  %v2339_v47 = vsel %vm949_vm4, %v11070_v2, %v2179_v36  ;;  %v7743_v2 = vld [vmem:[%s14865_s3 + $0x1e0] sm:$0xff] }
 0x464   : > { %7741 = vmatprep.mubr.msk.f32.mxu1 %vm949_vm4, %v11075_v45  ;;  %v2243_v24 = vpop.permute.xlu1 %2242  ;;  %v7744_v45 = vld [vmem:[%s14865_s3 + $0x1e8] sm:$0xff] }
 0x465   : > { %v2355_v16 = vsel %vm966_vm9, %v2339_v47, %v2243_v24  ;;  %v8146_v61 = vpack.c.bf16 %v7744_v45, %v7743_v2 }
 0x466   : > { %v2307_v54 = vpop.permute.xlu0 %2306 }
 0x467   : > { %2561 = vmatmul.mubr.f32.gmra.mrb[60].mxu1 %v2370_v33  ;;  %v2371_v29 = vsel %vm983_vm10, %v2355_v16, %v2307_v54  ;;  %8147 = vmatpush1.bf16.msra.mxu0 %v8146_v61 }
 0x468   : > { %7742 = vmatprep.mubr.msk.f32.mxu1 %vm949_vm4, %v2131_v15  ;;  %8148 = vmatprep.subr.bf16.mxu0 %v14891_v28 }
 0x46b   : > { %2566 = vmatmul.mubr.f32.gmra.mrb[62].mxu1 %v2371_v29  ;;  %8150 = vmatpush1.bf16.msra.mxu0 %v8149_v5 }
 0x46c   : > { %8151 = vmatprep.subr.bf16.mxu0 %v14891_v28 }
 0x46f   : > { %8153 = vmatpush1.bf16.msra.mxu0 %v8152_v37 }
 0x470   : > { %8154 = vmatprep.subr.bf16.mxu0 %v14891_v28 }
 0x473   : > { %8156 = vmatpush1.bf16.msra.mxu0 %v8155_v23 }
 0x474   : > { %8157 = vmatprep.subr.bf16.mxu0 %v14891_v28 }
 0x477   : > { %8159 = vmatpush1.bf16.msra.mxu0 %v8158_v53 }
 0x478   : > { %8160 = vmatprep.subr.bf16.mxu0 %v14891_v28 }
 0x47b   : > { %8162 = vmatpush1.bf16.msra.mxu0 %v8161_v50 }
 0x47c   : > { %8163 = vmatprep.subr.bf16.mxu0 %v14891_v28 }
 0x47f   : > { %8165 = vmatpush1.bf16.msra.mxu0 %v8164_v31 }
 0x480   : > { %8166 = vmatprep.subr.bf16.mxu0 %v14891_v28 }
 0x483   : > { %8168 = vmatpush1.bf16.msra.mxu0 %v8167_v59 }
 0x484   : > { %8169 = vmatprep.subr.bf16.mxu0 %v14891_v28 }
 0x487   : > { %8171 = vmatpush1.bf16.msra.mxu0 %v8170_v34 }
 0x488   : > { %8172 = vmatprep.subr.bf16.mxu0 %v14891_v28 }
 0x48b   : > { %8174 = vmatpush1.bf16.msra.mxu0 %v8173_v39 }
 0x48c   : > { %8205 = vmatprep.subr.bf16.mxu0 %v14891_v28 }
 0x502   : > { %v2492_v0 = vpop.f32.mrb[32].mxu1 }
 0x503   : > { %v2493_v56 = vadd.f32 %v11286_v22, %v2492_v0  ;;  %v2494_v60 = vpop.f32.mrb[33].mxu1 }
 0x505   : > { %v2571_v19 = vmax.f32 %v2493_v56, 0.0 }
 0x506   : > { %v2497_v55 = vpop.f32.mrb[34].mxu1 }
 0x507   : > { %v2498_v42 = vadd.f32 %v11286_v22, %v2497_v55  ;;  %v2499_v18 = vpop.f32.mrb[35].mxu1  ;;  %v2610_v6 = vrot.slane %v2571_v19, 6  ;;  %v2754_v47 = vrot.slane %v2571_v19, 2  ;;  %v2658_v29 = vrot.slane %v2571_v19, 7 }
 0x508   : > { %v2706_v45 = vrot.slane %v2571_v19, 1 }
 0x509   : > { %v2572_v36 = vmax.f32 %v2498_v42, 0.0 }
 0x50a   : > { %v2502_v14 = vpop.f32.mrb[36].mxu1 }
 0x50b   : > { %v2618_v24 = vrot.slane %v2572_v36, 6  ;;  %v2503_v33 = vadd.f32 %v11286_v22, %v2502_v14  ;;  %v2504_v16 = vpop.f32.mrb[37].mxu1  ;;  %v8682_v54 = vpack.i.bf16 %v2572_v36, %v2571_v19  ;;  %v2762_v15 = vrot.slane %v2572_v36, 2 }
 0x50c   : > { %v2666_v2 = vrot.slane %v2572_v36, 7  ;;  %v2714_v61 = vrot.slane %v2572_v36, 1 }
 0x50d   : > { %v2573_v57 = vmax.f32 %v2503_v33, 0.0  ;;  %8683 = vrot.lane.b32.xlu0 %v8682_v54, %s9428_s11  ;;  %v2770_v8 = vsel %vm724_vm1, %v2754_v47, %v2762_v15  ;;  %v11303_v41 = vsel %vm577_vm7, %v2618_v24, %v2610_v6  ;;  %v11307_v5 = vsel %vm724_vm1, %v2762_v15, %v2754_v47 }
 0x50e   : > { %v2507_v52 = vpop.f32.mrb[38].mxu1  ;;  %7765 = vmatprep.mubr.msk.f32.mxu0 %vm949_vm4, %v2770_v8  ;;  %v2674_v37 = vsel %vm626_vm3, %v2658_v29, %v2666_v2  ;;  %v2682_v35 = vsel %vm626_vm3, %v2666_v2, %v2658_v29  ;;  %v2722_v20 = vsel %vm675_vm2, %v2706_v45, %v2714_v61  ;;  %v2730_v23 = vsel %vm675_vm2, %v2714_v61, %v2706_v45 }
 0x50f   : > { %v2508_v51 = vadd.f32 %v11286_v22, %v2507_v52  ;;  %v2509_v21 = vpop.f32.mrb[39].mxu1  ;;  %v2690_v53 = vsel %vm292_vm6, %v2682_v35, 0.0  ;;  %v2739_v12 = vsel %vm299_vm5, %v2730_v23, 0.0  ;;  %v11325_v3 = vsel %vm577_vm7, %v2610_v6, %v2618_v24 }
 0x510   : > { %v8687_v44 = vpack.i.bf16 %v2674_v37, %v2690_v53  ;;  %v8692_v50 = vpack.i.bf16 %v2739_v12, %v2722_v20  ;;  %v2611_v31 = vrot.slane %v2573_v57, 6  ;;  %v2659_v11 = vrot.slane %v2573_v57, 7 }
 0x511   : > { %v2574_v7 = vmax.f32 %v2508_v51, 0.0  ;;  %v2707_v56 = vrot.slane %v2573_v57, 1  ;;  %v2755_v19 = vrot.slane %v2573_v57, 2 }
 0x512   : > { %8688 = vrot.lane.b32.xlu1 %v8687_v44, %s9427_s10  ;;  %v2512_v46 = vpop.f32.mrb[40].mxu1 }
 0x513   : > { %v2619_v59 = vrot.slane %v2574_v7, 6  ;;  %v2513_v32 = vadd.f32 %v11286_v22, %v2512_v46  ;;  %v2514_v58 = vpop.f32.mrb[41].mxu1  ;;  %v2667_v34 = vrot.slane %v2574_v7, 7  ;;  %v8697_v0 = vpack.i.bf16 %v2574_v7, %v2573_v57 }
 0x514   : > { %v2715_v60 = vrot.slane %v2574_v7, 1  ;;  %v2763_v55 = vrot.slane %v2574_v7, 2 }
 0x515   : > { %v2575_v42 = vmax.f32 %v2513_v32, 0.0  ;;  %v2675_v18 = vsel %vm626_vm3, %v2659_v11, %v2667_v34  ;;  %v2683_v1 = vsel %vm626_vm3, %v2667_v34, %v2659_v11  ;;  %v11335_v4 = vsel %vm577_vm7, %v2619_v59, %v2611_v31 }
 0x516   : > { %8693 = vrot.lane.b32.xlu1 %v8692_v50, %s9426_s9  ;;  %v2517_v39 = vpop.f32.mrb[42].mxu1  ;;  %v2692_v36 = vsel %vm292_vm6, %v2683_v1, 0.0  ;;  %v2723_v6 = vsel %vm675_vm2, %v2707_v56, %v2715_v60  ;;  %v2731_v14 = vsel %vm675_vm2, %v2715_v60, %v2707_v56  ;;  %v11346_v47 = vsel %vm724_vm1, %v2755_v19, %v2763_v55 }
 0x517   : > { %v2518_v24 = vadd.f32 %v11286_v22, %v2517_v39  ;;  %v2519_v33 = vpop.f32.mrb[43].mxu1  ;;  %v8702_v16 = vpack.i.bf16 %v2675_v18, %v2692_v36  ;;  %v2741_v54 = vsel %vm299_vm5, %v2731_v14, 0.0  ;;  %v11354_v2 = vsel %vm724_vm1, %v2763_v55, %v2755_v19 }
 0x518   : > { %v8707_v15 = vpack.i.bf16 %v2741_v54, %v2723_v6  ;;  %v11358_v45 = vsel %vm577_vm7, %v2611_v31, %v2619_v59  ;;  %v2612_v61 = vrot.slane %v2575_v42, 6  ;;  %v2660_v8 = vrot.slane %v2575_v42, 7 }
 0x519   : > { %v2576_v29 = vmax.f32 %v2518_v24, 0.0  ;;  %8703 = vrot.lane.b32.xlu0 %v8702_v16, %s9427_s10  ;;  %v2708_v51 = vrot.slane %v2575_v42, 1  ;;  %v2756_v53 = vrot.slane %v2575_v42, 2 }
 0x51a   : > { %8698 = vrot.lane.b32.xlu1 %v8697_v0, %s9428_s11  ;;  %v2522_v57 = vpop.f32.mrb[44].mxu1 }
 0x51b   : > { %v2620_v52 = vrot.slane %v2576_v29, 6  ;;  %v2523_v37 = vadd.f32 %v11286_v22, %v2522_v57  ;;  %v2524_v35 = vpop.f32.mrb[45].mxu1  ;;  %v8712_v20 = vpack.i.bf16 %v2576_v29, %v2575_v42  ;;  %v2668_v23 = vrot.slane %v2576_v29, 7 }
 0x51c   : > { %v2716_v21 = vrot.slane %v2576_v29, 1  ;;  %v2764_v12 = vrot.slane %v2576_v29, 2 }
 0x51d   : > { %v2577_v44 = vmax.f32 %v2523_v37, 0.0  ;;  %8708 = vrot.lane.b32.xlu0 %v8707_v15, %s9426_s9  ;;  %v2676_v50 = vsel %vm626_vm3, %v2660_v8, %v2668_v23  ;;  %v2684_v7 = vsel %vm626_vm3, %v2668_v23, %v2660_v8  ;;  %v11369_v31 = vsel %vm577_vm7, %v2620_v52, %v2612_v61 }
 0x51e   : > { %v2527_v46 = vpop.f32.mrb[46].mxu1  ;;  %v2694_v11 = vsel %vm292_vm6, %v2684_v7, 0.0  ;;  %v2724_v59 = vsel %vm675_vm2, %v2708_v51, %v2716_v21  ;;  %v2732_v32 = vsel %vm675_vm2, %v2716_v21, %v2708_v51  ;;  %v11379_v58 = vsel %vm724_vm1, %v2756_v53, %v2764_v12 }
 0x51f   : > { %v2528_v34 = vadd.f32 %v11286_v22, %v2527_v46  ;;  %v2529_v0 = vpop.f32.mrb[47].mxu1  ;;  %v8717_v56 = vpack.i.bf16 %v2676_v50, %v2694_v11  ;;  %v2743_v60 = vsel %vm299_vm5, %v2732_v32, 0.0  ;;  %v11388_v42 = vsel %vm724_vm1, %v2764_v12, %v2756_v53 }
 0x520   : > { %v8722_v19 = vpack.i.bf16 %v2743_v60, %v2724_v59  ;;  %v11392_v18 = vsel %vm577_vm7, %v2612_v61, %v2620_v52  ;;  %v2613_v1 = vrot.slane %v2577_v44, 6  ;;  %v2661_v36 = vrot.slane %v2577_v44, 7 }
 0x521   : > { %v2578_v55 = vmax.f32 %v2528_v34, 0.0  ;;  %8713 = vrot.lane.b32.xlu0 %v8712_v20, %s9428_s11  ;;  %8718 = vrot.lane.b32.xlu1 %v8717_v56, %s9427_s10  ;;  %v2709_v54 = vrot.slane %v2577_v44, 1  ;;  %v2757_v29 = vrot.slane %v2577_v44, 2 }
 0x522   : > { %v2532_v39 = vpop.f32.mrb[48].mxu1 }
 0x523   : > { %v2621_v6 = vrot.slane %v2578_v55, 6  ;;  %v2533_v14 = vadd.f32 %v11286_v22, %v2532_v39  ;;  %v2534_v24 = vpop.f32.mrb[49].mxu1  ;;  %v2669_v33 = vrot.slane %v2578_v55, 7  ;;  %v8727_v16 = vpack.i.bf16 %v2578_v55, %v2577_v44 }
 0x524   : > { %v2717_v15 = vrot.slane %v2578_v55, 1  ;;  %v2765_v57 = vrot.slane %v2578_v55, 2 }
 0x525   : > { %v2579_v8 = vmax.f32 %v2533_v14, 0.0  ;;  %8723 = vrot.lane.b32.xlu1 %v8722_v19, %s9426_s9  ;;  %v2677_v61 = vsel %vm626_vm3, %v2661_v36, %v2669_v33  ;;  %v2685_v52 = vsel %vm626_vm3, %v2669_v33, %v2661_v36  ;;  %v11402_v37 = vsel %vm577_vm7, %v2621_v6, %v2613_v1 }
 0x526   : > { %v2537_v35 = vpop.f32.mrb[50].mxu1  ;;  %v2696_v20 = vsel %vm292_vm6, %v2685_v52, 0.0  ;;  %v2725_v23 = vsel %vm675_vm2, %v2709_v54, %v2717_v15  ;;  %v2733_v51 = vsel %vm675_vm2, %v2717_v15, %v2709_v54  ;;  %v11412_v21 = vsel %vm724_vm1, %v2757_v29, %v2765_v57 }
 0x527   : > { %v2538_v53 = vadd.f32 %v11286_v22, %v2537_v35  ;;  %v2539_v12 = vpop.f32.mrb[51].mxu1  ;;  %v8732_v44 = vpack.i.bf16 %v2677_v61, %v2696_v20  ;;  %v2745_v50 = vsel %vm299_vm5, %v2733_v51, 0.0  ;;  %v11421_v11 = vsel %vm724_vm1, %v2765_v57, %v2757_v29 }
 0x528   : > { %v8737_v7 = vpack.i.bf16 %v2745_v50, %v2725_v23  ;;  %v11425_v59 = vsel %vm577_vm7, %v2613_v1, %v2621_v6  ;;  %v2614_v32 = vrot.slane %v2579_v8, 6  ;;  %v2662_v0 = vrot.slane %v2579_v8, 7 }
 0x529   : > { %v2580_v46 = vmax.f32 %v2538_v53, 0.0  ;;  %8733 = vrot.lane.b32.xlu0 %v8732_v44, %s9427_s10  ;;  %8728 = vrot.lane.b32.xlu1 %v8727_v16, %s9428_s11  ;;  %v2710_v36 = vrot.slane %v2579_v8, 1  ;;  %v2758_v24 = vrot.slane %v2579_v8, 2 }
 0x52a   : > { %v2542_v34 = vpop.f32.mrb[52].mxu1 }
 0x52b   : > { %v2622_v56 = vrot.slane %v2580_v46, 6  ;;  %v2543_v60 = vadd.f32 %v11286_v22, %v2542_v34  ;;  %v2544_v19 = vpop.f32.mrb[53].mxu1  ;;  %v8742_v55 = vpack.i.bf16 %v2580_v46, %v2579_v8  ;;  %v2670_v39 = vrot.slane %v2580_v46, 7 }
 0x52c   : > { %v2718_v14 = vrot.slane %v2580_v46, 1  ;;  %v2766_v33 = vrot.slane %v2580_v46, 2 }
 0x52d   : > { %v2581_v16 = vmax.f32 %v2543_v60, 0.0  ;;  %8738 = vrot.lane.b32.xlu0 %v8737_v7, %s9426_s9  ;;  %v2678_v1 = vsel %vm626_vm3, %v2662_v0, %v2670_v39  ;;  %v2686_v6 = vsel %vm626_vm3, %v2670_v39, %v2662_v0  ;;  %v11435_v54 = vsel %vm577_vm7, %v2622_v56, %v2614_v32 }
 0x52e   : > { %v2547_v15 = vpop.f32.mrb[54].mxu1  ;;  %v2698_v29 = vsel %vm292_vm6, %v2686_v6, 0.0  ;;  %v2726_v57 = vsel %vm675_vm2, %v2710_v36, %v2718_v14  ;;  %v2734_v8 = vsel %vm675_vm2, %v2718_v14, %v2710_v36  ;;  %v11445_v61 = vsel %vm724_vm1, %v2758_v24, %v2766_v33 }
 0x52f   : > { %v2548_v52 = vadd.f32 %v11286_v22, %v2547_v15  ;;  %v2549_v35 = vpop.f32.mrb[55].mxu1  ;;  %v8747_v20 = vpack.i.bf16 %v2678_v1, %v2698_v29  ;;  %v2747_v23 = vsel %vm299_vm5, %v2734_v8, 0.0  ;;  %v11454_v12 = vsel %vm724_vm1, %v2766_v33, %v2758_v24 }
 0x530   : > { %v8752_v51 = vpack.i.bf16 %v2747_v23, %v2726_v57  ;;  %v11458_v44 = vsel %vm577_vm7, %v2614_v32, %v2622_v56  ;;  %v2615_v50 = vrot.slane %v2581_v16, 6  ;;  %v2663_v46 = vrot.slane %v2581_v16, 7 }
 0x531   : > { %v2582_v53 = vmax.f32 %v2548_v52, 0.0  ;;  %8743 = vrot.lane.b32.xlu0 %v8742_v55, %s9428_s11  ;;  %8748 = vrot.lane.b32.xlu1 %v8747_v20, %s9427_s10  ;;  %v2711_v55 = vrot.slane %v2581_v16, 1  ;;  %v2759_v14 = vrot.slane %v2581_v16, 2 }
 0x532   : > { %v2552_v7 = vpop.f32.mrb[56].mxu1 }
 0x533   : > { %v2623_v34 = vrot.slane %v2582_v53, 6  ;;  %v2553_v0 = vadd.f32 %v11286_v22, %v2552_v7  ;;  %v2554_v60 = vpop.f32.mrb[57].mxu1  ;;  %v2671_v19 = vrot.slane %v2582_v53, 7  ;;  %v8757_v39 = vpack.i.bf16 %v2582_v53, %v2581_v16 }
 0x534   : > { %v2719_v36 = vrot.slane %v2582_v53, 1  ;;  %v2767_v1 = vrot.slane %v2582_v53, 2 }
 0x535   : > { %v2583_v6 = vmax.f32 %v2553_v0, 0.0  ;;  %8753 = vrot.lane.b32.xlu1 %v8752_v51, %s9426_s9  ;;  %v2679_v32 = vsel %vm626_vm3, %v2663_v46, %v2671_v19  ;;  %v2687_v56 = vsel %vm626_vm3, %v2671_v19, %v2663_v46  ;;  %v11468_v24 = vsel %vm577_vm7, %v2623_v34, %v2615_v50 }
 0x536   : > { %v2557_v33 = vpop.f32.mrb[58].mxu1  ;;  %v2700_v15 = vsel %vm292_vm6, %v2687_v56, 0.0  ;;  %v2727_v16 = vsel %vm675_vm2, %v2711_v55, %v2719_v36  ;;  %v2735_v29 = vsel %vm675_vm2, %v2719_v36, %v2711_v55  ;;  %v11478_v57 = vsel %vm724_vm1, %v2759_v14, %v2767_v1 }
 0x537   : > { %v2558_v8 = vadd.f32 %v11286_v22, %v2557_v33  ;;  %v2559_v52 = vpop.f32.mrb[59].mxu1  ;;  %v8762_v35 = vpack.i.bf16 %v2679_v32, %v2700_v15  ;;  %v2749_v20 = vsel %vm299_vm5, %v2735_v29, 0.0  ;;  %v11487_v53 = vsel %vm724_vm1, %v2767_v1, %v2759_v14 }
 0x538   : > { %v8767_v23 = vpack.i.bf16 %v2749_v20, %v2727_v16  ;;  %v11491_v7 = vsel %vm577_vm7, %v2615_v50, %v2623_v34  ;;  %v2616_v46 = vrot.slane %v2583_v6, 6  ;;  %v2664_v60 = vrot.slane %v2583_v6, 7 }
 0x539   : > { %v2584_v51 = vmax.f32 %v2558_v8, 0.0  ;;  %8763 = vrot.lane.b32.xlu0 %v8762_v35, %s9427_s10  ;;  %8758 = vrot.lane.b32.xlu1 %v8757_v39, %s9428_s11  ;;  %v2712_v33 = vrot.slane %v2583_v6, 1  ;;  %v2760_v39 = vrot.slane %v2583_v6, 2 }
 0x53a   : > { %v2562_v0 = vpop.f32.mrb[60].mxu1 }
 0x53b   : > { %v2624_v19 = vrot.slane %v2584_v51, 6  ;;  %v2563_v55 = vadd.f32 %v11286_v22, %v2562_v0  ;;  %v2564_v36 = vpop.f32.mrb[61].mxu1  ;;  %v8772_v32 = vpack.i.bf16 %v2584_v51, %v2583_v6  ;;  %v2672_v56 = vrot.slane %v2584_v51, 7 }
 0x53c   : > { %v2720_v15 = vrot.slane %v2584_v51, 1  ;;  %v2768_v16 = vrot.slane %v2584_v51, 2 }
 0x53d   : > { %v2585_v29 = vmax.f32 %v2563_v55, 0.0  ;;  %8768 = vrot.lane.b32.xlu0 %v8767_v23, %s9426_s9  ;;  %v2680_v50 = vsel %vm626_vm3, %v2664_v60, %v2672_v56  ;;  %v2688_v34 = vsel %vm626_vm3, %v2672_v56, %v2664_v60  ;;  %v11501_v14 = vsel %vm577_vm7, %v2624_v19, %v2616_v46 }
 0x53e   : > { %v2567_v1 = vpop.f32.mrb[62].mxu1  ;;  %v2702_v8 = vsel %vm292_vm6, %v2688_v34, 0.0  ;;  %v2728_v6 = vsel %vm675_vm2, %v2712_v33, %v2720_v15  ;;  %v2736_v52 = vsel %vm675_vm2, %v2720_v15, %v2712_v33  ;;  %v11511_v35 = vsel %vm724_vm1, %v2760_v39, %v2768_v16 }
 0x53f   : > { %v2568_v20 = vadd.f32 %v11286_v22, %v2567_v1  ;;  %v2569_v23 = vpop.f32.mrb[63].mxu1  ;;  %v8777_v51 = vpack.i.bf16 %v2680_v50, %v2702_v8  ;;  %v2751_v0 = vsel %vm299_vm5, %v2736_v52, 0.0  ;;  %v11520_v36 = vsel %vm724_vm1, %v2768_v16, %v2760_v39 }
 0x540   : > { %v8782_v60 = vpack.i.bf16 %v2751_v0, %v2728_v6  ;;  %v11524_v56 = vsel %vm577_vm7, %v2616_v46, %v2624_v19  ;;  %v2665_v22 = vrot.slane %v2585_v29, 7  ;;  %v2713_v33 = vrot.slane %v2585_v29, 1 }
 0x541   : > { %v2586_v55 = vmax.f32 %v2568_v20, 0.0  ;;  %8773 = vrot.lane.b32.xlu0 %v8772_v32, %s9428_s11  ;;  %8778 = vrot.lane.b32.xlu1 %v8777_v51, %s9427_s10  ;;  %v2617_v8 = vrot.slane %v2585_v29, 6  ;;  %v2761_v6 = vrot.slane %v2585_v29, 2 }
 0x543   : > { %v2673_v15 = vrot.slane %v2586_v55, 7  ;;  %v2721_v50 = vrot.slane %v2586_v55, 1  ;;  %v2625_v34 = vrot.slane %v2586_v55, 6  ;;  %v2769_v1 = vrot.slane %v2586_v55, 2 }
 0x545   : > { %8783 = vrot.lane.b32.xlu1 %v8782_v60, %s9426_s9  ;;  %v2689_v32 = vsel %vm626_vm3, %v2673_v15, %v2665_v22  ;;  %v2729_v39 = vsel %vm675_vm2, %v2713_v33, %v2721_v50  ;;  %v2681_v46 = vsel %vm626_vm3, %v2665_v22, %v2673_v15  ;;  %v2737_v19 = vsel %vm675_vm2, %v2721_v50, %v2713_v33 }
 0x546   : > { %v2704_v16 = vsel %vm292_vm6, %v2689_v32, 0.0  ;;  %v11539_v52 = vsel %vm577_vm7, %v2625_v34, %v2617_v8  ;;  %v11543_v20 = vsel %vm577_vm7, %v2617_v8, %v2625_v34  ;;  %v11548_v23 = vsel %vm724_vm1, %v2761_v6, %v2769_v1 }
 0x547   : > { %2846 = vrot.lane.b32.xlu0 %v2704_v16, %s9427_s10  ;;  %v11552_v51 = vsel %vm724_vm1, %v2769_v1, %v2761_v6  ;;  %v2753_v0 = vsel %vm299_vm5, %v2737_v19, 0.0  ;;  %v2642_v15 = vsel %vm286_vm8, %v11303_v41, 0.0  ;;  %v2787_v41 = vsel %vm303_vm11, %v11307_v5, 0.0 }
 0x549   : > { %2910 = vrot.lane.b32.xlu1 %v2585_v29, %s9428_s11 }
 0x54b   : > { %2974 = vrot.lane.b32.xlu0 %v2729_v39, %s9426_s9 }
 0x54d   : > { %2848 = vrot.lane.b32.xlu1 %v2681_v46, %s9427_s10 }
 0x54f   : > { %2912 = vrot.lane.b32.xlu0 %v2586_v55, %s9428_s11 }
 0x551   : > { %2976 = vrot.lane.b32.xlu1 %v2753_v0, %s9426_s9 }
 0x57f   : > { %v8684_v22 = vpop.permute.xlu0 %8683 }
 0x580   : > { %v8685_v34 = vunpack.i.l.bf16 %v8684_v22  ;;  %v8686_v19 = vunpack.i.h.bf16 %v8684_v22 }
 0x584   : > { %v8689_v60 = vpop.permute.xlu1 %8688 }
 0x585   : > { %v8690_v33 = vunpack.i.l.bf16 %v8689_v60  ;;  %v8691_v50 = vunpack.i.h.bf16 %v8689_v60 }
 0x587   : > { %v2994_v29 = vsel %vm949_vm4, %v2642_v15, %v8690_v33  ;;  %v2995_v46 = vsel %vm949_vm4, %v11325_v3, %v8691_v50  ;;  %v2644_v33 = vsel %vm286_vm8, %v11335_v4, 0.0 }
 0x588   : > { %v8694_v1 = vpop.permute.xlu1 %8693  ;;  %v3010_v55 = vsel %vm966_vm9, %v2994_v29, %v8685_v34  ;;  %v3011_v15 = vsel %vm966_vm9, %v2995_v46, %v8686_v19 }
 0x589   : > { %v8695_v8 = vunpack.i.l.bf16 %v8694_v1  ;;  %v8696_v6 = vunpack.i.h.bf16 %v8694_v1 }
 0x58b   : > { %v8704_v32 = vpop.permute.xlu0 %8703  ;;  %v3026_v39 = vsel %vm983_vm10, %v3010_v55, %v8695_v8  ;;  %v3027_v50 = vsel %vm983_vm10, %v3011_v15, %v8696_v6  ;;  %v2789_v6 = vsel %vm303_vm11, %v11354_v2, 0.0 }
 0x58c   : > { %v8705_v16 = vunpack.i.l.bf16 %v8704_v32  ;;  %v8699_v0 = vpop.permute.xlu1 %8698  ;;  %3161 = vmatmul.mubr.f32.vlgmr.msra.gmra.mrb[48].mxu0 %v3026_v39  ;;  %v8706_v3 = vunpack.i.h.bf16 %v8704_v32 }
 0x58d   : > { %v8700_v60 = vunpack.i.l.bf16 %v8699_v0  ;;  %7766 = vmatprep.mubr.msk.f32.mxu0 %vm949_vm4, %v2787_v41  ;;  %v8701_v1 = vunpack.i.h.bf16 %v8699_v0 }
 0x58e   : > { %v2996_v29 = vsel %vm949_vm4, %v2644_v33, %v8705_v16  ;;  %v2997_v46 = vsel %vm949_vm4, %v11358_v45, %v8706_v3 }
 0x58f   : > { %v8709_v22 = vpop.permute.xlu0 %8708  ;;  %v3012_v5 = vsel %vm966_vm9, %v2996_v29, %v8700_v60  ;;  %v3013_v16 = vsel %vm966_vm9, %v2997_v46, %v8701_v1 }
 0x590   : > { %v8710_v34 = vunpack.i.l.bf16 %v8709_v22  ;;  %3166 = vmatmul.mubr.f32.gmra.mrb[50].mxu0 %v3027_v50  ;;  %v8711_v55 = vunpack.i.h.bf16 %v8709_v22 }
 0x591   : > { %7767 = vmatprep.mubr.msk.f32.mxu0 %vm949_vm4, %v11346_v47  ;;  %v2646_v47 = vsel %vm286_vm8, %v11369_v31, 0.0 }
 0x592   : > { %v3028_v8 = vsel %vm983_vm10, %v3012_v5, %v8710_v34  ;;  %v3029_v45 = vsel %vm983_vm10, %v3013_v16, %v8711_v55  ;;  %v2791_v5 = vsel %vm303_vm11, %v11388_v42, 0.0 }
 0x593   : > { %v8714_v4 = vpop.permute.xlu0 %8713  ;;  %v8719_v39 = vpop.permute.xlu1 %8718 }
 0x594   : > { %v8720_v32 = vunpack.i.l.bf16 %v8719_v39  ;;  %3171 = vmatmul.mubr.f32.gmra.mrb[52].mxu0 %v3028_v8  ;;  %v8715_v19 = vunpack.i.l.bf16 %v8714_v4  ;;  %v8721_v41 = vunpack.i.h.bf16 %v8719_v39  ;;  %v8716_v15 = vunpack.i.h.bf16 %v8714_v4 }
 0x595   : > { %7768 = vmatprep.mubr.msk.f32.mxu0 %vm949_vm4, %v2789_v6 }
 0x596   : > { %v2998_v0 = vsel %vm949_vm4, %v2646_v47, %v8720_v32  ;;  %v2999_v50 = vsel %vm949_vm4, %v11392_v18, %v8721_v41  ;;  %v2793_v41 = vsel %vm303_vm11, %v11421_v11, 0.0 }
 0x597   : > { %v8724_v60 = vpop.permute.xlu1 %8723  ;;  %v3014_v2 = vsel %vm966_vm9, %v2998_v0, %v8715_v19  ;;  %v3015_v8 = vsel %vm966_vm9, %v2999_v50, %v8716_v15 }
 0x598   : > { %v8725_v33 = vunpack.i.l.bf16 %v8724_v60  ;;  %3176 = vmatmul.mubr.f32.gmra.mrb[54].mxu0 %v3029_v45  ;;  %v8726_v3 = vunpack.i.h.bf16 %v8724_v60 }
 0x599   : > { %7769 = vmatprep.mubr.msk.f32.mxu0 %vm949_vm4, %v11379_v58  ;;  %v2648_v58 = vsel %vm286_vm8, %v11402_v37, 0.0 }
 0x59a   : > { %v3030_v29 = vsel %vm983_vm10, %v3014_v2, %v8725_v33  ;;  %v3031_v18 = vsel %vm983_vm10, %v3015_v8, %v8726_v3 }
 0x59b   : > { %v8734_v31 = vpop.permute.xlu0 %8733  ;;  %v8729_v22 = vpop.permute.xlu1 %8728 }
 0x59c   : > { %v8735_v34 = vunpack.i.l.bf16 %v8734_v31  ;;  %3181 = vmatmul.mubr.f32.gmra.mrb[56].mxu0 %v3030_v29  ;;  %v8730_v1 = vunpack.i.l.bf16 %v8729_v22  ;;  %v8736_v4 = vunpack.i.h.bf16 %v8734_v31  ;;  %v8731_v32 = vunpack.i.h.bf16 %v8729_v22 }
 0x59d   : > { %7770 = vmatprep.mubr.msk.f32.mxu0 %vm949_vm4, %v2791_v5 }
 0x59e   : > { %v3000_v55 = vsel %vm949_vm4, %v2648_v58, %v8735_v34  ;;  %v3001_v16 = vsel %vm949_vm4, %v11425_v59, %v8736_v4 }
 0x59f   : > { %v8739_v39 = vpop.permute.xlu0 %8738  ;;  %v3016_v42 = vsel %vm966_vm9, %v3000_v55, %v8730_v1  ;;  %v3017_v45 = vsel %vm966_vm9, %v3001_v16, %v8731_v32  ;;  %v2795_v1 = vsel %vm303_vm11, %v11454_v12, 0.0 }
 0x5a0   : > { %v8740_v46 = vunpack.i.l.bf16 %v8739_v39  ;;  %3186 = vmatmul.mubr.f32.gmra.mrb[58].mxu0 %v3031_v18  ;;  %v8741_v19 = vunpack.i.h.bf16 %v8739_v39 }
 0x5a1   : > { %7771 = vmatprep.mubr.msk.f32.mxu0 %vm949_vm4, %v11412_v21  ;;  %v2650_v21 = vsel %vm286_vm8, %v11435_v54, 0.0 }
 0x5a2   : > { %v3032_v6 = vsel %vm983_vm10, %v3016_v42, %v8740_v46  ;;  %v3033_v59 = vsel %vm983_vm10, %v3017_v45, %v8741_v19 }
 0x5a3   : > { %v8744_v37 = vpop.permute.xlu0 %8743  ;;  %v8749_v47 = vpop.permute.xlu1 %8748 }
 0x5a4   : > { %v8750_v0 = vunpack.i.l.bf16 %v8749_v47  ;;  %3191 = vmatmul.mubr.f32.gmra.mrb[60].mxu0 %v3032_v6  ;;  %v8745_v60 = vunpack.i.l.bf16 %v8744_v37  ;;  %v8751_v2 = vunpack.i.h.bf16 %v8749_v47  ;;  %v8746_v3 = vunpack.i.h.bf16 %v8744_v37 }
 0x5a5   : > { %7772 = vmatprep.mubr.msk.f32.mxu0 %vm949_vm4, %v2793_v41  ;;  %v2797_v47 = vsel %vm303_vm11, %v11487_v53, 0.0 }
 0x5a6   : > { %v3002_v33 = vsel %vm949_vm4, %v2650_v21, %v8750_v0  ;;  %v3003_v34 = vsel %vm949_vm4, %v11458_v44, %v8751_v2 }
 0x5a7   : > { %v8754_v15 = vpop.permute.xlu1 %8753  ;;  %v3018_v11 = vsel %vm966_vm9, %v3002_v33, %v8745_v60  ;;  %v3019_v8 = vsel %vm966_vm9, %v3003_v34, %v8746_v3 }
 0x5a8   : > { %v8755_v29 = vunpack.i.l.bf16 %v8754_v15  ;;  %3196 = vmatmul.mubr.f32.gmra.mrb[62].mxu0 %v3033_v59  ;;  %v8756_v22 = vunpack.i.h.bf16 %v8754_v15 }
 0x5a9   : > { %7773 = vmatprep.mubr.msk.f32.mxu0 %vm949_vm4, %v11445_v61  ;;  %v2652_v61 = vsel %vm286_vm8, %v11468_v24, 0.0 }
 0x5aa   : > { %v3034_v31 = vsel %vm983_vm10, %v3018_v11, %v8755_v29  ;;  %v3035_v44 = vsel %vm983_vm10, %v3019_v8, %v8756_v22  ;;  %v2656_v11 = vsel %vm286_vm8, %v11539_v52, 0.0 }
 0x5ab   : > { %v8764_v54 = vpop.permute.xlu0 %8763  ;;  %v8759_v50 = vpop.permute.xlu1 %8758 }
 0x5ac   : > { %v8765_v5 = vunpack.i.l.bf16 %v8764_v54  ;;  %3201 = vmatmul.mubr.f32.gmra.mrb[64].mxu0 %v3034_v31  ;;  %v8760_v58 = vunpack.i.l.bf16 %v8759_v50  ;;  %v8766_v4 = vunpack.i.h.bf16 %v8764_v54  ;;  %v8761_v46 = vunpack.i.h.bf16 %v8759_v50 }
 0x5ad   : > { %7774 = vmatprep.mubr.msk.f32.mxu0 %vm949_vm4, %v2795_v1 }
 0x5ae   : > { %v3004_v55 = vsel %vm949_vm4, %v2652_v61, %v8765_v5  ;;  %v3005_v19 = vsel %vm949_vm4, %v11491_v7, %v8766_v4  ;;  %v7785_v4 = vld [vmem:[%s14865_s3 + $0x2a0] sm:$0xff] }
 0x5af   : > { %v8769_v39 = vpop.permute.xlu0 %8768  ;;  %v3020_v12 = vsel %vm966_vm9, %v3004_v55, %v8760_v58  ;;  %v3021_v0 = vsel %vm966_vm9, %v3005_v19, %v8761_v46  ;;  %v2801_v58 = vsel %vm303_vm11, %v11552_v51, 0.0  ;;  %v7783_v51 = vld [vmem:[%s14865_s3 + $0x290] sm:$0xff]  ;;  %v7784_v55 = vld [vmem:[%s14865_s3 + $0x298] sm:$0xff] }
 0x5b0   : > { %v8770_v18 = vunpack.i.l.bf16 %v8769_v39  ;;  %3206 = vmatmul.mubr.f32.gmra.mrb[66].mxu0 %v3035_v44  ;;  %v8771_v32 = vunpack.i.h.bf16 %v8769_v39  ;;  %v8179_v39 = vpack.c.bf16 %v7784_v55, %v7783_v51  ;;  %v7786_v44 = vld [vmem:[%s14865_s3 + $0x2a8] sm:$0xff]  ;;  %v7788_v46 = vld [vmem:[%s14865_s3 + $0x2b8] sm:$0xff]  ;;  %v7791_v19 = vld [vmem:[%s14865_s3 + $0x2d0] sm:$0xff] }
 0x5b1   : > { %7775 = vmatprep.mubr.msk.f32.mxu0 %vm949_vm4, %v11478_v57  ;;  %v2654_v57 = vsel %vm286_vm8, %v11501_v14, 0.0 }
 0x5b2   : > { %v3036_v42 = vsel %vm983_vm10, %v3020_v12, %v8770_v18  ;;  %v3037_v7 = vsel %vm983_vm10, %v3021_v0, %v8771_v32  ;;  %v8182_v18 = vpack.c.bf16 %v7786_v44, %v7785_v4  ;;  %v7787_v12 = vld [vmem:[%s14865_s3 + $0x2b0] sm:$0xff]  ;;  %v7789_v32 = vld [vmem:[%s14865_s3 + $0x2c0] sm:$0xff] }
 0x5b3   : > { %v8774_v24 = vpop.permute.xlu0 %8773  ;;  %v8779_v6 = vpop.permute.xlu1 %8778 }
 0x5b4   : > { %v8780_v37 = vunpack.i.l.bf16 %v8779_v6  ;;  %3211 = vmatmul.mubr.f32.gmra.mrb[68].mxu0 %v3036_v42  ;;  %v8775_v16 = vunpack.i.l.bf16 %v8774_v24  ;;  %v8781_v60 = vunpack.i.h.bf16 %v8779_v6  ;;  %v8776_v2 = vunpack.i.h.bf16 %v8774_v24  ;;  %v7790_v24 = vld [vmem:[%s14865_s3 + $0x2c8] sm:$0xff] }
 0x5b5   : > { %7776 = vmatprep.mubr.msk.f32.mxu0 %vm949_vm4, %v2797_v47  ;;  %v8185_v42 = vpack.c.bf16 %v7788_v46, %v7787_v12  ;;  %v8188_v6 = vpack.c.bf16 %v7790_v24, %v7789_v32 }
 0x5b6   : > { %v3006_v41 = vsel %vm949_vm4, %v2654_v57, %v8780_v37  ;;  %v3007_v29 = vsel %vm949_vm4, %v11524_v56, %v8781_v60  ;;  %v7792_v37 = vld [vmem:[%s14865_s3 + $0x2d8] sm:$0xff]  ;;  %v7794_v57 = vld [vmem:[%s14865_s3 + $0x2e8] sm:$0xff] }
 0x5b7   : > { %v8784_v21 = vpop.permute.xlu1 %8783  ;;  %v3022_v33 = vsel %vm966_vm9, %v3006_v41, %v8775_v16  ;;  %v3023_v22 = vsel %vm966_vm9, %v3007_v29, %v8776_v2  ;;  %v8191_v47 = vpack.c.bf16 %v7792_v37, %v7791_v19  ;;  %v7793_v16 = vld [vmem:[%s14865_s3 + $0x2e0] sm:$0xff]  ;;  %v7795_v41 = vld [vmem:[%s14865_s3 + $0x2f0] sm:$0xff]  ;;  %v7796_v60 = vld [vmem:[%s14865_s3 + $0x2f8] sm:$0xff] }
 0x5b8   : > { %v8785_v45 = vunpack.i.l.bf16 %v8784_v21  ;;  %3216 = vmatmul.mubr.f32.gmra.mrb[70].mxu0 %v3037_v7  ;;  %v8786_v14 = vunpack.i.h.bf16 %v8784_v21  ;;  %v8194_v0 = vpack.c.bf16 %v7794_v57, %v7793_v16  ;;  %v8197_v21 = vpack.c.bf16 %v7796_v60, %v7795_v41  ;;  %v7797_v7 = vld [vmem:[%s14865_s3 + $0x300] sm:$0xff] }
 0x5b9   : > { %7777 = vmatprep.mubr.msk.f32.mxu0 %vm949_vm4, %v11511_v35  ;;  %v2847_v53 = vpop.permute.xlu0 %2846  ;;  %v2799_v35 = vsel %vm303_vm11, %v11520_v36, 0.0 }
 0x5ba   : > { %v3038_v15 = vsel %vm983_vm10, %v3022_v33, %v8785_v45  ;;  %v3008_v3 = vsel %vm949_vm4, %v2656_v11, %v2847_v53  ;;  %v3039_v50 = vsel %vm983_vm10, %v3023_v22, %v8786_v14  ;;  %v7798_v45 = vld [vmem:[%s14865_s3 + $0x308] sm:$0xff]  ;;  %v11753_v33 = vld [vmem:[%s14866_s4 + $0x3] ss:$0 sm:$0xff] }
 0x5bb   : > { %v2911_v59 = vpop.permute.xlu1 %2910  ;;  %v8200_v53 = vpack.c.bf16 %v7798_v45, %v7797_v7 }
 0x5bc   : > { %3221 = vmatmul.mubr.f32.gmra.mrb[72].mxu0 %v3038_v15  ;;  %v3024_v56 = vsel %vm966_vm9, %v3008_v3, %v2911_v59 }
 0x5bd   : > { %7778 = vmatprep.mubr.msk.f32.mxu0 %vm949_vm4, %v2799_v35  ;;  %v2975_v31 = vpop.permute.xlu0 %2974 }
 0x5be   : > { %v3040_v34 = vsel %vm983_vm10, %v3024_v56, %v2975_v31 }
 0x5bf   : > { %v2849_v54 = vpop.permute.xlu1 %2848 }
 0x5c0   : > { %3226 = vmatmul.mubr.f32.gmra.mrb[74].mxu0 %v3039_v50  ;;  %v3009_v52 = vsel %vm949_vm4, %v11543_v20, %v2849_v54  ;;  %v7781_v20 = vld [vmem:[%s14865_s3 + $0x280] sm:$0xff] }
 0x5c1   : > { %7779 = vmatprep.mubr.msk.f32.mxu0 %vm949_vm4, %v11548_v23  ;;  %v2913_v36 = vpop.permute.xlu0 %2912  ;;  %v7782_v23 = vld [vmem:[%s14865_s3 + $0x288] sm:$0xff] }
 0x5c2   : > { %v3025_v5 = vsel %vm966_vm9, %v3009_v52, %v2913_v36  ;;  %v8176_v8 = vpack.c.bf16 %v7782_v23, %v7781_v20  ;;  %v7799_v36 = vld [vmem:[%s14865_s3 + $0x310] sm:$0xff] }
 0x5c3   : > { %v2977_v1 = vpop.permute.xlu1 %2976 }
 0x5c4   : > { %3231 = vmatmul.mubr.f32.gmra.mrb[76].mxu0 %v3040_v34  ;;  %v3041_v61 = vsel %vm983_vm10, %v3025_v5, %v2977_v1  ;;  %8177 = vmatpush1.bf16.msra.mxu1 %v8176_v8 }
 0x5c5   : > { %7780 = vmatprep.mubr.msk.f32.mxu0 %vm949_vm4, %v2801_v58  ;;  %8178 = vmatprep.subr.bf16.mxu1 %v14891_v28 }
 0x5c8   : > { %3236 = vmatmul.mubr.f32.gmra.mrb[78].mxu0 %v3041_v61  ;;  %8180 = vmatpush1.bf16.msra.mxu1 %v8179_v39 }
 0x5c9   : > { %8181 = vmatprep.subr.bf16.mxu1 %v14891_v28 }
 0x5cc   : > { %8183 = vmatpush1.bf16.msra.mxu1 %v8182_v18 }
 0x5cd   : > { %8184 = vmatprep.subr.bf16.mxu1 %v14891_v28 }
 0x5d0   : > { %8186 = vmatpush1.bf16.msra.mxu1 %v8185_v42 }
 0x5d1   : > { %8187 = vmatprep.subr.bf16.mxu1 %v14891_v28 }
 0x5d4   : > { %8189 = vmatpush1.bf16.msra.mxu1 %v8188_v6 }
 0x5d5   : > { %8190 = vmatprep.subr.bf16.mxu1 %v14891_v28 }
 0x5d8   : > { %8192 = vmatpush1.bf16.msra.mxu1 %v8191_v47 }
 0x5d9   : > { %8193 = vmatprep.subr.bf16.mxu1 %v14891_v28 }
 0x5dc   : > { %8195 = vmatpush1.bf16.msra.mxu1 %v8194_v0 }
 0x5dd   : > { %8196 = vmatprep.subr.bf16.mxu1 %v14891_v28 }
 0x5e0   : > { %8198 = vmatpush1.bf16.msra.mxu1 %v8197_v21 }
 0x5e1   : > { %8199 = vmatprep.subr.bf16.mxu1 %v14891_v28 }
 0x5e4   : > { %8201 = vmatpush1.bf16.msra.mxu1 %v8200_v53 }
 0x5e5   : > { %8202 = vmatprep.subr.bf16.mxu1 %v14891_v28 }
 0x65f   : > { %v3162_v2 = vpop.f32.mrb[48].mxu0 }
 0x660   : > { %v3163_v15 = vadd.f32 %v11753_v33, %v3162_v2  ;;  %v3164_v14 = vpop.f32.mrb[49].mxu0 }
 0x662   : > { %v3241_v59 = vmul.f32 0.3, %v3163_v15 }
 0x663   : > { %v3167_v29 = vpop.f32.mrb[50].mxu0 }
 0x664   : > { %v11757_v11 = vadd.f32 %v3241_v59, %v10731_v26  ;;  %v3168_v35 = vadd.f32 %v11753_v33, %v3167_v29  ;;  %v3169_v3 = vpop.f32.mrb[51].mxu0  ;;  %v7800_v26 = vld [vmem:[%s14865_s3 + $0x318] sm:$0xff] }
 0x665   : > { %v8203_v34 = vpack.c.bf16 %v7800_v26, %v7799_v36 }
 0x666   : > { %v3242_v31 = vmul.f32 0.3, %v3168_v35  ;;  %v3273_v22 = vmax.f32 %v11757_v11, 0.0 }
 0x667   : > { %v3172_v54 = vpop.f32.mrb[52].mxu0  ;;  %8204 = vmatpush1.bf16.msra.mxu1 %v8203_v34 }
 0x668   : > { %v11762_v50 = vadd.f32 %v3242_v31, %v10736_v27  ;;  %v3173_v56 = vadd.f32 %v11753_v33, %v3172_v54  ;;  %v3174_v52 = vpop.f32.mrb[53].mxu0  ;;  %v3456_v61 = vrot.slane %v3273_v22, 2  ;;  %v3360_v20 = vrot.slane %v3273_v22, 7  ;;  %8235 = vmatprep.subr.bf16.mxu1 %v14891_v28 }
 0x669   : > { %v3408_v27 = vrot.slane %v3273_v22, 1  ;;  %v3312_v18 = vrot.slane %v3273_v22, 6 }
 0x66a   : > { %v3274_v5 = vmax.f32 %v11762_v50, 0.0  ;;  %v3243_v1 = vmul.f32 0.3, %v3173_v56 }
 0x66b   : > { %v3177_v58 = vpop.f32.mrb[54].mxu0 }
 0x66c   : > { %v11773_v23 = vadd.f32 %v3243_v1, %v10747_v25  ;;  %v3178_v8 = vadd.f32 %v11753_v33, %v3177_v58  ;;  %v3179_v51 = vpop.f32.mrb[55].mxu0  ;;  %v8787_v55 = vpack.i.bf16 %v3274_v5, %v3273_v22  ;;  %v3464_v4 = vrot.slane %v3274_v5, 2 }
 0x66d   : > { %v3368_v39 = vrot.slane %v3274_v5, 7  ;;  %v3416_v44 = vrot.slane %v3274_v5, 1  ;;  %v3320_v12 = vrot.slane %v3274_v5, 6 }
 0x66e   : > { %v11778_v46 = vmax.f32 %v11773_v23, 0.0  ;;  %v3244_v42 = vmul.f32 0.3, %v3178_v8  ;;  %8788 = vrot.lane.b32.xlu1 %v8787_v55, %s9428_s11  ;;  %v3472_v25 = vsel %vm724_vm1, %v3456_v61, %v3464_v4  ;;  %v11785_v32 = vsel %vm724_vm1, %v3464_v4, %v3456_v61 }
 0x66f   : > { %v3182_v24 = vpop.f32.mrb[56].mxu0  ;;  %7803 = vmatprep.mubr.msk.f32.mxu1 %vm949_vm4, %v3472_v25  ;;  %v3376_v6 = vsel %vm626_vm3, %v3360_v20, %v3368_v39  ;;  %v3384_v19 = vsel %vm626_vm3, %v3368_v39, %v3360_v20  ;;  %v3424_v37 = vsel %vm675_vm2, %v3408_v27, %v3416_v44  ;;  %v3432_v47 = vsel %vm675_vm2, %v3416_v44, %v3408_v27 }
 0x670   : > { %v11797_v16 = vadd.f32 %v3244_v42, %v10771_v40  ;;  %v3183_v57 = vadd.f32 %v11753_v33, %v3182_v24  ;;  %v3184_v0 = vpop.f32.mrb[57].mxu0  ;;  %v3392_v41 = vsel %vm292_vm6, %v3384_v19, 0.0  ;;  %v3441_v60 = vsel %vm299_vm5, %v3432_v47, 0.0 }
 0x671   : > { %v8792_v21 = vpack.i.bf16 %v3376_v6, %v3392_v41  ;;  %v11807_v53 = vsel %vm577_vm7, %v3320_v12, %v3312_v18  ;;  %v8797_v2 = vpack.i.bf16 %v3441_v60, %v3424_v37  ;;  %v3361_v15 = vrot.slane %v11778_v46, 7 }
 0x672   : > { %v3276_v7 = vmax.f32 %v11797_v16, 0.0  ;;  %v3245_v45 = vmul.f32 0.3, %v3183_v57  ;;  %v3409_v14 = vrot.slane %v11778_v46, 1  ;;  %v11814_v59 = vsel %vm577_vm7, %v3312_v18, %v3320_v12 }
 0x673   : > { %8793 = vrot.lane.b32.xlu0 %v8792_v21, %s9427_s10  ;;  %v3187_v40 = vpop.f32.mrb[58].mxu0  ;;  %v3457_v22 = vrot.slane %v11778_v46, 2  ;;  %v3313_v52 = vrot.slane %v11778_v46, 6 }
 0x674   : > { %v11817_v29 = vadd.f32 %v3245_v45, %v10791_v10  ;;  %v3188_v35 = vadd.f32 %v11753_v33, %v3187_v40  ;;  %v3189_v3 = vpop.f32.mrb[59].mxu0  ;;  %v3369_v31 = vrot.slane %v3276_v7, 7  ;;  %v3417_v54 = vrot.slane %v3276_v7, 1 }
 0x675   : > { %v3465_v56 = vrot.slane %v3276_v7, 2  ;;  %v3321_v36 = vrot.slane %v3276_v7, 6  ;;  %v8802_v44 = vpack.i.bf16 %v3276_v7, %v11778_v46 }
 0x676   : > { %v11823_v26 = vmax.f32 %v11817_v29, 0.0  ;;  %v3246_v34 = vmul.f32 0.3, %v3188_v35  ;;  %v3377_v5 = vsel %vm626_vm3, %v3361_v15, %v3369_v31  ;;  %v3385_v10 = vsel %vm626_vm3, %v3369_v31, %v3361_v15 }
 0x677   : > { %8798 = vrot.lane.b32.xlu0 %v8797_v2, %s9426_s9  ;;  %v3192_v1 = vpop.f32.mrb[60].mxu0  ;;  %v3394_v58 = vsel %vm292_vm6, %v3385_v10, 0.0  ;;  %v3425_v61 = vsel %vm675_vm2, %v3409_v14, %v3417_v54  ;;  %v3433_v20 = vsel %vm675_vm2, %v3417_v54, %v3409_v14  ;;  %v11838_v27 = vsel %vm724_vm1, %v3457_v22, %v3465_v56 }
 0x678   : > { %v11841_v8 = vadd.f32 %v3246_v34, %v10815_v13  ;;  %v3193_v51 = vadd.f32 %v11753_v33, %v3192_v1  ;;  %v3194_v55 = vpop.f32.mrb[61].mxu0  ;;  %v8807_v4 = vpack.i.bf16 %v3377_v5, %v3394_v58  ;;  %v3443_v39 = vsel %vm299_vm5, %v3433_v20, 0.0 }
 0x679   : > { %v11849_v18 = vsel %vm577_vm7, %v3321_v36, %v3313_v52  ;;  %v8812_v13 = vpack.i.bf16 %v3443_v39, %v3425_v61  ;;  %v11855_v25 = vsel %vm724_vm1, %v3465_v56, %v3457_v22  ;;  %v3362_v6 = vrot.slane %v11823_v26, 7 }
 0x67a   : > { %v3278_v12 = vmax.f32 %v11841_v8, 0.0  ;;  %v3247_v42 = vmul.f32 0.3, %v3193_v51  ;;  %8808 = vrot.lane.b32.xlu1 %v8807_v4, %s9427_s10  ;;  %v3410_v46 = vrot.slane %v11823_v26, 1  ;;  %v11862_v19 = vsel %vm577_vm7, %v3313_v52, %v3321_v36 }
 0x67b   : > { %8803 = vrot.lane.b32.xlu0 %v8802_v44, %s9428_s11  ;;  %v3197_v24 = vpop.f32.mrb[62].mxu0  ;;  %v3458_v37 = vrot.slane %v11823_v26, 2  ;;  %v3314_v60 = vrot.slane %v11823_v26, 6 }
 0x67c   : > { %v11866_v47 = vadd.f32 %v3247_v42, %v10840_v48  ;;  %v3198_v57 = vadd.f32 %v11753_v33, %v3197_v24  ;;  %v3199_v0 = vpop.f32.mrb[63].mxu0  ;;  %v3370_v41 = vrot.slane %v3278_v12, 7  ;;  %v8817_v21 = vpack.i.bf16 %v3278_v12, %v11823_v26 }
 0x67d   : > { %v3418_v7 = vrot.slane %v3278_v12, 1  ;;  %v3466_v45 = vrot.slane %v3278_v12, 2  ;;  %v3322_v40 = vrot.slane %v3278_v12, 6 }
 0x67e   : > { %v11872_v2 = vmax.f32 %v11866_v47, 0.0  ;;  %v3248_v15 = vmul.f32 0.3, %v3198_v57  ;;  %8813 = vrot.lane.b32.xlu1 %v8812_v13, %s9426_s9  ;;  %v3378_v48 = vsel %vm626_vm3, %v3362_v6, %v3370_v41  ;;  %v3386_v14 = vsel %vm626_vm3, %v3370_v41, %v3362_v6 }
 0x67f   : > { %v3202_v35 = vpop.f32.mrb[64].mxu0  ;;  %v3396_v3 = vsel %vm292_vm6, %v3386_v14, 0.0  ;;  %v3426_v31 = vsel %vm675_vm2, %v3410_v46, %v3418_v7  ;;  %v3434_v22 = vsel %vm675_vm2, %v3418_v7, %v3410_v46  ;;  %v11887_v54 = vsel %vm724_vm1, %v3458_v37, %v3466_v45 }
 0x680   : > { %v11890_v56 = vadd.f32 %v3248_v15, %v10864_v63  ;;  %v3203_v52 = vadd.f32 %v11753_v33, %v3202_v35  ;;  %v3204_v36 = vpop.f32.mrb[65].mxu0  ;;  %v8822_v26 = vpack.i.bf16 %v3378_v48, %v3396_v3  ;;  %v3445_v34 = vsel %vm299_vm5, %v3434_v22, 0.0 }
 0x681   : > { %v11897_v5 = vsel %vm577_vm7, %v3322_v40, %v3314_v60  ;;  %v8827_v63 = vpack.i.bf16 %v3445_v34, %v3426_v31  ;;  %v11904_v58 = vsel %vm724_vm1, %v3466_v45, %v3458_v37  ;;  %v3363_v20 = vrot.slane %v11872_v2, 7 }
 0x682   : > { %v3280_v10 = vmax.f32 %v11890_v56, 0.0  ;;  %v3249_v1 = vmul.f32 0.3, %v3203_v52  ;;  %8818 = vrot.lane.b32.xlu1 %v8817_v21, %s9428_s11  ;;  %8823 = vrot.lane.b32.xlu0 %v8822_v26, %s9427_s10  ;;  %v3411_v51 = vrot.slane %v11872_v2, 1  ;;  %v11910_v55 = vsel %vm577_vm7, %v3314_v60, %v3322_v40 }
 0x683   : > { %v3207_v61 = vpop.f32.mrb[66].mxu0  ;;  %v3459_v4 = vrot.slane %v11872_v2, 2  ;;  %v3315_v13 = vrot.slane %v11872_v2, 6 }
 0x684   : > { %v11914_v39 = vadd.f32 %v3249_v1, %v10888_v9  ;;  %v3208_v44 = vadd.f32 %v11753_v33, %v3207_v61  ;;  %v3209_v12 = vpop.f32.mrb[67].mxu0  ;;  %v3371_v42 = vrot.slane %v3280_v10, 7  ;;  %v8832_v24 = vpack.i.bf16 %v3280_v10, %v11872_v2 }
 0x685   : > { %v3419_v6 = vrot.slane %v3280_v10, 1  ;;  %v3467_v46 = vrot.slane %v3280_v10, 2  ;;  %v3323_v37 = vrot.slane %v3280_v10, 6 }
 0x686   : > { %v11920_v57 = vmax.f32 %v11914_v39, 0.0  ;;  %v3250_v0 = vmul.f32 0.3, %v3208_v44  ;;  %8828 = vrot.lane.b32.xlu0 %v8827_v63, %s9426_s9  ;;  %v3379_v9 = vsel %vm626_vm3, %v3363_v20, %v3371_v42  ;;  %v3387_v41 = vsel %vm626_vm3, %v3371_v42, %v3363_v20 }
 0x687   : > { %v3212_v60 = vpop.f32.mrb[68].mxu0  ;;  %v3398_v21 = vsel %vm292_vm6, %v3387_v41, 0.0  ;;  %v3427_v7 = vsel %vm675_vm2, %v3411_v51, %v3419_v6  ;;  %v3435_v45 = vsel %vm675_vm2, %v3419_v6, %v3411_v51  ;;  %v11935_v40 = vsel %vm724_vm1, %v3459_v4, %v3467_v46 }
 0x688   : > { %v11938_v2 = vadd.f32 %v3250_v0, %v10912_v62  ;;  %v3213_v15 = vadd.f32 %v11753_v33, %v3212_v60  ;;  %v3214_v48 = vpop.f32.mrb[69].mxu0  ;;  %v8837_v14 = vpack.i.bf16 %v3379_v9, %v3398_v21  ;;  %v3447_v35 = vsel %vm299_vm5, %v3435_v45, 0.0 }
 0x689   : > { %v11945_v3 = vsel %vm577_vm7, %v3323_v37, %v3315_v13  ;;  %v8842_v62 = vpack.i.bf16 %v3447_v35, %v3427_v7  ;;  %v11952_v52 = vsel %vm724_vm1, %v3467_v46, %v3459_v4  ;;  %v3364_v26 = vrot.slane %v11920_v57, 7 }
 0x68a   : > { %v3282_v31 = vmax.f32 %v11938_v2, 0.0  ;;  %v3251_v22 = vmul.f32 0.3, %v3213_v15  ;;  %8838 = vrot.lane.b32.xlu1 %v8837_v14, %s9427_s10  ;;  %8833 = vrot.lane.b32.xlu0 %v8832_v24, %s9428_s11  ;;  %v3412_v34 = vrot.slane %v11920_v57, 1  ;;  %v11958_v10 = vsel %vm577_vm7, %v3315_v13, %v3323_v37 }
 0x68b   : > { %v3217_v36 = vpop.f32.mrb[70].mxu0  ;;  %v3460_v1 = vrot.slane %v11920_v57, 2  ;;  %v3316_v4 = vrot.slane %v11920_v57, 6 }
 0x68c   : > { %v11962_v63 = vadd.f32 %v3251_v22, %v10936_v30  ;;  %v3218_v61 = vadd.f32 %v11753_v33, %v3217_v36  ;;  %v3219_v20 = vpop.f32.mrb[71].mxu0  ;;  %v3372_v51 = vrot.slane %v3282_v31, 7  ;;  %v8847_v44 = vpack.i.bf16 %v3282_v31, %v11920_v57 }
 0x68d   : > { %v3420_v12 = vrot.slane %v3282_v31, 1  ;;  %v3468_v42 = vrot.slane %v3282_v31, 2  ;;  %v3324_v24 = vrot.slane %v3282_v31, 6 }
 0x68e   : > { %v3283_v6 = vmax.f32 %v11962_v63, 0.0  ;;  %v3252_v13 = vmul.f32 0.3, %v3218_v61  ;;  %8843 = vrot.lane.b32.xlu1 %v8842_v62, %s9426_s9  ;;  %v3380_v30 = vsel %vm626_vm3, %v3364_v26, %v3372_v51  ;;  %v3388_v46 = vsel %vm626_vm3, %v3372_v51, %v3364_v26 }
 0x68f   : > { %v3222_v37 = vpop.f32.mrb[72].mxu0  ;;  %v3400_v0 = vsel %vm292_vm6, %v3388_v46, 0.0  ;;  %v3428_v57 = vsel %vm675_vm2, %v3412_v34, %v3420_v12  ;;  %v3436_v9 = vsel %vm675_vm2, %v3420_v12, %v3412_v34  ;;  %v11981_v41 = vsel %vm724_vm1, %v3460_v1, %v3468_v42 }
 0x690   : > { %v11984_v60 = vadd.f32 %v3252_v13, %v10958_v17  ;;  %v3223_v21 = vadd.f32 %v11753_v33, %v3222_v37  ;;  %v3224_v7 = vpop.f32.mrb[73].mxu0  ;;  %v8852_v45 = vpack.i.bf16 %v3380_v30, %v3400_v0  ;;  %v3449_v15 = vsel %vm299_vm5, %v3436_v9, 0.0 }
 0x691   : > { %v11991_v48 = vsel %vm577_vm7, %v3324_v24, %v3316_v4  ;;  %v8857_v17 = vpack.i.bf16 %v3449_v15, %v3428_v57  ;;  %v11998_v31 = vsel %vm724_vm1, %v3468_v42, %v3460_v1  ;;  %v3365_v62 = vrot.slane %v3283_v6, 7 }
 0x692   : > { %v3284_v14 = vmax.f32 %v11984_v60, 0.0  ;;  %v3253_v35 = vmul.f32 0.3, %v3223_v21  ;;  %8848 = vrot.lane.b32.xlu1 %v8847_v44, %s9428_s11  ;;  %8853 = vrot.lane.b32.xlu0 %v8852_v45, %s9427_s10  ;;  %v3413_v36 = vrot.slane %v3283_v6, 1  ;;  %v12002_v26 = vsel %vm577_vm7, %v3316_v4, %v3324_v24  ;;  %v14898_v21 = vld [vmem:[#allocation3_spill] sm:$0xff] }
 0x693   : > { %v3227_v22 = vpop.f32.mrb[74].mxu0  ;;  %v3461_v34 = vrot.slane %v3283_v6, 2  ;;  %v3317_v12 = vrot.slane %v3283_v6, 6 }
 0x694   : > { %v12005_v61 = vadd.f32 %v3253_v35, %v10979_v38  ;;  %v3228_v20 = vadd.f32 %v11753_v33, %v3227_v22  ;;  %v3229_v51 = vpop.f32.mrb[75].mxu0  ;;  %v3373_v44 = vrot.slane %v3284_v14, 7  ;;  %v8862_v13 = vpack.i.bf16 %v3284_v14, %v3283_v6 }
 0x695   : > { %v3421_v30 = vrot.slane %v3284_v14, 1  ;;  %v3469_v1 = vrot.slane %v3284_v14, 2  ;;  %v3325_v42 = vrot.slane %v3284_v14, 6 }
 0x696   : > { %v3285_v46 = vmax.f32 %v12005_v61, 0.0  ;;  %v3254_v37 = vmul.f32 0.3, %v3228_v20  ;;  %8858 = vrot.lane.b32.xlu0 %v8857_v17, %s9426_s9  ;;  %v3381_v4 = vsel %vm626_vm3, %v3365_v62, %v3373_v44  ;;  %v3389_v38 = vsel %vm626_vm3, %v3373_v44, %v3365_v62 }
 0x697   : > { %v3232_v24 = vpop.f32.mrb[76].mxu0  ;;  %v3402_v0 = vsel %vm292_vm6, %v3389_v38, 0.0  ;;  %v3429_v6 = vsel %vm675_vm2, %v3413_v36, %v3421_v30  ;;  %v3437_v57 = vsel %vm675_vm2, %v3421_v30, %v3413_v36  ;;  %v12022_v9 = vsel %vm724_vm1, %v3461_v34, %v3469_v1 }
 0x698   : > { %v12025_v7 = vadd.f32 %v3254_v37, %v14898_v21  ;;  %v3233_v45 = vadd.f32 %v11753_v33, %v3232_v24  ;;  %v3234_v15 = vpop.f32.mrb[77].mxu0  ;;  %v8867_v14 = vpack.i.bf16 %v3381_v4, %v3402_v0  ;;  %v3451_v35 = vsel %vm299_vm5, %v3437_v57, 0.0  ;;  %v14900_v37 = vld [vmem:[#allocation5_spill] sm:$0xff] }
 0x699   : > { %v12032_v17 = vsel %vm577_vm7, %v3325_v42, %v3317_v12  ;;  %v12039_v36 = vsel %vm724_vm1, %v3469_v1, %v3461_v34  ;;  %v8872_v51 = vpack.i.bf16 %v3451_v35, %v3429_v6  ;;  %v3366_v44 = vrot.slane %v3285_v46, 7 }
 0x69a   : > { %14899 = vst [vmem:[#allocation3_spill] sm:$0xff] %v12025_v7  ;;  %v3286_v22 = vmax.f32 %v12025_v7, 0.0  ;;  %v3255_v62 = vmul.f32 0.3, %v3233_v45  ;;  %8868 = vrot.lane.b32.xlu1 %v8867_v14, %s9427_s10  ;;  %8863 = vrot.lane.b32.xlu0 %v8862_v13, %s9428_s11  ;;  %v12043_v30 = vsel %vm577_vm7, %v3317_v12, %v3325_v42  ;;  %v3414_v57 = vrot.slane %v3285_v46, 1 }
 0x69b   : > { %v3237_v20 = vpop.f32.mrb[78].mxu0  ;;  %v3462_v21 = vrot.slane %v3285_v46, 2  ;;  %v3318_v42 = vrot.slane %v3285_v46, 6 }
 0x69c   : > { %v12046_v4 = vadd.f32 %v3255_v62, %v14900_v37  ;;  %v3238_v38 = vadd.f32 %v11753_v33, %v3237_v20  ;;  %v3239_v24 = vpop.f32.mrb[79].mxu0  ;;  %v3374_v0 = vrot.slane %v3286_v22, 7  ;;  %v3422_v13 = vrot.slane %v3286_v22, 1  ;;  %v14902_v62 = vld [vmem:[#allocation4_spill] sm:$0xff] }
 0x69d   : > { %v3470_v45 = vrot.slane %v3286_v22, 2  ;;  %v3326_v34 = vrot.slane %v3286_v22, 6 }
 0x69e   : > { %14901 = vst [vmem:[#allocation5_spill] sm:$0xff] %v12046_v4  ;;  %v3256_v1 = vmul.f32 0.3, %v3238_v38  ;;  %8873 = vrot.lane.b32.xlu1 %v8872_v51, %s9426_s9  ;;  %v3382_v6 = vsel %vm626_vm3, %v3366_v44, %v3374_v0  ;;  %v3390_v12 = vsel %vm626_vm3, %v3374_v0, %v3366_v44  ;;  %v3287_v15 = vmax.f32 %v12046_v4, 0.0 }
 0x69f   : > { %v3404_v33 = vsel %vm292_vm6, %v3390_v12, 0.0  ;;  %v3438_v14 = vsel %vm675_vm2, %v3422_v13, %v3414_v57  ;;  %v12061_v35 = vsel %vm724_vm1, %v3462_v21, %v3470_v45  ;;  %v8877_v51 = vpack.i.bf16 %v3286_v22, %v3285_v46 }
 0x6a0   : > { %v12064_v20 = vadd.f32 %v3256_v1, %v14902_v62  ;;  %v8882_v37 = vpack.i.bf16 %v3382_v6, %v3404_v33  ;;  %v3430_v44 = vsel %vm675_vm2, %v3414_v57, %v3422_v13  ;;  %v3453_v38 = vsel %vm299_vm5, %v3438_v14, 0.0 }
 0x6a1   : > { %v12072_v24 = vsel %vm577_vm7, %v3326_v34, %v3318_v42  ;;  %v12079_v46 = vsel %vm724_vm1, %v3470_v45, %v3462_v21  ;;  %v12083_v22 = vsel %vm577_vm7, %v3318_v42, %v3326_v34  ;;  %v3367_v57 = vrot.slane %v3287_v15, 7 }
 0x6a2   : > { %14903 = vst [vmem:[#allocation4_spill] sm:$0xff] %v12064_v20  ;;  %v3288_v0 = vmax.f32 %v12064_v20, 0.0  ;;  %8878 = vrot.lane.b32.xlu1 %v8877_v51, %s9428_s11  ;;  %8883 = vrot.lane.b32.xlu0 %v8882_v37, %s9427_s10  ;;  %v8887_v13 = vpack.i.bf16 %v3453_v38, %v3430_v44  ;;  %v3319_v33 = vrot.slane %v3287_v15, 6  ;;  %v3463_v62 = vrot.slane %v3287_v15, 2 }
 0x6a3   : > { %v3415_v44 = vrot.slane %v3287_v15, 1 }
 0x6a4   : > { %v3375_v1 = vrot.slane %v3288_v0, 7  ;;  %v3327_v6 = vrot.slane %v3288_v0, 6  ;;  %v3471_v12 = vrot.slane %v3288_v0, 2  ;;  %v3423_v45 = vrot.slane %v3288_v0, 1 }
 0x6a6   : > { %8888 = vrot.lane.b32.xlu0 %v8887_v13, %s9426_s9  ;;  %v3391_v14 = vsel %vm626_vm3, %v3375_v1, %v3367_v57  ;;  %v12092_v34 = vsel %vm577_vm7, %v3327_v6, %v3319_v33  ;;  %v12096_v42 = vsel %vm577_vm7, %v3319_v33, %v3327_v6  ;;  %v12101_v51 = vsel %vm724_vm1, %v3463_v62, %v3471_v12 }
 0x6a7   : > { %v3406_v21 = vsel %vm292_vm6, %v3391_v14, 0.0  ;;  %v12105_v37 = vsel %vm724_vm1, %v3471_v12, %v3463_v62  ;;  %v3431_v38 = vsel %vm675_vm2, %v3415_v44, %v3423_v45  ;;  %v3383_v13 = vsel %vm626_vm3, %v3367_v57, %v3375_v1 }
 0x6a8   : > { %3548 = vrot.lane.b32.xlu1 %v3406_v21, %s9427_s10  ;;  %v3439_v6 = vsel %vm675_vm2, %v3423_v45, %v3415_v44  ;;  %v3344_v62 = vsel %vm286_vm8, %v11807_v53, 0.0  ;;  %v3489_v53 = vsel %vm303_vm11, %v11785_v32, 0.0 }
 0x6a9   : > { %v3455_v12 = vsel %vm299_vm5, %v3439_v6, 0.0 }
 0x6aa   : > { %3612 = vrot.lane.b32.xlu0 %v3287_v15, %s9428_s11 }
 0x6ac   : > { %3676 = vrot.lane.b32.xlu1 %v3431_v38, %s9426_s9 }
 0x6ae   : > { %3550 = vrot.lane.b32.xlu0 %v3383_v13, %s9427_s10 }
 0x6b0   : > { %3614 = vrot.lane.b32.xlu1 %v3288_v0, %s9428_s11 }
 0x6b2   : > { %3678 = vrot.lane.b32.xlu0 %v3455_v12, %s9426_s9 }
 0x6e0   : > { %v8789_v33 = vpop.permute.xlu1 %8788 }
 0x6e1   : > { %v8790_v21 = vunpack.i.l.bf16 %v8789_v33  ;;  %v8791_v20 = vunpack.i.h.bf16 %v8789_v33 }
 0x6e5   : > { %v8794_v15 = vpop.permute.xlu0 %8793 }
 0x6e6   : > { %v8795_v14 = vunpack.i.l.bf16 %v8794_v15  ;;  %v8796_v57 = vunpack.i.h.bf16 %v8794_v15 }
 0x6e8   : > { %v3696_v1 = vsel %vm949_vm4, %v3344_v62, %v8795_v14  ;;  %v3697_v12 = vsel %vm949_vm4, %v11814_v59, %v8796_v57  ;;  %v3346_v14 = vsel %vm286_vm8, %v11849_v18, 0.0 }
 0x6e9   : > { %v8799_v38 = vpop.permute.xlu0 %8798  ;;  %v3712_v0 = vsel %vm966_vm9, %v3696_v1, %v8790_v21  ;;  %v3713_v62 = vsel %vm966_vm9, %v3697_v12, %v8791_v20 }
 0x6ea   : > { %v8800_v45 = vunpack.i.l.bf16 %v8799_v38  ;;  %v8801_v44 = vunpack.i.h.bf16 %v8799_v38 }
 0x6ec   : > { %v8809_v13 = vpop.permute.xlu1 %8808  ;;  %v3728_v6 = vsel %vm983_vm10, %v3712_v0, %v8800_v45  ;;  %v3729_v57 = vsel %vm983_vm10, %v3713_v62, %v8801_v44  ;;  %v3491_v44 = vsel %vm303_vm11, %v11855_v25, 0.0 }
 0x6ed   : > { %v8810_v4 = vunpack.i.l.bf16 %v8809_v13  ;;  %v8804_v7 = vpop.permute.xlu0 %8803  ;;  %3863 = vmatmul.mubr.f32.vlgmr.msra.gmra.mrb[64].mxu1 %v3728_v6  ;;  %v8811_v59 = vunpack.i.h.bf16 %v8809_v13 }
 0x6ee   : > { %v8805_v15 = vunpack.i.l.bf16 %v8804_v7  ;;  %7804 = vmatprep.mubr.msk.f32.mxu1 %vm949_vm4, %v3489_v53  ;;  %v8806_v38 = vunpack.i.h.bf16 %v8804_v7 }
 0x6ef   : > { %v3698_v1 = vsel %vm949_vm4, %v3346_v14, %v8810_v4  ;;  %v3699_v4 = vsel %vm949_vm4, %v11862_v19, %v8811_v59 }
 0x6f0   : > { %v8814_v33 = vpop.permute.xlu1 %8813  ;;  %v3714_v32 = vsel %vm966_vm9, %v3698_v1, %v8805_v15  ;;  %v3715_v7 = vsel %vm966_vm9, %v3699_v4, %v8806_v38 }
 0x6f1   : > { %v8815_v21 = vunpack.i.l.bf16 %v8814_v33  ;;  %3868 = vmatmul.mubr.f32.gmra.mrb[66].mxu1 %v3729_v57  ;;  %v8816_v0 = vunpack.i.h.bf16 %v8814_v33 }
 0x6f2   : > { %7805 = vmatprep.mubr.msk.f32.mxu1 %vm949_vm4, %v11838_v27  ;;  %v3348_v27 = vsel %vm286_vm8, %v11897_v5, 0.0 }
 0x6f3   : > { %v3730_v45 = vsel %vm983_vm10, %v3714_v32, %v8815_v21  ;;  %v3731_v19 = vsel %vm983_vm10, %v3715_v7, %v8816_v0  ;;  %v3493_v32 = vsel %vm303_vm11, %v11904_v58, 0.0 }
 0x6f4   : > { %v8819_v18 = vpop.permute.xlu1 %8818  ;;  %v8824_v6 = vpop.permute.xlu0 %8823 }
 0x6f5   : > { %v8825_v20 = vunpack.i.l.bf16 %v8824_v6  ;;  %3873 = vmatmul.mubr.f32.gmra.mrb[68].mxu1 %v3730_v45  ;;  %v8820_v13 = vunpack.i.l.bf16 %v8819_v18  ;;  %v8826_v53 = vunpack.i.h.bf16 %v8824_v6  ;;  %v8821_v62 = vunpack.i.h.bf16 %v8819_v18 }
 0x6f6   : > { %7806 = vmatprep.mubr.msk.f32.mxu1 %vm949_vm4, %v3491_v44 }
 0x6f7   : > { %v3700_v12 = vsel %vm949_vm4, %v3348_v27, %v8825_v20  ;;  %v3701_v57 = vsel %vm949_vm4, %v11910_v55, %v8826_v53  ;;  %v3495_v53 = vsel %vm303_vm11, %v11952_v52, 0.0 }
 0x6f8   : > { %v8829_v15 = vpop.permute.xlu0 %8828  ;;  %v3716_v25 = vsel %vm966_vm9, %v3700_v12, %v8820_v13  ;;  %v3717_v45 = vsel %vm966_vm9, %v3701_v57, %v8821_v62 }
 0x6f9   : > { %v8830_v14 = vunpack.i.l.bf16 %v8829_v15  ;;  %3878 = vmatmul.mubr.f32.gmra.mrb[70].mxu1 %v3731_v19  ;;  %v8831_v59 = vunpack.i.h.bf16 %v8829_v15 }
 0x6fa   : > { %7807 = vmatprep.mubr.msk.f32.mxu1 %vm949_vm4, %v11887_v54  ;;  %v3350_v54 = vsel %vm286_vm8, %v11945_v3, 0.0 }
 0x6fb   : > { %v3732_v1 = vsel %vm983_vm10, %v3716_v25, %v8830_v14  ;;  %v3733_v55 = vsel %vm983_vm10, %v3717_v45, %v8831_v59 }
 0x6fc   : > { %v8839_v5 = vpop.permute.xlu1 %8838  ;;  %v8834_v33 = vpop.permute.xlu0 %8833 }
 0x6fd   : > { %v8840_v21 = vunpack.i.l.bf16 %v8839_v5  ;;  %3883 = vmatmul.mubr.f32.gmra.mrb[72].mxu1 %v3732_v1  ;;  %v8835_v38 = vunpack.i.l.bf16 %v8834_v33  ;;  %v8841_v18 = vunpack.i.h.bf16 %v8839_v5  ;;  %v8836_v20 = vunpack.i.h.bf16 %v8834_v33 }
 0x6fe   : > { %7808 = vmatprep.mubr.msk.f32.mxu1 %vm949_vm4, %v3493_v32 }
 0x6ff   : > { %v3702_v0 = vsel %vm949_vm4, %v3350_v54, %v8840_v21  ;;  %v3703_v7 = vsel %vm949_vm4, %v11958_v10, %v8841_v18 }
 0x700   : > { %v8844_v6 = vpop.permute.xlu1 %8843  ;;  %v3718_v58 = vsel %vm966_vm9, %v3702_v0, %v8835_v38  ;;  %v3719_v19 = vsel %vm966_vm9, %v3703_v7, %v8836_v20  ;;  %v3497_v38 = vsel %vm303_vm11, %v11998_v31, 0.0 }
 0x701   : > { %v8845_v4 = vunpack.i.l.bf16 %v8844_v6  ;;  %3888 = vmatmul.mubr.f32.gmra.mrb[74].mxu1 %v3733_v55  ;;  %v8846_v13 = vunpack.i.h.bf16 %v8844_v6 }
 0x702   : > { %7809 = vmatprep.mubr.msk.f32.mxu1 %vm949_vm4, %v11935_v40  ;;  %v3352_v40 = vsel %vm286_vm8, %v11991_v48, 0.0 }
 0x703   : > { %v3734_v44 = vsel %vm983_vm10, %v3718_v58, %v8845_v4  ;;  %v3735_v10 = vsel %vm983_vm10, %v3719_v19, %v8846_v13 }
 0x704   : > { %v8849_v3 = vpop.permute.xlu1 %8848  ;;  %v8854_v27 = vpop.permute.xlu0 %8853 }
 0x705   : > { %v8855_v12 = vunpack.i.l.bf16 %v8854_v27  ;;  %3893 = vmatmul.mubr.f32.gmra.mrb[76].mxu1 %v3734_v44  ;;  %v8850_v15 = vunpack.i.l.bf16 %v8849_v3  ;;  %v8856_v25 = vunpack.i.h.bf16 %v8854_v27  ;;  %v8851_v59 = vunpack.i.h.bf16 %v8849_v3 }
 0x706   : > { %7810 = vmatprep.mubr.msk.f32.mxu1 %vm949_vm4, %v3495_v53  ;;  %v3499_v27 = vsel %vm303_vm11, %v12039_v36, 0.0 }
 0x707   : > { %v3704_v14 = vsel %vm949_vm4, %v3352_v40, %v8855_v12  ;;  %v3705_v21 = vsel %vm949_vm4, %v12002_v26, %v8856_v25 }
 0x708   : > { %v8859_v62 = vpop.permute.xlu0 %8858  ;;  %v3720_v52 = vsel %vm966_vm9, %v3704_v14, %v8850_v15  ;;  %v3721_v45 = vsel %vm966_vm9, %v3705_v21, %v8851_v59 }
 0x709   : > { %v8860_v1 = vunpack.i.l.bf16 %v8859_v62  ;;  %3898 = vmatmul.mubr.f32.gmra.mrb[78].mxu1 %v3735_v10  ;;  %v8861_v33 = vunpack.i.h.bf16 %v8859_v62 }
 0x70a   : > { %7811 = vmatprep.mubr.msk.f32.mxu1 %vm949_vm4, %v11981_v41  ;;  %v3354_v41 = vsel %vm286_vm8, %v12032_v17, 0.0 }
 0x70b   : > { %v3736_v5 = vsel %vm983_vm10, %v3720_v52, %v8860_v1  ;;  %v3737_v26 = vsel %vm983_vm10, %v3721_v45, %v8861_v33  ;;  %v3358_v52 = vsel %vm286_vm8, %v12092_v34, 0.0 }
 0x70c   : > { %v8869_v48 = vpop.permute.xlu1 %8868  ;;  %v8864_v57 = vpop.permute.xlu0 %8863 }
 0x70d   : > { %v8870_v32 = vunpack.i.l.bf16 %v8869_v48  ;;  %3903 = vmatmul.mubr.f32.gmra.mrb[80].mxu1 %v3736_v5  ;;  %v8865_v54 = vunpack.i.l.bf16 %v8864_v57  ;;  %v8871_v18 = vunpack.i.h.bf16 %v8869_v48  ;;  %v8866_v4 = vunpack.i.h.bf16 %v8864_v57 }
 0x70e   : > { %7812 = vmatprep.mubr.msk.f32.mxu1 %vm949_vm4, %v3497_v38 }
 0x70f   : > { %v3706_v0 = vsel %vm949_vm4, %v3354_v41, %v8870_v32  ;;  %v3707_v13 = vsel %vm949_vm4, %v12043_v30, %v8871_v18  ;;  %v7823_v18 = vld [vmem:[%s14865_s3 + $0x340] sm:$0xff] }
 0x710   : > { %v8874_v6 = vpop.permute.xlu1 %8873  ;;  %v3722_v31 = vsel %vm966_vm9, %v3706_v0, %v8865_v54  ;;  %v3723_v12 = vsel %vm966_vm9, %v3707_v13, %v8866_v4  ;;  %v3503_v54 = vsel %vm303_vm11, %v12105_v37, 0.0  ;;  %v7821_v37 = vld [vmem:[%s14865_s3 + $0x330] sm:$0xff]  ;;  %v7822_v0 = vld [vmem:[%s14865_s3 + $0x338] sm:$0xff] }
 0x711   : > { %v8875_v55 = vunpack.i.l.bf16 %v8874_v6  ;;  %3908 = vmatmul.mubr.f32.gmra.mrb[82].mxu1 %v3737_v26  ;;  %v8876_v20 = vunpack.i.h.bf16 %v8874_v6  ;;  %v8209_v6 = vpack.c.bf16 %v7822_v0, %v7821_v37  ;;  %v7824_v26 = vld [vmem:[%s14865_s3 + $0x348] sm:$0xff]  ;;  %v7826_v4 = vld [vmem:[%s14865_s3 + $0x358] sm:$0xff]  ;;  %v7829_v13 = vld [vmem:[%s14865_s3 + $0x370] sm:$0xff] }
 0x712   : > { %7813 = vmatprep.mubr.msk.f32.mxu1 %vm949_vm4, %v12022_v9  ;;  %v3356_v9 = vsel %vm286_vm8, %v12072_v24, 0.0 }
 0x713   : > { %v3738_v58 = vsel %vm983_vm10, %v3722_v31, %v8875_v55  ;;  %v3739_v30 = vsel %vm983_vm10, %v3723_v12, %v8876_v20  ;;  %v8212_v55 = vpack.c.bf16 %v7824_v26, %v7823_v18  ;;  %v7825_v31 = vld [vmem:[%s14865_s3 + $0x350] sm:$0xff]  ;;  %v7827_v20 = vld [vmem:[%s14865_s3 + $0x360] sm:$0xff] }
 0x714   : > { %v8879_v17 = vpop.permute.xlu1 %8878  ;;  %v8884_v44 = vpop.permute.xlu0 %8883 }
 0x715   : > { %v8885_v3 = vunpack.i.l.bf16 %v8884_v44  ;;  %3913 = vmatmul.mubr.f32.gmra.mrb[84].mxu1 %v3738_v58  ;;  %v8880_v7 = vunpack.i.l.bf16 %v8879_v17  ;;  %v8886_v15 = vunpack.i.h.bf16 %v8884_v44  ;;  %v8881_v25 = vunpack.i.h.bf16 %v8879_v17  ;;  %v7828_v17 = vld [vmem:[%s14865_s3 + $0x368] sm:$0xff] }
 0x716   : > { %7814 = vmatprep.mubr.msk.f32.mxu1 %vm949_vm4, %v3499_v27  ;;  %v8215_v58 = vpack.c.bf16 %v7826_v4, %v7825_v31  ;;  %v8218_v44 = vpack.c.bf16 %v7828_v17, %v7827_v20 }
 0x717   : > { %v3708_v53 = vsel %vm949_vm4, %v3356_v9, %v8885_v3  ;;  %v3709_v1 = vsel %vm949_vm4, %v12083_v22, %v8886_v15  ;;  %v7830_v3 = vld [vmem:[%s14865_s3 + $0x378] sm:$0xff]  ;;  %v7832_v9 = vld [vmem:[%s14865_s3 + $0x388] sm:$0xff] }
 0x718   : > { %v8889_v40 = vpop.permute.xlu0 %8888  ;;  %v3724_v14 = vsel %vm966_vm9, %v3708_v53, %v8880_v7  ;;  %v3725_v33 = vsel %vm966_vm9, %v3709_v1, %v8881_v25  ;;  %v8221_v27 = vpack.c.bf16 %v7830_v3, %v7829_v13  ;;  %v7831_v7 = vld [vmem:[%s14865_s3 + $0x380] sm:$0xff]  ;;  %v7833_v53 = vld [vmem:[%s14865_s3 + $0x390] sm:$0xff]  ;;  %v7834_v15 = vld [vmem:[%s14865_s3 + $0x398] sm:$0xff] }
 0x719   : > { %v8890_v19 = vunpack.i.l.bf16 %v8889_v40  ;;  %3918 = vmatmul.mubr.f32.gmra.mrb[86].mxu1 %v3739_v30  ;;  %v8891_v24 = vunpack.i.h.bf16 %v8889_v40  ;;  %v8224_v12 = vpack.c.bf16 %v7832_v9, %v7831_v7  ;;  %v8227_v40 = vpack.c.bf16 %v7834_v15, %v7833_v53  ;;  %v7835_v30 = vld [vmem:[%s14865_s3 + $0x3a0] sm:$0xff] }
 0x71a   : > { %7815 = vmatprep.mubr.msk.f32.mxu1 %vm949_vm4, %v12061_v35  ;;  %v3549_v36 = vpop.permute.xlu1 %3548  ;;  %v3501_v35 = vsel %vm303_vm11, %v12079_v46, 0.0 }
 0x71b   : > { %v3740_v62 = vsel %vm983_vm10, %v3724_v14, %v8890_v19  ;;  %v3710_v59 = vsel %vm949_vm4, %v3358_v52, %v3549_v36  ;;  %v3741_v57 = vsel %vm983_vm10, %v3725_v33, %v8891_v24  ;;  %v7836_v19 = vld [vmem:[%s14865_s3 + $0x3a8] sm:$0xff]  ;;  %v12312_v14 = vld [vmem:[%s14866_s4 + $0x4] ss:$0 sm:$0xff] }
 0x71c   : > { %v3613_v10 = vpop.permute.xlu0 %3612  ;;  %v8230_v36 = vpack.c.bf16 %v7836_v19, %v7835_v30 }
 0x71d   : > { %3923 = vmatmul.mubr.f32.gmra.mrb[88].mxu1 %v3740_v62  ;;  %v3726_v22 = vsel %vm966_vm9, %v3710_v59, %v3613_v10  ;;  %v7837_v59 = vld [vmem:[%s14865_s3 + $0x3b0] sm:$0xff] }
 0x71e   : > { %7816 = vmatprep.mubr.msk.f32.mxu1 %vm949_vm4, %v3501_v35  ;;  %v3677_v5 = vpop.permute.xlu1 %3676 }
 0x71f   : > { %v3742_v21 = vsel %vm983_vm10, %v3726_v22, %v3677_v5  ;;  %v7838_v5 = vld [vmem:[%s14865_s3 + $0x3b8] sm:$0xff] }
 0x720   : > { %v3551_v48 = vpop.permute.xlu0 %3550  ;;  %v8233_v33 = vpack.c.bf16 %v7838_v5, %v7837_v59 }
 0x721   : > { %3928 = vmatmul.mubr.f32.gmra.mrb[90].mxu1 %v3741_v57  ;;  %v3711_v34 = vsel %vm949_vm4, %v12096_v42, %v3551_v48  ;;  %v7819_v42 = vld [vmem:[%s14865_s3 + $0x320] sm:$0xff] }
 0x722   : > { %7817 = vmatprep.mubr.msk.f32.mxu1 %vm949_vm4, %v12101_v51  ;;  %v3615_v46 = vpop.permute.xlu1 %3614  ;;  %v7820_v51 = vld [vmem:[%s14865_s3 + $0x328] sm:$0xff] }
 0x723   : > { %v3727_v32 = vsel %vm966_vm9, %v3711_v34, %v3615_v46  ;;  %v8206_v45 = vpack.c.bf16 %v7820_v51, %v7819_v42 }
 0x724   : > { %v3679_v38 = vpop.permute.xlu0 %3678 }
 0x725   : > { %3933 = vmatmul.mubr.f32.gmra.mrb[92].mxu1 %v3742_v21  ;;  %v3743_v41 = vsel %vm983_vm10, %v3727_v32, %v3679_v38  ;;  %8207 = vmatpush1.bf16.msra.mxu0 %v8206_v45 }
 0x726   : > { %7818 = vmatprep.mubr.msk.f32.mxu1 %vm949_vm4, %v3503_v54  ;;  %8208 = vmatprep.subr.bf16.mxu0 %v14891_v28 }
 0x729   : > { %3938 = vmatmul.mubr.f32.gmra.mrb[94].mxu1 %v3743_v41  ;;  %8210 = vmatpush1.bf16.msra.mxu0 %v8209_v6 }
 0x72a   : > { %8211 = vmatprep.subr.bf16.mxu0 %v14891_v28 }
 0x72d   : > { %8213 = vmatpush1.bf16.msra.mxu0 %v8212_v55 }
 0x72e   : > { %8214 = vmatprep.subr.bf16.mxu0 %v14891_v28 }
 0x731   : > { %8216 = vmatpush1.bf16.msra.mxu0 %v8215_v58 }
 0x732   : > { %8217 = vmatprep.subr.bf16.mxu0 %v14891_v28 }
 0x735   : > { %8219 = vmatpush1.bf16.msra.mxu0 %v8218_v44 }
 0x736   : > { %8220 = vmatprep.subr.bf16.mxu0 %v14891_v28 }
 0x739   : > { %8222 = vmatpush1.bf16.msra.mxu0 %v8221_v27 }
 0x73a   : > { %8223 = vmatprep.subr.bf16.mxu0 %v14891_v28 }
 0x73d   : > { %8225 = vmatpush1.bf16.msra.mxu0 %v8224_v12 }
 0x73e   : > { %8226 = vmatprep.subr.bf16.mxu0 %v14891_v28 }
 0x741   : > { %8228 = vmatpush1.bf16.msra.mxu0 %v8227_v40 }
 0x742   : > { %8229 = vmatprep.subr.bf16.mxu0 %v14891_v28 }
 0x745   : > { %8231 = vmatpush1.bf16.msra.mxu0 %v8230_v36 }
 0x746   : > { %8232 = vmatprep.subr.bf16.mxu0 %v14891_v28 }
 0x749   : > { %8234 = vmatpush1.bf16.msra.mxu0 %v8233_v33 }
 0x74a   : > { %8265 = vmatprep.subr.bf16.mxu0 %v14891_v28 }
 0x7c0   : > { %v3864_v25 = vpop.f32.mrb[64].mxu1 }
 0x7c1   : > { %v3865_v62 = vadd.f32 %v12312_v14, %v3864_v25  ;;  %v3866_v24 = vpop.f32.mrb[65].mxu1 }
 0x7c3   : > { %v3943_v10 = vmax.f32 %v3865_v62, 0.0 }
 0x7c4   : > { %v3869_v1 = vpop.f32.mrb[66].mxu1 }
 0x7c5   : > { %v3870_v52 = vadd.f32 %v12312_v14, %v3869_v1  ;;  %v3871_v35 = vpop.f32.mrb[67].mxu1  ;;  %v3982_v57 = vrot.slane %v3943_v10, 6  ;;  %v4126_v34 = vrot.slane %v3943_v10, 2  ;;  %v4030_v41 = vrot.slane %v3943_v10, 7 }
 0x7c6   : > { %v4078_v51 = vrot.slane %v3943_v10, 1 }
 0x7c7   : > { %v3944_v48 = vmax.f32 %v3870_v52, 0.0 }
 0x7c8   : > { %v3874_v22 = vpop.f32.mrb[68].mxu1 }
 0x7c9   : > { %v3990_v46 = vrot.slane %v3944_v48, 6  ;;  %v3875_v21 = vadd.f32 %v12312_v14, %v3874_v22  ;;  %v3876_v32 = vpop.f32.mrb[69].mxu1  ;;  %v8892_v38 = vpack.i.bf16 %v3944_v48, %v3943_v10  ;;  %v4134_v54 = vrot.slane %v3944_v48, 2 }
 0x7ca   : > { %v4038_v42 = vrot.slane %v3944_v48, 7  ;;  %v4086_v45 = vrot.slane %v3944_v48, 1 }
 0x7cb   : > { %v3945_v37 = vmax.f32 %v3875_v21, 0.0  ;;  %8893 = vrot.lane.b32.xlu0 %v8892_v38, %s9428_s11  ;;  %v4142_v0 = vsel %vm724_vm1, %v4126_v34, %v4134_v54  ;;  %v12329_v18 = vsel %vm577_vm7, %v3990_v46, %v3982_v57  ;;  %v12333_v6 = vsel %vm724_vm1, %v4134_v54, %v4126_v34 }
 0x7cc   : > { %v3879_v26 = vpop.f32.mrb[70].mxu1  ;;  %7841 = vmatprep.mubr.msk.f32.mxu0 %vm949_vm4, %v4142_v0  ;;  %v4046_v55 = vsel %vm626_vm3, %v4030_v41, %v4038_v42  ;;  %v4054_v31 = vsel %vm626_vm3, %v4038_v42, %v4030_v41  ;;  %v4094_v4 = vsel %vm675_vm2, %v4078_v51, %v4086_v45  ;;  %v4102_v58 = vsel %vm675_vm2, %v4086_v45, %v4078_v51 }
 0x7cd   : > { %v3880_v20 = vadd.f32 %v12312_v14, %v3879_v26  ;;  %v3881_v17 = vpop.f32.mrb[71].mxu1  ;;  %v4062_v44 = vsel %vm292_vm6, %v4054_v31, 0.0  ;;  %v4111_v13 = vsel %vm299_vm5, %v4102_v58, 0.0  ;;  %v12351_v9 = vsel %vm577_vm7, %v3982_v57, %v3990_v46 }
 0x7ce   : > { %v8897_v3 = vpack.i.bf16 %v4046_v55, %v4062_v44  ;;  %v8902_v27 = vpack.i.bf16 %v4111_v13, %v4094_v4  ;;  %v3983_v12 = vrot.slane %v3945_v37, 6  ;;  %v4031_v15 = vrot.slane %v3945_v37, 7 }
 0x7cf   : > { %v3946_v7 = vmax.f32 %v3880_v20, 0.0  ;;  %v4079_v62 = vrot.slane %v3945_v37, 1  ;;  %v4127_v10 = vrot.slane %v3945_v37, 2 }
 0x7d0   : > { %8898 = vrot.lane.b32.xlu1 %v8897_v3, %s9427_s10  ;;  %v3884_v53 = vpop.f32.mrb[72].mxu1 }
 0x7d1   : > { %v3991_v40 = vrot.slane %v3946_v7, 6  ;;  %v3885_v30 = vadd.f32 %v12312_v14, %v3884_v53  ;;  %v3886_v19 = vpop.f32.mrb[73].mxu1  ;;  %v4039_v36 = vrot.slane %v3946_v7, 7  ;;  %v8907_v25 = vpack.i.bf16 %v3946_v7, %v3945_v37 }
 0x7d2   : > { %v4087_v24 = vrot.slane %v3946_v7, 1  ;;  %v4135_v1 = vrot.slane %v3946_v7, 2 }
 0x7d3   : > { %v3947_v52 = vmax.f32 %v3885_v30, 0.0  ;;  %v4047_v35 = vsel %vm626_vm3, %v4031_v15, %v4039_v36  ;;  %v4055_v59 = vsel %vm626_vm3, %v4039_v36, %v4031_v15  ;;  %v12361_v5 = vsel %vm577_vm7, %v3991_v40, %v3983_v12 }
 0x7d4   : > { %8903 = vrot.lane.b32.xlu1 %v8902_v27, %s9426_s9  ;;  %v3889_v33 = vpop.f32.mrb[74].mxu1  ;;  %v4064_v48 = vsel %vm292_vm6, %v4055_v59, 0.0  ;;  %v4095_v57 = vsel %vm675_vm2, %v4079_v62, %v4087_v24  ;;  %v4103_v22 = vsel %vm675_vm2, %v4087_v24, %v4079_v62  ;;  %v12372_v34 = vsel %vm724_vm1, %v4127_v10, %v4135_v1 }
 0x7d5   : > { %v3890_v46 = vadd.f32 %v12312_v14, %v3889_v33  ;;  %v3891_v21 = vpop.f32.mrb[75].mxu1  ;;  %v8912_v32 = vpack.i.bf16 %v4047_v35, %v4064_v48  ;;  %v4113_v38 = vsel %vm299_vm5, %v4103_v22, 0.0  ;;  %v12380_v42 = vsel %vm724_vm1, %v4135_v1, %v4127_v10 }
 0x7d6   : > { %v8917_v54 = vpack.i.bf16 %v4113_v38, %v4095_v57  ;;  %v12384_v51 = vsel %vm577_vm7, %v3983_v12, %v3991_v40  ;;  %v3984_v45 = vrot.slane %v3947_v52, 6  ;;  %v4032_v0 = vrot.slane %v3947_v52, 7 }
 0x7d7   : > { %v3948_v41 = vmax.f32 %v3890_v46, 0.0  ;;  %8913 = vrot.lane.b32.xlu0 %v8912_v32, %s9427_s10  ;;  %v4080_v20 = vrot.slane %v3947_v52, 1  ;;  %v4128_v44 = vrot.slane %v3947_v52, 2 }
 0x7d8   : > { %8908 = vrot.lane.b32.xlu1 %v8907_v25, %s9428_s11  ;;  %v3894_v37 = vpop.f32.mrb[76].mxu1 }
 0x7d9   : > { %v3992_v26 = vrot.slane %v3948_v41, 6  ;;  %v3895_v55 = vadd.f32 %v12312_v14, %v3894_v37  ;;  %v3896_v31 = vpop.f32.mrb[77].mxu1  ;;  %v8922_v4 = vpack.i.bf16 %v3948_v41, %v3947_v52  ;;  %v4040_v58 = vrot.slane %v3948_v41, 7 }
 0x7da   : > { %v4088_v17 = vrot.slane %v3948_v41, 1  ;;  %v4136_v13 = vrot.slane %v3948_v41, 2 }
 0x7db   : > { %v3949_v3 = vmax.f32 %v3895_v55, 0.0  ;;  %8918 = vrot.lane.b32.xlu0 %v8917_v54, %s9426_s9  ;;  %v4048_v27 = vsel %vm626_vm3, %v4032_v0, %v4040_v58  ;;  %v4056_v7 = vsel %vm626_vm3, %v4040_v58, %v4032_v0  ;;  %v12395_v12 = vsel %vm577_vm7, %v3992_v26, %v3984_v45 }
 0x7dc   : > { %v3899_v53 = vpop.f32.mrb[78].mxu1  ;;  %v4066_v15 = vsel %vm292_vm6, %v4056_v7, 0.0  ;;  %v4096_v40 = vsel %vm675_vm2, %v4080_v20, %v4088_v17  ;;  %v4104_v30 = vsel %vm675_vm2, %v4088_v17, %v4080_v20  ;;  %v12405_v19 = vsel %vm724_vm1, %v4128_v44, %v4136_v13 }
 0x7dd   : > { %v3900_v36 = vadd.f32 %v12312_v14, %v3899_v53  ;;  %v3901_v25 = vpop.f32.mrb[79].mxu1  ;;  %v8927_v62 = vpack.i.bf16 %v4048_v27, %v4066_v15  ;;  %v4115_v24 = vsel %vm299_vm5, %v4104_v30, 0.0  ;;  %v12414_v52 = vsel %vm724_vm1, %v4136_v13, %v4128_v44 }
 0x7de   : > { %v8932_v10 = vpack.i.bf16 %v4115_v24, %v4096_v40  ;;  %v12418_v35 = vsel %vm577_vm7, %v3984_v45, %v3992_v26  ;;  %v3985_v59 = vrot.slane %v3949_v3, 6  ;;  %v4033_v48 = vrot.slane %v3949_v3, 7 }
 0x7df   : > { %v3950_v1 = vmax.f32 %v3900_v36, 0.0  ;;  %8923 = vrot.lane.b32.xlu0 %v8922_v4, %s9428_s11  ;;  %8928 = vrot.lane.b32.xlu1 %v8927_v62, %s9427_s10  ;;  %v4081_v38 = vrot.slane %v3949_v3, 1  ;;  %v4129_v41 = vrot.slane %v3949_v3, 2 }
 0x7e0   : > { %v3904_v33 = vpop.f32.mrb[80].mxu1 }
 0x7e1   : > { %v3993_v57 = vrot.slane %v3950_v1, 6  ;;  %v3905_v22 = vadd.f32 %v12312_v14, %v3904_v33  ;;  %v3906_v46 = vpop.f32.mrb[81].mxu1  ;;  %v4041_v21 = vrot.slane %v3950_v1, 7  ;;  %v8937_v32 = vpack.i.bf16 %v3950_v1, %v3949_v3 }
 0x7e2   : > { %v4089_v54 = vrot.slane %v3950_v1, 1  ;;  %v4137_v37 = vrot.slane %v3950_v1, 2 }
 0x7e3   : > { %v3951_v0 = vmax.f32 %v3905_v22, 0.0  ;;  %8933 = vrot.lane.b32.xlu1 %v8932_v10, %s9426_s9  ;;  %v4049_v45 = vsel %vm626_vm3, %v4033_v48, %v4041_v21  ;;  %v4057_v26 = vsel %vm626_vm3, %v4041_v21, %v4033_v48  ;;  %v12428_v55 = vsel %vm577_vm7, %v3993_v57, %v3985_v59 }
 0x7e4   : > { %v3909_v31 = vpop.f32.mrb[82].mxu1  ;;  %v4068_v4 = vsel %vm292_vm6, %v4057_v26, 0.0  ;;  %v4097_v58 = vsel %vm675_vm2, %v4081_v38, %v4089_v54  ;;  %v4105_v20 = vsel %vm675_vm2, %v4089_v54, %v4081_v38  ;;  %v12438_v17 = vsel %vm724_vm1, %v4129_v41, %v4137_v37 }
 0x7e5   : > { %v3910_v44 = vadd.f32 %v12312_v14, %v3909_v31  ;;  %v3911_v13 = vpop.f32.mrb[83].mxu1  ;;  %v8942_v3 = vpack.i.bf16 %v4049_v45, %v4068_v4  ;;  %v4117_v27 = vsel %vm299_vm5, %v4105_v20, 0.0  ;;  %v12447_v15 = vsel %vm724_vm1, %v4137_v37, %v4129_v41 }
 0x7e6   : > { %v8947_v7 = vpack.i.bf16 %v4117_v27, %v4097_v58  ;;  %v12451_v40 = vsel %vm577_vm7, %v3985_v59, %v3993_v57  ;;  %v3986_v30 = vrot.slane %v3951_v0, 6  ;;  %v4034_v25 = vrot.slane %v3951_v0, 7 }
 0x7e7   : > { %v3952_v53 = vmax.f32 %v3910_v44, 0.0  ;;  %8943 = vrot.lane.b32.xlu0 %v8942_v3, %s9427_s10  ;;  %8938 = vrot.lane.b32.xlu1 %v8937_v32, %s9428_s11  ;;  %v4082_v48 = vrot.slane %v3951_v0, 1  ;;  %v4130_v46 = vrot.slane %v3951_v0, 2 }
 0x7e8   : > { %v3914_v36 = vpop.f32.mrb[84].mxu1 }
 0x7e9   : > { %v3994_v62 = vrot.slane %v3952_v53, 6  ;;  %v3915_v24 = vadd.f32 %v12312_v14, %v3914_v36  ;;  %v3916_v10 = vpop.f32.mrb[85].mxu1  ;;  %v8952_v1 = vpack.i.bf16 %v3952_v53, %v3951_v0  ;;  %v4042_v33 = vrot.slane %v3952_v53, 7 }
 0x7ea   : > { %v4090_v22 = vrot.slane %v3952_v53, 1  ;;  %v4138_v21 = vrot.slane %v3952_v53, 2 }
 0x7eb   : > { %v3953_v32 = vmax.f32 %v3915_v24, 0.0  ;;  %8948 = vrot.lane.b32.xlu0 %v8947_v7, %s9426_s9  ;;  %v4050_v59 = vsel %vm626_vm3, %v4034_v25, %v4042_v33  ;;  %v4058_v57 = vsel %vm626_vm3, %v4042_v33, %v4034_v25  ;;  %v12461_v38 = vsel %vm577_vm7, %v3994_v62, %v3986_v30 }
 0x7ec   : > { %v3919_v54 = vpop.f32.mrb[86].mxu1  ;;  %v4070_v41 = vsel %vm292_vm6, %v4058_v57, 0.0  ;;  %v4098_v37 = vsel %vm675_vm2, %v4082_v48, %v4090_v22  ;;  %v4106_v0 = vsel %vm675_vm2, %v4090_v22, %v4082_v48  ;;  %v12471_v45 = vsel %vm724_vm1, %v4130_v46, %v4138_v21 }
 0x7ed   : > { %v3920_v26 = vadd.f32 %v12312_v14, %v3919_v54  ;;  %v3921_v31 = vpop.f32.mrb[87].mxu1  ;;  %v8957_v4 = vpack.i.bf16 %v4050_v59, %v4070_v41  ;;  %v4119_v58 = vsel %vm299_vm5, %v4106_v0, 0.0  ;;  %v12480_v13 = vsel %vm724_vm1, %v4138_v21, %v4130_v46 }
 0x7ee   : > { %v8962_v20 = vpack.i.bf16 %v4119_v58, %v4098_v37  ;;  %v12484_v3 = vsel %vm577_vm7, %v3986_v30, %v3994_v62  ;;  %v3987_v27 = vrot.slane %v3953_v32, 6  ;;  %v4035_v53 = vrot.slane %v3953_v32, 7 }
 0x7ef   : > { %v3954_v44 = vmax.f32 %v3920_v26, 0.0  ;;  %8953 = vrot.lane.b32.xlu0 %v8952_v1, %s9428_s11  ;;  %8958 = vrot.lane.b32.xlu1 %v8957_v4, %s9427_s10  ;;  %v4083_v1 = vrot.slane %v3953_v32, 1  ;;  %v4131_v22 = vrot.slane %v3953_v32, 2 }
 0x7f0   : > { %v3924_v7 = vpop.f32.mrb[88].mxu1 }
 0x7f1   : > { %v3995_v36 = vrot.slane %v3954_v44, 6  ;;  %v3925_v25 = vadd.f32 %v12312_v14, %v3924_v7  ;;  %v3926_v24 = vpop.f32.mrb[89].mxu1  ;;  %v4043_v10 = vrot.slane %v3954_v44, 7  ;;  %v8967_v33 = vpack.i.bf16 %v3954_v44, %v3953_v32 }
 0x7f2   : > { %v4091_v48 = vrot.slane %v3954_v44, 1  ;;  %v4139_v59 = vrot.slane %v3954_v44, 2 }
 0x7f3   : > { %v3955_v57 = vmax.f32 %v3925_v25, 0.0  ;;  %8963 = vrot.lane.b32.xlu1 %v8962_v20, %s9426_s9  ;;  %v4051_v30 = vsel %vm626_vm3, %v4035_v53, %v4043_v10  ;;  %v4059_v62 = vsel %vm626_vm3, %v4043_v10, %v4035_v53  ;;  %v12494_v46 = vsel %vm577_vm7, %v3995_v36, %v3987_v27 }
 0x7f4   : > { %v3929_v21 = vpop.f32.mrb[90].mxu1  ;;  %v4072_v54 = vsel %vm292_vm6, %v4059_v62, 0.0  ;;  %v4099_v32 = vsel %vm675_vm2, %v4083_v1, %v4091_v48  ;;  %v4107_v41 = vsel %vm675_vm2, %v4091_v48, %v4083_v1  ;;  %v12504_v37 = vsel %vm724_vm1, %v4131_v22, %v4139_v59 }
 0x7f5   : > { %v3930_v0 = vadd.f32 %v12312_v14, %v3929_v21  ;;  %v3931_v26 = vpop.f32.mrb[91].mxu1  ;;  %v8972_v31 = vpack.i.bf16 %v4051_v30, %v4072_v54  ;;  %v4121_v4 = vsel %vm299_vm5, %v4107_v41, 0.0  ;;  %v12513_v44 = vsel %vm724_vm1, %v4139_v59, %v4131_v22 }
 0x7f6   : > { %v8977_v58 = vpack.i.bf16 %v4121_v4, %v4099_v32  ;;  %v12517_v7 = vsel %vm577_vm7, %v3987_v27, %v3995_v36  ;;  %v3988_v53 = vrot.slane %v3955_v57, 6  ;;  %v4036_v24 = vrot.slane %v3955_v57, 7 }
 0x7f7   : > { %v3956_v20 = vmax.f32 %v3930_v0, 0.0  ;;  %8973 = vrot.lane.b32.xlu0 %v8972_v31, %s9427_s10  ;;  %8968 = vrot.lane.b32.xlu1 %v8967_v33, %s9428_s11  ;;  %v4084_v21 = vrot.slane %v3955_v57, 1  ;;  %v4132_v33 = vrot.slane %v3955_v57, 2 }
 0x7f8   : > { %v3934_v25 = vpop.f32.mrb[92].mxu1 }
 0x7f9   : > { %v3996_v10 = vrot.slane %v3956_v20, 6  ;;  %v3935_v1 = vadd.f32 %v12312_v14, %v3934_v25  ;;  %v3936_v48 = vpop.f32.mrb[93].mxu1  ;;  %v8982_v30 = vpack.i.bf16 %v3956_v20, %v3955_v57  ;;  %v4044_v62 = vrot.slane %v3956_v20, 7 }
 0x7fa   : > { %v4092_v54 = vrot.slane %v3956_v20, 1  ;;  %v4140_v32 = vrot.slane %v3956_v20, 2 }
 0x7fb   : > { %v3957_v41 = vmax.f32 %v3935_v1, 0.0  ;;  %8978 = vrot.lane.b32.xlu0 %v8977_v58, %s9426_s9  ;;  %v4052_v27 = vsel %vm626_vm3, %v4036_v24, %v4044_v62  ;;  %v4060_v36 = vsel %vm626_vm3, %v4044_v62, %v4036_v24  ;;  %v12527_v22 = vsel %vm577_vm7, %v3996_v10, %v3988_v53 }
 0x7fc   : > { %v3939_v59 = vpop.f32.mrb[94].mxu1  ;;  %v4074_v0 = vsel %vm292_vm6, %v4060_v36, 0.0  ;;  %v4100_v57 = vsel %vm675_vm2, %v4084_v21, %v4092_v54  ;;  %v4108_v26 = vsel %vm675_vm2, %v4092_v54, %v4084_v21  ;;  %v12537_v31 = vsel %vm724_vm1, %v4132_v33, %v4140_v32 }
 0x7fd   : > { %v3940_v4 = vadd.f32 %v12312_v14, %v3939_v59  ;;  %v3941_v58 = vpop.f32.mrb[95].mxu1  ;;  %v8987_v20 = vpack.i.bf16 %v4052_v27, %v4074_v0  ;;  %v4123_v25 = vsel %vm299_vm5, %v4108_v26, 0.0  ;;  %v12546_v48 = vsel %vm724_vm1, %v4140_v32, %v4132_v33 }
 0x7fe   : > { %v8992_v24 = vpack.i.bf16 %v4123_v25, %v4100_v57  ;;  %v12550_v62 = vsel %vm577_vm7, %v3988_v53, %v3996_v10  ;;  %v4037_v14 = vrot.slane %v3957_v41, 7  ;;  %v4085_v21 = vrot.slane %v3957_v41, 1 }
 0x7ff   : > { %v3958_v1 = vmax.f32 %v3940_v4, 0.0  ;;  %8983 = vrot.lane.b32.xlu0 %v8982_v30, %s9428_s11  ;;  %8988 = vrot.lane.b32.xlu1 %v8987_v20, %s9427_s10  ;;  %v3989_v0 = vrot.slane %v3957_v41, 6  ;;  %v4133_v57 = vrot.slane %v3957_v41, 2 }
 0x801   : > { %v4045_v54 = vrot.slane %v3958_v1, 7  ;;  %v4093_v27 = vrot.slane %v3958_v1, 1  ;;  %v3997_v36 = vrot.slane %v3958_v1, 6  ;;  %v4141_v59 = vrot.slane %v3958_v1, 2 }
 0x803   : > { %8993 = vrot.lane.b32.xlu1 %v8992_v24, %s9426_s9  ;;  %v4061_v30 = vsel %vm626_vm3, %v4045_v54, %v4037_v14  ;;  %v4101_v33 = vsel %vm675_vm2, %v4085_v21, %v4093_v27  ;;  %v4053_v53 = vsel %vm626_vm3, %v4037_v14, %v4045_v54  ;;  %v4109_v10 = vsel %vm675_vm2, %v4093_v27, %v4085_v21 }
 0x804   : > { %v4076_v32 = vsel %vm292_vm6, %v4061_v30, 0.0  ;;  %v12565_v26 = vsel %vm577_vm7, %v3997_v36, %v3989_v0  ;;  %v12569_v4 = vsel %vm577_vm7, %v3989_v0, %v3997_v36  ;;  %v12574_v58 = vsel %vm724_vm1, %v4133_v57, %v4141_v59 }
 0x805   : > { %4218 = vrot.lane.b32.xlu0 %v4076_v32, %s9427_s10  ;;  %v12578_v20 = vsel %vm724_vm1, %v4141_v59, %v4133_v57  ;;  %v4125_v25 = vsel %vm299_vm5, %v4109_v10, 0.0  ;;  %v4014_v54 = vsel %vm286_vm8, %v12329_v18, 0.0  ;;  %v4159_v18 = vsel %vm303_vm11, %v12333_v6, 0.0 }
 0x807   : > { %4282 = vrot.lane.b32.xlu1 %v3957_v41, %s9428_s11 }
 0x809   : > { %4346 = vrot.lane.b32.xlu0 %v4101_v33, %s9426_s9 }
 0x80b   : > { %4220 = vrot.lane.b32.xlu1 %v4053_v53, %s9427_s10 }
 0x80d   : > { %4284 = vrot.lane.b32.xlu0 %v3958_v1, %s9428_s11 }
 0x80f   : > { %4348 = vrot.lane.b32.xlu1 %v4125_v25, %s9426_s9 }
 0x83d   : > { %v8894_v14 = vpop.permute.xlu0 %8893 }
 0x83e   : > { %v8895_v36 = vunpack.i.l.bf16 %v8894_v14  ;;  %v8896_v10 = vunpack.i.h.bf16 %v8894_v14 }
 0x842   : > { %v8899_v24 = vpop.permute.xlu1 %8898 }
 0x843   : > { %v8900_v21 = vunpack.i.l.bf16 %v8899_v24  ;;  %v8901_v27 = vunpack.i.h.bf16 %v8899_v24 }
 0x845   : > { %v4366_v41 = vsel %vm949_vm4, %v4014_v54, %v8900_v21  ;;  %v4367_v53 = vsel %vm949_vm4, %v12351_v9, %v8901_v27  ;;  %v4016_v21 = vsel %vm286_vm8, %v12361_v5, 0.0 }
 0x846   : > { %v8904_v59 = vpop.permute.xlu1 %8903  ;;  %v4382_v1 = vsel %vm966_vm9, %v4366_v41, %v8895_v36  ;;  %v4383_v54 = vsel %vm966_vm9, %v4367_v53, %v8896_v10 }
 0x847   : > { %v8905_v0 = vunpack.i.l.bf16 %v8904_v59  ;;  %v8906_v57 = vunpack.i.h.bf16 %v8904_v59 }
 0x849   : > { %v8914_v30 = vpop.permute.xlu0 %8913  ;;  %v4398_v33 = vsel %vm983_vm10, %v4382_v1, %v8905_v0  ;;  %v4399_v27 = vsel %vm983_vm10, %v4383_v54, %v8906_v57  ;;  %v4161_v57 = vsel %vm303_vm11, %v12380_v42, 0.0 }
 0x84a   : > { %v8915_v32 = vunpack.i.l.bf16 %v8914_v30  ;;  %v8909_v25 = vpop.permute.xlu1 %8908  ;;  %4533 = vmatmul.mubr.f32.vlgmr.msra.gmra.mrb[80].mxu0 %v4398_v33  ;;  %v8916_v9 = vunpack.i.h.bf16 %v8914_v30 }
 0x84b   : > { %v8910_v24 = vunpack.i.l.bf16 %v8909_v25  ;;  %7842 = vmatprep.mubr.msk.f32.mxu0 %vm949_vm4, %v4159_v18  ;;  %v8911_v59 = vunpack.i.h.bf16 %v8909_v25 }
 0x84c   : > { %v4368_v41 = vsel %vm949_vm4, %v4016_v21, %v8915_v32  ;;  %v4369_v53 = vsel %vm949_vm4, %v12384_v51, %v8916_v9 }
 0x84d   : > { %v8919_v14 = vpop.permute.xlu0 %8918  ;;  %v4384_v6 = vsel %vm966_vm9, %v4368_v41, %v8910_v24  ;;  %v4385_v32 = vsel %vm966_vm9, %v4369_v53, %v8911_v59 }
 0x84e   : > { %v8920_v36 = vunpack.i.l.bf16 %v8919_v14  ;;  %4538 = vmatmul.mubr.f32.gmra.mrb[82].mxu0 %v4399_v27  ;;  %v8921_v1 = vunpack.i.h.bf16 %v8919_v14 }
 0x84f   : > { %7843 = vmatprep.mubr.msk.f32.mxu0 %vm949_vm4, %v12372_v34  ;;  %v4018_v34 = vsel %vm286_vm8, %v12395_v12, 0.0 }
 0x850   : > { %v4400_v0 = vsel %vm983_vm10, %v4384_v6, %v8920_v36  ;;  %v4401_v51 = vsel %vm983_vm10, %v4385_v32, %v8921_v1  ;;  %v4163_v6 = vsel %vm303_vm11, %v12414_v52, 0.0 }
 0x851   : > { %v8924_v5 = vpop.permute.xlu0 %8923  ;;  %v8929_v33 = vpop.permute.xlu1 %8928 }
 0x852   : > { %v8930_v30 = vunpack.i.l.bf16 %v8929_v33  ;;  %4543 = vmatmul.mubr.f32.gmra.mrb[84].mxu0 %v4400_v0  ;;  %v8925_v10 = vunpack.i.l.bf16 %v8924_v5  ;;  %v8931_v18 = vunpack.i.h.bf16 %v8929_v33  ;;  %v8926_v54 = vunpack.i.h.bf16 %v8924_v5 }
 0x853   : > { %7844 = vmatprep.mubr.msk.f32.mxu0 %vm949_vm4, %v4161_v57 }
 0x854   : > { %v4370_v25 = vsel %vm949_vm4, %v4018_v34, %v8930_v30  ;;  %v4371_v27 = vsel %vm949_vm4, %v12418_v35, %v8931_v18  ;;  %v4165_v18 = vsel %vm303_vm11, %v12447_v15, 0.0 }
 0x855   : > { %v8934_v24 = vpop.permute.xlu1 %8933  ;;  %v4386_v42 = vsel %vm966_vm9, %v4370_v25, %v8925_v10  ;;  %v4387_v0 = vsel %vm966_vm9, %v4371_v27, %v8926_v54 }
 0x856   : > { %v8935_v21 = vunpack.i.l.bf16 %v8934_v24  ;;  %4548 = vmatmul.mubr.f32.gmra.mrb[86].mxu0 %v4401_v51  ;;  %v8936_v9 = vunpack.i.h.bf16 %v8934_v24 }
 0x857   : > { %7845 = vmatprep.mubr.msk.f32.mxu0 %vm949_vm4, %v12405_v19  ;;  %v4020_v19 = vsel %vm286_vm8, %v12428_v55, 0.0 }
 0x858   : > { %v4402_v41 = vsel %vm983_vm10, %v4386_v42, %v8935_v21  ;;  %v4403_v35 = vsel %vm983_vm10, %v4387_v0, %v8936_v9 }
 0x859   : > { %v8944_v12 = vpop.permute.xlu0 %8943  ;;  %v8939_v14 = vpop.permute.xlu1 %8938 }
 0x85a   : > { %v8945_v36 = vunpack.i.l.bf16 %v8944_v12  ;;  %4553 = vmatmul.mubr.f32.gmra.mrb[88].mxu0 %v4402_v41  ;;  %v8940_v59 = vunpack.i.l.bf16 %v8939_v14  ;;  %v8946_v5 = vunpack.i.h.bf16 %v8944_v12  ;;  %v8941_v30 = vunpack.i.h.bf16 %v8939_v14 }
 0x85b   : > { %7846 = vmatprep.mubr.msk.f32.mxu0 %vm949_vm4, %v4163_v6 }
 0x85c   : > { %v4372_v1 = vsel %vm949_vm4, %v4020_v19, %v8945_v36  ;;  %v4373_v32 = vsel %vm949_vm4, %v12451_v40, %v8946_v5 }
 0x85d   : > { %v8949_v33 = vpop.permute.xlu0 %8948  ;;  %v4388_v52 = vsel %vm966_vm9, %v4372_v1, %v8940_v59  ;;  %v4389_v51 = vsel %vm966_vm9, %v4373_v32, %v8941_v30  ;;  %v4167_v59 = vsel %vm303_vm11, %v12480_v13, 0.0 }
 0x85e   : > { %v8950_v53 = vunpack.i.l.bf16 %v8949_v33  ;;  %4558 = vmatmul.mubr.f32.gmra.mrb[90].mxu0 %v4403_v35  ;;  %v8951_v10 = vunpack.i.h.bf16 %v8949_v33 }
 0x85f   : > { %7847 = vmatprep.mubr.msk.f32.mxu0 %vm949_vm4, %v12438_v17  ;;  %v4022_v17 = vsel %vm286_vm8, %v12461_v38, 0.0 }
 0x860   : > { %v4404_v57 = vsel %vm983_vm10, %v4388_v52, %v8950_v53  ;;  %v4405_v40 = vsel %vm983_vm10, %v4389_v51, %v8951_v10 }
 0x861   : > { %v8954_v55 = vpop.permute.xlu0 %8953  ;;  %v8959_v34 = vpop.permute.xlu1 %8958 }
 0x862   : > { %v8960_v25 = vunpack.i.l.bf16 %v8959_v34  ;;  %4563 = vmatmul.mubr.f32.gmra.mrb[92].mxu0 %v4404_v57  ;;  %v8955_v24 = vunpack.i.l.bf16 %v8954_v55  ;;  %v8961_v42 = vunpack.i.h.bf16 %v8959_v34  ;;  %v8956_v9 = vunpack.i.h.bf16 %v8954_v55 }
 0x863   : > { %7848 = vmatprep.mubr.msk.f32.mxu0 %vm949_vm4, %v4165_v18  ;;  %v4169_v34 = vsel %vm303_vm11, %v12513_v44, 0.0 }
 0x864   : > { %v4374_v21 = vsel %vm949_vm4, %v4022_v17, %v8960_v25  ;;  %v4375_v36 = vsel %vm949_vm4, %v12484_v3, %v8961_v42 }
 0x865   : > { %v8964_v54 = vpop.permute.xlu1 %8963  ;;  %v4390_v15 = vsel %vm966_vm9, %v4374_v21, %v8955_v24  ;;  %v4391_v0 = vsel %vm966_vm9, %v4375_v36, %v8956_v9 }
 0x866   : > { %v8965_v41 = vunpack.i.l.bf16 %v8964_v54  ;;  %4568 = vmatmul.mubr.f32.gmra.mrb[94].mxu0 %v4405_v40  ;;  %v8966_v14 = vunpack.i.h.bf16 %v8964_v54 }
 0x867   : > { %7849 = vmatprep.mubr.msk.f32.mxu0 %vm949_vm4, %v12471_v45  ;;  %v4024_v45 = vsel %vm286_vm8, %v12494_v46, 0.0 }
 0x868   : > { %v4406_v12 = vsel %vm983_vm10, %v4390_v15, %v8965_v41  ;;  %v4407_v3 = vsel %vm983_vm10, %v4391_v0, %v8966_v14  ;;  %v4028_v15 = vsel %vm286_vm8, %v12565_v26, 0.0 }
 0x869   : > { %v8974_v38 = vpop.permute.xlu0 %8973  ;;  %v8969_v27 = vpop.permute.xlu1 %8968 }
 0x86a   : > { %v8975_v6 = vunpack.i.l.bf16 %v8974_v38  ;;  %4573 = vmatmul.mubr.f32.gmra.mrb[96].mxu0 %v4406_v12  ;;  %v8970_v19 = vunpack.i.l.bf16 %v8969_v27  ;;  %v8976_v5 = vunpack.i.h.bf16 %v8974_v38  ;;  %v8971_v53 = vunpack.i.h.bf16 %v8969_v27 }
 0x86b   : > { %7850 = vmatprep.mubr.msk.f32.mxu0 %vm949_vm4, %v4167_v59 }
 0x86c   : > { %v4376_v1 = vsel %vm949_vm4, %v4024_v45, %v8975_v6  ;;  %v4377_v10 = vsel %vm949_vm4, %v12517_v7, %v8976_v5  ;;  %v7861_v5 = vld [vmem:[%s14865_s3 + $0x3e0] sm:$0xff] }
 0x86d   : > { %v8979_v33 = vpop.permute.xlu0 %8978  ;;  %v4392_v13 = vsel %vm966_vm9, %v4376_v1, %v8970_v19  ;;  %v4393_v25 = vsel %vm966_vm9, %v4377_v10, %v8971_v53  ;;  %v4173_v19 = vsel %vm303_vm11, %v12578_v20, 0.0  ;;  %v7859_v20 = vld [vmem:[%s14865_s3 + $0x3d0] sm:$0xff]  ;;  %v7860_v1 = vld [vmem:[%s14865_s3 + $0x3d8] sm:$0xff] }
 0x86e   : > { %v8980_v35 = vunpack.i.l.bf16 %v8979_v33  ;;  %4578 = vmatmul.mubr.f32.gmra.mrb[98].mxu0 %v4407_v3  ;;  %v8981_v30 = vunpack.i.h.bf16 %v8979_v33  ;;  %v8239_v33 = vpack.c.bf16 %v7860_v1, %v7859_v20  ;;  %v7862_v3 = vld [vmem:[%s14865_s3 + $0x3e8] sm:$0xff]  ;;  %v7864_v53 = vld [vmem:[%s14865_s3 + $0x3f8] sm:$0xff]  ;;  %v7867_v10 = vld [vmem:[%s14865_s3 + $0x410] sm:$0xff] }
 0x86f   : > { %7851 = vmatprep.mubr.msk.f32.mxu0 %vm949_vm4, %v12504_v37  ;;  %v4026_v37 = vsel %vm286_vm8, %v12527_v22, 0.0 }
 0x870   : > { %v4408_v52 = vsel %vm983_vm10, %v4392_v13, %v8980_v35  ;;  %v4409_v7 = vsel %vm983_vm10, %v4393_v25, %v8981_v30  ;;  %v8242_v35 = vpack.c.bf16 %v7862_v3, %v7861_v5  ;;  %v7863_v13 = vld [vmem:[%s14865_s3 + $0x3f0] sm:$0xff]  ;;  %v7865_v30 = vld [vmem:[%s14865_s3 + $0x400] sm:$0xff] }
 0x871   : > { %v8984_v46 = vpop.permute.xlu0 %8983  ;;  %v8989_v57 = vpop.permute.xlu1 %8988 }
 0x872   : > { %v8990_v55 = vunpack.i.l.bf16 %v8989_v57  ;;  %4583 = vmatmul.mubr.f32.gmra.mrb[100].mxu0 %v4408_v52  ;;  %v8985_v32 = vunpack.i.l.bf16 %v8984_v46  ;;  %v8991_v24 = vunpack.i.h.bf16 %v8989_v57  ;;  %v8986_v42 = vunpack.i.h.bf16 %v8984_v46  ;;  %v7866_v46 = vld [vmem:[%s14865_s3 + $0x408] sm:$0xff] }
 0x873   : > { %7852 = vmatprep.mubr.msk.f32.mxu0 %vm949_vm4, %v4169_v34  ;;  %v8245_v52 = vpack.c.bf16 %v7864_v53, %v7863_v13  ;;  %v8248_v57 = vpack.c.bf16 %v7866_v46, %v7865_v30 }
 0x874   : > { %v4378_v18 = vsel %vm949_vm4, %v4026_v37, %v8990_v55  ;;  %v4379_v41 = vsel %vm949_vm4, %v12550_v62, %v8991_v24  ;;  %v7868_v55 = vld [vmem:[%s14865_s3 + $0x418] sm:$0xff]  ;;  %v7870_v37 = vld [vmem:[%s14865_s3 + $0x428] sm:$0xff] }
 0x875   : > { %v8994_v17 = vpop.permute.xlu1 %8993  ;;  %v4394_v21 = vsel %vm966_vm9, %v4378_v18, %v8985_v32  ;;  %v4395_v14 = vsel %vm966_vm9, %v4379_v41, %v8986_v42  ;;  %v8251_v34 = vpack.c.bf16 %v7868_v55, %v7867_v10  ;;  %v7869_v32 = vld [vmem:[%s14865_s3 + $0x420] sm:$0xff]  ;;  %v7871_v18 = vld [vmem:[%s14865_s3 + $0x430] sm:$0xff]  ;;  %v7872_v24 = vld [vmem:[%s14865_s3 + $0x438] sm:$0xff] }
 0x876   : > { %v8995_v51 = vunpack.i.l.bf16 %v8994_v17  ;;  %4588 = vmatmul.mubr.f32.gmra.mrb[102].mxu0 %v4409_v7  ;;  %v8996_v22 = vunpack.i.h.bf16 %v8994_v17  ;;  %v8254_v25 = vpack.c.bf16 %v7870_v37, %v7869_v32  ;;  %v8257_v17 = vpack.c.bf16 %v7872_v24, %v7871_v18  ;;  %v7873_v7 = vld [vmem:[%s14865_s3 + $0x440] sm:$0xff] }
 0x877   : > { %7853 = vmatprep.mubr.msk.f32.mxu0 %vm949_vm4, %v12537_v31  ;;  %v4219_v44 = vpop.permute.xlu0 %4218  ;;  %v4171_v31 = vsel %vm303_vm11, %v12546_v48, 0.0 }
 0x878   : > { %v4410_v54 = vsel %vm983_vm10, %v4394_v21, %v8995_v51  ;;  %v4380_v9 = vsel %vm949_vm4, %v4028_v15, %v4219_v44  ;;  %v4411_v27 = vsel %vm983_vm10, %v4395_v14, %v8996_v22  ;;  %v7874_v51 = vld [vmem:[%s14865_s3 + $0x448] sm:$0xff]  ;;  %v12779_v21 = vld [vmem:[%s14866_s4 + $0x5] ss:$0 sm:$0xff] }
 0x879   : > { %v4283_v40 = vpop.permute.xlu1 %4282  ;;  %v8260_v44 = vpack.c.bf16 %v7874_v51, %v7873_v7 }
 0x87a   : > { %4593 = vmatmul.mubr.f32.gmra.mrb[104].mxu0 %v4410_v54  ;;  %v4396_v62 = vsel %vm966_vm9, %v4380_v9, %v4283_v40 }
 0x87b   : > { %7854 = vmatprep.mubr.msk.f32.mxu0 %vm949_vm4, %v4171_v31  ;;  %v4347_v12 = vpop.permute.xlu0 %4346 }
 0x87c   : > { %v4412_v36 = vsel %vm983_vm10, %v4396_v62, %v4347_v12 }
 0x87d   : > { %v4221_v38 = vpop.permute.xlu1 %4220 }
 0x87e   : > { %4598 = vmatmul.mubr.f32.gmra.mrb[106].mxu0 %v4411_v27  ;;  %v4381_v26 = vsel %vm949_vm4, %v12569_v4, %v4221_v38  ;;  %v7857_v4 = vld [vmem:[%s14865_s3 + $0x3c0] sm:$0xff] }
 0x87f   : > { %7855 = vmatprep.mubr.msk.f32.mxu0 %vm949_vm4, %v12574_v58  ;;  %v4285_v48 = vpop.permute.xlu0 %4284  ;;  %v7858_v58 = vld [vmem:[%s14865_s3 + $0x3c8] sm:$0xff] }
 0x880   : > { %v4397_v6 = vsel %vm966_vm9, %v4381_v26, %v4285_v48  ;;  %v8236_v0 = vpack.c.bf16 %v7858_v58, %v7857_v4  ;;  %v7875_v48 = vld [vmem:[%s14865_s3 + $0x450] sm:$0xff] }
 0x881   : > { %v4349_v59 = vpop.permute.xlu1 %4348 }
 0x882   : > { %4603 = vmatmul.mubr.f32.gmra.mrb[108].mxu0 %v4412_v36  ;;  %v4413_v45 = vsel %vm983_vm10, %v4397_v6, %v4349_v59  ;;  %8237 = vmatpush1.bf16.msra.mxu1 %v8236_v0 }
 0x883   : > { %7856 = vmatprep.mubr.msk.f32.mxu0 %vm949_vm4, %v4173_v19  ;;  %8238 = vmatprep.subr.bf16.mxu1 %v14891_v28 }
 0x886   : > { %4608 = vmatmul.mubr.f32.gmra.mrb[110].mxu0 %v4413_v45  ;;  %8240 = vmatpush1.bf16.msra.mxu1 %v8239_v33 }
 0x887   : > { %8241 = vmatprep.subr.bf16.mxu1 %v14891_v28 }
 0x88a   : > { %8243 = vmatpush1.bf16.msra.mxu1 %v8242_v35 }
 0x88b   : > { %8244 = vmatprep.subr.bf16.mxu1 %v14891_v28 }
 0x88e   : > { %8246 = vmatpush1.bf16.msra.mxu1 %v8245_v52 }
 0x88f   : > { %8247 = vmatprep.subr.bf16.mxu1 %v14891_v28 }
 0x892   : > { %8249 = vmatpush1.bf16.msra.mxu1 %v8248_v57 }
 0x893   : > { %8250 = vmatprep.subr.bf16.mxu1 %v14891_v28 }
 0x896   : > { %8252 = vmatpush1.bf16.msra.mxu1 %v8251_v34 }
 0x897   : > { %8253 = vmatprep.subr.bf16.mxu1 %v14891_v28 }
 0x89a   : > { %8255 = vmatpush1.bf16.msra.mxu1 %v8254_v25 }
 0x89b   : > { %8256 = vmatprep.subr.bf16.mxu1 %v14891_v28 }
 0x89e   : > { %8258 = vmatpush1.bf16.msra.mxu1 %v8257_v17 }
 0x89f   : > { %8259 = vmatprep.subr.bf16.mxu1 %v14891_v28 }
 0x8a2   : > { %8261 = vmatpush1.bf16.msra.mxu1 %v8260_v44 }
 0x8a3   : > { %8262 = vmatprep.subr.bf16.mxu1 %v14891_v28 }
 0x91d   : > { %v4534_v42 = vpop.f32.mrb[80].mxu0 }
 0x91e   : > { %v4535_v54 = vadd.f32 %v12779_v21, %v4534_v42  ;;  %v4536_v22 = vpop.f32.mrb[81].mxu0 }
 0x920   : > { %v4613_v40 = vmul.f32 0.3, %v4535_v54 }
 0x921   : > { %v4539_v41 = vpop.f32.mrb[82].mxu0 }
 0x922   : > { %v12783_v15 = vadd.f32 %v4613_v40, %v11757_v11  ;;  %v4540_v31 = vadd.f32 %v12779_v21, %v4539_v41  ;;  %v4541_v9 = vpop.f32.mrb[83].mxu0  ;;  %v7876_v11 = vld [vmem:[%s14865_s3 + $0x458] sm:$0xff] }
 0x923   : > { %v8263_v36 = vpack.c.bf16 %v7876_v11, %v7875_v48 }
 0x924   : > { %v4614_v12 = vmul.f32 0.3, %v4540_v31  ;;  %v4645_v14 = vmax.f32 %v12783_v15, 0.0 }
 0x925   : > { %v4544_v38 = vpop.f32.mrb[84].mxu0  ;;  %8264 = vmatpush1.bf16.msra.mxu1 %v8263_v36 }
 0x926   : > { %v12788_v27 = vadd.f32 %v4614_v12, %v11762_v50  ;;  %v4545_v62 = vadd.f32 %v12779_v21, %v4544_v38  ;;  %v4546_v26 = vpop.f32.mrb[85].mxu0  ;;  %v4828_v45 = vrot.slane %v4645_v14, 2  ;;  %v4732_v4 = vrot.slane %v4645_v14, 7  ;;  %8295 = vmatprep.subr.bf16.mxu1 %v14891_v28 }
 0x927   : > { %v4780_v50 = vrot.slane %v4645_v14, 1  ;;  %v4684_v35 = vrot.slane %v4645_v14, 6 }
 0x928   : > { %v4646_v6 = vmax.f32 %v12788_v27, 0.0  ;;  %v4615_v59 = vmul.f32 0.3, %v4545_v62 }
 0x929   : > { %v4549_v19 = vpop.f32.mrb[86].mxu0 }
 0x92a   : > { %v12799_v58 = vadd.f32 %v4615_v59, %v11773_v23  ;;  %v4550_v0 = vadd.f32 %v12779_v21, %v4549_v19  ;;  %v4551_v20 = vpop.f32.mrb[87].mxu0  ;;  %v8997_v1 = vpack.i.bf16 %v4646_v6, %v4645_v14  ;;  %v4836_v5 = vrot.slane %v4646_v6, 2 }
 0x92b   : > { %v4740_v33 = vrot.slane %v4646_v6, 7  ;;  %v4788_v3 = vrot.slane %v4646_v6, 1  ;;  %v4692_v13 = vrot.slane %v4646_v6, 6 }
 0x92c   : > { %v12804_v53 = vmax.f32 %v12799_v58, 0.0  ;;  %v4616_v52 = vmul.f32 0.3, %v4550_v0  ;;  %8998 = vrot.lane.b32.xlu1 %v8997_v1, %s9428_s11  ;;  %v4844_v23 = vsel %vm724_vm1, %v4828_v45, %v4836_v5  ;;  %v12811_v30 = vsel %vm724_vm1, %v4836_v5, %v4828_v45 }
 0x92d   : > { %v4554_v46 = vpop.f32.mrb[88].mxu0  ;;  %7879 = vmatprep.mubr.msk.f32.mxu1 %vm949_vm4, %v4844_v23  ;;  %v4748_v57 = vsel %vm626_vm3, %v4732_v4, %v4740_v33  ;;  %v4756_v10 = vsel %vm626_vm3, %v4740_v33, %v4732_v4  ;;  %v4796_v55 = vsel %vm675_vm2, %v4780_v50, %v4788_v3  ;;  %v4804_v34 = vsel %vm675_vm2, %v4788_v3, %v4780_v50 }
 0x92e   : > { %v12823_v32 = vadd.f32 %v4616_v52, %v11797_v16  ;;  %v4555_v37 = vadd.f32 %v12779_v21, %v4554_v46  ;;  %v4556_v25 = vpop.f32.mrb[89].mxu0  ;;  %v4764_v18 = vsel %vm292_vm6, %v4756_v10, 0.0  ;;  %v4813_v24 = vsel %vm299_vm5, %v4804_v34, 0.0 }
 0x92f   : > { %v9002_v17 = vpack.i.bf16 %v4748_v57, %v4764_v18  ;;  %v12833_v44 = vsel %vm577_vm7, %v4692_v13, %v4684_v35  ;;  %v9007_v42 = vpack.i.bf16 %v4813_v24, %v4796_v55  ;;  %v4733_v54 = vrot.slane %v12804_v53, 7 }
 0x930   : > { %v4648_v7 = vmax.f32 %v12823_v32, 0.0  ;;  %v4617_v51 = vmul.f32 0.3, %v4555_v37  ;;  %v4781_v22 = vrot.slane %v12804_v53, 1  ;;  %v12840_v40 = vsel %vm577_vm7, %v4684_v35, %v4692_v13 }
 0x931   : > { %9003 = vrot.lane.b32.xlu0 %v9002_v17, %s9427_s10  ;;  %v4559_v16 = vpop.f32.mrb[90].mxu0  ;;  %v4829_v14 = vrot.slane %v12804_v53, 2  ;;  %v4685_v26 = vrot.slane %v12804_v53, 6 }
 0x932   : > { %v12843_v41 = vadd.f32 %v4617_v51, %v11817_v29  ;;  %v4560_v31 = vadd.f32 %v12779_v21, %v4559_v16  ;;  %v4561_v9 = vpop.f32.mrb[91].mxu0  ;;  %v4741_v12 = vrot.slane %v4648_v7, 7  ;;  %v4789_v38 = vrot.slane %v4648_v7, 1 }
 0x933   : > { %v4837_v62 = vrot.slane %v4648_v7, 2  ;;  %v4693_v48 = vrot.slane %v4648_v7, 6  ;;  %v9012_v3 = vpack.i.bf16 %v4648_v7, %v12804_v53 }
 0x934   : > { %v12849_v11 = vmax.f32 %v12843_v41, 0.0  ;;  %v4618_v36 = vmul.f32 0.3, %v4560_v31  ;;  %v4749_v6 = vsel %vm626_vm3, %v4733_v54, %v4741_v12  ;;  %v4757_v29 = vsel %vm626_vm3, %v4741_v12, %v4733_v54 }
 0x935   : > { %9008 = vrot.lane.b32.xlu0 %v9007_v42, %s9426_s9  ;;  %v4564_v59 = vpop.f32.mrb[92].mxu0  ;;  %v4766_v19 = vsel %vm292_vm6, %v4757_v29, 0.0  ;;  %v4797_v45 = vsel %vm675_vm2, %v4781_v22, %v4789_v38  ;;  %v4805_v4 = vsel %vm675_vm2, %v4789_v38, %v4781_v22  ;;  %v12864_v50 = vsel %vm724_vm1, %v4829_v14, %v4837_v62 }
 0x936   : > { %v12867_v0 = vadd.f32 %v4618_v36, %v11841_v8  ;;  %v4565_v20 = vadd.f32 %v12779_v21, %v4564_v59  ;;  %v4566_v1 = vpop.f32.mrb[93].mxu0  ;;  %v9017_v5 = vpack.i.bf16 %v4749_v6, %v4766_v19  ;;  %v4815_v33 = vsel %vm299_vm5, %v4805_v4, 0.0 }
 0x937   : > { %v12875_v35 = vsel %vm577_vm7, %v4693_v48, %v4685_v26  ;;  %v9022_v8 = vpack.i.bf16 %v4815_v33, %v4797_v45  ;;  %v12881_v23 = vsel %vm724_vm1, %v4837_v62, %v4829_v14  ;;  %v4734_v57 = vrot.slane %v12849_v11, 7 }
 0x938   : > { %v4650_v13 = vmax.f32 %v12867_v0, 0.0  ;;  %v4619_v52 = vmul.f32 0.3, %v4565_v20  ;;  %9018 = vrot.lane.b32.xlu1 %v9017_v5, %s9427_s10  ;;  %v4782_v53 = vrot.slane %v12849_v11, 1  ;;  %v12888_v10 = vsel %vm577_vm7, %v4685_v26, %v4693_v48 }
 0x939   : > { %9013 = vrot.lane.b32.xlu0 %v9012_v3, %s9428_s11  ;;  %v4569_v46 = vpop.f32.mrb[94].mxu0  ;;  %v4830_v55 = vrot.slane %v12849_v11, 2  ;;  %v4686_v24 = vrot.slane %v12849_v11, 6 }
 0x93a   : > { %v12892_v34 = vadd.f32 %v4619_v52, %v11866_v47  ;;  %v4570_v37 = vadd.f32 %v12779_v21, %v4569_v46  ;;  %v4571_v25 = vpop.f32.mrb[95].mxu0  ;;  %v4742_v18 = vrot.slane %v4650_v13, 7  ;;  %v9027_v17 = vpack.i.bf16 %v4650_v13, %v12849_v11 }
 0x93b   : > { %v4790_v7 = vrot.slane %v4650_v13, 1  ;;  %v4838_v51 = vrot.slane %v4650_v13, 2  ;;  %v4694_v16 = vrot.slane %v4650_v13, 6 }
 0x93c   : > { %v12898_v42 = vmax.f32 %v12892_v34, 0.0  ;;  %v4620_v54 = vmul.f32 0.3, %v4570_v37  ;;  %9023 = vrot.lane.b32.xlu1 %v9022_v8, %s9426_s9  ;;  %v4750_v47 = vsel %vm626_vm3, %v4734_v57, %v4742_v18  ;;  %v4758_v22 = vsel %vm626_vm3, %v4742_v18, %v4734_v57 }
 0x93d   : > { %v4574_v31 = vpop.f32.mrb[96].mxu0  ;;  %v4768_v9 = vsel %vm292_vm6, %v4758_v22, 0.0  ;;  %v4798_v12 = vsel %vm675_vm2, %v4782_v53, %v4790_v7  ;;  %v4806_v14 = vsel %vm675_vm2, %v4790_v7, %v4782_v53  ;;  %v12913_v38 = vsel %vm724_vm1, %v4830_v55, %v4838_v51 }
 0x93e   : > { %v12916_v62 = vadd.f32 %v4620_v54, %v11890_v56  ;;  %v4575_v26 = vadd.f32 %v12779_v21, %v4574_v31  ;;  %v4576_v48 = vpop.f32.mrb[97].mxu0  ;;  %v9032_v11 = vpack.i.bf16 %v4750_v47, %v4768_v9  ;;  %v4817_v36 = vsel %vm299_vm5, %v4806_v14, 0.0 }
 0x93f   : > { %v12923_v6 = vsel %vm577_vm7, %v4694_v16, %v4686_v24  ;;  %v9037_v56 = vpack.i.bf16 %v4817_v36, %v4798_v12  ;;  %v12930_v19 = vsel %vm724_vm1, %v4838_v51, %v4830_v55  ;;  %v4735_v4 = vrot.slane %v12898_v42, 7 }
 0x940   : > { %v4652_v29 = vmax.f32 %v12916_v62, 0.0  ;;  %v4621_v59 = vmul.f32 0.3, %v4575_v26  ;;  %9028 = vrot.lane.b32.xlu1 %v9027_v17, %s9428_s11  ;;  %9033 = vrot.lane.b32.xlu0 %v9032_v11, %s9427_s10  ;;  %v4783_v20 = vrot.slane %v12898_v42, 1  ;;  %v12936_v1 = vsel %vm577_vm7, %v4686_v24, %v4694_v16 }
 0x941   : > { %v4579_v45 = vpop.f32.mrb[98].mxu0  ;;  %v4831_v5 = vrot.slane %v12898_v42, 2  ;;  %v4687_v8 = vrot.slane %v12898_v42, 6 }
 0x942   : > { %v12940_v33 = vadd.f32 %v4621_v59, %v11914_v39  ;;  %v4580_v3 = vadd.f32 %v12779_v21, %v4579_v45  ;;  %v4581_v13 = vpop.f32.mrb[99].mxu0  ;;  %v4743_v52 = vrot.slane %v4652_v29, 7  ;;  %v9042_v46 = vpack.i.bf16 %v4652_v29, %v12898_v42 }
 0x943   : > { %v4791_v57 = vrot.slane %v4652_v29, 1  ;;  %v4839_v53 = vrot.slane %v4652_v29, 2  ;;  %v4695_v55 = vrot.slane %v4652_v29, 6 }
 0x944   : > { %v12946_v37 = vmax.f32 %v12940_v33, 0.0  ;;  %v4622_v25 = vmul.f32 0.3, %v4580_v3  ;;  %9038 = vrot.lane.b32.xlu0 %v9037_v56, %s9426_s9  ;;  %v4751_v39 = vsel %vm626_vm3, %v4735_v4, %v4743_v52  ;;  %v4759_v18 = vsel %vm626_vm3, %v4743_v52, %v4735_v4 }
 0x945   : > { %v4584_v24 = vpop.f32.mrb[100].mxu0  ;;  %v4770_v17 = vsel %vm292_vm6, %v4759_v18, 0.0  ;;  %v4799_v7 = vsel %vm675_vm2, %v4783_v20, %v4791_v57  ;;  %v4807_v51 = vsel %vm675_vm2, %v4791_v57, %v4783_v20  ;;  %v12961_v16 = vsel %vm724_vm1, %v4831_v5, %v4839_v53 }
 0x946   : > { %v12964_v42 = vadd.f32 %v4622_v25, %v11938_v2  ;;  %v4585_v54 = vadd.f32 %v12779_v21, %v4584_v24  ;;  %v4586_v47 = vpop.f32.mrb[101].mxu0  ;;  %v9047_v22 = vpack.i.bf16 %v4751_v39, %v4770_v17  ;;  %v4819_v31 = vsel %vm299_vm5, %v4807_v51, 0.0 }
 0x947   : > { %v12971_v9 = vsel %vm577_vm7, %v4695_v55, %v4687_v8  ;;  %v9052_v2 = vpack.i.bf16 %v4819_v31, %v4799_v7  ;;  %v12978_v26 = vsel %vm724_vm1, %v4839_v53, %v4831_v5  ;;  %v4736_v11 = vrot.slane %v12946_v37, 7 }
 0x948   : > { %v4654_v12 = vmax.f32 %v12964_v42, 0.0  ;;  %v4623_v14 = vmul.f32 0.3, %v4585_v54  ;;  %9048 = vrot.lane.b32.xlu1 %v9047_v22, %s9427_s10  ;;  %9043 = vrot.lane.b32.xlu0 %v9042_v46, %s9428_s11  ;;  %v4784_v36 = vrot.slane %v12946_v37, 1  ;;  %v12984_v29 = vsel %vm577_vm7, %v4687_v8, %v4695_v55 }
 0x949   : > { %v4589_v48 = vpop.f32.mrb[102].mxu0  ;;  %v4832_v59 = vrot.slane %v12946_v37, 2  ;;  %v4688_v5 = vrot.slane %v12946_v37, 6 }
 0x94a   : > { %v12988_v56 = vadd.f32 %v4623_v14, %v11962_v63  ;;  %v4590_v45 = vadd.f32 %v12779_v21, %v4589_v48  ;;  %v4591_v4 = vpop.f32.mrb[103].mxu0  ;;  %v4744_v20 = vrot.slane %v4654_v12, 7  ;;  %v9057_v3 = vpack.i.bf16 %v4654_v12, %v12946_v37 }
 0x94b   : > { %v4792_v13 = vrot.slane %v4654_v12, 1  ;;  %v4840_v52 = vrot.slane %v4654_v12, 2  ;;  %v4696_v46 = vrot.slane %v4654_v12, 6 }
 0x94c   : > { %v4655_v57 = vmax.f32 %v12988_v56, 0.0  ;;  %v4624_v8 = vmul.f32 0.3, %v4590_v45  ;;  %9053 = vrot.lane.b32.xlu1 %v9052_v2, %s9426_s9  ;;  %v4752_v63 = vsel %vm626_vm3, %v4736_v11, %v4744_v20  ;;  %v4760_v53 = vsel %vm626_vm3, %v4744_v20, %v4736_v11 }
 0x94d   : > { %v4594_v55 = vpop.f32.mrb[104].mxu0  ;;  %v4772_v25 = vsel %vm292_vm6, %v4760_v53, 0.0  ;;  %v4800_v37 = vsel %vm675_vm2, %v4784_v36, %v4792_v13  ;;  %v4808_v39 = vsel %vm675_vm2, %v4792_v13, %v4784_v36  ;;  %v13007_v18 = vsel %vm724_vm1, %v4832_v59, %v4840_v52 }
 0x94e   : > { %v13010_v24 = vadd.f32 %v4624_v8, %v11984_v60  ;;  %v4595_v17 = vadd.f32 %v12779_v21, %v4594_v55  ;;  %v4596_v7 = vpop.f32.mrb[105].mxu0  ;;  %v9062_v51 = vpack.i.bf16 %v4752_v63, %v4772_v25  ;;  %v4821_v54 = vsel %vm299_vm5, %v4808_v39, 0.0 }
 0x94f   : > { %v13017_v47 = vsel %vm577_vm7, %v4696_v46, %v4688_v5  ;;  %v9067_v60 = vpack.i.bf16 %v4821_v54, %v4800_v37  ;;  %v13024_v12 = vsel %vm724_vm1, %v4840_v52, %v4832_v59  ;;  %v4737_v2 = vrot.slane %v4655_v57, 7 }
 0x950   : > { %v4656_v22 = vmax.f32 %v13010_v24, 0.0  ;;  %v4625_v31 = vmul.f32 0.3, %v4595_v17  ;;  %9058 = vrot.lane.b32.xlu1 %v9057_v3, %s9428_s11  ;;  %9063 = vrot.lane.b32.xlu0 %v9062_v51, %s9427_s10  ;;  %v4785_v48 = vrot.slane %v4655_v57, 1  ;;  %v13028_v11 = vsel %vm577_vm7, %v4688_v5, %v4696_v46  ;;  %v14904_v17 = vld [vmem:[#allocation3_spill] sm:$0xff] }
 0x951   : > { %v4599_v14 = vpop.f32.mrb[106].mxu0  ;;  %v4833_v36 = vrot.slane %v4655_v57, 2  ;;  %v4689_v13 = vrot.slane %v4655_v57, 6 }
 0x952   : > { %v13031_v45 = vadd.f32 %v4625_v31, %v12005_v61  ;;  %v4600_v4 = vadd.f32 %v12779_v21, %v4599_v14  ;;  %v4601_v20 = vpop.f32.mrb[107].mxu0  ;;  %v4745_v3 = vrot.slane %v4656_v22, 7  ;;  %v9072_v8 = vpack.i.bf16 %v4656_v22, %v4655_v57 }
 0x953   : > { %v4793_v63 = vrot.slane %v4656_v22, 1  ;;  %v4841_v59 = vrot.slane %v4656_v22, 2  ;;  %v4697_v52 = vrot.slane %v4656_v22, 6 }
 0x954   : > { %v4657_v53 = vmax.f32 %v13031_v45, 0.0  ;;  %v4626_v55 = vmul.f32 0.3, %v4600_v4  ;;  %9068 = vrot.lane.b32.xlu0 %v9067_v60, %s9426_s9  ;;  %v4753_v5 = vsel %vm626_vm3, %v4737_v2, %v4745_v3  ;;  %v4761_v61 = vsel %vm626_vm3, %v4745_v3, %v4737_v2 }
 0x955   : > { %v4604_v46 = vpop.f32.mrb[108].mxu0  ;;  %v4774_v25 = vsel %vm292_vm6, %v4761_v61, 0.0  ;;  %v4801_v57 = vsel %vm675_vm2, %v4785_v48, %v4793_v63  ;;  %v4809_v37 = vsel %vm675_vm2, %v4793_v63, %v4785_v48  ;;  %v13048_v39 = vsel %vm724_vm1, %v4833_v36, %v4841_v59 }
 0x956   : > { %v13051_v7 = vadd.f32 %v4626_v55, %v14904_v17  ;;  %v4605_v51 = vadd.f32 %v12779_v21, %v4604_v46  ;;  %v4606_v54 = vpop.f32.mrb[109].mxu0  ;;  %v9077_v22 = vpack.i.bf16 %v4753_v5, %v4774_v25  ;;  %v4823_v31 = vsel %vm299_vm5, %v4809_v37, 0.0  ;;  %v14906_v55 = vld [vmem:[#allocation5_spill] sm:$0xff] }
 0x957   : > { %v13058_v60 = vsel %vm577_vm7, %v4697_v52, %v4689_v13  ;;  %v13065_v48 = vsel %vm724_vm1, %v4841_v59, %v4833_v36  ;;  %v9082_v20 = vpack.i.bf16 %v4823_v31, %v4801_v57  ;;  %v4738_v3 = vrot.slane %v4657_v53, 7 }
 0x958   : > { %14905 = vst [vmem:[#allocation3_spill] sm:$0xff] %v13051_v7  ;;  %v4658_v14 = vmax.f32 %v13051_v7, 0.0  ;;  %v4627_v2 = vmul.f32 0.3, %v4605_v51  ;;  %9078 = vrot.lane.b32.xlu1 %v9077_v22, %s9427_s10  ;;  %9073 = vrot.lane.b32.xlu0 %v9072_v8, %s9428_s11  ;;  %v13069_v63 = vsel %vm577_vm7, %v4689_v13, %v4697_v52  ;;  %v4786_v37 = vrot.slane %v4657_v53, 1 }
 0x959   : > { %v4609_v4 = vpop.f32.mrb[110].mxu0  ;;  %v4834_v17 = vrot.slane %v4657_v53, 2  ;;  %v4690_v52 = vrot.slane %v4657_v53, 6 }
 0x95a   : > { %v13072_v5 = vadd.f32 %v4627_v2, %v14906_v55  ;;  %v4610_v61 = vadd.f32 %v12779_v21, %v4609_v4  ;;  %v4611_v46 = vpop.f32.mrb[111].mxu0  ;;  %v4746_v25 = vrot.slane %v4658_v14, 7  ;;  %v4794_v8 = vrot.slane %v4658_v14, 1  ;;  %v14908_v2 = vld [vmem:[#allocation4_spill] sm:$0xff] }
 0x95b   : > { %v4842_v51 = vrot.slane %v4658_v14, 2  ;;  %v4698_v36 = vrot.slane %v4658_v14, 6 }
 0x95c   : > { %14907 = vst [vmem:[#allocation5_spill] sm:$0xff] %v13072_v5  ;;  %v4628_v59 = vmul.f32 0.3, %v4610_v61  ;;  %9083 = vrot.lane.b32.xlu1 %v9082_v20, %s9426_s9  ;;  %v4754_v57 = vsel %vm626_vm3, %v4738_v3, %v4746_v25  ;;  %v4762_v13 = vsel %vm626_vm3, %v4746_v25, %v4738_v3  ;;  %v4659_v54 = vmax.f32 %v13072_v5, 0.0 }
 0x95d   : > { %v4776_v21 = vsel %vm292_vm6, %v4762_v13, 0.0  ;;  %v4810_v22 = vsel %vm675_vm2, %v4794_v8, %v4786_v37  ;;  %v13087_v31 = vsel %vm724_vm1, %v4834_v17, %v4842_v51  ;;  %v9087_v20 = vpack.i.bf16 %v4658_v14, %v4657_v53 }
 0x95e   : > { %v13090_v4 = vadd.f32 %v4628_v59, %v14908_v2  ;;  %v9092_v55 = vpack.i.bf16 %v4754_v57, %v4776_v21  ;;  %v4802_v3 = vsel %vm675_vm2, %v4786_v37, %v4794_v8  ;;  %v4825_v61 = vsel %vm299_vm5, %v4810_v22, 0.0 }
 0x95f   : > { %v13098_v46 = vsel %vm577_vm7, %v4698_v36, %v4690_v52  ;;  %v13105_v53 = vsel %vm724_vm1, %v4842_v51, %v4834_v17  ;;  %v13109_v14 = vsel %vm577_vm7, %v4690_v52, %v4698_v36  ;;  %v4739_v37 = vrot.slane %v4659_v54, 7 }
 0x960   : > { %14909 = vst [vmem:[#allocation4_spill] sm:$0xff] %v13090_v4  ;;  %v4660_v25 = vmax.f32 %v13090_v4, 0.0  ;;  %9088 = vrot.lane.b32.xlu1 %v9087_v20, %s9428_s11  ;;  %9093 = vrot.lane.b32.xlu0 %v9092_v55, %s9427_s10  ;;  %v9097_v8 = vpack.i.bf16 %v4825_v61, %v4802_v3  ;;  %v4691_v21 = vrot.slane %v4659_v54, 6  ;;  %v4835_v2 = vrot.slane %v4659_v54, 2 }
 0x961   : > { %v4787_v3 = vrot.slane %v4659_v54, 1 }
 0x962   : > { %v4747_v59 = vrot.slane %v4660_v25, 7  ;;  %v4699_v57 = vrot.slane %v4660_v25, 6  ;;  %v4843_v13 = vrot.slane %v4660_v25, 2  ;;  %v4795_v51 = vrot.slane %v4660_v25, 1 }
 0x964   : > { %9098 = vrot.lane.b32.xlu0 %v9097_v8, %s9426_s9  ;;  %v4763_v22 = vsel %vm626_vm3, %v4747_v59, %v4739_v37  ;;  %v13118_v36 = vsel %vm577_vm7, %v4699_v57, %v4691_v21  ;;  %v13122_v52 = vsel %vm577_vm7, %v4691_v21, %v4699_v57  ;;  %v13127_v20 = vsel %vm724_vm1, %v4835_v2, %v4843_v13 }
 0x965   : > { %v4778_v17 = vsel %vm292_vm6, %v4763_v22, 0.0  ;;  %v13131_v55 = vsel %vm724_vm1, %v4843_v13, %v4835_v2  ;;  %v4803_v61 = vsel %vm675_vm2, %v4787_v3, %v4795_v51  ;;  %v4755_v8 = vsel %vm626_vm3, %v4739_v37, %v4747_v59 }
 0x966   : > { %4920 = vrot.lane.b32.xlu1 %v4778_v17, %s9427_s10  ;;  %v4811_v57 = vsel %vm675_vm2, %v4795_v51, %v4787_v3  ;;  %v4716_v2 = vsel %vm286_vm8, %v12833_v44, 0.0  ;;  %v4861_v44 = vsel %vm303_vm11, %v12811_v30, 0.0 }
 0x967   : > { %v4827_v13 = vsel %vm299_vm5, %v4811_v57, 0.0 }
 0x968   : > { %4984 = vrot.lane.b32.xlu0 %v4659_v54, %s9428_s11 }
 0x96a   : > { %5048 = vrot.lane.b32.xlu1 %v4803_v61, %s9426_s9 }
 0x96c   : > { %4922 = vrot.lane.b32.xlu0 %v4755_v8, %s9427_s10 }
 0x96e   : > { %4986 = vrot.lane.b32.xlu1 %v4660_v25, %s9428_s11 }
 0x970   : > { %5050 = vrot.lane.b32.xlu0 %v4827_v13, %s9426_s9 }
 0x99e   : > { %v8999_v21 = vpop.permute.xlu1 %8998 }
 0x99f   : > { %v9000_v17 = vunpack.i.l.bf16 %v8999_v21  ;;  %v9001_v4 = vunpack.i.h.bf16 %v8999_v21 }
 0x9a3   : > { %v9004_v54 = vpop.permute.xlu0 %9003 }
 0x9a4   : > { %v9005_v22 = vunpack.i.l.bf16 %v9004_v54  ;;  %v9006_v37 = vunpack.i.h.bf16 %v9004_v54 }
 0x9a6   : > { %v5068_v59 = vsel %vm949_vm4, %v4716_v2, %v9005_v22  ;;  %v5069_v13 = vsel %vm949_vm4, %v12840_v40, %v9006_v37  ;;  %v4718_v22 = vsel %vm286_vm8, %v12875_v35, 0.0 }
 0x9a7   : > { %v9009_v61 = vpop.permute.xlu0 %9008  ;;  %v5084_v25 = vsel %vm966_vm9, %v5068_v59, %v9000_v17  ;;  %v5085_v2 = vsel %vm966_vm9, %v5069_v13, %v9001_v4 }
 0x9a8   : > { %v9010_v51 = vunpack.i.l.bf16 %v9009_v61  ;;  %v9011_v3 = vunpack.i.h.bf16 %v9009_v61 }
 0x9aa   : > { %v9019_v8 = vpop.permute.xlu1 %9018  ;;  %v5100_v57 = vsel %vm983_vm10, %v5084_v25, %v9010_v51  ;;  %v5101_v37 = vsel %vm983_vm10, %v5085_v2, %v9011_v3  ;;  %v4863_v3 = vsel %vm303_vm11, %v12881_v23, 0.0 }
 0x9ab   : > { %v9020_v5 = vunpack.i.l.bf16 %v9019_v8  ;;  %v9014_v7 = vpop.permute.xlu0 %9013  ;;  %5235 = vmatmul.mubr.f32.vlgmr.msra.gmra.mrb[96].mxu1 %v5100_v57  ;;  %v9021_v40 = vunpack.i.h.bf16 %v9019_v8 }
 0x9ac   : > { %v9015_v54 = vunpack.i.l.bf16 %v9014_v7  ;;  %7880 = vmatprep.mubr.msk.f32.mxu1 %vm949_vm4, %v4861_v44  ;;  %v9016_v61 = vunpack.i.h.bf16 %v9014_v7 }
 0x9ad   : > { %v5070_v59 = vsel %vm949_vm4, %v4718_v22, %v9020_v5  ;;  %v5071_v5 = vsel %vm949_vm4, %v12888_v10, %v9021_v40 }
 0x9ae   : > { %v9024_v21 = vpop.permute.xlu1 %9023  ;;  %v5086_v30 = vsel %vm966_vm9, %v5070_v59, %v9015_v54  ;;  %v5087_v7 = vsel %vm966_vm9, %v5071_v5, %v9016_v61 }
 0x9af   : > { %v9025_v17 = vunpack.i.l.bf16 %v9024_v21  ;;  %5240 = vmatmul.mubr.f32.gmra.mrb[98].mxu1 %v5101_v37  ;;  %v9026_v25 = vunpack.i.h.bf16 %v9024_v21 }
 0x9b0   : > { %7881 = vmatprep.mubr.msk.f32.mxu1 %vm949_vm4, %v12864_v50  ;;  %v4720_v50 = vsel %vm286_vm8, %v12923_v6, 0.0 }
 0x9b1   : > { %v5102_v51 = vsel %vm983_vm10, %v5086_v30, %v9025_v17  ;;  %v5103_v10 = vsel %vm983_vm10, %v5087_v7, %v9026_v25  ;;  %v4865_v30 = vsel %vm303_vm11, %v12930_v19, 0.0 }
 0x9b2   : > { %v9029_v35 = vpop.permute.xlu1 %9028  ;;  %v9034_v57 = vpop.permute.xlu0 %9033 }
 0x9b3   : > { %v9035_v4 = vunpack.i.l.bf16 %v9034_v57  ;;  %5245 = vmatmul.mubr.f32.gmra.mrb[100].mxu1 %v5102_v51  ;;  %v9030_v8 = vunpack.i.l.bf16 %v9029_v35  ;;  %v9036_v44 = vunpack.i.h.bf16 %v9034_v57  ;;  %v9031_v2 = vunpack.i.h.bf16 %v9029_v35 }
 0x9b4   : > { %7882 = vmatprep.mubr.msk.f32.mxu1 %vm949_vm4, %v4863_v3 }
 0x9b5   : > { %v5072_v13 = vsel %vm949_vm4, %v4720_v50, %v9035_v4  ;;  %v5073_v37 = vsel %vm949_vm4, %v12936_v1, %v9036_v44  ;;  %v4867_v44 = vsel %vm303_vm11, %v12978_v26, 0.0 }
 0x9b6   : > { %v9039_v54 = vpop.permute.xlu0 %9038  ;;  %v5088_v23 = vsel %vm966_vm9, %v5072_v13, %v9030_v8  ;;  %v5089_v51 = vsel %vm966_vm9, %v5073_v37, %v9031_v2 }
 0x9b7   : > { %v9040_v22 = vunpack.i.l.bf16 %v9039_v54  ;;  %5250 = vmatmul.mubr.f32.gmra.mrb[102].mxu1 %v5103_v10  ;;  %v9041_v40 = vunpack.i.h.bf16 %v9039_v54 }
 0x9b8   : > { %7883 = vmatprep.mubr.msk.f32.mxu1 %vm949_vm4, %v12913_v38  ;;  %v4722_v38 = vsel %vm286_vm8, %v12971_v9, 0.0 }
 0x9b9   : > { %v5104_v59 = vsel %vm983_vm10, %v5088_v23, %v9040_v22  ;;  %v5105_v1 = vsel %vm983_vm10, %v5089_v51, %v9041_v40 }
 0x9ba   : > { %v9049_v6 = vpop.permute.xlu1 %9048  ;;  %v9044_v21 = vpop.permute.xlu0 %9043 }
 0x9bb   : > { %v9050_v17 = vunpack.i.l.bf16 %v9049_v6  ;;  %5255 = vmatmul.mubr.f32.gmra.mrb[104].mxu1 %v5104_v59  ;;  %v9045_v61 = vunpack.i.l.bf16 %v9044_v21  ;;  %v9051_v35 = vunpack.i.h.bf16 %v9049_v6  ;;  %v9046_v4 = vunpack.i.h.bf16 %v9044_v21 }
 0x9bc   : > { %7884 = vmatprep.mubr.msk.f32.mxu1 %vm949_vm4, %v4865_v30 }
 0x9bd   : > { %v5074_v25 = vsel %vm949_vm4, %v4722_v38, %v9050_v17  ;;  %v5075_v7 = vsel %vm949_vm4, %v12984_v29, %v9051_v35 }
 0x9be   : > { %v9054_v57 = vpop.permute.xlu1 %9053  ;;  %v5090_v19 = vsel %vm966_vm9, %v5074_v25, %v9045_v61  ;;  %v5091_v10 = vsel %vm966_vm9, %v5075_v7, %v9046_v4  ;;  %v4869_v61 = vsel %vm303_vm11, %v13024_v12, 0.0 }
 0x9bf   : > { %v9055_v5 = vunpack.i.l.bf16 %v9054_v57  ;;  %5260 = vmatmul.mubr.f32.gmra.mrb[106].mxu1 %v5105_v1  ;;  %v9056_v8 = vunpack.i.h.bf16 %v9054_v57 }
 0x9c0   : > { %7885 = vmatprep.mubr.msk.f32.mxu1 %vm949_vm4, %v12961_v16  ;;  %v4724_v16 = vsel %vm286_vm8, %v13017_v47, 0.0 }
 0x9c1   : > { %v5106_v3 = vsel %vm983_vm10, %v5090_v19, %v9055_v5  ;;  %v5107_v29 = vsel %vm983_vm10, %v5091_v10, %v9056_v8 }
 0x9c2   : > { %v9059_v9 = vpop.permute.xlu1 %9058  ;;  %v9064_v50 = vpop.permute.xlu0 %9063 }
 0x9c3   : > { %v9065_v13 = vunpack.i.l.bf16 %v9064_v50  ;;  %5265 = vmatmul.mubr.f32.gmra.mrb[108].mxu1 %v5106_v3  ;;  %v9060_v54 = vunpack.i.l.bf16 %v9059_v9  ;;  %v9066_v23 = vunpack.i.h.bf16 %v9064_v50  ;;  %v9061_v40 = vunpack.i.h.bf16 %v9059_v9 }
 0x9c4   : > { %7886 = vmatprep.mubr.msk.f32.mxu1 %vm949_vm4, %v4867_v44  ;;  %v4871_v50 = vsel %vm303_vm11, %v13065_v48, 0.0 }
 0x9c5   : > { %v5076_v22 = vsel %vm949_vm4, %v4724_v16, %v9065_v13  ;;  %v5077_v17 = vsel %vm949_vm4, %v13028_v11, %v9066_v23 }
 0x9c6   : > { %v9069_v2 = vpop.permute.xlu0 %9068  ;;  %v5092_v26 = vsel %vm966_vm9, %v5076_v22, %v9060_v54  ;;  %v5093_v51 = vsel %vm966_vm9, %v5077_v17, %v9061_v40 }
 0x9c7   : > { %v9070_v59 = vunpack.i.l.bf16 %v9069_v2  ;;  %5270 = vmatmul.mubr.f32.gmra.mrb[110].mxu1 %v5107_v29  ;;  %v9071_v21 = vunpack.i.h.bf16 %v9069_v2 }
 0x9c8   : > { %7887 = vmatprep.mubr.msk.f32.mxu1 %vm949_vm4, %v13007_v18  ;;  %v4726_v18 = vsel %vm286_vm8, %v13058_v60, 0.0 }
 0x9c9   : > { %v5108_v6 = vsel %vm983_vm10, %v5092_v26, %v9070_v59  ;;  %v5109_v11 = vsel %vm983_vm10, %v5093_v51, %v9071_v21  ;;  %v4730_v26 = vsel %vm286_vm8, %v13118_v36, 0.0 }
 0x9ca   : > { %v9079_v47 = vpop.permute.xlu1 %9078  ;;  %v9074_v37 = vpop.permute.xlu0 %9073 }
 0x9cb   : > { %v9080_v30 = vunpack.i.l.bf16 %v9079_v47  ;;  %5275 = vmatmul.mubr.f32.gmra.mrb[112].mxu1 %v5108_v6  ;;  %v9075_v38 = vunpack.i.l.bf16 %v9074_v37  ;;  %v9081_v35 = vunpack.i.h.bf16 %v9079_v47  ;;  %v9076_v5 = vunpack.i.h.bf16 %v9074_v37 }
 0x9cc   : > { %7888 = vmatprep.mubr.msk.f32.mxu1 %vm949_vm4, %v4869_v61 }
 0x9cd   : > { %v5078_v25 = vsel %vm949_vm4, %v4726_v18, %v9080_v30  ;;  %v5079_v8 = vsel %vm949_vm4, %v13069_v63, %v9081_v35  ;;  %v7899_v35 = vld [vmem:[%s14865_s3 + $0x480] sm:$0xff] }
 0x9ce   : > { %v9084_v57 = vpop.permute.xlu1 %9083  ;;  %v5094_v12 = vsel %vm966_vm9, %v5078_v25, %v9075_v38  ;;  %v5095_v13 = vsel %vm966_vm9, %v5079_v8, %v9076_v5  ;;  %v4875_v38 = vsel %vm303_vm11, %v13131_v55, 0.0  ;;  %v7897_v55 = vld [vmem:[%s14865_s3 + $0x470] sm:$0xff]  ;;  %v7898_v25 = vld [vmem:[%s14865_s3 + $0x478] sm:$0xff] }
 0x9cf   : > { %v9085_v1 = vunpack.i.l.bf16 %v9084_v57  ;;  %5280 = vmatmul.mubr.f32.gmra.mrb[114].mxu1 %v5109_v11  ;;  %v9086_v4 = vunpack.i.h.bf16 %v9084_v57  ;;  %v8269_v57 = vpack.c.bf16 %v7898_v25, %v7897_v55  ;;  %v7900_v11 = vld [vmem:[%s14865_s3 + $0x488] sm:$0xff]  ;;  %v7902_v5 = vld [vmem:[%s14865_s3 + $0x498] sm:$0xff]  ;;  %v7905_v8 = vld [vmem:[%s14865_s3 + $0x4b0] sm:$0xff] }
 0x9d0   : > { %7889 = vmatprep.mubr.msk.f32.mxu1 %vm949_vm4, %v13048_v39  ;;  %v4728_v39 = vsel %vm286_vm8, %v13098_v46, 0.0 }
 0x9d1   : > { %v5110_v19 = vsel %vm983_vm10, %v5094_v12, %v9085_v1  ;;  %v5111_v63 = vsel %vm983_vm10, %v5095_v13, %v9086_v4  ;;  %v8272_v1 = vpack.c.bf16 %v7900_v11, %v7899_v35  ;;  %v7901_v12 = vld [vmem:[%s14865_s3 + $0x490] sm:$0xff]  ;;  %v7903_v4 = vld [vmem:[%s14865_s3 + $0x4a0] sm:$0xff] }
 0x9d2   : > { %v9089_v60 = vpop.permute.xlu1 %9088  ;;  %v9094_v3 = vpop.permute.xlu0 %9093 }
 0x9d3   : > { %v9095_v9 = vunpack.i.l.bf16 %v9094_v3  ;;  %5285 = vmatmul.mubr.f32.gmra.mrb[116].mxu1 %v5110_v19  ;;  %v9090_v7 = vunpack.i.l.bf16 %v9089_v60  ;;  %v9096_v54 = vunpack.i.h.bf16 %v9094_v3  ;;  %v9091_v23 = vunpack.i.h.bf16 %v9089_v60  ;;  %v7904_v60 = vld [vmem:[%s14865_s3 + $0x4a8] sm:$0xff] }
 0x9d4   : > { %7890 = vmatprep.mubr.msk.f32.mxu1 %vm949_vm4, %v4871_v50  ;;  %v8275_v19 = vpack.c.bf16 %v7902_v5, %v7901_v12  ;;  %v8278_v3 = vpack.c.bf16 %v7904_v60, %v7903_v4 }
 0x9d5   : > { %v5080_v44 = vsel %vm949_vm4, %v4728_v39, %v9095_v9  ;;  %v5081_v59 = vsel %vm949_vm4, %v13109_v14, %v9096_v54  ;;  %v7906_v9 = vld [vmem:[%s14865_s3 + $0x4b8] sm:$0xff]  ;;  %v7908_v39 = vld [vmem:[%s14865_s3 + $0x4c8] sm:$0xff] }
 0x9d6   : > { %v9099_v16 = vpop.permute.xlu0 %9098  ;;  %v5096_v22 = vsel %vm966_vm9, %v5080_v44, %v9090_v7  ;;  %v5097_v21 = vsel %vm966_vm9, %v5081_v59, %v9091_v23  ;;  %v8281_v50 = vpack.c.bf16 %v7906_v9, %v7905_v8  ;;  %v7907_v7 = vld [vmem:[%s14865_s3 + $0x4c0] sm:$0xff]  ;;  %v7909_v44 = vld [vmem:[%s14865_s3 + $0x4d0] sm:$0xff]  ;;  %v7910_v54 = vld [vmem:[%s14865_s3 + $0x4d8] sm:$0xff] }
 0x9d7   : > { %v9100_v10 = vunpack.i.l.bf16 %v9099_v16  ;;  %5290 = vmatmul.mubr.f32.gmra.mrb[118].mxu1 %v5111_v63  ;;  %v9101_v46 = vunpack.i.h.bf16 %v9099_v16  ;;  %v8284_v13 = vpack.c.bf16 %v7908_v39, %v7907_v7  ;;  %v8287_v16 = vpack.c.bf16 %v7910_v54, %v7909_v44  ;;  %v7911_v63 = vld [vmem:[%s14865_s3 + $0x4e0] sm:$0xff] }
 0x9d8   : > { %7891 = vmatprep.mubr.msk.f32.mxu1 %vm949_vm4, %v13087_v31  ;;  %v4921_v48 = vpop.permute.xlu1 %4920  ;;  %v4873_v31 = vsel %vm303_vm11, %v13105_v53, 0.0 }
 0x9d9   : > { %v5112_v2 = vsel %vm983_vm10, %v5096_v22, %v9100_v10  ;;  %v5082_v40 = vsel %vm949_vm4, %v4730_v26, %v4921_v48  ;;  %v5113_v37 = vsel %vm983_vm10, %v5097_v21, %v9101_v46  ;;  %v7912_v10 = vld [vmem:[%s14865_s3 + $0x4e8] sm:$0xff]  ;;  %v13338_v22 = vld [vmem:[%s14866_s4 + $0x6] ss:$0 sm:$0xff] }
 0x9da   : > { %v4985_v29 = vpop.permute.xlu0 %4984  ;;  %v8290_v48 = vpack.c.bf16 %v7912_v10, %v7911_v63 }
 0x9db   : > { %5295 = vmatmul.mubr.f32.gmra.mrb[120].mxu1 %v5112_v2  ;;  %v5098_v14 = vsel %vm966_vm9, %v5082_v40, %v4985_v29  ;;  %v7913_v40 = vld [vmem:[%s14865_s3 + $0x4f0] sm:$0xff] }
 0x9dc   : > { %7892 = vmatprep.mubr.msk.f32.mxu1 %vm949_vm4, %v4873_v31  ;;  %v5049_v6 = vpop.permute.xlu1 %5048 }
 0x9dd   : > { %v5114_v17 = vsel %vm983_vm10, %v5098_v14, %v5049_v6  ;;  %v7914_v6 = vld [vmem:[%s14865_s3 + $0x4f8] sm:$0xff] }
 0x9de   : > { %v4923_v47 = vpop.permute.xlu0 %4922  ;;  %v8293_v21 = vpack.c.bf16 %v7914_v6, %v7913_v40 }
 0x9df   : > { %5300 = vmatmul.mubr.f32.gmra.mrb[122].mxu1 %v5113_v37  ;;  %v5083_v36 = vsel %vm949_vm4, %v13122_v52, %v4923_v47  ;;  %v7895_v52 = vld [vmem:[%s14865_s3 + $0x460] sm:$0xff] }
 0x9e0   : > { %7893 = vmatprep.mubr.msk.f32.mxu1 %vm949_vm4, %v13127_v20  ;;  %v4987_v53 = vpop.permute.xlu1 %4986  ;;  %v7896_v20 = vld [vmem:[%s14865_s3 + $0x468] sm:$0xff] }
 0x9e1   : > { %v5099_v30 = vsel %vm966_vm9, %v5083_v36, %v4987_v53  ;;  %v8266_v51 = vpack.c.bf16 %v7896_v20, %v7895_v52 }
 0x9e2   : > { %v5051_v61 = vpop.permute.xlu0 %5050 }
 0x9e3   : > { %5305 = vmatmul.mubr.f32.gmra.mrb[124].mxu1 %v5114_v17  ;;  %v5115_v18 = vsel %vm983_vm10, %v5099_v30, %v5051_v61  ;;  %8267 = vmatpush1.bf16.msra.mxu0 %v8266_v51 }
 0x9e4   : > { %7894 = vmatprep.mubr.msk.f32.mxu1 %vm949_vm4, %v4875_v38  ;;  %8268 = vmatprep.subr.bf16.mxu0 %v14891_v28 }
 0x9e7   : > { %5310 = vmatmul.mubr.f32.gmra.mrb[126].mxu1 %v5115_v18  ;;  %8270 = vmatpush1.bf16.msra.mxu0 %v8269_v57 }
 0x9e8   : > { %8271 = vmatprep.subr.bf16.mxu0 %v14891_v28 }
 0x9eb   : > { %8273 = vmatpush1.bf16.msra.mxu0 %v8272_v1 }
 0x9ec   : > { %8274 = vmatprep.subr.bf16.mxu0 %v14891_v28 }
 0x9ef   : > { %8276 = vmatpush1.bf16.msra.mxu0 %v8275_v19 }
 0x9f0   : > { %8277 = vmatprep.subr.bf16.mxu0 %v14891_v28 }
 0x9f3   : > { %8279 = vmatpush1.bf16.msra.mxu0 %v8278_v3 }
 0x9f4   : > { %8280 = vmatprep.subr.bf16.mxu0 %v14891_v28 }
 0x9f7   : > { %8282 = vmatpush1.bf16.msra.mxu0 %v8281_v50 }
 0x9f8   : > { %8283 = vmatprep.subr.bf16.mxu0 %v14891_v28 }
 0x9fb   : > { %8285 = vmatpush1.bf16.msra.mxu0 %v8284_v13 }
 0x9fc   : > { %8286 = vmatprep.subr.bf16.mxu0 %v14891_v28 }
 0x9ff   : > { %8288 = vmatpush1.bf16.msra.mxu0 %v8287_v16 }
 0xa00   : > { %8289 = vmatprep.subr.bf16.mxu0 %v14891_v28 }
 0xa03   : > { %8291 = vmatpush1.bf16.msra.mxu0 %v8290_v48 }
 0xa04   : > { %8292 = vmatprep.subr.bf16.mxu0 %v14891_v28 }
 0xa07   : > { %8294 = vmatpush1.bf16.msra.mxu0 %v8293_v21 }
 0xa08   : > { %8325 = vmatprep.subr.bf16.mxu0 %v14891_v28 }
 0xa7e   : > { %v5236_v23 = vpop.f32.mrb[96].mxu1 }
 0xa7f   : > { %v5237_v2 = vadd.f32 %v13338_v22, %v5236_v23  ;;  %v5238_v46 = vpop.f32.mrb[97].mxu1 }
 0xa81   : > { %v5315_v29 = vmax.f32 %v5237_v2, 0.0 }
 0xa82   : > { %v5241_v59 = vpop.f32.mrb[98].mxu1 }
 0xa83   : > { %v5242_v26 = vadd.f32 %v13338_v22, %v5241_v59  ;;  %v5243_v31 = vpop.f32.mrb[99].mxu1  ;;  %v5354_v37 = vrot.slane %v5315_v29, 6  ;;  %v5498_v36 = vrot.slane %v5315_v29, 2  ;;  %v5402_v18 = vrot.slane %v5315_v29, 7 }
 0xa84   : > { %v5450_v20 = vrot.slane %v5315_v29, 1 }
 0xa85   : > { %v5316_v47 = vmax.f32 %v5242_v26, 0.0 }
 0xa86   : > { %v5246_v14 = vpop.f32.mrb[100].mxu1 }
 0xa87   : > { %v5362_v53 = vrot.slane %v5316_v47, 6  ;;  %v5247_v17 = vadd.f32 %v13338_v22, %v5246_v14  ;;  %v5248_v30 = vpop.f32.mrb[101].mxu1  ;;  %v9102_v61 = vpack.i.bf16 %v5316_v47, %v5315_v29  ;;  %v5506_v38 = vrot.slane %v5316_v47, 2 }
 0xa88   : > { %v5410_v52 = vrot.slane %v5316_v47, 7  ;;  %v5458_v51 = vrot.slane %v5316_v47, 1 }
 0xa89   : > { %v5317_v55 = vmax.f32 %v5247_v17, 0.0  ;;  %9103 = vrot.lane.b32.xlu0 %v9102_v61, %s9428_s11  ;;  %v5514_v25 = vsel %vm724_vm1, %v5498_v36, %v5506_v38  ;;  %v13355_v35 = vsel %vm577_vm7, %v5362_v53, %v5354_v37  ;;  %v13359_v57 = vsel %vm724_vm1, %v5506_v38, %v5498_v36 }
 0xa8a   : > { %v5251_v11 = vpop.f32.mrb[102].mxu1  ;;  %7917 = vmatprep.mubr.msk.f32.mxu0 %vm949_vm4, %v5514_v25  ;;  %v5418_v1 = vsel %vm626_vm3, %v5402_v18, %v5410_v52  ;;  %v5426_v12 = vsel %vm626_vm3, %v5410_v52, %v5402_v18  ;;  %v5466_v5 = vsel %vm675_vm2, %v5450_v20, %v5458_v51  ;;  %v5474_v19 = vsel %vm675_vm2, %v5458_v51, %v5450_v20 }
 0xa8b   : > { %v5252_v4 = vadd.f32 %v13338_v22, %v5251_v11  ;;  %v5253_v60 = vpop.f32.mrb[103].mxu1  ;;  %v5434_v3 = vsel %vm292_vm6, %v5426_v12, 0.0  ;;  %v5483_v8 = vsel %vm299_vm5, %v5474_v19, 0.0  ;;  %v13377_v39 = vsel %vm577_vm7, %v5354_v37, %v5362_v53 }
 0xa8c   : > { %v9107_v9 = vpack.i.bf16 %v5418_v1, %v5434_v3  ;;  %v9112_v50 = vpack.i.bf16 %v5483_v8, %v5466_v5  ;;  %v5355_v13 = vrot.slane %v5317_v55, 6  ;;  %v5403_v54 = vrot.slane %v5317_v55, 7 }
 0xa8d   : > { %v5318_v7 = vmax.f32 %v5252_v4, 0.0  ;;  %v5451_v2 = vrot.slane %v5317_v55, 1  ;;  %v5499_v29 = vrot.slane %v5317_v55, 2 }
 0xa8e   : > { %9108 = vrot.lane.b32.xlu1 %v9107_v9, %s9427_s10  ;;  %v5256_v44 = vpop.f32.mrb[104].mxu1 }
 0xa8f   : > { %v5363_v16 = vrot.slane %v5318_v7, 6  ;;  %v5257_v63 = vadd.f32 %v13338_v22, %v5256_v44  ;;  %v5258_v10 = vpop.f32.mrb[105].mxu1  ;;  %v5411_v48 = vrot.slane %v5318_v7, 7  ;;  %v9117_v23 = vpack.i.bf16 %v5318_v7, %v5317_v55 }
 0xa90   : > { %v5459_v46 = vrot.slane %v5318_v7, 1  ;;  %v5507_v59 = vrot.slane %v5318_v7, 2 }
 0xa91   : > { %v5319_v26 = vmax.f32 %v5257_v63, 0.0  ;;  %v5419_v31 = vsel %vm626_vm3, %v5403_v54, %v5411_v48  ;;  %v5427_v40 = vsel %vm626_vm3, %v5411_v48, %v5403_v54  ;;  %v13387_v6 = vsel %vm577_vm7, %v5363_v16, %v5355_v13 }
 0xa92   : > { %9113 = vrot.lane.b32.xlu1 %v9112_v50, %s9426_s9  ;;  %v5261_v21 = vpop.f32.mrb[106].mxu1  ;;  %v5436_v47 = vsel %vm292_vm6, %v5427_v40, 0.0  ;;  %v5467_v37 = vsel %vm675_vm2, %v5451_v2, %v5459_v46  ;;  %v5475_v14 = vsel %vm675_vm2, %v5459_v46, %v5451_v2  ;;  %v13398_v36 = vsel %vm724_vm1, %v5499_v29, %v5507_v59 }
 0xa93   : > { %v5262_v53 = vadd.f32 %v13338_v22, %v5261_v21  ;;  %v5263_v17 = vpop.f32.mrb[107].mxu1  ;;  %v9122_v30 = vpack.i.bf16 %v5419_v31, %v5436_v47  ;;  %v5485_v61 = vsel %vm299_vm5, %v5475_v14, 0.0  ;;  %v13406_v52 = vsel %vm724_vm1, %v5507_v59, %v5499_v29 }
 0xa94   : > { %v9127_v38 = vpack.i.bf16 %v5485_v61, %v5467_v37  ;;  %v13410_v20 = vsel %vm577_vm7, %v5355_v13, %v5363_v16  ;;  %v5356_v51 = vrot.slane %v5319_v26, 6  ;;  %v5404_v25 = vrot.slane %v5319_v26, 7 }
 0xa95   : > { %v5320_v18 = vmax.f32 %v5262_v53, 0.0  ;;  %9123 = vrot.lane.b32.xlu0 %v9122_v30, %s9427_s10  ;;  %v5452_v4 = vrot.slane %v5319_v26, 1  ;;  %v5500_v3 = vrot.slane %v5319_v26, 2 }
 0xa96   : > { %9118 = vrot.lane.b32.xlu1 %v9117_v23, %s9428_s11  ;;  %v5266_v55 = vpop.f32.mrb[108].mxu1 }
 0xa97   : > { %v5364_v11 = vrot.slane %v5320_v18, 6  ;;  %v5267_v1 = vadd.f32 %v13338_v22, %v5266_v55  ;;  %v5268_v12 = vpop.f32.mrb[109].mxu1  ;;  %v9132_v5 = vpack.i.bf16 %v5320_v18, %v5319_v26  ;;  %v5412_v19 = vrot.slane %v5320_v18, 7 }
 0xa98   : > { %v5460_v60 = vrot.slane %v5320_v18, 1  ;;  %v5508_v8 = vrot.slane %v5320_v18, 2 }
 0xa99   : > { %v5321_v9 = vmax.f32 %v5267_v1, 0.0  ;;  %9128 = vrot.lane.b32.xlu0 %v9127_v38, %s9426_s9  ;;  %v5420_v50 = vsel %vm626_vm3, %v5404_v25, %v5412_v19  ;;  %v5428_v7 = vsel %vm626_vm3, %v5412_v19, %v5404_v25  ;;  %v13421_v13 = vsel %vm577_vm7, %v5364_v11, %v5356_v51 }
 0xa9a   : > { %v5271_v44 = vpop.f32.mrb[110].mxu1  ;;  %v5438_v54 = vsel %vm292_vm6, %v5428_v7, 0.0  ;;  %v5468_v16 = vsel %vm675_vm2, %v5452_v4, %v5460_v60  ;;  %v5476_v63 = vsel %vm675_vm2, %v5460_v60, %v5452_v4  ;;  %v13431_v10 = vsel %vm724_vm1, %v5500_v3, %v5508_v8 }
 0xa9b   : > { %v5272_v48 = vadd.f32 %v13338_v22, %v5271_v44  ;;  %v5273_v23 = vpop.f32.mrb[111].mxu1  ;;  %v9137_v2 = vpack.i.bf16 %v5420_v50, %v5438_v54  ;;  %v5487_v46 = vsel %vm299_vm5, %v5476_v63, 0.0  ;;  %v13440_v26 = vsel %vm724_vm1, %v5508_v8, %v5500_v3 }
 0xa9c   : > { %v9142_v29 = vpack.i.bf16 %v5487_v46, %v5468_v16  ;;  %v13444_v31 = vsel %vm577_vm7, %v5356_v51, %v5364_v11  ;;  %v5357_v40 = vrot.slane %v5321_v9, 6  ;;  %v5405_v47 = vrot.slane %v5321_v9, 7 }
 0xa9d   : > { %v5322_v59 = vmax.f32 %v5272_v48, 0.0  ;;  %9133 = vrot.lane.b32.xlu0 %v9132_v5, %s9428_s11  ;;  %9138 = vrot.lane.b32.xlu1 %v9137_v2, %s9427_s10  ;;  %v5453_v61 = vrot.slane %v5321_v9, 1  ;;  %v5501_v18 = vrot.slane %v5321_v9, 2 }
 0xa9e   : > { %v5276_v21 = vpop.f32.mrb[112].mxu1 }
 0xa9f   : > { %v5365_v37 = vrot.slane %v5322_v59, 6  ;;  %v5277_v14 = vadd.f32 %v13338_v22, %v5276_v21  ;;  %v5278_v53 = vpop.f32.mrb[113].mxu1  ;;  %v5413_v17 = vrot.slane %v5322_v59, 7  ;;  %v9147_v30 = vpack.i.bf16 %v5322_v59, %v5321_v9 }
 0xaa0   : > { %v5461_v38 = vrot.slane %v5322_v59, 1  ;;  %v5509_v55 = vrot.slane %v5322_v59, 2 }
 0xaa1   : > { %v5323_v25 = vmax.f32 %v5277_v14, 0.0  ;;  %9143 = vrot.lane.b32.xlu1 %v9142_v29, %s9426_s9  ;;  %v5421_v51 = vsel %vm626_vm3, %v5405_v47, %v5413_v17  ;;  %v5429_v11 = vsel %vm626_vm3, %v5413_v17, %v5405_v47  ;;  %v13454_v1 = vsel %vm577_vm7, %v5365_v37, %v5357_v40 }
 0xaa2   : > { %v5281_v12 = vpop.f32.mrb[114].mxu1  ;;  %v5440_v5 = vsel %vm292_vm6, %v5429_v11, 0.0  ;;  %v5469_v19 = vsel %vm675_vm2, %v5453_v61, %v5461_v38  ;;  %v5477_v4 = vsel %vm675_vm2, %v5461_v38, %v5453_v61  ;;  %v13464_v60 = vsel %vm724_vm1, %v5501_v18, %v5509_v55 }
 0xaa3   : > { %v5282_v3 = vadd.f32 %v13338_v22, %v5281_v12  ;;  %v5283_v8 = vpop.f32.mrb[115].mxu1  ;;  %v9152_v9 = vpack.i.bf16 %v5421_v51, %v5440_v5  ;;  %v5489_v50 = vsel %vm299_vm5, %v5477_v4, 0.0  ;;  %v13473_v54 = vsel %vm724_vm1, %v5509_v55, %v5501_v18 }
 0xaa4   : > { %v9157_v7 = vpack.i.bf16 %v5489_v50, %v5469_v19  ;;  %v13477_v16 = vsel %vm577_vm7, %v5357_v40, %v5365_v37  ;;  %v5358_v63 = vrot.slane %v5323_v25, 6  ;;  %v5406_v23 = vrot.slane %v5323_v25, 7 }
 0xaa5   : > { %v5324_v44 = vmax.f32 %v5282_v3, 0.0  ;;  %9153 = vrot.lane.b32.xlu0 %v9152_v9, %s9427_s10  ;;  %9148 = vrot.lane.b32.xlu1 %v9147_v30, %s9428_s11  ;;  %v5454_v47 = vrot.slane %v5323_v25, 1  ;;  %v5502_v53 = vrot.slane %v5323_v25, 2 }
 0xaa6   : > { %v5286_v48 = vpop.f32.mrb[116].mxu1 }
 0xaa7   : > { %v5366_v2 = vrot.slane %v5324_v44, 6  ;;  %v5287_v46 = vadd.f32 %v13338_v22, %v5286_v48  ;;  %v5288_v29 = vpop.f32.mrb[117].mxu1  ;;  %v9162_v59 = vpack.i.bf16 %v5324_v44, %v5323_v25  ;;  %v5414_v21 = vrot.slane %v5324_v44, 7 }
 0xaa8   : > { %v5462_v14 = vrot.slane %v5324_v44, 1  ;;  %v5510_v17 = vrot.slane %v5324_v44, 2 }
 0xaa9   : > { %v5325_v30 = vmax.f32 %v5287_v46, 0.0  ;;  %9158 = vrot.lane.b32.xlu0 %v9157_v7, %s9426_s9  ;;  %v5422_v40 = vsel %vm626_vm3, %v5406_v23, %v5414_v21  ;;  %v5430_v37 = vsel %vm626_vm3, %v5414_v21, %v5406_v23  ;;  %v13487_v61 = vsel %vm577_vm7, %v5366_v2, %v5358_v63 }
 0xaaa   : > { %v5291_v38 = vpop.f32.mrb[118].mxu1  ;;  %v5442_v18 = vsel %vm292_vm6, %v5430_v37, 0.0  ;;  %v5470_v55 = vsel %vm675_vm2, %v5454_v47, %v5462_v14  ;;  %v5478_v25 = vsel %vm675_vm2, %v5462_v14, %v5454_v47  ;;  %v13497_v51 = vsel %vm724_vm1, %v5502_v53, %v5510_v17 }
 0xaab   : > { %v5292_v11 = vadd.f32 %v13338_v22, %v5291_v38  ;;  %v5293_v12 = vpop.f32.mrb[119].mxu1  ;;  %v9167_v5 = vpack.i.bf16 %v5422_v40, %v5442_v18  ;;  %v5491_v19 = vsel %vm299_vm5, %v5478_v25, 0.0  ;;  %v13506_v8 = vsel %vm724_vm1, %v5510_v17, %v5502_v53 }
 0xaac   : > { %v9172_v4 = vpack.i.bf16 %v5491_v19, %v5470_v55  ;;  %v13510_v9 = vsel %vm577_vm7, %v5358_v63, %v5366_v2  ;;  %v5359_v50 = vrot.slane %v5325_v30, 6  ;;  %v5407_v44 = vrot.slane %v5325_v30, 7 }
 0xaad   : > { %v5326_v3 = vmax.f32 %v5292_v11, 0.0  ;;  %9163 = vrot.lane.b32.xlu0 %v9162_v59, %s9428_s11  ;;  %9168 = vrot.lane.b32.xlu1 %v9167_v5, %s9427_s10  ;;  %v5455_v59 = vrot.slane %v5325_v30, 1  ;;  %v5503_v14 = vrot.slane %v5325_v30, 2 }
 0xaae   : > { %v5296_v7 = vpop.f32.mrb[120].mxu1 }
 0xaaf   : > { %v5367_v48 = vrot.slane %v5326_v3, 6  ;;  %v5297_v23 = vadd.f32 %v13338_v22, %v5296_v7  ;;  %v5298_v46 = vpop.f32.mrb[121].mxu1  ;;  %v5415_v29 = vrot.slane %v5326_v3, 7  ;;  %v9177_v21 = vpack.i.bf16 %v5326_v3, %v5325_v30 }
 0xab0   : > { %v5463_v47 = vrot.slane %v5326_v3, 1  ;;  %v5511_v40 = vrot.slane %v5326_v3, 2 }
 0xab1   : > { %v5327_v37 = vmax.f32 %v5297_v23, 0.0  ;;  %9173 = vrot.lane.b32.xlu1 %v9172_v4, %s9426_s9  ;;  %v5423_v63 = vsel %vm626_vm3, %v5407_v44, %v5415_v29  ;;  %v5431_v2 = vsel %vm626_vm3, %v5415_v29, %v5407_v44  ;;  %v13520_v53 = vsel %vm577_vm7, %v5367_v48, %v5359_v50 }
 0xab2   : > { %v5301_v17 = vpop.f32.mrb[122].mxu1  ;;  %v5444_v38 = vsel %vm292_vm6, %v5431_v2, 0.0  ;;  %v5471_v30 = vsel %vm675_vm2, %v5455_v59, %v5463_v47  ;;  %v5479_v18 = vsel %vm675_vm2, %v5463_v47, %v5455_v59  ;;  %v13530_v55 = vsel %vm724_vm1, %v5503_v14, %v5511_v40 }
 0xab3   : > { %v5302_v25 = vadd.f32 %v13338_v22, %v5301_v17  ;;  %v5303_v11 = vpop.f32.mrb[123].mxu1  ;;  %v9182_v12 = vpack.i.bf16 %v5423_v63, %v5444_v38  ;;  %v5493_v5 = vsel %vm299_vm5, %v5479_v18, 0.0  ;;  %v13539_v3 = vsel %vm724_vm1, %v5511_v40, %v5503_v14 }
 0xab4   : > { %v9187_v19 = vpack.i.bf16 %v5493_v5, %v5471_v30  ;;  %v13543_v7 = vsel %vm577_vm7, %v5359_v50, %v5367_v48  ;;  %v5360_v44 = vrot.slane %v5327_v37, 6  ;;  %v5408_v46 = vrot.slane %v5327_v37, 7 }
 0xab5   : > { %v5328_v4 = vmax.f32 %v5302_v25, 0.0  ;;  %9183 = vrot.lane.b32.xlu0 %v9182_v12, %s9427_s10  ;;  %9178 = vrot.lane.b32.xlu1 %v9177_v21, %s9428_s11  ;;  %v5456_v17 = vrot.slane %v5327_v37, 1  ;;  %v5504_v21 = vrot.slane %v5327_v37, 2 }
 0xab6   : > { %v5306_v23 = vpop.f32.mrb[124].mxu1 }
 0xab7   : > { %v5368_v29 = vrot.slane %v5328_v4, 6  ;;  %v5307_v59 = vadd.f32 %v13338_v22, %v5306_v23  ;;  %v5308_v47 = vpop.f32.mrb[125].mxu1  ;;  %v9192_v63 = vpack.i.bf16 %v5328_v4, %v5327_v37  ;;  %v5416_v2 = vrot.slane %v5328_v4, 7 }
 0xab8   : > { %v5464_v38 = vrot.slane %v5328_v4, 1  ;;  %v5512_v30 = vrot.slane %v5328_v4, 2 }
 0xab9   : > { %v5329_v18 = vmax.f32 %v5307_v59, 0.0  ;;  %9188 = vrot.lane.b32.xlu0 %v9187_v19, %s9426_s9  ;;  %v5424_v50 = vsel %vm626_vm3, %v5408_v46, %v5416_v2  ;;  %v5432_v48 = vsel %vm626_vm3, %v5416_v2, %v5408_v46  ;;  %v13553_v14 = vsel %vm577_vm7, %v5368_v29, %v5360_v44 }
 0xaba   : > { %v5311_v40 = vpop.f32.mrb[126].mxu1  ;;  %v5446_v25 = vsel %vm292_vm6, %v5432_v48, 0.0  ;;  %v5472_v37 = vsel %vm675_vm2, %v5456_v17, %v5464_v38  ;;  %v5480_v11 = vsel %vm675_vm2, %v5464_v38, %v5456_v17  ;;  %v13563_v12 = vsel %vm724_vm1, %v5504_v21, %v5512_v30 }
 0xabb   : > { %v5312_v5 = vadd.f32 %v13338_v22, %v5311_v40  ;;  %v5313_v19 = vpop.f32.mrb[127].mxu1  ;;  %v9197_v4 = vpack.i.bf16 %v5424_v50, %v5446_v25  ;;  %v5495_v23 = vsel %vm299_vm5, %v5480_v11, 0.0  ;;  %v13572_v47 = vsel %vm724_vm1, %v5512_v30, %v5504_v21 }
 0xabc   : > { %v9202_v46 = vpack.i.bf16 %v5495_v23, %v5472_v37  ;;  %v13576_v2 = vsel %vm577_vm7, %v5360_v44, %v5368_v29  ;;  %v5409_v22 = vrot.slane %v5329_v18, 7  ;;  %v5457_v17 = vrot.slane %v5329_v18, 1 }
 0xabd   : > { %v5330_v59 = vmax.f32 %v5312_v5, 0.0  ;;  %9193 = vrot.lane.b32.xlu0 %v9192_v63, %s9428_s11  ;;  %9198 = vrot.lane.b32.xlu1 %v9197_v4, %s9427_s10  ;;  %v5361_v25 = vrot.slane %v5329_v18, 6  ;;  %v5505_v37 = vrot.slane %v5329_v18, 2 }
 0xabf   : > { %v5417_v38 = vrot.slane %v5330_v59, 7  ;;  %v5465_v50 = vrot.slane %v5330_v59, 1  ;;  %v5369_v48 = vrot.slane %v5330_v59, 6  ;;  %v5513_v40 = vrot.slane %v5330_v59, 2 }
 0xac1   : > { %9203 = vrot.lane.b32.xlu1 %v9202_v46, %s9426_s9  ;;  %v5433_v63 = vsel %vm626_vm3, %v5417_v38, %v5409_v22  ;;  %v5473_v21 = vsel %vm675_vm2, %v5457_v17, %v5465_v50  ;;  %v5425_v44 = vsel %vm626_vm3, %v5409_v22, %v5417_v38  ;;  %v5481_v29 = vsel %vm675_vm2, %v5465_v50, %v5457_v17 }
 0xac2   : > { %v5448_v30 = vsel %vm292_vm6, %v5433_v63, 0.0  ;;  %v13591_v11 = vsel %vm577_vm7, %v5369_v48, %v5361_v25  ;;  %v13595_v5 = vsel %vm577_vm7, %v5361_v25, %v5369_v48  ;;  %v13600_v19 = vsel %vm724_vm1, %v5505_v37, %v5513_v40 }
 0xac3   : > { %5590 = vrot.lane.b32.xlu0 %v5448_v30, %s9427_s10  ;;  %v13604_v4 = vsel %vm724_vm1, %v5513_v40, %v5505_v37  ;;  %v5497_v23 = vsel %vm299_vm5, %v5481_v29, 0.0  ;;  %v5386_v38 = vsel %vm286_vm8, %v13355_v35, 0.0  ;;  %v5531_v35 = vsel %vm303_vm11, %v13359_v57, 0.0 }
 0xac5   : > { %5654 = vrot.lane.b32.xlu1 %v5329_v18, %s9428_s11 }
 0xac7   : > { %5718 = vrot.lane.b32.xlu0 %v5473_v21, %s9426_s9 }
 0xac9   : > { %5592 = vrot.lane.b32.xlu1 %v5425_v44, %s9427_s10 }
 0xacb   : > { %5656 = vrot.lane.b32.xlu0 %v5330_v59, %s9428_s11 }
 0xacd   : > { %5720 = vrot.lane.b32.xlu1 %v5497_v23, %s9426_s9 }
 0xafb   : > { %v9104_v22 = vpop.permute.xlu0 %9103 }
 0xafc   : > { %v9105_v48 = vunpack.i.l.bf16 %v9104_v22  ;;  %v9106_v29 = vunpack.i.h.bf16 %v9104_v22 }
 0xb00   : > { %v9109_v46 = vpop.permute.xlu1 %9108 }
 0xb01   : > { %v9110_v17 = vunpack.i.l.bf16 %v9109_v46  ;;  %v9111_v50 = vunpack.i.h.bf16 %v9109_v46 }
 0xb03   : > { %v5738_v18 = vsel %vm949_vm4, %v5386_v38, %v9110_v17  ;;  %v5739_v44 = vsel %vm949_vm4, %v13377_v39, %v9111_v50  ;;  %v5388_v17 = vsel %vm286_vm8, %v13387_v6, 0.0 }
 0xb04   : > { %v9114_v40 = vpop.permute.xlu1 %9113  ;;  %v5754_v59 = vsel %vm966_vm9, %v5738_v18, %v9105_v48  ;;  %v5755_v38 = vsel %vm966_vm9, %v5739_v44, %v9106_v29 }
 0xb05   : > { %v9115_v25 = vunpack.i.l.bf16 %v9114_v40  ;;  %v9116_v37 = vunpack.i.h.bf16 %v9114_v40 }
 0xb07   : > { %v9124_v63 = vpop.permute.xlu0 %9123  ;;  %v5770_v21 = vsel %vm983_vm10, %v5754_v59, %v9115_v25  ;;  %v5771_v50 = vsel %vm983_vm10, %v5755_v38, %v9116_v37  ;;  %v5533_v37 = vsel %vm303_vm11, %v13406_v52, 0.0 }
 0xb08   : > { %v9125_v30 = vunpack.i.l.bf16 %v9124_v63  ;;  %v9119_v23 = vpop.permute.xlu1 %9118  ;;  %5905 = vmatmul.mubr.f32.vlgmr.msra.gmra.mrb[112].mxu0 %v5770_v21  ;;  %v9126_v39 = vunpack.i.h.bf16 %v9124_v63 }
 0xb09   : > { %v9120_v46 = vunpack.i.l.bf16 %v9119_v23  ;;  %7918 = vmatprep.mubr.msk.f32.mxu0 %vm949_vm4, %v5531_v35  ;;  %v9121_v40 = vunpack.i.h.bf16 %v9119_v23 }
 0xb0a   : > { %v5740_v18 = vsel %vm949_vm4, %v5388_v17, %v9125_v30  ;;  %v5741_v44 = vsel %vm949_vm4, %v13410_v20, %v9126_v39 }
 0xb0b   : > { %v9129_v22 = vpop.permute.xlu0 %9128  ;;  %v5756_v57 = vsel %vm966_vm9, %v5740_v18, %v9120_v46  ;;  %v5757_v30 = vsel %vm966_vm9, %v5741_v44, %v9121_v40 }
 0xb0c   : > { %v9130_v48 = vunpack.i.l.bf16 %v9129_v22  ;;  %5910 = vmatmul.mubr.f32.gmra.mrb[114].mxu0 %v5771_v50  ;;  %v9131_v59 = vunpack.i.h.bf16 %v9129_v22 }
 0xb0d   : > { %7919 = vmatprep.mubr.msk.f32.mxu0 %vm949_vm4, %v13398_v36  ;;  %v5390_v36 = vsel %vm286_vm8, %v13421_v13, 0.0 }
 0xb0e   : > { %v5772_v25 = vsel %vm983_vm10, %v5756_v57, %v9130_v48  ;;  %v5773_v20 = vsel %vm983_vm10, %v5757_v30, %v9131_v59  ;;  %v5535_v57 = vsel %vm303_vm11, %v13440_v26, 0.0 }
 0xb0f   : > { %v9134_v6 = vpop.permute.xlu0 %9133  ;;  %v9139_v21 = vpop.permute.xlu1 %9138 }
 0xb10   : > { %v9140_v63 = vunpack.i.l.bf16 %v9139_v21  ;;  %5915 = vmatmul.mubr.f32.gmra.mrb[116].mxu0 %v5772_v25  ;;  %v9135_v29 = vunpack.i.l.bf16 %v9134_v6  ;;  %v9141_v35 = vunpack.i.h.bf16 %v9139_v21  ;;  %v9136_v38 = vunpack.i.h.bf16 %v9134_v6 }
 0xb11   : > { %7920 = vmatprep.mubr.msk.f32.mxu0 %vm949_vm4, %v5533_v37 }
 0xb12   : > { %v5742_v23 = vsel %vm949_vm4, %v5390_v36, %v9140_v63  ;;  %v5743_v50 = vsel %vm949_vm4, %v13444_v31, %v9141_v35  ;;  %v5537_v35 = vsel %vm303_vm11, %v13473_v54, 0.0 }
 0xb13   : > { %v9144_v46 = vpop.permute.xlu1 %9143  ;;  %v5758_v52 = vsel %vm966_vm9, %v5742_v23, %v9135_v29  ;;  %v5759_v25 = vsel %vm966_vm9, %v5743_v50, %v9136_v38 }
 0xb14   : > { %v9145_v17 = vunpack.i.l.bf16 %v9144_v46  ;;  %5920 = vmatmul.mubr.f32.gmra.mrb[118].mxu0 %v5773_v20  ;;  %v9146_v39 = vunpack.i.h.bf16 %v9144_v46 }
 0xb15   : > { %7921 = vmatprep.mubr.msk.f32.mxu0 %vm949_vm4, %v13431_v10  ;;  %v5392_v10 = vsel %vm286_vm8, %v13454_v1, 0.0 }
 0xb16   : > { %v5774_v18 = vsel %vm983_vm10, %v5758_v52, %v9145_v17  ;;  %v5775_v31 = vsel %vm983_vm10, %v5759_v25, %v9146_v39 }
 0xb17   : > { %v9154_v13 = vpop.permute.xlu0 %9153  ;;  %v9149_v22 = vpop.permute.xlu1 %9148 }
 0xb18   : > { %v9155_v48 = vunpack.i.l.bf16 %v9154_v13  ;;  %5925 = vmatmul.mubr.f32.gmra.mrb[120].mxu0 %v5774_v18  ;;  %v9150_v40 = vunpack.i.l.bf16 %v9149_v22  ;;  %v9156_v6 = vunpack.i.h.bf16 %v9154_v13  ;;  %v9151_v63 = vunpack.i.h.bf16 %v9149_v22 }
 0xb19   : > { %7922 = vmatprep.mubr.msk.f32.mxu0 %vm949_vm4, %v5535_v57 }
 0xb1a   : > { %v5744_v59 = vsel %vm949_vm4, %v5392_v10, %v9155_v48  ;;  %v5745_v30 = vsel %vm949_vm4, %v13477_v16, %v9156_v6 }
 0xb1b   : > { %v9159_v21 = vpop.permute.xlu0 %9158  ;;  %v5760_v26 = vsel %vm966_vm9, %v5744_v59, %v9150_v40  ;;  %v5761_v20 = vsel %vm966_vm9, %v5745_v30, %v9151_v63  ;;  %v5539_v40 = vsel %vm303_vm11, %v13506_v8, 0.0 }
 0xb1c   : > { %v9160_v44 = vunpack.i.l.bf16 %v9159_v21  ;;  %5930 = vmatmul.mubr.f32.gmra.mrb[122].mxu0 %v5775_v31  ;;  %v9161_v29 = vunpack.i.h.bf16 %v9159_v21 }
 0xb1d   : > { %7923 = vmatprep.mubr.msk.f32.mxu0 %vm949_vm4, %v13464_v60  ;;  %v5394_v60 = vsel %vm286_vm8, %v13487_v61, 0.0 }
 0xb1e   : > { %v5776_v37 = vsel %vm983_vm10, %v5760_v26, %v9160_v44  ;;  %v5777_v16 = vsel %vm983_vm10, %v5761_v20, %v9161_v29 }
 0xb1f   : > { %v9164_v1 = vpop.permute.xlu0 %9163  ;;  %v9169_v36 = vpop.permute.xlu1 %9168 }
 0xb20   : > { %v9170_v23 = vunpack.i.l.bf16 %v9169_v36  ;;  %5935 = vmatmul.mubr.f32.gmra.mrb[124].mxu0 %v5776_v37  ;;  %v9165_v46 = vunpack.i.l.bf16 %v9164_v1  ;;  %v9171_v52 = vunpack.i.h.bf16 %v9169_v36  ;;  %v9166_v39 = vunpack.i.h.bf16 %v9164_v1 }
 0xb21   : > { %7924 = vmatprep.mubr.msk.f32.mxu0 %vm949_vm4, %v5537_v35  ;;  %v5541_v36 = vsel %vm303_vm11, %v13539_v3, 0.0 }
 0xb22   : > { %v5746_v17 = vsel %vm949_vm4, %v5394_v60, %v9170_v23  ;;  %v5747_v48 = vsel %vm949_vm4, %v13510_v9, %v9171_v52 }
 0xb23   : > { %v9174_v38 = vpop.permute.xlu1 %9173  ;;  %v5762_v54 = vsel %vm966_vm9, %v5746_v17, %v9165_v46  ;;  %v5763_v25 = vsel %vm966_vm9, %v5747_v48, %v9166_v39 }
 0xb24   : > { %v9175_v18 = vunpack.i.l.bf16 %v9174_v38  ;;  %5940 = vmatmul.mubr.f32.gmra.mrb[126].mxu0 %v5777_v16  ;;  %v9176_v22 = vunpack.i.h.bf16 %v9174_v38 }
 0xb25   : > { %7925 = vmatprep.mubr.msk.f32.mxu0 %vm949_vm4, %v13497_v51  ;;  %v5396_v51 = vsel %vm286_vm8, %v13520_v53, 0.0 }
 0xb26   : > { %v5778_v13 = vsel %vm983_vm10, %v5762_v54, %v9175_v18  ;;  %v5779_v9 = vsel %vm983_vm10, %v5763_v25, %v9176_v22  ;;  %v5400_v54 = vsel %vm286_vm8, %v13591_v11, 0.0 }
 0xb27   : > { %v9184_v61 = vpop.permute.xlu0 %9183  ;;  %v9179_v50 = vpop.permute.xlu1 %9178 }
 0xb28   : > { %v9185_v57 = vunpack.i.l.bf16 %v9184_v61  ;;  %5945 = vmatmul.mubr.f32.gmra.mrb[128].mxu0 %v5778_v13  ;;  %v9180_v10 = vunpack.i.l.bf16 %v9179_v50  ;;  %v9186_v6 = vunpack.i.h.bf16 %v9184_v61  ;;  %v9181_v44 = vunpack.i.h.bf16 %v9179_v50 }
 0xb29   : > { %7926 = vmatprep.mubr.msk.f32.mxu0 %vm949_vm4, %v5539_v40 }
 0xb2a   : > { %v5748_v59 = vsel %vm949_vm4, %v5396_v51, %v9185_v57  ;;  %v5749_v29 = vsel %vm949_vm4, %v13543_v7, %v9186_v6  ;;  %v7937_v6 = vld [vmem:[%s14865_s3 + $0x520] sm:$0xff] }
 0xb2b   : > { %v9189_v21 = vpop.permute.xlu0 %9188  ;;  %v5764_v8 = vsel %vm966_vm9, %v5748_v59, %v9180_v10  ;;  %v5765_v23 = vsel %vm966_vm9, %v5749_v29, %v9181_v44  ;;  %v5545_v10 = vsel %vm303_vm11, %v13604_v4, 0.0  ;;  %v7935_v4 = vld [vmem:[%s14865_s3 + $0x510] sm:$0xff]  ;;  %v7936_v59 = vld [vmem:[%s14865_s3 + $0x518] sm:$0xff] }
 0xb2c   : > { %v9190_v31 = vunpack.i.l.bf16 %v9189_v21  ;;  %5950 = vmatmul.mubr.f32.gmra.mrb[130].mxu0 %v5779_v9  ;;  %v9191_v63 = vunpack.i.h.bf16 %v9189_v21  ;;  %v8299_v21 = vpack.c.bf16 %v7936_v59, %v7935_v4  ;;  %v7938_v9 = vld [vmem:[%s14865_s3 + $0x528] sm:$0xff]  ;;  %v7940_v44 = vld [vmem:[%s14865_s3 + $0x538] sm:$0xff]  ;;  %v7943_v29 = vld [vmem:[%s14865_s3 + $0x550] sm:$0xff] }
 0xb2d   : > { %7927 = vmatprep.mubr.msk.f32.mxu0 %vm949_vm4, %v13530_v55  ;;  %v5398_v55 = vsel %vm286_vm8, %v13553_v14, 0.0 }
 0xb2e   : > { %v5780_v26 = vsel %vm983_vm10, %v5764_v8, %v9190_v31  ;;  %v5781_v7 = vsel %vm983_vm10, %v5765_v23, %v9191_v63  ;;  %v8302_v31 = vpack.c.bf16 %v7938_v9, %v7937_v6  ;;  %v7939_v8 = vld [vmem:[%s14865_s3 + $0x530] sm:$0xff]  ;;  %v7941_v63 = vld [vmem:[%s14865_s3 + $0x540] sm:$0xff] }
 0xb2f   : > { %v9194_v53 = vpop.permute.xlu0 %9193  ;;  %v9199_v37 = vpop.permute.xlu1 %9198 }
 0xb30   : > { %v9200_v1 = vunpack.i.l.bf16 %v9199_v37  ;;  %5955 = vmatmul.mubr.f32.gmra.mrb[132].mxu0 %v5780_v26  ;;  %v9195_v30 = vunpack.i.l.bf16 %v9194_v53  ;;  %v9201_v46 = vunpack.i.h.bf16 %v9199_v37  ;;  %v9196_v52 = vunpack.i.h.bf16 %v9194_v53  ;;  %v7942_v53 = vld [vmem:[%s14865_s3 + $0x548] sm:$0xff] }
 0xb31   : > { %7928 = vmatprep.mubr.msk.f32.mxu0 %vm949_vm4, %v5541_v36  ;;  %v8305_v26 = vpack.c.bf16 %v7940_v44, %v7939_v8  ;;  %v8308_v37 = vpack.c.bf16 %v7942_v53, %v7941_v63 }
 0xb32   : > { %v5750_v35 = vsel %vm949_vm4, %v5398_v55, %v9200_v1  ;;  %v5751_v18 = vsel %vm949_vm4, %v13576_v2, %v9201_v46  ;;  %v7944_v1 = vld [vmem:[%s14865_s3 + $0x558] sm:$0xff]  ;;  %v7946_v55 = vld [vmem:[%s14865_s3 + $0x568] sm:$0xff] }
 0xb33   : > { %v9204_v60 = vpop.permute.xlu1 %9203  ;;  %v5766_v17 = vsel %vm966_vm9, %v5750_v35, %v9195_v30  ;;  %v5767_v22 = vsel %vm966_vm9, %v5751_v18, %v9196_v52  ;;  %v8311_v36 = vpack.c.bf16 %v7944_v1, %v7943_v29  ;;  %v7945_v30 = vld [vmem:[%s14865_s3 + $0x560] sm:$0xff]  ;;  %v7947_v35 = vld [vmem:[%s14865_s3 + $0x570] sm:$0xff]  ;;  %v7948_v46 = vld [vmem:[%s14865_s3 + $0x578] sm:$0xff] }
 0xb34   : > { %v9205_v20 = vunpack.i.l.bf16 %v9204_v60  ;;  %5960 = vmatmul.mubr.f32.gmra.mrb[134].mxu0 %v5781_v7  ;;  %v9206_v14 = vunpack.i.h.bf16 %v9204_v60  ;;  %v8314_v23 = vpack.c.bf16 %v7946_v55, %v7945_v30  ;;  %v8317_v60 = vpack.c.bf16 %v7948_v46, %v7947_v35  ;;  %v7949_v7 = vld [vmem:[%s14865_s3 + $0x580] sm:$0xff] }
 0xb35   : > { %7929 = vmatprep.mubr.msk.f32.mxu0 %vm949_vm4, %v13563_v12  ;;  %v5591_v3 = vpop.permute.xlu0 %5590  ;;  %v5543_v12 = vsel %vm303_vm11, %v13572_v47, 0.0 }
 0xb36   : > { %v5782_v38 = vsel %vm983_vm10, %v5766_v17, %v9205_v20  ;;  %v5752_v39 = vsel %vm949_vm4, %v5400_v54, %v5591_v3  ;;  %v5783_v50 = vsel %vm983_vm10, %v5767_v22, %v9206_v14  ;;  %v7950_v20 = vld [vmem:[%s14865_s3 + $0x588] sm:$0xff]  ;;  %v13805_v17 = vld [vmem:[%s14866_s4 + $0x7] ss:$0 sm:$0xff] }
 0xb37   : > { %v5655_v16 = vpop.permute.xlu1 %5654  ;;  %v8320_v3 = vpack.c.bf16 %v7950_v20, %v7949_v7 }
 0xb38   : > { %5965 = vmatmul.mubr.f32.gmra.mrb[136].mxu0 %v5782_v38  ;;  %v5768_v2 = vsel %vm966_vm9, %v5752_v39, %v5655_v16 }
 0xb39   : > { %7930 = vmatprep.mubr.msk.f32.mxu0 %vm949_vm4, %v5543_v12  ;;  %v5719_v13 = vpop.permute.xlu0 %5718 }
 0xb3a   : > { %v5784_v48 = vsel %vm983_vm10, %v5768_v2, %v5719_v13 }
 0xb3b   : > { %v5593_v61 = vpop.permute.xlu1 %5592 }
 0xb3c   : > { %5970 = vmatmul.mubr.f32.gmra.mrb[138].mxu0 %v5783_v50  ;;  %v5753_v11 = vsel %vm949_vm4, %v13595_v5, %v5593_v61  ;;  %v7933_v5 = vld [vmem:[%s14865_s3 + $0x500] sm:$0xff] }
 0xb3d   : > { %7931 = vmatprep.mubr.msk.f32.mxu0 %vm949_vm4, %v13600_v19  ;;  %v5657_v47 = vpop.permute.xlu0 %5656  ;;  %v7934_v19 = vld [vmem:[%s14865_s3 + $0x508] sm:$0xff] }
 0xb3e   : > { %v5769_v57 = vsel %vm966_vm9, %v5753_v11, %v5657_v47  ;;  %v8296_v25 = vpack.c.bf16 %v7934_v19, %v7933_v5  ;;  %v7951_v47 = vld [vmem:[%s14865_s3 + $0x590] sm:$0xff] }
 0xb3f   : > { %v5721_v40 = vpop.permute.xlu1 %5720 }
 0xb40   : > { %5975 = vmatmul.mubr.f32.gmra.mrb[140].mxu0 %v5784_v48  ;;  %v5785_v51 = vsel %vm983_vm10, %v5769_v57, %v5721_v40  ;;  %8297 = vmatpush1.bf16.msra.mxu1 %v8296_v25 }
 0xb41   : > { %7932 = vmatprep.mubr.msk.f32.mxu0 %vm949_vm4, %v5545_v10  ;;  %8298 = vmatprep.subr.bf16.mxu1 %v14891_v28 }
 0xb44   : > { %5980 = vmatmul.mubr.f32.gmra.mrb[142].mxu0 %v5785_v51  ;;  %8300 = vmatpush1.bf16.msra.mxu1 %v8299_v21 }
 0xb45   : > { %8301 = vmatprep.subr.bf16.mxu1 %v14891_v28 }
 0xb48   : > { %8303 = vmatpush1.bf16.msra.mxu1 %v8302_v31 }
 0xb49   : > { %8304 = vmatprep.subr.bf16.mxu1 %v14891_v28 }
 0xb4c   : > { %8306 = vmatpush1.bf16.msra.mxu1 %v8305_v26 }
 0xb4d   : > { %8307 = vmatprep.subr.bf16.mxu1 %v14891_v28 }
 0xb50   : > { %8309 = vmatpush1.bf16.msra.mxu1 %v8308_v37 }
 0xb51   : > { %8310 = vmatprep.subr.bf16.mxu1 %v14891_v28 }
 0xb54   : > { %8312 = vmatpush1.bf16.msra.mxu1 %v8311_v36 }
 0xb55   : > { %8313 = vmatprep.subr.bf16.mxu1 %v14891_v28 }
 0xb58   : > { %8315 = vmatpush1.bf16.msra.mxu1 %v8314_v23 }
 0xb59   : > { %8316 = vmatprep.subr.bf16.mxu1 %v14891_v28 }
 0xb5c   : > { %8318 = vmatpush1.bf16.msra.mxu1 %v8317_v60 }
 0xb5d   : > { %8319 = vmatprep.subr.bf16.mxu1 %v14891_v28 }
 0xb60   : > { %8321 = vmatpush1.bf16.msra.mxu1 %v8320_v3 }
 0xb61   : > { %8322 = vmatprep.subr.bf16.mxu1 %v14891_v28 }
 0xbdb   : > { %v5906_v52 = vpop.f32.mrb[112].mxu0 }
 0xbdc   : > { %v5907_v38 = vadd.f32 %v13805_v17, %v5906_v52  ;;  %v5908_v14 = vpop.f32.mrb[113].mxu0 }
 0xbde   : > { %v5985_v16 = vmul.f32 0.3, %v5907_v38 }
 0xbdf   : > { %v5911_v18 = vpop.f32.mrb[114].mxu0 }
 0xbe0   : > { %v13809_v54 = vadd.f32 %v5985_v16, %v12783_v15  ;;  %v5912_v12 = vadd.f32 %v13805_v17, %v5911_v18  ;;  %v5913_v39 = vpop.f32.mrb[115].mxu0  ;;  %v7952_v15 = vld [vmem:[%s14865_s3 + $0x598] sm:$0xff] }
 0xbe1   : > { %v8323_v48 = vpack.c.bf16 %v7952_v15, %v7951_v47 }
 0xbe2   : > { %v5986_v13 = vmul.f32 0.3, %v5912_v12  ;;  %v6017_v22 = vmax.f32 %v13809_v54, 0.0 }
 0xbe3   : > { %v5916_v61 = vpop.f32.mrb[116].mxu0  ;;  %8324 = vmatpush1.bf16.msra.mxu1 %v8323_v48 }
 0xbe4   : > { %v13814_v50 = vadd.f32 %v5986_v13, %v12788_v27  ;;  %v5917_v2 = vadd.f32 %v13805_v17, %v5916_v61  ;;  %v5918_v11 = vpop.f32.mrb[117].mxu0  ;;  %v6200_v51 = vrot.slane %v6017_v22, 2  ;;  %v6104_v5 = vrot.slane %v6017_v22, 7 }
 0xbe5   : > { %v6152_v27 = vrot.slane %v6017_v22, 1  ;;  %v6056_v31 = vrot.slane %v6017_v22, 6 }
 0xbe6   : > { %v6018_v57 = vmax.f32 %v13814_v50, 0.0  ;;  %v5987_v40 = vmul.f32 0.3, %v5917_v2 }
 0xbe7   : > { %v5921_v10 = vpop.f32.mrb[118].mxu0 }
 0xbe8   : > { %v13825_v19 = vadd.f32 %v5987_v40, %v12799_v58  ;;  %v5922_v25 = vadd.f32 %v13805_v17, %v5921_v10  ;;  %v5923_v4 = vpop.f32.mrb[119].mxu0  ;;  %v9207_v59 = vpack.i.bf16 %v6018_v57, %v6017_v22  ;;  %v6208_v6 = vrot.slane %v6018_v57, 2 }
 0xbe9   : > { %v6112_v21 = vrot.slane %v6018_v57, 7  ;;  %v6160_v9 = vrot.slane %v6018_v57, 1  ;;  %v6064_v8 = vrot.slane %v6018_v57, 6 }
 0xbea   : > { %v13829_v44 = vmax.f32 %v13825_v19, 0.0  ;;  %v5988_v26 = vmul.f32 0.3, %v5922_v25  ;;  %9208 = vrot.lane.b32.xlu1 %v9207_v59, %s9428_s11  ;;  %v6216_v63 = vsel %vm724_vm1, %v6200_v51, %v6208_v6  ;;  %v13836_v58 = vsel %vm724_vm1, %v6208_v6, %v6200_v51 }
 0xbeb   : > { %v5926_v53 = vpop.f32.mrb[120].mxu0  ;;  %7955 = vmatprep.mubr.msk.f32.mxu1 %vm949_vm4, %v6216_v63  ;;  %v6120_v37 = vsel %vm626_vm3, %v6104_v5, %v6112_v21  ;;  %v6128_v29 = vsel %vm626_vm3, %v6112_v21, %v6104_v5  ;;  %v6168_v1 = vsel %vm675_vm2, %v6152_v27, %v6160_v9  ;;  %v6176_v36 = vsel %vm675_vm2, %v6160_v9, %v6152_v27 }
 0xbec   : > { %v13848_v30 = vadd.f32 %v5988_v26, %v12823_v32  ;;  %v5927_v55 = vadd.f32 %v13805_v17, %v5926_v53  ;;  %v5928_v23 = vpop.f32.mrb[121].mxu0  ;;  %v6136_v35 = vsel %vm292_vm6, %v6128_v29, 0.0  ;;  %v6185_v46 = vsel %vm299_vm5, %v6176_v36, 0.0 }
 0xbed   : > { %v9212_v60 = vpack.i.bf16 %v6120_v37, %v6136_v35  ;;  %v13858_v3 = vsel %vm577_vm7, %v6064_v8, %v6056_v31  ;;  %v9217_v52 = vpack.i.bf16 %v6185_v46, %v6168_v1  ;;  %v6105_v38 = vrot.slane %v13829_v44, 7 }
 0xbee   : > { %v6020_v7 = vmax.f32 %v13848_v30, 0.0  ;;  %v5989_v20 = vmul.f32 0.3, %v5927_v55  ;;  %v6153_v14 = vrot.slane %v13829_v44, 1  ;;  %v13865_v16 = vsel %vm577_vm7, %v6056_v31, %v6064_v8 }
 0xbef   : > { %9213 = vrot.lane.b32.xlu0 %v9212_v60, %s9427_s10  ;;  %v5931_v32 = vpop.f32.mrb[122].mxu0  ;;  %v6201_v22 = vrot.slane %v13829_v44, 2  ;;  %v6057_v11 = vrot.slane %v13829_v44, 6 }
 0xbf0   : > { %v13868_v18 = vadd.f32 %v5989_v20, %v12843_v41  ;;  %v5932_v12 = vadd.f32 %v13805_v17, %v5931_v32  ;;  %v5933_v39 = vpop.f32.mrb[123].mxu0  ;;  %v6113_v13 = vrot.slane %v6020_v7, 7  ;;  %v6161_v61 = vrot.slane %v6020_v7, 1 }
 0xbf1   : > { %v6209_v2 = vrot.slane %v6020_v7, 2  ;;  %v6065_v47 = vrot.slane %v6020_v7, 6  ;;  %v9222_v9 = vpack.i.bf16 %v6020_v7, %v13829_v44 }
 0xbf2   : > { %v13874_v15 = vmax.f32 %v13868_v18, 0.0  ;;  %v5990_v48 = vmul.f32 0.3, %v5932_v12  ;;  %v6121_v57 = vsel %vm626_vm3, %v6105_v38, %v6113_v13  ;;  %v6129_v41 = vsel %vm626_vm3, %v6113_v13, %v6105_v38 }
 0xbf3   : > { %9218 = vrot.lane.b32.xlu0 %v9217_v52, %s9426_s9  ;;  %v5936_v40 = vpop.f32.mrb[124].mxu0  ;;  %v6138_v10 = vsel %vm292_vm6, %v6129_v41, 0.0  ;;  %v6169_v51 = vsel %vm675_vm2, %v6153_v14, %v6161_v61  ;;  %v6177_v5 = vsel %vm675_vm2, %v6161_v61, %v6153_v14  ;;  %v13889_v27 = vsel %vm724_vm1, %v6201_v22, %v6209_v2 }
 0xbf4   : > { %v13892_v25 = vadd.f32 %v5990_v48, %v12867_v0  ;;  %v5937_v4 = vadd.f32 %v13805_v17, %v5936_v40  ;;  %v5938_v59 = vpop.f32.mrb[125].mxu0  ;;  %v9227_v6 = vpack.i.bf16 %v6121_v57, %v6138_v10  ;;  %v6187_v21 = vsel %vm299_vm5, %v6177_v5, 0.0 }
 0xbf5   : > { %v13900_v31 = vsel %vm577_vm7, %v6065_v47, %v6057_v11  ;;  %v9232_v0 = vpack.i.bf16 %v6187_v21, %v6169_v51  ;;  %v13906_v63 = vsel %vm724_vm1, %v6209_v2, %v6201_v22  ;;  %v6106_v37 = vrot.slane %v13874_v15, 7 }
 0xbf6   : > { %v6022_v8 = vmax.f32 %v13892_v25, 0.0  ;;  %v5991_v26 = vmul.f32 0.3, %v5937_v4  ;;  %9228 = vrot.lane.b32.xlu1 %v9227_v6, %s9427_s10  ;;  %v6154_v44 = vrot.slane %v13874_v15, 1  ;;  %v13913_v29 = vsel %vm577_vm7, %v6057_v11, %v6065_v47 }
 0xbf7   : > { %9223 = vrot.lane.b32.xlu0 %v9222_v9, %s9428_s11  ;;  %v5941_v53 = vpop.f32.mrb[126].mxu0  ;;  %v6202_v1 = vrot.slane %v13874_v15, 2  ;;  %v6058_v46 = vrot.slane %v13874_v15, 6 }
 0xbf8   : > { %v13917_v36 = vadd.f32 %v5991_v26, %v12892_v34  ;;  %v5942_v55 = vadd.f32 %v13805_v17, %v5941_v53  ;;  %v5943_v23 = vpop.f32.mrb[127].mxu0  ;;  %v6114_v35 = vrot.slane %v6022_v8, 7  ;;  %v9237_v60 = vpack.i.bf16 %v6022_v8, %v13874_v15 }
 0xbf9   : > { %v6162_v7 = vrot.slane %v6022_v8, 1  ;;  %v6210_v20 = vrot.slane %v6022_v8, 2  ;;  %v6066_v32 = vrot.slane %v6022_v8, 6 }
 0xbfa   : > { %v13923_v52 = vmax.f32 %v13917_v36, 0.0  ;;  %v5992_v38 = vmul.f32 0.3, %v5942_v55  ;;  %9233 = vrot.lane.b32.xlu1 %v9232_v0, %s9426_s9  ;;  %v6122_v34 = vsel %vm626_vm3, %v6106_v37, %v6114_v35  ;;  %v6130_v14 = vsel %vm626_vm3, %v6114_v35, %v6106_v37 }
 0xbfb   : > { %v5946_v12 = vpop.f32.mrb[128].mxu0  ;;  %v6140_v39 = vsel %vm292_vm6, %v6130_v14, 0.0  ;;  %v6170_v13 = vsel %vm675_vm2, %v6154_v44, %v6162_v7  ;;  %v6178_v22 = vsel %vm675_vm2, %v6162_v7, %v6154_v44  ;;  %v13938_v61 = vsel %vm724_vm1, %v6202_v1, %v6210_v20 }
 0xbfc   : > { %v13941_v2 = vadd.f32 %v5992_v38, %v12916_v62  ;;  %v5947_v11 = vadd.f32 %v13805_v17, %v5946_v12  ;;  %v5948_v47 = vpop.f32.mrb[129].mxu0  ;;  %v9242_v15 = vpack.i.bf16 %v6122_v34, %v6140_v39  ;;  %v6189_v48 = vsel %vm299_vm5, %v6178_v22, 0.0 }
 0xbfd   : > { %v13948_v57 = vsel %vm577_vm7, %v6066_v32, %v6058_v46  ;;  %v9247_v62 = vpack.i.bf16 %v6189_v48, %v6170_v13  ;;  %v13955_v10 = vsel %vm724_vm1, %v6210_v20, %v6202_v1  ;;  %v6107_v5 = vrot.slane %v13923_v52, 7 }
 0xbfe   : > { %v6024_v41 = vmax.f32 %v13941_v2, 0.0  ;;  %v5993_v40 = vmul.f32 0.3, %v5947_v11  ;;  %9238 = vrot.lane.b32.xlu1 %v9237_v60, %s9428_s11  ;;  %9243 = vrot.lane.b32.xlu0 %v9242_v15, %s9427_s10  ;;  %v6155_v4 = vrot.slane %v13923_v52, 1  ;;  %v13961_v59 = vsel %vm577_vm7, %v6058_v46, %v6066_v32 }
 0xbff   : > { %v5951_v51 = vpop.f32.mrb[130].mxu0  ;;  %v6203_v6 = vrot.slane %v13923_v52, 2  ;;  %v6059_v0 = vrot.slane %v13923_v52, 6 }
 0xc00   : > { %v13965_v21 = vadd.f32 %v5993_v40, %v12940_v33  ;;  %v5952_v9 = vadd.f32 %v13805_v17, %v5951_v51  ;;  %v5953_v8 = vpop.f32.mrb[131].mxu0  ;;  %v6115_v26 = vrot.slane %v6024_v41, 7  ;;  %v9252_v53 = vpack.i.bf16 %v6024_v41, %v13923_v52 }
 0xc01   : > { %v6163_v37 = vrot.slane %v6024_v41, 1  ;;  %v6211_v44 = vrot.slane %v6024_v41, 2  ;;  %v6067_v1 = vrot.slane %v6024_v41, 6 }
 0xc02   : > { %v13971_v55 = vmax.f32 %v13965_v21, 0.0  ;;  %v5994_v23 = vmul.f32 0.3, %v5952_v9  ;;  %9248 = vrot.lane.b32.xlu0 %v9247_v62, %s9426_s9  ;;  %v6123_v33 = vsel %vm626_vm3, %v6107_v5, %v6115_v26  ;;  %v6131_v35 = vsel %vm626_vm3, %v6115_v26, %v6107_v5 }
 0xc03   : > { %v5956_v46 = vpop.f32.mrb[132].mxu0  ;;  %v6142_v60 = vsel %vm292_vm6, %v6131_v35, 0.0  ;;  %v6171_v7 = vsel %vm675_vm2, %v6155_v4, %v6163_v37  ;;  %v6179_v20 = vsel %vm675_vm2, %v6163_v37, %v6155_v4  ;;  %v13986_v32 = vsel %vm724_vm1, %v6203_v6, %v6211_v44 }
 0xc04   : > { %v13989_v52 = vadd.f32 %v5994_v23, %v12964_v42  ;;  %v5957_v38 = vadd.f32 %v13805_v17, %v5956_v46  ;;  %v5958_v34 = vpop.f32.mrb[133].mxu0  ;;  %v9257_v14 = vpack.i.bf16 %v6123_v33, %v6142_v60  ;;  %v6191_v12 = vsel %vm299_vm5, %v6179_v20, 0.0 }
 0xc05   : > { %v13996_v39 = vsel %vm577_vm7, %v6067_v1, %v6059_v0  ;;  %v9262_v42 = vpack.i.bf16 %v6191_v12, %v6171_v7  ;;  %v14003_v11 = vsel %vm724_vm1, %v6211_v44, %v6203_v6  ;;  %v6108_v15 = vrot.slane %v13971_v55, 7 }
 0xc06   : > { %v6026_v13 = vmax.f32 %v13989_v52, 0.0  ;;  %v5995_v22 = vmul.f32 0.3, %v5957_v38  ;;  %9258 = vrot.lane.b32.xlu1 %v9257_v14, %s9427_s10  ;;  %9253 = vrot.lane.b32.xlu0 %v9252_v53, %s9428_s11  ;;  %v6156_v48 = vrot.slane %v13971_v55, 1  ;;  %v14009_v41 = vsel %vm577_vm7, %v6059_v0, %v6067_v1 }
 0xc07   : > { %v5961_v47 = vpop.f32.mrb[134].mxu0  ;;  %v6204_v40 = vrot.slane %v13971_v55, 2  ;;  %v6060_v6 = vrot.slane %v13971_v55, 6 }
 0xc08   : > { %v14013_v62 = vadd.f32 %v5995_v22, %v12988_v56  ;;  %v5962_v51 = vadd.f32 %v13805_v17, %v5961_v47  ;;  %v5963_v5 = vpop.f32.mrb[135].mxu0  ;;  %v6116_v4 = vrot.slane %v6026_v13, 7  ;;  %v9267_v9 = vpack.i.bf16 %v6026_v13, %v13971_v55 }
 0xc09   : > { %v6164_v8 = vrot.slane %v6026_v13, 1  ;;  %v6212_v26 = vrot.slane %v6026_v13, 2  ;;  %v6068_v53 = vrot.slane %v6026_v13, 6 }
 0xc0a   : > { %v6027_v37 = vmax.f32 %v14013_v62, 0.0  ;;  %v5996_v0 = vmul.f32 0.3, %v5962_v51  ;;  %9263 = vrot.lane.b32.xlu1 %v9262_v42, %s9426_s9  ;;  %v6124_v56 = vsel %vm626_vm3, %v6108_v15, %v6116_v4  ;;  %v6132_v44 = vsel %vm626_vm3, %v6116_v4, %v6108_v15 }
 0xc0b   : > { %v5966_v1 = vpop.f32.mrb[136].mxu0  ;;  %v6144_v23 = vsel %vm292_vm6, %v6132_v44, 0.0  ;;  %v6172_v55 = vsel %vm675_vm2, %v6156_v48, %v6164_v8  ;;  %v6180_v33 = vsel %vm675_vm2, %v6164_v8, %v6156_v48  ;;  %v14032_v35 = vsel %vm724_vm1, %v6204_v40, %v6212_v26 }
 0xc0c   : > { %v14035_v46 = vadd.f32 %v5996_v0, %v13010_v24  ;;  %v5967_v60 = vadd.f32 %v13805_v17, %v5966_v1  ;;  %v5968_v7 = vpop.f32.mrb[137].mxu0  ;;  %v9272_v20 = vpack.i.bf16 %v6124_v56, %v6144_v23  ;;  %v6193_v38 = vsel %vm299_vm5, %v6180_v33, 0.0 }
 0xc0d   : > { %v14042_v34 = vsel %vm577_vm7, %v6068_v53, %v6060_v6  ;;  %v9277_v24 = vpack.i.bf16 %v6193_v38, %v6172_v55  ;;  %v14049_v13 = vsel %vm724_vm1, %v6212_v26, %v6204_v40  ;;  %v6109_v42 = vrot.slane %v6027_v37, 7 }
 0xc0e   : > { %v6028_v14 = vmax.f32 %v14035_v46, 0.0  ;;  %v5997_v12 = vmul.f32 0.3, %v5967_v60  ;;  %9268 = vrot.lane.b32.xlu1 %v9267_v9, %s9428_s11  ;;  %9273 = vrot.lane.b32.xlu0 %v9272_v20, %s9427_s10  ;;  %v6157_v47 = vrot.slane %v6027_v37, 1  ;;  %v14053_v15 = vsel %vm577_vm7, %v6060_v6, %v6068_v53  ;;  %v14910_v60 = vld [vmem:[#allocation3_spill] sm:$0xff] }
 0xc0f   : > { %v5971_v22 = vpop.f32.mrb[138].mxu0  ;;  %v6205_v48 = vrot.slane %v6027_v37, 2  ;;  %v6061_v8 = vrot.slane %v6027_v37, 6 }
 0xc10   : > { %v14056_v51 = vadd.f32 %v5997_v12, %v13031_v45  ;;  %v5972_v5 = vadd.f32 %v13805_v17, %v5971_v22  ;;  %v5973_v4 = vpop.f32.mrb[139].mxu0  ;;  %v6117_v9 = vrot.slane %v6028_v14, 7  ;;  %v9282_v0 = vpack.i.bf16 %v6028_v14, %v6027_v37 }
 0xc11   : > { %v6165_v56 = vrot.slane %v6028_v14, 1  ;;  %v6213_v40 = vrot.slane %v6028_v14, 2  ;;  %v6069_v26 = vrot.slane %v6028_v14, 6 }
 0xc12   : > { %v6029_v44 = vmax.f32 %v14056_v51, 0.0  ;;  %v5998_v1 = vmul.f32 0.3, %v5972_v5  ;;  %9278 = vrot.lane.b32.xlu0 %v9277_v24, %s9426_s9  ;;  %v6125_v6 = vsel %vm626_vm3, %v6109_v42, %v6117_v9  ;;  %v6133_v45 = vsel %vm626_vm3, %v6117_v9, %v6109_v42 }
 0xc13   : > { %v5976_v53 = vpop.f32.mrb[140].mxu0  ;;  %v6146_v23 = vsel %vm292_vm6, %v6133_v45, 0.0  ;;  %v6173_v37 = vsel %vm675_vm2, %v6157_v47, %v6165_v56  ;;  %v6181_v55 = vsel %vm675_vm2, %v6165_v56, %v6157_v47  ;;  %v14073_v33 = vsel %vm724_vm1, %v6205_v48, %v6213_v40 }
 0xc14   : > { %v14076_v7 = vadd.f32 %v5998_v1, %v14910_v60  ;;  %v5977_v20 = vadd.f32 %v13805_v17, %v5976_v53  ;;  %v5978_v38 = vpop.f32.mrb[141].mxu0  ;;  %v9287_v14 = vpack.i.bf16 %v6125_v6, %v6146_v23  ;;  %v6195_v12 = vsel %vm299_vm5, %v6181_v55, 0.0  ;;  %v14912_v1 = vld [vmem:[#allocation5_spill] sm:$0xff] }
 0xc15   : > { %v14083_v24 = vsel %vm577_vm7, %v6069_v26, %v6061_v8  ;;  %v14090_v47 = vsel %vm724_vm1, %v6213_v40, %v6205_v48  ;;  %v9292_v4 = vpack.i.bf16 %v6195_v12, %v6173_v37  ;;  %v6110_v9 = vrot.slane %v6029_v44, 7 }
 0xc16   : > { %14911 = vst [vmem:[#allocation3_spill] sm:$0xff] %v14076_v7  ;;  %v6030_v22 = vmax.f32 %v14076_v7, 0.0  ;;  %v5999_v42 = vmul.f32 0.3, %v5977_v20  ;;  %9288 = vrot.lane.b32.xlu1 %v9287_v14, %s9427_s10  ;;  %9283 = vrot.lane.b32.xlu0 %v9282_v0, %s9428_s11  ;;  %v14094_v56 = vsel %vm577_vm7, %v6061_v8, %v6069_v26  ;;  %v6158_v55 = vrot.slane %v6029_v44, 1 }
 0xc17   : > { %v5981_v5 = vpop.f32.mrb[142].mxu0  ;;  %v6206_v60 = vrot.slane %v6029_v44, 2  ;;  %v6062_v26 = vrot.slane %v6029_v44, 6 }
 0xc18   : > { %v14097_v6 = vadd.f32 %v5999_v42, %v14912_v1  ;;  %v5982_v45 = vadd.f32 %v13805_v17, %v5981_v5  ;;  %v5983_v53 = vpop.f32.mrb[143].mxu0  ;;  %v6118_v23 = vrot.slane %v6030_v22, 7  ;;  %v6166_v0 = vrot.slane %v6030_v22, 1  ;;  %v14914_v42 = vld [vmem:[#allocation4_spill] sm:$0xff] }
 0xc19   : > { %v6214_v20 = vrot.slane %v6030_v22, 2  ;;  %v6070_v48 = vrot.slane %v6030_v22, 6 }
 0xc1a   : > { %14913 = vst [vmem:[#allocation5_spill] sm:$0xff] %v14097_v6  ;;  %v6000_v40 = vmul.f32 0.3, %v5982_v45  ;;  %9293 = vrot.lane.b32.xlu1 %v9292_v4, %s9426_s9  ;;  %v6126_v37 = vsel %vm626_vm3, %v6110_v9, %v6118_v23  ;;  %v6134_v8 = vsel %vm626_vm3, %v6118_v23, %v6110_v9  ;;  %v6031_v38 = vmax.f32 %v14097_v6, 0.0 }
 0xc1b   : > { %v6148_v17 = vsel %vm292_vm6, %v6134_v8, 0.0  ;;  %v6182_v14 = vsel %vm675_vm2, %v6166_v0, %v6158_v55  ;;  %v14112_v12 = vsel %vm724_vm1, %v6206_v60, %v6214_v20  ;;  %v9297_v4 = vpack.i.bf16 %v6030_v22, %v6029_v44 }
 0xc1c   : > { %v14115_v5 = vadd.f32 %v6000_v40, %v14914_v42  ;;  %v9302_v1 = vpack.i.bf16 %v6126_v37, %v6148_v17  ;;  %v6174_v9 = vsel %vm675_vm2, %v6158_v55, %v6166_v0  ;;  %v6197_v45 = vsel %vm299_vm5, %v6182_v14, 0.0 }
 0xc1d   : > { %v14123_v53 = vsel %vm577_vm7, %v6070_v48, %v6062_v26  ;;  %v14130_v44 = vsel %vm724_vm1, %v6214_v20, %v6206_v60  ;;  %v14134_v22 = vsel %vm577_vm7, %v6062_v26, %v6070_v48  ;;  %v6111_v55 = vrot.slane %v6031_v38, 7 }
 0xc1e   : > { %14915 = vst [vmem:[#allocation4_spill] sm:$0xff] %v14115_v5  ;;  %v6032_v23 = vmax.f32 %v14115_v5, 0.0  ;;  %9298 = vrot.lane.b32.xlu1 %v9297_v4, %s9428_s11  ;;  %9303 = vrot.lane.b32.xlu0 %v9302_v1, %s9427_s10  ;;  %v9307_v0 = vpack.i.bf16 %v6197_v45, %v6174_v9  ;;  %v6063_v17 = vrot.slane %v6031_v38, 6  ;;  %v6207_v42 = vrot.slane %v6031_v38, 2 }
 0xc1f   : > { %v6159_v9 = vrot.slane %v6031_v38, 1 }
 0xc20   : > { %v6119_v40 = vrot.slane %v6032_v23, 7  ;;  %v6071_v37 = vrot.slane %v6032_v23, 6  ;;  %v6215_v8 = vrot.slane %v6032_v23, 2  ;;  %v6167_v20 = vrot.slane %v6032_v23, 1 }
 0xc22   : > { %9308 = vrot.lane.b32.xlu0 %v9307_v0, %s9426_s9  ;;  %v6135_v14 = vsel %vm626_vm3, %v6119_v40, %v6111_v55  ;;  %v14143_v48 = vsel %vm577_vm7, %v6071_v37, %v6063_v17  ;;  %v14147_v26 = vsel %vm577_vm7, %v6063_v17, %v6071_v37  ;;  %v14152_v4 = vsel %vm724_vm1, %v6207_v42, %v6215_v8 }
 0xc23   : > { %v6150_v60 = vsel %vm292_vm6, %v6135_v14, 0.0  ;;  %v14156_v1 = vsel %vm724_vm1, %v6215_v8, %v6207_v42  ;;  %v6175_v45 = vsel %vm675_vm2, %v6159_v9, %v6167_v20  ;;  %v6127_v0 = vsel %vm626_vm3, %v6111_v55, %v6119_v40 }
 0xc24   : > { %6292 = vrot.lane.b32.xlu1 %v6150_v60, %s9427_s10  ;;  %v6183_v37 = vsel %vm675_vm2, %v6167_v20, %v6159_v9  ;;  %v6088_v42 = vsel %vm286_vm8, %v13858_v3, 0.0  ;;  %v6233_v3 = vsel %vm303_vm11, %v13836_v58, 0.0 }
 0xc25   : > { %v6199_v8 = vsel %vm299_vm5, %v6183_v37, 0.0 }
 0xc26   : > { %6356 = vrot.lane.b32.xlu0 %v6031_v38, %s9428_s11 }
 0xc28   : > { %6420 = vrot.lane.b32.xlu1 %v6175_v45, %s9426_s9 }
 0xc2a   : > { %6294 = vrot.lane.b32.xlu0 %v6127_v0, %s9427_s10 }
 0xc2c   : > { %6358 = vrot.lane.b32.xlu1 %v6032_v23, %s9428_s11 }
 0xc2e   : > { %6422 = vrot.lane.b32.xlu0 %v6199_v8, %s9426_s9 }
 0xc5c   : > { %v9209_v17 = vpop.permute.xlu1 %9208 }
 0xc5d   : > { %v9210_v60 = vunpack.i.l.bf16 %v9209_v17  ;;  %v9211_v5 = vunpack.i.h.bf16 %v9209_v17 }
 0xc61   : > { %v9214_v38 = vpop.permute.xlu0 %9213 }
 0xc62   : > { %v9215_v14 = vunpack.i.l.bf16 %v9214_v38  ;;  %v9216_v55 = vunpack.i.h.bf16 %v9214_v38 }
 0xc64   : > { %v6440_v40 = vsel %vm949_vm4, %v6088_v42, %v9215_v14  ;;  %v6441_v8 = vsel %vm949_vm4, %v13865_v16, %v9216_v55  ;;  %v6090_v14 = vsel %vm286_vm8, %v13900_v31, 0.0 }
 0xc65   : > { %v9219_v45 = vpop.permute.xlu0 %9218  ;;  %v6456_v23 = vsel %vm966_vm9, %v6440_v40, %v9210_v60  ;;  %v6457_v42 = vsel %vm966_vm9, %v6441_v8, %v9211_v5 }
 0xc66   : > { %v9220_v20 = vunpack.i.l.bf16 %v9219_v45  ;;  %v9221_v9 = vunpack.i.h.bf16 %v9219_v45 }
 0xc68   : > { %v9229_v0 = vpop.permute.xlu1 %9228  ;;  %v6472_v37 = vsel %vm983_vm10, %v6456_v23, %v9220_v20  ;;  %v6473_v55 = vsel %vm983_vm10, %v6457_v42, %v9221_v9  ;;  %v6235_v9 = vsel %vm303_vm11, %v13906_v63, 0.0 }
 0xc69   : > { %v9230_v6 = vunpack.i.l.bf16 %v9229_v0  ;;  %v9224_v7 = vpop.permute.xlu0 %9223  ;;  %6607 = vmatmul.mubr.f32.vlgmr.msra.gmra.mrb[128].mxu1 %v6472_v37  ;;  %v9231_v16 = vunpack.i.h.bf16 %v9229_v0 }
 0xc6a   : > { %v9225_v38 = vunpack.i.l.bf16 %v9224_v7  ;;  %7956 = vmatprep.mubr.msk.f32.mxu1 %vm949_vm4, %v6233_v3  ;;  %v9226_v45 = vunpack.i.h.bf16 %v9224_v7 }
 0xc6b   : > { %v6442_v40 = vsel %vm949_vm4, %v6090_v14, %v9230_v6  ;;  %v6443_v6 = vsel %vm949_vm4, %v13913_v29, %v9231_v16 }
 0xc6c   : > { %v9234_v17 = vpop.permute.xlu1 %9233  ;;  %v6458_v58 = vsel %vm966_vm9, %v6442_v40, %v9225_v38  ;;  %v6459_v7 = vsel %vm966_vm9, %v6443_v6, %v9226_v45 }
 0xc6d   : > { %v9235_v60 = vunpack.i.l.bf16 %v9234_v17  ;;  %6612 = vmatmul.mubr.f32.gmra.mrb[130].mxu1 %v6473_v55  ;;  %v9236_v23 = vunpack.i.h.bf16 %v9234_v17 }
 0xc6e   : > { %7957 = vmatprep.mubr.msk.f32.mxu1 %vm949_vm4, %v13889_v27  ;;  %v6092_v27 = vsel %vm286_vm8, %v13948_v57, 0.0 }
 0xc6f   : > { %v6474_v20 = vsel %vm983_vm10, %v6458_v58, %v9235_v60  ;;  %v6475_v29 = vsel %vm983_vm10, %v6459_v7, %v9236_v23  ;;  %v6237_v58 = vsel %vm303_vm11, %v13955_v10, 0.0 }
 0xc70   : > { %v9239_v31 = vpop.permute.xlu1 %9238  ;;  %v9244_v37 = vpop.permute.xlu0 %9243 }
 0xc71   : > { %v9245_v5 = vunpack.i.l.bf16 %v9244_v37  ;;  %6617 = vmatmul.mubr.f32.gmra.mrb[132].mxu1 %v6474_v20  ;;  %v9240_v0 = vunpack.i.l.bf16 %v9239_v31  ;;  %v9246_v3 = vunpack.i.h.bf16 %v9244_v37  ;;  %v9241_v42 = vunpack.i.h.bf16 %v9239_v31 }
 0xc72   : > { %7958 = vmatprep.mubr.msk.f32.mxu1 %vm949_vm4, %v6235_v9 }
 0xc73   : > { %v6444_v8 = vsel %vm949_vm4, %v6092_v27, %v9245_v5  ;;  %v6445_v55 = vsel %vm949_vm4, %v13961_v59, %v9246_v3  ;;  %v6239_v3 = vsel %vm303_vm11, %v14003_v11, 0.0 }
 0xc74   : > { %v9249_v38 = vpop.permute.xlu0 %9248  ;;  %v6460_v63 = vsel %vm966_vm9, %v6444_v8, %v9240_v0  ;;  %v6461_v20 = vsel %vm966_vm9, %v6445_v55, %v9241_v42 }
 0xc75   : > { %v9250_v14 = vunpack.i.l.bf16 %v9249_v38  ;;  %6622 = vmatmul.mubr.f32.gmra.mrb[134].mxu1 %v6475_v29  ;;  %v9251_v16 = vunpack.i.h.bf16 %v9249_v38 }
 0xc76   : > { %7959 = vmatprep.mubr.msk.f32.mxu1 %vm949_vm4, %v13938_v61  ;;  %v6094_v61 = vsel %vm286_vm8, %v13996_v39, 0.0 }
 0xc77   : > { %v6476_v40 = vsel %vm983_vm10, %v6460_v63, %v9250_v14  ;;  %v6477_v59 = vsel %vm983_vm10, %v6461_v20, %v9251_v16 }
 0xc78   : > { %v9259_v57 = vpop.permute.xlu1 %9258  ;;  %v9254_v17 = vpop.permute.xlu0 %9253 }
 0xc79   : > { %v9260_v60 = vunpack.i.l.bf16 %v9259_v57  ;;  %6627 = vmatmul.mubr.f32.gmra.mrb[136].mxu1 %v6476_v40  ;;  %v9255_v45 = vunpack.i.l.bf16 %v9254_v17  ;;  %v9261_v31 = vunpack.i.h.bf16 %v9259_v57  ;;  %v9256_v5 = vunpack.i.h.bf16 %v9254_v17 }
 0xc7a   : > { %7960 = vmatprep.mubr.msk.f32.mxu1 %vm949_vm4, %v6237_v58 }
 0xc7b   : > { %v6446_v23 = vsel %vm949_vm4, %v6094_v61, %v9260_v60  ;;  %v6447_v7 = vsel %vm949_vm4, %v14009_v41, %v9261_v31 }
 0xc7c   : > { %v9264_v37 = vpop.permute.xlu1 %9263  ;;  %v6462_v10 = vsel %vm966_vm9, %v6446_v23, %v9255_v45  ;;  %v6463_v29 = vsel %vm966_vm9, %v6447_v7, %v9256_v5  ;;  %v6241_v45 = vsel %vm303_vm11, %v14049_v13, 0.0 }
 0xc7d   : > { %v9265_v6 = vunpack.i.l.bf16 %v9264_v37  ;;  %6632 = vmatmul.mubr.f32.gmra.mrb[138].mxu1 %v6477_v59  ;;  %v9266_v0 = vunpack.i.h.bf16 %v9264_v37 }
 0xc7e   : > { %7961 = vmatprep.mubr.msk.f32.mxu1 %vm949_vm4, %v13986_v32  ;;  %v6096_v32 = vsel %vm286_vm8, %v14042_v34, 0.0 }
 0xc7f   : > { %v6478_v9 = vsel %vm983_vm10, %v6462_v10, %v9265_v6  ;;  %v6479_v41 = vsel %vm983_vm10, %v6463_v29, %v9266_v0 }
 0xc80   : > { %v9269_v39 = vpop.permute.xlu1 %9268  ;;  %v9274_v27 = vpop.permute.xlu0 %9273 }
 0xc81   : > { %v9275_v8 = vunpack.i.l.bf16 %v9274_v27  ;;  %6637 = vmatmul.mubr.f32.gmra.mrb[140].mxu1 %v6478_v9  ;;  %v9270_v38 = vunpack.i.l.bf16 %v9269_v39  ;;  %v9276_v63 = vunpack.i.h.bf16 %v9274_v27  ;;  %v9271_v16 = vunpack.i.h.bf16 %v9269_v39 }
 0xc82   : > { %7962 = vmatprep.mubr.msk.f32.mxu1 %vm949_vm4, %v6239_v3  ;;  %v6243_v27 = vsel %vm303_vm11, %v14090_v47, 0.0 }
 0xc83   : > { %v6448_v14 = vsel %vm949_vm4, %v6096_v32, %v9275_v8  ;;  %v6449_v60 = vsel %vm949_vm4, %v14053_v15, %v9276_v63 }
 0xc84   : > { %v9279_v42 = vpop.permute.xlu0 %9278  ;;  %v6464_v11 = vsel %vm966_vm9, %v6448_v14, %v9270_v38  ;;  %v6465_v20 = vsel %vm966_vm9, %v6449_v60, %v9271_v16 }
 0xc85   : > { %v9280_v40 = vunpack.i.l.bf16 %v9279_v42  ;;  %6642 = vmatmul.mubr.f32.gmra.mrb[142].mxu1 %v6479_v41  ;;  %v9281_v17 = vunpack.i.h.bf16 %v9279_v42 }
 0xc86   : > { %7963 = vmatprep.mubr.msk.f32.mxu1 %vm949_vm4, %v14032_v35  ;;  %v6098_v35 = vsel %vm286_vm8, %v14083_v24, 0.0 }
 0xc87   : > { %v6480_v57 = vsel %vm983_vm10, %v6464_v11, %v9280_v40  ;;  %v6481_v15 = vsel %vm983_vm10, %v6465_v20, %v9281_v17  ;;  %v6102_v11 = vsel %vm286_vm8, %v14143_v48, 0.0 }
 0xc88   : > { %v9289_v34 = vpop.permute.xlu1 %9288  ;;  %v9284_v55 = vpop.permute.xlu0 %9283 }
 0xc89   : > { %v9290_v58 = vunpack.i.l.bf16 %v9289_v34  ;;  %6647 = vmatmul.mubr.f32.gmra.mrb[144].mxu1 %v6480_v57  ;;  %v9285_v61 = vunpack.i.l.bf16 %v9284_v55  ;;  %v9291_v31 = vunpack.i.h.bf16 %v9289_v34  ;;  %v9286_v6 = vunpack.i.h.bf16 %v9284_v55 }
 0xc8a   : > { %7964 = vmatprep.mubr.msk.f32.mxu1 %vm949_vm4, %v6241_v45 }
 0xc8b   : > { %v6450_v23 = vsel %vm949_vm4, %v6098_v35, %v9290_v58  ;;  %v6451_v0 = vsel %vm949_vm4, %v14094_v56, %v9291_v31  ;;  %v7975_v31 = vld [vmem:[%s14865_s3 + $0x5c0] sm:$0xff] }
 0xc8c   : > { %v9294_v37 = vpop.permute.xlu1 %9293  ;;  %v6466_v13 = vsel %vm966_vm9, %v6450_v23, %v9285_v61  ;;  %v6467_v8 = vsel %vm966_vm9, %v6451_v0, %v9286_v6  ;;  %v6247_v61 = vsel %vm303_vm11, %v14156_v1, 0.0  ;;  %v7973_v1 = vld [vmem:[%s14865_s3 + $0x5b0] sm:$0xff]  ;;  %v7974_v23 = vld [vmem:[%s14865_s3 + $0x5b8] sm:$0xff] }
 0xc8d   : > { %v9295_v59 = vunpack.i.l.bf16 %v9294_v37  ;;  %6652 = vmatmul.mubr.f32.gmra.mrb[146].mxu1 %v6481_v15  ;;  %v9296_v5 = vunpack.i.h.bf16 %v9294_v37  ;;  %v8329_v37 = vpack.c.bf16 %v7974_v23, %v7973_v1  ;;  %v7976_v15 = vld [vmem:[%s14865_s3 + $0x5c8] sm:$0xff]  ;;  %v7978_v6 = vld [vmem:[%s14865_s3 + $0x5d8] sm:$0xff]  ;;  %v7981_v0 = vld [vmem:[%s14865_s3 + $0x5f0] sm:$0xff] }
 0xc8e   : > { %7965 = vmatprep.mubr.msk.f32.mxu1 %vm949_vm4, %v14073_v33  ;;  %v6100_v33 = vsel %vm286_vm8, %v14123_v53, 0.0 }
 0xc8f   : > { %v6482_v10 = vsel %vm983_vm10, %v6466_v13, %v9295_v59  ;;  %v6483_v56 = vsel %vm983_vm10, %v6467_v8, %v9296_v5  ;;  %v8332_v59 = vpack.c.bf16 %v7976_v15, %v7975_v31  ;;  %v7977_v13 = vld [vmem:[%s14865_s3 + $0x5d0] sm:$0xff]  ;;  %v7979_v5 = vld [vmem:[%s14865_s3 + $0x5e0] sm:$0xff] }
 0xc90   : > { %v9299_v24 = vpop.permute.xlu1 %9298  ;;  %v9304_v9 = vpop.permute.xlu0 %9303 }
 0xc91   : > { %v9305_v39 = vunpack.i.l.bf16 %v9304_v9  ;;  %6657 = vmatmul.mubr.f32.gmra.mrb[148].mxu1 %v6482_v10  ;;  %v9300_v7 = vunpack.i.l.bf16 %v9299_v24  ;;  %v9306_v38 = vunpack.i.h.bf16 %v9304_v9  ;;  %v9301_v63 = vunpack.i.h.bf16 %v9299_v24  ;;  %v7980_v24 = vld [vmem:[%s14865_s3 + $0x5e8] sm:$0xff] }
 0xc92   : > { %7966 = vmatprep.mubr.msk.f32.mxu1 %vm949_vm4, %v6243_v27  ;;  %v8335_v10 = vpack.c.bf16 %v7978_v6, %v7977_v13  ;;  %v8338_v9 = vpack.c.bf16 %v7980_v24, %v7979_v5 }
 0xc93   : > { %v6452_v3 = vsel %vm949_vm4, %v6100_v33, %v9305_v39  ;;  %v6453_v40 = vsel %vm949_vm4, %v14134_v22, %v9306_v38  ;;  %v7982_v39 = vld [vmem:[%s14865_s3 + $0x5f8] sm:$0xff]  ;;  %v7984_v33 = vld [vmem:[%s14865_s3 + $0x608] sm:$0xff] }
 0xc94   : > { %v9309_v32 = vpop.permute.xlu0 %9308  ;;  %v6468_v14 = vsel %vm966_vm9, %v6452_v3, %v9300_v7  ;;  %v6469_v17 = vsel %vm966_vm9, %v6453_v40, %v9301_v63  ;;  %v8341_v27 = vpack.c.bf16 %v7982_v39, %v7981_v0  ;;  %v7983_v7 = vld [vmem:[%s14865_s3 + $0x600] sm:$0xff]  ;;  %v7985_v3 = vld [vmem:[%s14865_s3 + $0x610] sm:$0xff]  ;;  %v7986_v38 = vld [vmem:[%s14865_s3 + $0x618] sm:$0xff] }
 0xc95   : > { %v9310_v29 = vunpack.i.l.bf16 %v9309_v32  ;;  %6662 = vmatmul.mubr.f32.gmra.mrb[150].mxu1 %v6483_v56  ;;  %v9311_v53 = vunpack.i.h.bf16 %v9309_v32  ;;  %v8344_v8 = vpack.c.bf16 %v7984_v33, %v7983_v7  ;;  %v8347_v32 = vpack.c.bf16 %v7986_v38, %v7985_v3  ;;  %v7987_v56 = vld [vmem:[%s14865_s3 + $0x620] sm:$0xff] }
 0xc96   : > { %7967 = vmatprep.mubr.msk.f32.mxu1 %vm949_vm4, %v14112_v12  ;;  %v6293_v47 = vpop.permute.xlu1 %6292  ;;  %v6245_v12 = vsel %vm303_vm11, %v14130_v44, 0.0 }
 0xc97   : > { %v6484_v42 = vsel %vm983_vm10, %v6468_v14, %v9310_v29  ;;  %v6454_v16 = vsel %vm949_vm4, %v6102_v11, %v6293_v47  ;;  %v6485_v55 = vsel %vm983_vm10, %v6469_v17, %v9311_v53  ;;  %v7988_v29 = vld [vmem:[%s14865_s3 + $0x628] sm:$0xff] }
 0xc98   : > { %v6357_v41 = vpop.permute.xlu0 %6356  ;;  %v8350_v47 = vpack.c.bf16 %v7988_v29, %v7987_v56  ;;  %v14363_v14 = vld [vmem:[%s14866_s4 + $0x8] ss:$0 sm:$0xff] }
 0xc99   : > { %6667 = vmatmul.mubr.f32.gmra.mrb[152].mxu1 %v6484_v42  ;;  %v6470_v22 = vsel %vm966_vm9, %v6454_v16, %v6357_v41  ;;  %v7989_v16 = vld [vmem:[%s14865_s3 + $0x630] sm:$0xff] }
 0xc9a   : > { %7968 = vmatprep.mubr.msk.f32.mxu1 %vm949_vm4, %v6245_v12  ;;  %v6421_v57 = vpop.permute.xlu1 %6420 }
 0xc9b   : > { %v6486_v60 = vsel %vm983_vm10, %v6470_v22, %v6421_v57 }
 0xc9c   : > { %v6295_v34 = vpop.permute.xlu0 %6294 }
 0xc9d   : > { %6672 = vmatmul.mubr.f32.gmra.mrb[154].mxu1 %v6485_v55  ;;  %v6455_v48 = vsel %vm949_vm4, %v14147_v26, %v6295_v34  ;;  %v7971_v26 = vld [vmem:[%s14865_s3 + $0x5a0] sm:$0xff] }
 0xc9e   : > { %7969 = vmatprep.mubr.msk.f32.mxu1 %vm949_vm4, %v14152_v4  ;;  %v6359_v44 = vpop.permute.xlu1 %6358  ;;  %v7972_v4 = vld [vmem:[%s14865_s3 + $0x5a8] sm:$0xff] }
 0xc9f   : > { %v6471_v58 = vsel %vm966_vm9, %v6455_v48, %v6359_v44  ;;  %v8326_v20 = vpack.c.bf16 %v7972_v4, %v7971_v26 }
 0xca0   : > { %v6423_v45 = vpop.permute.xlu0 %6422 }
 0xca1   : > { %6677 = vmatmul.mubr.f32.gmra.mrb[156].mxu1 %v6486_v60  ;;  %v6487_v35 = vsel %vm983_vm10, %v6471_v58, %v6423_v45  ;;  %8327 = vmatpush1.bf16.msra.mxu0 %v8326_v20 }
 0xca2   : > { %7970 = vmatprep.mubr.msk.f32.mxu1 %vm949_vm4, %v6247_v61  ;;  %8328 = vmatprep.subr.bf16.mxu0 %v14891_v28 }
 0xca5   : > { %6682 = vmatmul.mubr.f32.gmra.mrb[158].mxu1 %v6487_v35  ;;  %8330 = vmatpush1.bf16.msra.mxu0 %v8329_v37 }
 0xca6   : > { %8331 = vmatprep.subr.bf16.mxu0 %v14891_v28 }
 0xca9   : > { %8333 = vmatpush1.bf16.msra.mxu0 %v8332_v59 }
 0xcaa   : > { %8334 = vmatprep.subr.bf16.mxu0 %v14891_v28 }
 0xcad   : > { %8336 = vmatpush1.bf16.msra.mxu0 %v8335_v10 }
 0xcae   : > { %8337 = vmatprep.subr.bf16.mxu0 %v14891_v28 }
 0xcb1   : > { %8339 = vmatpush1.bf16.msra.mxu0 %v8338_v9 }
 0xcb2   : > { %8340 = vmatprep.subr.bf16.mxu0 %v14891_v28 }
 0xcb5   : > { %8342 = vmatpush1.bf16.msra.mxu0 %v8341_v27 }
 0xcb6   : > { %8343 = vmatprep.subr.bf16.mxu0 %v14891_v28 }
 0xcb9   : > { %8345 = vmatpush1.bf16.msra.mxu0 %v8344_v8 }
 0xcba   : > { %8346 = vmatprep.subr.bf16.mxu0 %v14891_v28 }
 0xcbd   : > { %8348 = vmatpush1.bf16.msra.mxu0 %v8347_v32 }
 0xcbe   : > { %8349 = vmatprep.subr.bf16.mxu0 %v14891_v28 }
 0xcc1   : > { %8351 = vmatpush1.bf16.msra.mxu0 %v8350_v47 }
 0xcc2   : > { %8352 = vmatprep.subr.bf16.mxu0 %v14891_v28  ;;  %v7990_v28 = vld [vmem:[%s14865_s3 + $0x638] sm:$0xff] }
 0xcc3   : > { %v8353_v57 = vpack.c.bf16 %v7990_v28, %v7989_v16 }
 0xcc5   : > { %8354 = vmatpush1.bf16.msra.mxu0 %v8353_v57 }
 0xd3c   : > { %v6608_v63 = vpop.f32.mrb[128].mxu1 }
 0xd3d   : > { %v6609_v42 = vadd.f32 %v14363_v14, %v6608_v63  ;;  %v6610_v53 = vpop.f32.mrb[129].mxu1 }
 0xd3f   : > { %v6687_v41 = vmax.f32 %v6609_v42, 0.0 }
 0xd40   : > { %v6613_v40 = vpop.f32.mrb[130].mxu1 }
 0xd41   : > { %v6614_v11 = vadd.f32 %v14363_v14, %v6613_v40  ;;  %v6615_v12 = vpop.f32.mrb[131].mxu1  ;;  %v6726_v34 = vrot.slane %v6687_v41, 6  ;;  %v6870_v22 = vrot.slane %v6687_v41, 2  ;;  %v6774_v61 = vrot.slane %v6687_v41, 7 }
 0xd42   : > { %v6822_v26 = vrot.slane %v6687_v41, 1 }
 0xd43   : > { %v6688_v17 = vmax.f32 %v6614_v11, 0.0 }
 0xd44   : > { %v6618_v55 = vpop.f32.mrb[132].mxu1 }
 0xd45   : > { %v6734_v48 = vrot.slane %v6688_v17, 6  ;;  %v6619_v44 = vadd.f32 %v14363_v14, %v6618_v55  ;;  %v6620_v60 = vpop.f32.mrb[133].mxu1  ;;  %v9312_v58 = vpack.i.bf16 %v6688_v17, %v6687_v41  ;;  %v6878_v45 = vrot.slane %v6688_v17, 2 }
 0xd46   : > { %v6782_v35 = vrot.slane %v6688_v17, 7  ;;  %v6830_v4 = vrot.slane %v6688_v17, 1 }
 0xd47   : > { %v6689_v20 = vmax.f32 %v6619_v44, 0.0  ;;  %9313 = vrot.lane.b32.xlu0 %v9312_v58, %s9428_s11  ;;  %v6886_v1 = vsel %vm724_vm1, %v6870_v22, %v6878_v45  ;;  %v14379_v23 = vsel %vm577_vm7, %v6734_v48, %v6726_v34  ;;  %v14383_v31 = vsel %vm724_vm1, %v6878_v45, %v6870_v22 }
 0xd48   : > { %v6623_v37 = vpop.f32.mrb[134].mxu1  ;;  %7993 = vmatprep.mubr.msk.f32.mxu0 %vm949_vm4, %v6886_v1  ;;  %v6790_v15 = vsel %vm626_vm3, %v6774_v61, %v6782_v35  ;;  %v6798_v59 = vsel %vm626_vm3, %v6782_v35, %v6774_v61  ;;  %v6838_v13 = vsel %vm675_vm2, %v6822_v26, %v6830_v4  ;;  %v6846_v6 = vsel %vm675_vm2, %v6830_v4, %v6822_v26 }
 0xd49   : > { %v6624_v10 = vadd.f32 %v14363_v14, %v6623_v37  ;;  %v6625_v5 = vpop.f32.mrb[135].mxu1  ;;  %v6806_v24 = vsel %vm292_vm6, %v6798_v59, 0.0  ;;  %v6855_v9 = vsel %vm299_vm5, %v6846_v6, 0.0  ;;  %v14401_v7 = vsel %vm577_vm7, %v6726_v34, %v6734_v48 }
 0xd4a   : > { %v9317_v0 = vpack.i.bf16 %v6790_v15, %v6806_v24  ;;  %v9322_v39 = vpack.i.bf16 %v6855_v9, %v6838_v13  ;;  %v6727_v33 = vrot.slane %v6689_v20, 6  ;;  %v6775_v3 = vrot.slane %v6689_v20, 7 }
 0xd4b   : > { %v6690_v27 = vmax.f32 %v6624_v10, 0.0  ;;  %v6823_v63 = vrot.slane %v6689_v20, 1  ;;  %v6871_v53 = vrot.slane %v6689_v20, 2 }
 0xd4c   : > { %9318 = vrot.lane.b32.xlu1 %v9317_v0, %s9427_s10  ;;  %v6628_v8 = vpop.f32.mrb[136].mxu1 }
 0xd4d   : > { %v6735_v38 = vrot.slane %v6690_v27, 6  ;;  %v6629_v32 = vadd.f32 %v14363_v14, %v6628_v8  ;;  %v6630_v56 = vpop.f32.mrb[137].mxu1  ;;  %v6783_v29 = vrot.slane %v6690_v27, 7  ;;  %v9327_v47 = vpack.i.bf16 %v6690_v27, %v6689_v20 }
 0xd4e   : > { %v6831_v42 = vrot.slane %v6690_v27, 1  ;;  %v6879_v41 = vrot.slane %v6690_v27, 2 }
 0xd4f   : > { %v6691_v40 = vmax.f32 %v6629_v32, 0.0  ;;  %v6791_v11 = vsel %vm626_vm3, %v6775_v3, %v6783_v29  ;;  %v6799_v12 = vsel %vm626_vm3, %v6783_v29, %v6775_v3  ;;  %v14411_v16 = vsel %vm577_vm7, %v6735_v38, %v6727_v33 }
 0xd50   : > { %9323 = vrot.lane.b32.xlu1 %v9322_v39, %s9426_s9  ;;  %v6633_v28 = vpop.f32.mrb[138].mxu1  ;;  %v6808_v57 = vsel %vm292_vm6, %v6799_v12, 0.0  ;;  %v6839_v17 = vsel %vm675_vm2, %v6823_v63, %v6831_v42  ;;  %v6847_v34 = vsel %vm675_vm2, %v6831_v42, %v6823_v63  ;;  %v14422_v55 = vsel %vm724_vm1, %v6871_v53, %v6879_v41 }
 0xd51   : > { %v6634_v22 = vadd.f32 %v14363_v14, %v6633_v28  ;;  %v6635_v48 = vpop.f32.mrb[139].mxu1  ;;  %v9332_v44 = vpack.i.bf16 %v6791_v11, %v6808_v57  ;;  %v6857_v60 = vsel %vm299_vm5, %v6847_v34, 0.0  ;;  %v14430_v61 = vsel %vm724_vm1, %v6879_v41, %v6871_v53 }
 0xd52   : > { %v9337_v58 = vpack.i.bf16 %v6857_v60, %v6839_v17  ;;  %v14434_v35 = vsel %vm577_vm7, %v6727_v33, %v6735_v38  ;;  %v6728_v26 = vrot.slane %v6691_v40, 6  ;;  %v6776_v20 = vrot.slane %v6691_v40, 7 }
 0xd53   : > { %v6692_v45 = vmax.f32 %v6634_v22, 0.0  ;;  %9333 = vrot.lane.b32.xlu0 %v9332_v44, %s9427_s10  ;;  %v6824_v6 = vrot.slane %v6691_v40, 1  ;;  %v6872_v5 = vrot.slane %v6691_v40, 2 }
 0xd54   : > { %9328 = vrot.lane.b32.xlu1 %v9327_v47, %s9428_s11  ;;  %v6638_v4 = vpop.f32.mrb[140].mxu1 }
 0xd55   : > { %v6736_v1 = vrot.slane %v6692_v45, 6  ;;  %v6639_v37 = vadd.f32 %v14363_v14, %v6638_v4  ;;  %v6640_v15 = vpop.f32.mrb[141].mxu1  ;;  %v9342_v59 = vpack.i.bf16 %v6692_v45, %v6691_v40  ;;  %v6784_v13 = vrot.slane %v6692_v45, 7 }
 0xd56   : > { %v6832_v10 = vrot.slane %v6692_v45, 1  ;;  %v6880_v24 = vrot.slane %v6692_v45, 2 }
 0xd57   : > { %v6693_v9 = vmax.f32 %v6639_v37, 0.0  ;;  %9338 = vrot.lane.b32.xlu0 %v9337_v58, %s9426_s9  ;;  %v6792_v0 = vsel %vm626_vm3, %v6776_v20, %v6784_v13  ;;  %v6800_v39 = vsel %vm626_vm3, %v6784_v13, %v6776_v20  ;;  %v14445_v27 = vsel %vm577_vm7, %v6736_v1, %v6728_v26 }
 0xd58   : > { %v6643_v33 = vpop.f32.mrb[142].mxu1  ;;  %v6810_v8 = vsel %vm292_vm6, %v6800_v39, 0.0  ;;  %v6840_v3 = vsel %vm675_vm2, %v6824_v6, %v6832_v10  ;;  %v6848_v38 = vsel %vm675_vm2, %v6832_v10, %v6824_v6  ;;  %v14455_v32 = vsel %vm724_vm1, %v6872_v5, %v6880_v24 }
 0xd59   : > { %v6644_v56 = vadd.f32 %v14363_v14, %v6643_v33  ;;  %v6645_v29 = vpop.f32.mrb[143].mxu1  ;;  %v9347_v47 = vpack.i.bf16 %v6792_v0, %v6810_v8  ;;  %v6859_v63 = vsel %vm299_vm5, %v6848_v38, 0.0  ;;  %v14464_v41 = vsel %vm724_vm1, %v6880_v24, %v6872_v5 }
 0xd5a   : > { %v9352_v42 = vpack.i.bf16 %v6859_v63, %v6840_v3  ;;  %v14468_v40 = vsel %vm577_vm7, %v6728_v26, %v6736_v1  ;;  %v6729_v11 = vrot.slane %v6693_v9, 6  ;;  %v6777_v28 = vrot.slane %v6693_v9, 7 }
 0xd5b   : > { %v6694_v53 = vmax.f32 %v6644_v56, 0.0  ;;  %9343 = vrot.lane.b32.xlu0 %v9342_v59, %s9428_s11  ;;  %9348 = vrot.lane.b32.xlu1 %v9347_v47, %s9427_s10  ;;  %v6825_v44 = vrot.slane %v6693_v9, 1  ;;  %v6873_v58 = vrot.slane %v6693_v9, 2 }
 0xd5c   : > { %v6648_v12 = vpop.f32.mrb[144].mxu1 }
 0xd5d   : > { %v6737_v57 = vrot.slane %v6694_v53, 6  ;;  %v6649_v17 = vadd.f32 %v14363_v14, %v6648_v12  ;;  %v6650_v34 = vpop.f32.mrb[145].mxu1  ;;  %v6785_v22 = vrot.slane %v6694_v53, 7  ;;  %v9357_v48 = vpack.i.bf16 %v6694_v53, %v6693_v9 }
 0xd5e   : > { %v6833_v60 = vrot.slane %v6694_v53, 1  ;;  %v6881_v45 = vrot.slane %v6694_v53, 2 }
 0xd5f   : > { %v6695_v4 = vmax.f32 %v6649_v17, 0.0  ;;  %9353 = vrot.lane.b32.xlu1 %v9352_v42, %s9426_s9  ;;  %v6793_v26 = vsel %vm626_vm3, %v6777_v28, %v6785_v22  ;;  %v6801_v20 = vsel %vm626_vm3, %v6785_v22, %v6777_v28  ;;  %v14478_v1 = vsel %vm577_vm7, %v6737_v57, %v6729_v11 }
 0xd60   : > { %v6653_v37 = vpop.f32.mrb[146].mxu1  ;;  %v6812_v15 = vsel %vm292_vm6, %v6801_v20, 0.0  ;;  %v6841_v59 = vsel %vm675_vm2, %v6825_v44, %v6833_v60  ;;  %v6849_v13 = vsel %vm675_vm2, %v6833_v60, %v6825_v44  ;;  %v14488_v6 = vsel %vm724_vm1, %v6873_v58, %v6881_v45 }
 0xd61   : > { %v6654_v10 = vadd.f32 %v14363_v14, %v6653_v37  ;;  %v6655_v5 = vpop.f32.mrb[147].mxu1  ;;  %v9362_v24 = vpack.i.bf16 %v6793_v26, %v6812_v15  ;;  %v6861_v9 = vsel %vm299_vm5, %v6849_v13, 0.0  ;;  %v14497_v33 = vsel %vm724_vm1, %v6881_v45, %v6873_v58 }
 0xd62   : > { %v9367_v0 = vpack.i.bf16 %v6861_v9, %v6841_v59  ;;  %v14501_v8 = vsel %vm577_vm7, %v6729_v11, %v6737_v57  ;;  %v6730_v3 = vrot.slane %v6695_v4, 6  ;;  %v6778_v56 = vrot.slane %v6695_v4, 7 }
 0xd63   : > { %v6696_v39 = vmax.f32 %v6654_v10, 0.0  ;;  %9363 = vrot.lane.b32.xlu0 %v9362_v24, %s9427_s10  ;;  %9358 = vrot.lane.b32.xlu1 %v9357_v48, %s9428_s11  ;;  %v6826_v12 = vrot.slane %v6695_v4, 1  ;;  %v6874_v17 = vrot.slane %v6695_v4, 2 }
 0xd64   : > { %v6658_v38 = vpop.f32.mrb[148].mxu1 }
 0xd65   : > { %v6738_v29 = vrot.slane %v6696_v39, 6  ;;  %v6659_v47 = vadd.f32 %v14363_v14, %v6658_v38  ;;  %v6660_v63 = vpop.f32.mrb[149].mxu1  ;;  %v9372_v42 = vpack.i.bf16 %v6696_v39, %v6695_v4  ;;  %v6786_v53 = vrot.slane %v6696_v39, 7 }
 0xd66   : > { %v6834_v28 = vrot.slane %v6696_v39, 1  ;;  %v6882_v34 = vrot.slane %v6696_v39, 2 }
 0xd67   : > { %v6697_v22 = vmax.f32 %v6659_v47, 0.0  ;;  %9368 = vrot.lane.b32.xlu0 %v9367_v0, %s9426_s9  ;;  %v6794_v11 = vsel %vm626_vm3, %v6778_v56, %v6786_v53  ;;  %v6802_v57 = vsel %vm626_vm3, %v6786_v53, %v6778_v56  ;;  %v14511_v48 = vsel %vm577_vm7, %v6738_v29, %v6730_v3 }
 0xd68   : > { %v6663_v44 = vpop.f32.mrb[150].mxu1  ;;  %v6814_v60 = vsel %vm292_vm6, %v6802_v57, 0.0  ;;  %v6842_v58 = vsel %vm675_vm2, %v6826_v12, %v6834_v28  ;;  %v6850_v45 = vsel %vm675_vm2, %v6834_v28, %v6826_v12  ;;  %v14521_v4 = vsel %vm724_vm1, %v6874_v17, %v6882_v34 }
 0xd69   : > { %v6664_v26 = vadd.f32 %v14363_v14, %v6663_v44  ;;  %v6665_v20 = vpop.f32.mrb[151].mxu1  ;;  %v9377_v37 = vpack.i.bf16 %v6794_v11, %v6814_v60  ;;  %v6863_v15 = vsel %vm299_vm5, %v6850_v45, 0.0  ;;  %v14530_v10 = vsel %vm724_vm1, %v6882_v34, %v6874_v17 }
 0xd6a   : > { %v9382_v59 = vpack.i.bf16 %v6863_v15, %v6842_v58  ;;  %v14534_v5 = vsel %vm577_vm7, %v6730_v3, %v6738_v29  ;;  %v6731_v24 = vrot.slane %v6697_v22, 6  ;;  %v6779_v0 = vrot.slane %v6697_v22, 7 }
 0xd6b   : > { %v6698_v13 = vmax.f32 %v6664_v26, 0.0  ;;  %9373 = vrot.lane.b32.xlu0 %v9372_v42, %s9428_s11  ;;  %9378 = vrot.lane.b32.xlu1 %v9377_v37, %s9427_s10  ;;  %v6827_v42 = vrot.slane %v6697_v22, 1  ;;  %v6875_v12 = vrot.slane %v6697_v22, 2 }
 0xd6c   : > { %v6668_v9 = vpop.f32.mrb[152].mxu1 }
 0xd6d   : > { %v6739_v39 = vrot.slane %v6698_v13, 6  ;;  %v6669_v38 = vadd.f32 %v14363_v14, %v6668_v9  ;;  %v6670_v56 = vpop.f32.mrb[153].mxu1  ;;  %v6787_v47 = vrot.slane %v6698_v13, 7  ;;  %v9387_v63 = vpack.i.bf16 %v6698_v13, %v6697_v22 }
 0xd6e   : > { %v6835_v53 = vrot.slane %v6698_v13, 1  ;;  %v6883_v28 = vrot.slane %v6698_v13, 2 }
 0xd6f   : > { %v6699_v11 = vmax.f32 %v6669_v38, 0.0  ;;  %9383 = vrot.lane.b32.xlu1 %v9382_v59, %s9426_s9  ;;  %v6795_v3 = vsel %vm626_vm3, %v6779_v0, %v6787_v47  ;;  %v6803_v29 = vsel %vm626_vm3, %v6787_v47, %v6779_v0  ;;  %v14544_v17 = vsel %vm577_vm7, %v6739_v39, %v6731_v24 }
 0xd70   : > { %v6673_v34 = vpop.f32.mrb[154].mxu1  ;;  %v6816_v57 = vsel %vm292_vm6, %v6803_v29, 0.0  ;;  %v6843_v22 = vsel %vm675_vm2, %v6827_v42, %v6835_v53  ;;  %v6851_v44 = vsel %vm675_vm2, %v6835_v53, %v6827_v42  ;;  %v14554_v60 = vsel %vm724_vm1, %v6875_v12, %v6883_v28 }
 0xd71   : > { %v6674_v58 = vadd.f32 %v14363_v14, %v6673_v34  ;;  %v6675_v45 = vpop.f32.mrb[155].mxu1  ;;  %v9392_v26 = vpack.i.bf16 %v6795_v3, %v6816_v57  ;;  %v6865_v20 = vsel %vm299_vm5, %v6851_v44, 0.0  ;;  %v14563_v59 = vsel %vm724_vm1, %v6883_v28, %v6875_v12 }
 0xd72   : > { %v9397_v37 = vpack.i.bf16 %v6865_v20, %v6843_v22  ;;  %v14567_v13 = vsel %vm577_vm7, %v6731_v24, %v6739_v39  ;;  %v6732_v9 = vrot.slane %v6699_v11, 6  ;;  %v6780_v38 = vrot.slane %v6699_v11, 7 }
 0xd73   : > { %v6700_v15 = vmax.f32 %v6674_v58, 0.0  ;;  %9393 = vrot.lane.b32.xlu0 %v9392_v26, %s9427_s10  ;;  %9388 = vrot.lane.b32.xlu1 %v9387_v63, %s9428_s11  ;;  %v6828_v29 = vrot.slane %v6699_v11, 1  ;;  %v6876_v63 = vrot.slane %v6699_v11, 2 }
 0xd74   : > { %v6678_v0 = vpop.f32.mrb[156].mxu1 }
 0xd75   : > { %v6740_v56 = vrot.slane %v6700_v15, 6  ;;  %v6679_v47 = vadd.f32 %v14363_v14, %v6678_v0  ;;  %v6680_v42 = vpop.f32.mrb[157].mxu1  ;;  %v9402_v53 = vpack.i.bf16 %v6700_v15, %v6699_v11  ;;  %v6788_v3 = vrot.slane %v6700_v15, 7 }
 0xd76   : > { %v6836_v34 = vrot.slane %v6700_v15, 1  ;;  %v6884_v57 = vrot.slane %v6700_v15, 2 }
 0xd77   : > { %v6701_v22 = vmax.f32 %v6679_v47, 0.0  ;;  %9398 = vrot.lane.b32.xlu0 %v9397_v37, %s9426_s9  ;;  %v6796_v24 = vsel %vm626_vm3, %v6780_v38, %v6788_v3  ;;  %v6804_v39 = vsel %vm626_vm3, %v6788_v3, %v6780_v38  ;;  %v14577_v12 = vsel %vm577_vm7, %v6740_v56, %v6732_v9 }
 0xd78   : > { %v6683_v28 = vpop.f32.mrb[158].mxu1  ;;  %v6818_v44 = vsel %vm292_vm6, %v6804_v39, 0.0  ;;  %v6844_v11 = vsel %vm675_vm2, %v6828_v29, %v6836_v34  ;;  %v6852_v58 = vsel %vm675_vm2, %v6836_v34, %v6828_v29  ;;  %v14587_v45 = vsel %vm724_vm1, %v6876_v63, %v6884_v57 }
 0xd79   : > { %v6684_v26 = vadd.f32 %v14363_v14, %v6683_v28  ;;  %v6685_v20 = vpop.f32.mrb[159].mxu1  ;;  %v9407_v37 = vpack.i.bf16 %v6796_v24, %v6818_v44  ;;  %v6867_v15 = vsel %vm299_vm5, %v6852_v58, 0.0  ;;  %v14596_v47 = vsel %vm724_vm1, %v6884_v57, %v6876_v63 }
 0xd7a   : > { %v9412_v0 = vpack.i.bf16 %v6867_v15, %v6844_v11  ;;  %v14600_v42 = vsel %vm577_vm7, %v6732_v9, %v6740_v56  ;;  %v6781_v14 = vrot.slane %v6701_v22, 7  ;;  %v6829_v3 = vrot.slane %v6701_v22, 1 }
 0xd7b   : > { %v6702_v38 = vmax.f32 %v6684_v26, 0.0  ;;  %9403 = vrot.lane.b32.xlu0 %v9402_v53, %s9428_s11  ;;  %9408 = vrot.lane.b32.xlu1 %v9407_v37, %s9427_s10  ;;  %v6733_v28 = vrot.slane %v6701_v22, 6  ;;  %v6877_v44 = vrot.slane %v6701_v22, 2 }
 0xd7d   : > { %v6789_v29 = vrot.slane %v6702_v38, 7  ;;  %v6837_v34 = vrot.slane %v6702_v38, 1  ;;  %v6741_v24 = vrot.slane %v6702_v38, 6  ;;  %v6885_v39 = vrot.slane %v6702_v38, 2 }
 0xd7f   : > { %9413 = vrot.lane.b32.xlu1 %v9412_v0, %s9426_s9  ;;  %v6805_v53 = vsel %vm626_vm3, %v6789_v29, %v6781_v14  ;;  %v6845_v63 = vsel %vm675_vm2, %v6829_v3, %v6837_v34  ;;  %v6797_v9 = vsel %vm626_vm3, %v6781_v14, %v6789_v29  ;;  %v6853_v56 = vsel %vm675_vm2, %v6837_v34, %v6829_v3 }
 0xd80   : > { %v6820_v57 = vsel %vm292_vm6, %v6805_v53, 0.0  ;;  %v14615_v11 = vsel %vm577_vm7, %v6741_v24, %v6733_v28  ;;  %v14619_v58 = vsel %vm577_vm7, %v6733_v28, %v6741_v24  ;;  %v14624_v26 = vsel %vm724_vm1, %v6877_v44, %v6885_v39 }
 0xd81   : > { %6962 = vrot.lane.b32.xlu0 %v6820_v57, %s9427_s10  ;;  %v14628_v20 = vsel %vm724_vm1, %v6885_v39, %v6877_v44  ;;  %v6869_v37 = vsel %vm299_vm5, %v6853_v56, 0.0  ;;  %v6758_v3 = vsel %vm286_vm8, %v14379_v23, 0.0  ;;  %v6903_v23 = vsel %vm303_vm11, %v14383_v31, 0.0 }
 0xd82   : > { %vm7555_vm1 = vcmask 1045509   ;;  %vm7557_vm2 = vcmask 1046534   ;;  %vm7559_vm3 = vcmask 1047559   ;;  %vm7569_vm5 = vcmask 7168  }
 0xd83   : > { %7026 = vrot.lane.b32.xlu1 %v6701_v22, %s9428_s11 }
 0xd85   : > { %7090 = vrot.lane.b32.xlu0 %v6845_v63, %s9426_s9 }
 0xd87   : > { %6964 = vrot.lane.b32.xlu1 %v6797_v9, %s9427_s10 }
 0xd89   : > { %7028 = vrot.lane.b32.xlu0 %v6702_v38, %s9428_s11 }
 0xd8b   : > { %7092 = vrot.lane.b32.xlu1 %v6869_v37, %s9426_s9 }
 0xdb9   : > { %v9314_v0 = vpop.permute.xlu0 %9313 }
 0xdba   : > { %v9315_v34 = vunpack.i.l.bf16 %v9314_v0  ;;  %v9316_v9 = vunpack.i.h.bf16 %v9314_v0 }
 0xdbe   : > { %v9319_v15 = vpop.permute.xlu1 %9318 }
 0xdbf   : > { %v9320_v14 = vunpack.i.l.bf16 %v9319_v15  ;;  %v9321_v29 = vunpack.i.h.bf16 %v9319_v15  ;;  %v6760_v15 = vsel %vm286_vm8, %v14411_v16, 0.0 }
 0xdc1   : > { %v7110_v22 = vsel %vm949_vm4, %v6758_v3, %v9320_v14  ;;  %v7111_v63 = vsel %vm949_vm4, %v14401_v7, %v9321_v29 }
 0xdc2   : > { %v9324_v24 = vpop.permute.xlu1 %9323  ;;  %v7126_v38 = vsel %vm966_vm9, %v7110_v22, %v9315_v34  ;;  %v7127_v14 = vsel %vm966_vm9, %v7111_v63, %v9316_v9 }
 0xdc3   : > { %v9325_v39 = vunpack.i.l.bf16 %v9324_v24  ;;  %v9326_v28 = vunpack.i.h.bf16 %v9324_v24 }
 0xdc5   : > { %v9334_v44 = vpop.permute.xlu0 %9333  ;;  %v7142_v53 = vsel %vm983_vm10, %v7126_v38, %v9325_v39  ;;  %v7143_v29 = vsel %vm983_vm10, %v7127_v14, %v9326_v28  ;;  %v6905_v28 = vsel %vm303_vm11, %v14430_v61, 0.0 }
 0xdc6   : > { %v9335_v56 = vunpack.i.l.bf16 %v9334_v44  ;;  %v9329_v57 = vpop.permute.xlu1 %9328  ;;  %7277 = vmatmul.mubr.f32.vlgmr.msra.gmra.mrb[144].mxu0 %v7142_v53  ;;  %v9336_v7 = vunpack.i.h.bf16 %v9334_v44 }
 0xdc7   : > { %v9330_v37 = vunpack.i.l.bf16 %v9329_v57  ;;  %7994 = vmatprep.mubr.msk.f32.mxu0 %vm949_vm4, %v6903_v23  ;;  %v9331_v34 = vunpack.i.h.bf16 %v9329_v57 }
 0xdc8   : > { %v7112_v3 = vsel %vm949_vm4, %v6760_v15, %v9335_v56  ;;  %v7113_v53 = vsel %vm949_vm4, %v14434_v35, %v9336_v7 }
 0xdc9   : > { %v9339_v0 = vpop.permute.xlu0 %9338  ;;  %v7128_v31 = vsel %vm966_vm9, %v7112_v3, %v9330_v37  ;;  %v7129_v9 = vsel %vm966_vm9, %v7113_v53, %v9331_v34 }
 0xdca   : > { %v9340_v22 = vunpack.i.l.bf16 %v9339_v0  ;;  %7282 = vmatmul.mubr.f32.gmra.mrb[146].mxu0 %v7143_v29  ;;  %v9341_v39 = vunpack.i.h.bf16 %v9339_v0 }
 0xdcb   : > { %7995 = vmatprep.mubr.msk.f32.mxu0 %vm949_vm4, %v14422_v55  ;;  %v6762_v55 = vsel %vm286_vm8, %v14445_v27, 0.0 }
 0xdcc   : > { %v7144_v24 = vsel %vm983_vm10, %v7128_v31, %v9340_v22  ;;  %v7145_v35 = vsel %vm983_vm10, %v7129_v9, %v9341_v39  ;;  %v6907_v22 = vsel %vm303_vm11, %v14464_v41, 0.0 }
 0xdcd   : > { %v9344_v16 = vpop.permute.xlu0 %9343  ;;  %v9349_v38 = vpop.permute.xlu1 %9348 }
 0xdce   : > { %v9350_v44 = vunpack.i.l.bf16 %v9349_v38  ;;  %7287 = vmatmul.mubr.f32.gmra.mrb[148].mxu0 %v7144_v24  ;;  %v9345_v63 = vunpack.i.l.bf16 %v9344_v16  ;;  %v9351_v57 = vunpack.i.h.bf16 %v9349_v38  ;;  %v9346_v15 = vunpack.i.h.bf16 %v9344_v16 }
 0xdcf   : > { %7996 = vmatprep.mubr.msk.f32.mxu0 %vm949_vm4, %v6905_v28 }
 0xdd0   : > { %v7114_v56 = vsel %vm949_vm4, %v6762_v55, %v9350_v44  ;;  %v7115_v0 = vsel %vm949_vm4, %v14468_v40, %v9351_v57 }
 0xdd1   : > { %v9354_v23 = vpop.permute.xlu1 %9353  ;;  %v7130_v61 = vsel %vm966_vm9, %v7114_v56, %v9345_v63  ;;  %v7131_v34 = vsel %vm966_vm9, %v7115_v0, %v9346_v15  ;;  %v6909_v56 = vsel %vm303_vm11, %v14497_v33, 0.0 }
 0xdd2   : > { %v9355_v37 = vunpack.i.l.bf16 %v9354_v23  ;;  %7292 = vmatmul.mubr.f32.gmra.mrb[150].mxu0 %v7145_v35  ;;  %v9356_v3 = vunpack.i.h.bf16 %v9354_v23 }
 0xdd3   : > { %7997 = vmatprep.mubr.msk.f32.mxu0 %vm949_vm4, %v14455_v32  ;;  %v6764_v32 = vsel %vm286_vm8, %v14478_v1, 0.0 }
 0xdd4   : > { %v7146_v14 = vsel %vm983_vm10, %v7130_v61, %v9355_v37  ;;  %v7147_v40 = vsel %vm983_vm10, %v7131_v34, %v9356_v3 }
 0xdd5   : > { %v9364_v27 = vpop.permute.xlu0 %9363  ;;  %v9359_v7 = vpop.permute.xlu1 %9358 }
 0xdd6   : > { %v9365_v29 = vunpack.i.l.bf16 %v9364_v27  ;;  %7297 = vmatmul.mubr.f32.gmra.mrb[152].mxu0 %v7146_v14  ;;  %v9360_v31 = vunpack.i.l.bf16 %v9359_v7  ;;  %v9366_v39 = vunpack.i.h.bf16 %v9364_v27  ;;  %v9361_v53 = vunpack.i.h.bf16 %v9359_v7 }
 0xdd7   : > { %7998 = vmatprep.mubr.msk.f32.mxu0 %vm949_vm4, %v6907_v22  ;;  %v6911_v22 = vsel %vm303_vm11, %v14530_v10, 0.0 }
 0xdd8   : > { %v7116_v24 = vsel %vm949_vm4, %v6764_v32, %v9365_v29  ;;  %v7117_v55 = vsel %vm949_vm4, %v14501_v8, %v9366_v39 }
 0xdd9   : > { %v9369_v16 = vpop.permute.xlu0 %9368  ;;  %v7132_v41 = vsel %vm966_vm9, %v7116_v24, %v9360_v31  ;;  %v7133_v23 = vsel %vm966_vm9, %v7117_v55, %v9361_v53 }
 0xdda   : > { %v9370_v38 = vunpack.i.l.bf16 %v9369_v16  ;;  %7302 = vmatmul.mubr.f32.gmra.mrb[154].mxu0 %v7147_v40  ;;  %v9371_v28 = vunpack.i.h.bf16 %v9369_v16 }
 0xddb   : > { %7999 = vmatprep.mubr.msk.f32.mxu0 %vm949_vm4, %v14488_v6  ;;  %v6766_v6 = vsel %vm286_vm8, %v14511_v48, 0.0 }
 0xddc   : > { %v7148_v44 = vsel %vm983_vm10, %v7132_v41, %v9370_v38  ;;  %v7149_v8 = vsel %vm983_vm10, %v7133_v23, %v9371_v28 }
 0xddd   : > { %v9374_v1 = vpop.permute.xlu0 %9373  ;;  %v9379_v63 = vpop.permute.xlu1 %9378 }
 0xdde   : > { %v9380_v9 = vunpack.i.l.bf16 %v9379_v63  ;;  %7307 = vmatmul.mubr.f32.gmra.mrb[156].mxu0 %v7148_v44  ;;  %v9375_v57 = vunpack.i.l.bf16 %v9374_v1  ;;  %v9381_v37 = vunpack.i.h.bf16 %v9379_v63  ;;  %v9376_v14 = vunpack.i.h.bf16 %v9374_v1 }
 0xddf   : > { %8000 = vmatprep.mubr.msk.f32.mxu0 %vm949_vm4, %v6909_v56  ;;  %v6913_v1 = vsel %vm303_vm11, %v14563_v59, 0.0 }
 0xde0   : > { %v7118_v35 = vsel %vm949_vm4, %v6766_v6, %v9380_v9  ;;  %v7119_v0 = vsel %vm949_vm4, %v14534_v5, %v9381_v37 }
 0xde1   : > { %v9384_v61 = vpop.permute.xlu1 %9383  ;;  %v7134_v33 = vsel %vm966_vm9, %v7118_v35, %v9375_v57  ;;  %v7135_v32 = vsel %vm966_vm9, %v7119_v0, %v9376_v14 }
 0xde2   : > { %v9385_v15 = vunpack.i.l.bf16 %v9384_v61  ;;  %7312 = vmatmul.mubr.f32.gmra.mrb[158].mxu0 %v7149_v8  ;;  %v9386_v27 = vunpack.i.h.bf16 %v9384_v61 }
 0xde3   : > { %8001 = vmatprep.mubr.msk.f32.mxu0 %vm949_vm4, %v14521_v4  ;;  %v6768_v4 = vsel %vm286_vm8, %v14544_v17, 0.0 }
 0xde4   : > { %v7150_v3 = vsel %vm983_vm10, %v7134_v33, %v9385_v15  ;;  %v7151_v5 = vsel %vm983_vm10, %v7135_v32, %v9386_v27  ;;  %v6772_v15 = vsel %vm286_vm8, %v14615_v11, 0.0 }
 0xde5   : > { %v9394_v48 = vpop.permute.xlu0 %9393  ;;  %v9389_v7 = vpop.permute.xlu1 %9388 }
 0xde6   : > { %v9395_v29 = vunpack.i.l.bf16 %v9394_v48  ;;  %7317 = vmatmul.mubr.f32.gmra.mrb[160].mxu0 %v7150_v3  ;;  %v9390_v31 = vunpack.i.l.bf16 %v9389_v7  ;;  %v9396_v24 = vunpack.i.h.bf16 %v9394_v48  ;;  %v9391_v40 = vunpack.i.h.bf16 %v9389_v7 }
 0xde7   : > { %8002 = vmatprep.mubr.msk.f32.mxu0 %vm949_vm4, %v6911_v22  ;;  %v6917_v22 = vsel %vm303_vm11, %v14628_v20, 0.0 }
 0xde8   : > { %v7120_v34 = vsel %vm949_vm4, %v6768_v4, %v9395_v29  ;;  %v7121_v44 = vsel %vm949_vm4, %v14567_v13, %v9396_v24 }
 0xde9   : > { %v9399_v39 = vpop.permute.xlu0 %9398  ;;  %v7136_v10 = vsel %vm966_vm9, %v7120_v34, %v9390_v31  ;;  %v7137_v55 = vsel %vm966_vm9, %v7121_v44, %v9391_v40 }
 0xdea   : > { %v9400_v16 = vunpack.i.l.bf16 %v9399_v39  ;;  %7322 = vmatmul.mubr.f32.gmra.mrb[162].mxu0 %v7151_v5  ;;  %v9401_v41 = vunpack.i.h.bf16 %v9399_v39 }
 0xdeb   : > { %8003 = vmatprep.mubr.msk.f32.mxu0 %vm949_vm4, %v14554_v60  ;;  %v6770_v60 = vsel %vm286_vm8, %v14577_v12, 0.0 }
 0xdec   : > { %v7152_v38 = vsel %vm983_vm10, %v7136_v10, %v9400_v16  ;;  %v7153_v13 = vsel %vm983_vm10, %v7137_v55, %v9401_v41 }
 0xded   : > { %v9404_v17 = vpop.permute.xlu0 %9403  ;;  %v9409_v53 = vpop.permute.xlu1 %9408 }
 0xdee   : > { %v9410_v28 = vunpack.i.l.bf16 %v9409_v53  ;;  %7327 = vmatmul.mubr.f32.gmra.mrb[164].mxu0 %v7152_v38  ;;  %v9405_v63 = vunpack.i.l.bf16 %v9404_v17  ;;  %v9411_v56 = vunpack.i.h.bf16 %v9409_v53  ;;  %v9406_v35 = vunpack.i.h.bf16 %v9404_v17  ;;  %v14780_v38 = vld [vmem:[%s14867_s5 + $0x8] sm:$0xff] }
 0xdef   : > { %8004 = vmatprep.mubr.msk.f32.mxu0 %vm949_vm4, %v6913_v1 }
 0xdf0   : > { %v7122_v9 = vsel %vm949_vm4, %v6770_v60, %v9410_v28  ;;  %v7123_v8 = vsel %vm949_vm4, %v14600_v42, %v9411_v56 }
 0xdf1   : > { %v9414_v57 = vpop.permute.xlu1 %9413  ;;  %v7138_v23 = vsel %vm966_vm9, %v7122_v9, %v9405_v63  ;;  %v7139_v3 = vsel %vm966_vm9, %v7123_v8, %v9406_v35 }
 0xdf2   : > { %v9415_v6 = vunpack.i.l.bf16 %v9414_v57  ;;  %7332 = vmatmul.mubr.f32.gmra.mrb[166].mxu0 %v7153_v13  ;;  %v9416_v12 = vunpack.i.h.bf16 %v9414_v57 }
 0xdf3   : > { %8005 = vmatprep.mubr.msk.f32.mxu0 %vm949_vm4, %v14587_v45  ;;  %v6963_v59 = vpop.permute.xlu0 %6962  ;;  %v6915_v45 = vsel %vm303_vm11, %v14596_v47, 0.0 }
 0xdf4   : > { %v7154_v37 = vsel %vm983_vm10, %v7138_v23, %v9415_v6  ;;  %v7124_v33 = vsel %vm949_vm4, %v6772_v15, %v6963_v59  ;;  %v7155_v48 = vsel %vm983_vm10, %v7139_v3, %v9416_v12 }
 0xdf5   : > { %v7027_v61 = vpop.permute.xlu1 %7026 }
 0xdf6   : > { %7337 = vmatmul.mubr.f32.gmra.mrb[168].mxu0 %v7154_v37  ;;  %v7140_v42 = vsel %vm966_vm9, %v7124_v33, %v7027_v61 }
 0xdf7   : > { %8006 = vmatprep.mubr.msk.f32.mxu0 %vm949_vm4, %v6915_v45  ;;  %v7091_v14 = vpop.permute.xlu0 %7090 }
 0xdf8   : > { %v7156_v7 = vsel %vm983_vm10, %v7140_v42, %v7091_v14 }
 0xdf9   : > { %v6965_v27 = vpop.permute.xlu1 %6964 }
 0xdfa   : > { %7342 = vmatmul.mubr.f32.gmra.mrb[170].mxu0 %v7155_v48  ;;  %v7125_v11 = vsel %vm949_vm4, %v14619_v58, %v6965_v27  ;;  %v14766_v58 = vld [vmem:[%s14866_s4 + $0x9] ss:$0 sm:$0xff] }
 0xdfb   : > { %8007 = vmatprep.mubr.msk.f32.mxu0 %vm949_vm4, %v14624_v26  ;;  %v7029_v47 = vpop.permute.xlu0 %7028 }
 0xdfc   : > { %v7141_v0 = vsel %vm966_vm9, %v7125_v11, %v7029_v47 }
 0xdfd   : > { %v7093_v29 = vpop.permute.xlu1 %7092 }
 0xdfe   : > { %7347 = vmatmul.mubr.f32.gmra.mrb[172].mxu0 %v7156_v7  ;;  %v7157_v31 = vsel %vm983_vm10, %v7141_v0, %v7093_v29 }
 0xdff   : > { %8008 = vmatprep.mubr.msk.f32.mxu0 %vm949_vm4, %v6917_v22 }
 0xe02   : > { %7352 = vmatmul.mubr.f32.gmra.mrb[174].mxu0 %v7157_v31 }
 0xe99   : > { %v7278_v26 = vpop.f32.mrb[144].mxu0 }
 0xe9a   : > { %v7279_v4 = vadd.f32 %v14766_v58, %v7278_v26  ;;  %v7280_v32 = vpop.f32.mrb[145].mxu0 }
 0xe9c   : > { %v7357_v34 = vmul.f32 0.3, %v7279_v4 }
 0xe9d   : > { %v7283_v24 = vpop.f32.mrb[146].mxu0 }
 0xe9e   : > { %v7373_v20 = vadd.f32 %v7357_v34, %v13809_v54  ;;  %v7284_v39 = vadd.f32 %v14766_v58, %v7283_v24  ;;  %v7285_v5 = vpop.f32.mrb[147].mxu0 }
 0xea0   : > { %v7358_v16 = vmul.f32 0.3, %v7284_v39  ;;  %v7391_v10 = vmul.f32 %v14772_v49, %v7373_v20 }
 0xea1   : > { %v7288_v40 = vpop.f32.mrb[148].mxu0 }
 0xea2   : > { %v7374_v41 = vadd.f32 %v7358_v16, %v13814_v50  ;;  %v7289_v17 = vadd.f32 %v14766_v58, %v7288_v40  ;;  %v7290_v53 = vpop.f32.mrb[149].mxu0  ;;  %v7407_v44 = vsel %vm949_vm4, %v7391_v10, 0.0 }
 0xea3   : > { %7408 = vadd.xlane.f32.xlu0 %v7407_v44 }
 0xea4   : > { %v7359_v54 = vmul.f32 0.3, %v7289_v17  ;;  %v7392_v28 = vmul.f32 %v14780_v38, %v7374_v41 }
 0xea5   : > { %v7293_v1 = vpop.f32.mrb[150].mxu0 }
 0xea6   : > { %v7375_v63 = vadd.f32 %v7359_v54, %v13825_v19  ;;  %v7294_v60 = vadd.f32 %v14766_v58, %v7293_v1  ;;  %v7295_v55 = vpop.f32.mrb[151].mxu0  ;;  %v7410_v9 = vsel %vm949_vm4, %v7392_v28, 0.0 }
 0xea7   : > { %7411 = vadd.xlane.f32.xlu1 %v7410_v9 }
 0xea8   : > { %v7360_v56 = vmul.f32 0.3, %v7294_v60  ;;  %v7393_v50 = vmul.f32 %v14772_v49, %v7375_v63 }
 0xea9   : > { %v7298_v57 = vpop.f32.mrb[152].mxu0 }
 0xeaa   : > { %v7376_v13 = vadd.f32 %v7360_v56, %v13848_v30  ;;  %v7299_v6 = vadd.f32 %v14766_v58, %v7298_v57  ;;  %v7300_v59 = vpop.f32.mrb[153].mxu0  ;;  %v7413_v23 = vsel %vm949_vm4, %v7393_v50, 0.0 }
 0xeab   : > { %7414 = vadd.xlane.f32.xlu0 %v7413_v23 }
 0xeac   : > { %v7361_v35 = vmul.f32 0.3, %v7299_v6  ;;  %v7394_v19 = vmul.f32 %v14780_v38, %v7376_v13 }
 0xead   : > { %v7303_v37 = vpop.f32.mrb[154].mxu0 }
 0xeae   : > { %v7377_v12 = vadd.f32 %v7361_v35, %v13868_v18  ;;  %v7304_v61 = vadd.f32 %v14766_v58, %v7303_v37  ;;  %v7305_v8 = vpop.f32.mrb[155].mxu0  ;;  %v7416_v15 = vsel %vm949_vm4, %v7394_v19, 0.0 }
 0xeaf   : > { %7417 = vadd.xlane.f32.xlu0 %v7416_v15 }
 0xeb0   : > { %v7362_v45 = vmul.f32 0.3, %v7304_v61  ;;  %v7395_v30 = vmul.f32 %v14772_v49, %v7377_v12 }
 0xeb1   : > { %v7308_v33 = vpop.f32.mrb[156].mxu0 }
 0xeb2   : > { %v7378_v14 = vadd.f32 %v7362_v45, %v13892_v25  ;;  %v7309_v3 = vadd.f32 %v14766_v58, %v7308_v33  ;;  %v7310_v27 = vpop.f32.mrb[157].mxu0  ;;  %v7419_v48 = vsel %vm949_vm4, %v7395_v30, 0.0  ;;  %v14916_v45 = vld [vmem:[#allocation3_spill] sm:$0xff] }
 0xeb3   : > { %7420 = vadd.xlane.f32.xlu1 %v7419_v48 }
 0xeb4   : > { %v7363_v42 = vmul.f32 0.3, %v7309_v3  ;;  %v7396_v18 = vmul.f32 %v14780_v38, %v7378_v14 }
 0xeb5   : > { %v7313_v11 = vpop.f32.mrb[158].mxu0 }
 0xeb6   : > { %v7379_v47 = vadd.f32 %v7363_v42, %v13917_v36  ;;  %v7314_v7 = vadd.f32 %v14766_v58, %v7313_v11  ;;  %v7315_v0 = vpop.f32.mrb[159].mxu0  ;;  %v7422_v29 = vsel %vm949_vm4, %v7396_v18, 0.0  ;;  %v14917_v42 = vld [vmem:[#allocation5_spill] sm:$0xff] }
 0xeb7   : > { %7423 = vadd.xlane.f32.xlu0 %v7422_v29 }
 0xeb8   : > { %v7364_v22 = vmul.f32 0.3, %v7314_v7  ;;  %v7397_v25 = vmul.f32 %v14772_v49, %v7379_v47 }
 0xeb9   : > { %v7318_v31 = vpop.f32.mrb[160].mxu0 }
 0xeba   : > { %v7380_v26 = vadd.f32 %v7364_v22, %v13941_v2  ;;  %v7319_v4 = vadd.f32 %v14766_v58, %v7318_v31  ;;  %v7320_v32 = vpop.f32.mrb[161].mxu0  ;;  %v7425_v34 = vsel %vm949_vm4, %v7397_v25, 0.0  ;;  %v14918_v22 = vld [vmem:[#allocation4_spill] sm:$0xff] }
 0xebb   : > { %7426 = vadd.xlane.f32.xlu1 %v7425_v34 }
 0xebc   : > { %v7365_v24 = vmul.f32 0.3, %v7319_v4  ;;  %v7398_v36 = vmul.f32 %v14780_v38, %v7380_v26 }
 0xebd   : > { %v7323_v20 = vpop.f32.mrb[162].mxu0 }
 0xebe   : > { %v7381_v39 = vadd.f32 %v7365_v24, %v13965_v21  ;;  %v7324_v5 = vadd.f32 %v14766_v58, %v7323_v20  ;;  %v7325_v16 = vpop.f32.mrb[163].mxu0  ;;  %v7428_v10 = vsel %vm949_vm4, %v7398_v36, 0.0 }
 0xebf   : > { %7429 = vadd.xlane.f32.xlu0 %v7428_v10  ;;  %v14919_v16 = vlaneseq }
 0xec0   : > { %v7366_v40 = vmul.f32 0.3, %v7324_v5  ;;  %v7399_v2 = vmul.f32 %v14772_v49, %v7381_v39 }
 0xec1   : > { %v7328_v41 = vpop.f32.mrb[164].mxu0 }
 0xec2   : > { %v7382_v17 = vadd.f32 %v7366_v40, %v13989_v52  ;;  %v7329_v53 = vadd.f32 %v14766_v58, %v7328_v41  ;;  %v7330_v44 = vpop.f32.mrb[165].mxu0  ;;  %v7431_v54 = vsel %vm949_vm4, %v7399_v2, 0.0 }
 0xec3   : > { %7432 = vadd.xlane.f32.xlu1 %v7431_v54 }
 0xec4   : > { %v7367_v28 = vmul.f32 0.3, %v7329_v53  ;;  %v7400_v21 = vmul.f32 %v14780_v38, %v7382_v17 }
 0xec5   : > { %v7333_v1 = vpop.f32.mrb[166].mxu0 }
 0xec6   : > { %v7383_v63 = vadd.f32 %v7367_v28, %v14013_v62  ;;  %v7334_v60 = vadd.f32 %v14766_v58, %v7333_v1  ;;  %v7335_v55 = vpop.f32.mrb[167].mxu0  ;;  %v7434_v9 = vsel %vm949_vm4, %v7400_v21, 0.0 }
 0xec7   : > { %7435 = vadd.xlane.f32.xlu0 %v7434_v9 }
 0xec8   : > { %v7368_v56 = vmul.f32 0.3, %v7334_v60  ;;  %v7401_v52 = vmul.f32 %v14772_v49, %v7383_v63 }
 0xec9   : > { %v7338_v50 = vpop.f32.mrb[168].mxu0 }
 0xeca   : > { %v7384_v57 = vadd.f32 %v7368_v56, %v14035_v46  ;;  %v7339_v13 = vadd.f32 %v14766_v58, %v7338_v50  ;;  %v7340_v6 = vpop.f32.mrb[169].mxu0  ;;  %v7437_v59 = vsel %vm949_vm4, %v7401_v52, 0.0 }
 0xecb   : > { %7438 = vadd.xlane.f32.xlu1 %v7437_v59 }
 0xecc   : > { %v7369_v23 = vmul.f32 0.3, %v7339_v13  ;;  %v7402_v62 = vmul.f32 %v14780_v38, %v7384_v57 }
 0xecd   : > { %v7343_v35 = vpop.f32.mrb[170].mxu0 }
 0xece   : > { %v7385_v19 = vadd.f32 %v7369_v23, %v14056_v51  ;;  %v7344_v37 = vadd.f32 %v14766_v58, %v7343_v35  ;;  %v7345_v12 = vpop.f32.mrb[171].mxu0  ;;  %v7440_v61 = vsel %vm949_vm4, %v7402_v62, 0.0 }
 0xecf   : > { %7441 = vadd.xlane.f32.xlu0 %v7440_v61 }
 0xed0   : > { %v7370_v8 = vmul.f32 0.3, %v7344_v37  ;;  %v7403_v46 = vmul.f32 %v14772_v49, %v7385_v19 }
 0xed1   : > { %v7348_v15 = vpop.f32.mrb[172].mxu0 }
 0xed2   : > { %v7386_v30 = vadd.f32 %v7370_v8, %v14916_v45  ;;  %v7349_v33 = vadd.f32 %v14766_v58, %v7348_v15  ;;  %v7350_v14 = vpop.f32.mrb[173].mxu0  ;;  %v7443_v3 = vsel %vm949_vm4, %v7403_v46, 0.0 }
 0xed3   : > { %7444 = vadd.xlane.f32.xlu1 %v7443_v3 }
 0xed4   : > { %v7371_v27 = vmul.f32 0.3, %v7349_v33  ;;  %v7404_v51 = vmul.f32 %v14780_v38, %v7386_v30 }
 0xed5   : > { %v7353_v48 = vpop.f32.mrb[174].mxu0 }
 0xed6   : > { %v7387_v18 = vadd.f32 %v7371_v27, %v14917_v42  ;;  %v7354_v11 = vadd.f32 %v14766_v58, %v7353_v48  ;;  %v7355_v47 = vpop.f32.mrb[175].mxu0  ;;  %v7446_v7 = vsel %vm949_vm4, %v7404_v51, 0.0 }
 0xed7   : > { %7447 = vadd.xlane.f32.xlu0 %v7446_v7 }
 0xed8   : > { %v7372_v0 = vmul.f32 0.3, %v7354_v11  ;;  %v7405_v29 = vmul.f32 %v14772_v49, %v7387_v18  ;;  %v7472_v49 = vand.u32 127, %v14919_v16  ;;  %v7567_v18 = vstv %s7566_s13 }
 0xeda   : > { %v7388_v25 = vadd.f32 %v7372_v0, %v14918_v22  ;;  %v7449_v31 = vsel %vm949_vm4, %v7405_v29, 0.0  ;;  %v7477_v10 = vadd.s32 4294967288, %v7472_v49  ;;  %v7475_v53 = vsub.s32 %v7472_v49, %v9582_v43 }
 0xedb   : > { %7450 = vadd.xlane.f32.xlu1 %v7449_v31 }
 0xedc   : > { %v7406_v26 = vmul.f32 %v14780_v38, %v7388_v25  ;;  %v7480_v41 = vsub.s32 %v7477_v10, %v9582_v43 }
 0xede   : > { %v7452_v4 = vsel %vm949_vm4, %v7406_v26, 0.0  ;;  %vm7562_vm4 = vcmask 130048  }
 0xedf   : > { %7453 = vadd.xlane.f32.xlu0 %v7452_v4 }
 0xf30   : > { %v7409_v32 = vpop.xlane.xlu0 %7408 }
 0xf31   : > { %v7476_v56 = vrot.slane %v7409_v32, %v7475_v53 }
 0xf34   : > { %v7412_v24 = vpop.xlane.xlu1 %7411 }
 0xf35   : > { %v7481_v28 = vrot.slane %v7412_v24, %v7480_v41 }
 0xf37   : > { %v7483_v59 = vsel %vm7482_vm12, %v7481_v28, %v7476_v56 }
 0xf38   : > { %v7415_v34 = vpop.xlane.xlu0 %7414 }
 0xf39   : > { %v7487_v21 = vrot.slane %v7415_v34, %v7475_v53 }
 0xf3c   : > { %v7418_v58 = vpop.xlane.xlu0 %7417 }
 0xf3d   : > { %v7491_v44 = vrot.slane %v7418_v58, %v7480_v41 }
 0xf3f   : > { %v7492_v52 = vsel %vm7482_vm12, %v7491_v44, %v7487_v21 }
 0xf40   : > { %v7421_v20 = vpop.xlane.xlu1 %7420  ;;  %v7548_v35 = vsel %vm7547_vm13, %v7492_v52, %v7483_v59 }
 0xf41   : > { %v7496_v60 = vrot.slane %v7421_v20, %v7475_v53 }
 0xf44   : > { %v7424_v36 = vpop.xlane.xlu0 %7423 }
 0xf45   : > { %v7500_v54 = vrot.slane %v7424_v36, %v7480_v41 }
 0xf47   : > { %v7501_v13 = vsel %vm7482_vm12, %v7500_v54, %v7496_v60 }
 0xf48   : > { %v7427_v5 = vpop.xlane.xlu1 %7426  ;;  %v7550_v61 = vsel %vm7549_vm14, %v7501_v13, %v7548_v35 }
 0xf49   : > { %v7505_v50 = vrot.slane %v7427_v5, %v7475_v53 }
 0xf4c   : > { %v7430_v39 = vpop.xlane.xlu0 %7429 }
 0xf4d   : > { %v7509_v1 = vrot.slane %v7430_v39, %v7480_v41 }
 0xf4f   : > { %v7510_v23 = vsel %vm7482_vm12, %v7509_v1, %v7505_v50 }
 0xf50   : > { %v7433_v2 = vpop.xlane.xlu1 %7432  ;;  %v7552_v46 = vsel %vm7551_vm15, %v7510_v23, %v7550_v61 }
 0xf51   : > { %v7514_v43 = vrot.slane %v7433_v2, %v7475_v53 }
 0xf54   : > { %v7436_v40 = vpop.xlane.xlu0 %7435 }
 0xf55   : > { %v7518_v55 = vrot.slane %v7436_v40, %v7480_v41 }
 0xf57   : > { %v7519_v19 = vsel %vm7482_vm12, %v7518_v55, %v7514_v43 }
 0xf58   : > { %v7439_v38 = vpop.xlane.xlu1 %7438  ;;  %v7554_v30 = vsel %vm7553_vm0, %v7519_v19, %v7552_v46 }
 0xf59   : > { %v7523_v62 = vrot.slane %v7439_v38, %v7475_v53 }
 0xf5c   : > { %v7442_v17 = vpop.xlane.xlu0 %7441 }
 0xf5d   : > { %v7527_v57 = vrot.slane %v7442_v17, %v7480_v41 }
 0xf5f   : > { %v7528_v8 = vsel %vm7482_vm12, %v7527_v57, %v7523_v62 }
 0xf60   : > { %v7445_v9 = vpop.xlane.xlu1 %7444  ;;  %v7556_v3 = vsel %vm7555_vm1, %v7528_v8, %v7554_v30 }
 0xf61   : > { %v7532_v37 = vrot.slane %v7445_v9, %v7475_v53 }
 0xf64   : > { %v7448_v63 = vpop.xlane.xlu0 %7447 }
 0xf65   : > { %v7536_v6 = vrot.slane %v7448_v63, %v7480_v41 }
 0xf67   : > { %v7537_v15 = vsel %vm7482_vm12, %v7536_v6, %v7532_v37 }
 0xf68   : > { %v7451_v12 = vpop.xlane.xlu1 %7450  ;;  %v7558_v51 = vsel %vm7557_vm2, %v7537_v15, %v7556_v3 }
 0xf69   : > { %v7541_v33 = vrot.slane %v7451_v12, %v7475_v53 }
 0xf6c   : > { %v7454_v45 = vpop.xlane.xlu0 %7453 }
 0xf6d   : > { %v7545_v14 = vrot.slane %v7454_v45, %v7480_v41 }
 0xf6f   : > { %v7546_v27 = vsel %vm7482_vm12, %v7545_v14, %v7541_v33 }
 0xf70   : > { %v7560_v48 = vsel %vm7559_vm3, %v7546_v27, %v7558_v51 }
 0xf71   : > { %v7563_v42 = vsel %vm7562_vm4, %v7560_v48, 0.0 }
 0xf72   : > { %7564 = vadd.xlane.f32.xlu1 %v7563_v42 }
 0xfff   : > { %v7565_v11 = vpop.xlane.xlu1 %7564 }
0x1000   : > { %v7568_v47 = vadd.f32 %v7567_v18, %v7565_v11 }
0x1002   : > { %7570 = vst.msk [vmem:[%s282_s17] sm:$0xff] %vm7569_vm5, %v7568_v47 }
0x1003 PF: > { %s18_s26 = sadd.s32 1, %s9423_s26  }
0x1004   : > { %p15_p5 = scmp.ge.s32.totalorder %s18_s26, 4  }
0x1006   :  { %17 = sbr.rel (!%p15_p5) target bundleno = 2 (0x2), region = 96 }

</bundles_post_ra>
